<compile_context>
chip_gen: v7x
topology: tpu7x:2x2x1
jax: 0.10.0
libtpu: 0.0.40
codegen_flags: <defaults>
</compile_context>

<pallas_src>
import functools

import jax
import jax.numpy as jnp
from jax.experimental import pallas as pl
from jax.experimental.pallas import tpu as pltpu


# ----------------------------------------------------------------------------
# Pallas kernels
# ----------------------------------------------------------------------------
def _conv_bn_silu_kernel(*refs):
    """refs = (x_0, w_0, x_1, w_1, ..., x_{n-1}, w_{n-1}, bias, out).

    x_i : (TM, K_i)   bf16 patches / activations
    w_i : (K_i, COUTP) bf16 weights (BN scale already folded in)
    bias: (1, COUTP)  f32 folded BN bias
    out : (TM, COUTP) bf16
    Computes SiLU(sum_i x_i @ w_i + bias)  — i.e. conv over the channel concat of
    the x_i, with fused BatchNorm and SiLU.
    """
    b_ref, o_ref = refs[-2], refs[-1]
    n_in = (len(refs) - 2) // 2
    acc = jnp.dot(refs[0][...], refs[1][...], preferred_element_type=jnp.float32)
    for i in range(1, n_in):
        acc = acc + jnp.dot(refs[2 * i][...], refs[2 * i + 1][...],
                            preferred_element_type=jnp.float32)
    y = acc + b_ref[...]                                        # folded BN bias
    # SiLU: sigmoid denominator reciprocal goes to the EUP slot (approx rcp);
    # clamp the exponent so exp never overflows to inf.
    sig = pl.reciprocal(1.0 + jnp.exp(-jnp.maximum(y, -30.0)), approx=True)
    o_ref[...] = (y * sig).astype(o_ref.dtype)


def _spp_pool_kernel(x_ref, p5_ref, p9_ref, p13_ref, *, H, W):
    """Fused SPP max-pools (k=5,9,13, stride 1, 'same') for one batch element.

    x_ref: (1, H+12, W+12, C) spatially padded with -inf (torch MaxPool2d semantics).
    pool9 = pool5(pool5(x)), pool13 = pool5(pool9); each pool5 is a separable
    (row then column) running max — pure VPU work, one HBM read of the feature map.
    """
    x = x_ref[...].astype(jnp.float32)

    def pool5(a, h, w):                       # (1, h+4, w+4, C) -> (1, h, w, C)
        r = a[:, 0:h]
        for d in range(1, 5):
            r = jnp.maximum(r, a[:, d:d + h])
        o = r[:, :, 0:w]
        for d in range(1, 5):
            o = jnp.maximum(o, r[:, :, d:d + w])
        return o

    p5e = pool5(x, H + 8, W + 8)              # valid region padded by 4
    p9e = pool5(p5e, H + 4, W + 4)            # valid region padded by 2
    p13 = pool5(p9e, H, W)
    p5_ref[...] = p5e[:, 4:4 + H, 4:4 + W, :].astype(p5_ref.dtype)
    p9_ref[...] = p9e[:, 2:2 + H, 2:2 + W, :].astype(p9_ref.dtype)
    p13_ref[...] = p13.astype(p13_ref.dtype)


# ----------------------------------------------------------------------------
# Kernel wrappers
# ----------------------------------------------------------------------------
def _round_up(v, m):
    return ((v + m - 1) // m) * m


def conv_bn_silu(p, xs):
    """BaseConv (Conv2d(bias=False, pad=(k-1)//2) + BN + SiLU) applied to the channel
    concatenation of the activations in `xs`.

    p : {"w": (kh, kw, cin_total, cout) bf16 (BN scale folded), "b": (cout,) f32,
         "stride": int}
    xs: list of (array_NHWC, real_channels).  Arrays may carry lane-padding channels
        beyond `real_channels`; the matching weight rows are zero so they never
        contribute.
    Returns (out_NHWC with cout padded to a multiple of 128, cout_real).
    """
    w, b, stride = p["w"], p["b"], p["stride"]
    kh, kw, cin_total, cout = w.shape
    assert sum(c for _, c in xs) == cin_total
    N, H, W, _ = xs[0][0].shape
    pad = (kh - 1) // 2
    Ho = (H + 2 * pad - kh) // stride + 1
    Wo = (W + 2 * pad - kw) // stride + 1
    M = N * Ho * Wo
    COUTP = _round_up(cout, 128)              # lane-dense output stores
    TM = min(512, _round_up(M, 8))            # fixed M tile, never a giant fallback block
    Mp = _round_up(M, TM)

    operands, in_specs = [], []
    coff = 0
    for arr, c in xs:
        wi = w[:, :, coff:coff + c, :]                      # (kh, kw, c, cout) chunk
        coff += c
        if kh == 1 and kw == 1 and stride == 1:
            # 1x1 conv: implicit GEMM directly on the (channel-padded) activation;
            # pad the weight rows with zeros instead of slicing/copying x.
            cp = arr.shape[-1]
            mat = arr.reshape(M, cp)
            wk = jnp.pad(wi.reshape(c, cout), ((0, cp - c), (0, COUTP - cout)))
        else:
            # kxk conv: im2col over the real channels only (keeps K = kh*kw*c_real).
            # TODO(synk): replace with an implicit-GEMM (in-kernel tap loop) to avoid
            # materializing the kh*kw patch matrix in HBM.
            a = arr if arr.shape[-1] == c else arr[..., :c]
            ap = jnp.pad(a, ((0, 0), (pad, pad), (pad, pad), (0, 0)))
            cols = [ap[:, dh:dh + stride * (Ho - 1) + 1:stride,
                        dw:dw + stride * (Wo - 1) + 1:stride, :]
                    for dh in range(kh) for dw in range(kw)]
            mat = cols[0] if len(cols) == 1 else jnp.concatenate(cols, axis=-1)
            mat = mat.reshape(M, kh * kw * c)
            wk = jnp.pad(wi.reshape(kh * kw * c, cout), ((0, 0), (0, COUTP - cout)))
        if Mp != M:
            mat = jnp.pad(mat, ((0, Mp - M), (0, 0)))
        mat = mat.astype(jnp.bfloat16)                      # bf16 MXU operands
        wk = wk.astype(jnp.bfloat16)
        Ki = mat.shape[1]
        operands += [mat, wk]
        in_specs += [pl.BlockSpec((TM, Ki), lambda i: (i, 0)),
                     pl.BlockSpec((Ki, COUTP), lambda i: (0, 0))]

    bias = jnp.pad(b, (0, COUTP - cout)).reshape(1, COUTP).astype(jnp.float32)
    operands.append(bias)
    in_specs.append(pl.BlockSpec((1, COUTP), lambda i: (0, 0)))

    out = pl.pallas_call(
        _conv_bn_silu_kernel,
        out_shape=jax.ShapeDtypeStruct((Mp, COUTP), jnp.bfloat16),
        grid=(Mp // TM,),
        in_specs=in_specs,
        out_specs=pl.BlockSpec((TM, COUTP), lambda i: (i, 0)),
        compiler_params=pltpu.CompilerParams(
            dimension_semantics=("parallel",),      # v7x: shard M tiles across both TCs
            vmem_limit_bytes=48 * 1024 * 1024),
    )(*operands)

    out = out[:M].reshape(N, Ho, Wo, COUTP)
    return out, cout


def spp_pools(arr):
    """MaxPool2d(k, stride=1, pad=k//2) for k in (5, 9, 13) in one fused kernel."""
    N, H, W, C = arr.shape
    xp = jnp.pad(arr, ((0, 0), (6, 6), (6, 6), (0, 0)), constant_values=-jnp.inf)
    kern = functools.partial(_spp_pool_kernel, H=H, W=W)
    shp = jax.ShapeDtypeStruct((N, H, W, C), arr.dtype)
    return pl.pallas_call(
        kern,
        out_shape=(shp, shp, shp),
        grid=(N,),
        in_specs=[pl.BlockSpec((1, H + 12, W + 12, C), lambda n: (n, 0, 0, 0))],
        out_specs=(pl.BlockSpec((1, H, W, C), lambda n: (n, 0, 0, 0)),) * 3,
        compiler_params=pltpu.CompilerParams(dimension_semantics=("parallel",)),
    )(xp)


def upsample2x(act):
    """nn.Upsample(scale_factor=2, mode='nearest') on an (array, real_c) activation."""
    # TODO(synk): fuse the nearest upsample into the consumer conv's index_map instead
    # of materializing the 4x tensor (small at these FPN resolutions).
    arr, c = act
    return jnp.repeat(jnp.repeat(arr, 2, axis=1), 2, axis=2), c


# ----------------------------------------------------------------------------
# Deterministic parameter construction (synthetic; BN folded into conv weights)
# ----------------------------------------------------------------------------
class KeyGen:
    def __init__(self, key):
        self.key = key

    def __call__(self):
        self.key, sub = jax.random.split(self.key)
        return sub


def init_base_conv(kg, cin, cout, ksize, stride):
    fan_in = cin * ksize * ksize
    w = jax.random.normal(kg(), (ksize, ksize, cin, cout), jnp.float32) * jnp.sqrt(2.0 / fan_in)
    scale = 1.0 + 0.05 * jax.random.normal(kg(), (cout,), jnp.float32)
    bias = 0.05 * jax.random.normal(kg(), (cout,), jnp.float32)
    # Fold the BatchNorm scale into the conv weights (per output channel) and keep
    # weights in bf16 for the MXU; the bias stays f32 for the kernel epilogue.
    return {"w": (w * scale).astype(jnp.bfloat16), "b": bias, "stride": stride}


def init_bottleneck(kg, cin, cout, shortcut, expansion=1.0):
    hidden = int(cout * expansion)
    return {
        "conv1": init_base_conv(kg, cin, hidden, 1, 1),
        "conv2": init_base_conv(kg, hidden, cout, 3, 1),
        "use_add": bool(shortcut and cin == cout),
    }


def init_csp(kg, cin, cout, n, shortcut=True):
    hidden = int(cout * 0.5)
    return {
        "conv1": init_base_conv(kg, cin, hidden, 1, 1),
        "conv2": init_base_conv(kg, cin, hidden, 1, 1),
        "conv3": init_base_conv(kg, 2 * hidden, cout, 1, 1),
        "m": [init_bottleneck(kg, hidden, hidden, shortcut, 1.0) for _ in range(n)],
        "hidden": hidden,
    }


def init_focus(kg, cin, cout, ksize):
    return {"conv": init_base_conv(kg, cin * 4, cout, ksize, 1)}


def init_spp(kg, cin, cout, ks=(5, 9, 13)):
    hidden = cin // 2
    return {
        "conv1": init_base_conv(kg, cin, hidden, 1, 1),
        "conv2": init_base_conv(kg, hidden * (len(ks) + 1), cout, 1, 1),
        "ks": ks,
        "hidden": hidden,
    }


def init_darknet(kg, dep_mul, wid_mul):
    bc = int(wid_mul * 64)
    bd = max(round(dep_mul * 3), 1)
    return {
        "stem": init_focus(kg, 3, bc, 3),
        "dark2": {"conv": init_base_conv(kg, bc, bc * 2, 3, 2),
                  "csp": init_csp(kg, bc * 2, bc * 2, bd)},
        "dark3": {"conv": init_base_conv(kg, bc * 2, bc * 4, 3, 2),
                  "csp": init_csp(kg, bc * 4, bc * 4, bd * 3)},
        "dark4": {"conv": init_base_conv(kg, bc * 4, bc * 8, 3, 2),
                  "csp": init_csp(kg, bc * 8, bc * 8, bd * 3)},
        "dark5": {"conv": init_base_conv(kg, bc * 8, bc * 16, 3, 2),
                  "spp": init_spp(kg, bc * 16, bc * 16),
                  "csp": init_csp(kg, bc * 16, bc * 16, bd, shortcut=False)},
    }


def init_yolopafpn(kg, depth, width, in_channels=(256, 512, 1024)):
    c0 = int(in_channels[0] * width)
    c1 = int(in_channels[1] * width)
    c2 = int(in_channels[2] * width)
    n = round(3 * depth)
    return {
        "backbone": init_darknet(kg, depth, width),
        "lateral_conv0": init_base_conv(kg, c2, c1, 1, 1),
        "C3_p4": init_csp(kg, 2 * c1, c1, n, shortcut=False),
        "reduce_conv1": init_base_conv(kg, c1, c0, 1, 1),
        "C3_p3": init_csp(kg, 2 * c0, c0, n, shortcut=False),
        "bu_conv2": init_base_conv(kg, c0, c0, 3, 2),
        "C3_n3": init_csp(kg, 2 * c0, c1, n, shortcut=False),
        "bu_conv1": init_base_conv(kg, c1, c1, 3, 2),
        "C3_n4": init_csp(kg, 2 * c1, c2, n, shortcut=False),
    }


# ----------------------------------------------------------------------------
# Forward passes (mirror the PyTorch module structure)
# Activations are (array_NHWC_channel_padded, real_channels) tuples.
# ----------------------------------------------------------------------------
def base_conv(p, xs):
    return conv_bn_silu(p, xs)


def bottleneck(p, x):
    y = base_conv(p["conv2"], [base_conv(p["conv1"], [x])])
    if p["use_add"]:
        y = (x[0] + y[0], y[1])
    return y


def csp_layer(p, xs):
    # conv1/conv2 consume the (virtual) channel concat of `xs` directly (fused concat).
    x1 = base_conv(p["conv1"], xs)
    x2 = base_conv(p["conv2"], xs)
    for bp in p["m"]:
        x1 = bottleneck(bp, x1)
    return base_conv(p["conv3"], [x1, x2])        # cat([x1, x2]) fused into conv3


def focus(p, x):
    # Space-to-depth (patch_top_left, patch_bot_left, patch_top_right, patch_bot_right).
    tl = x[:, ::2, ::2, :]
    tr = x[:, ::2, 1::2, :]
    bl = x[:, 1::2, ::2, :]
    br = x[:, 1::2, 1::2, :]
    s2d = jnp.concatenate([tl, bl, tr, br], axis=-1)
    return base_conv(p["conv"], [(s2d, s2d.shape[-1])])


def spp_bottleneck(p, x):
    assert tuple(p["ks"]) == (5, 9, 13)
    x1 = base_conv(p["conv1"], [x])
    arr, h = x1
    p5, p9, p13 = spp_pools(arr)                  # single fused cascaded-max kernel
    # cat([x, p5, p9, p13]) fused into conv2 as four split-K matmul operands.
    return base_conv(p["conv2"], [x1, (p5, h), (p9, h), (p13, h)])


def csp_darknet(p, x):
    x = focus(p["stem"], x)
    x = csp_layer(p["dark2"]["csp"], [base_conv(p["dark2"]["conv"], [x])])
    d3 = csp_layer(p["dark3"]["csp"], [base_conv(p["dark3"]["conv"], [x])])
    d4 = csp_layer(p["dark4"]["csp"], [base_conv(p["dark4"]["conv"], [d3])])
    x5 = base_conv(p["dark5"]["conv"], [d4])
    x5 = spp_bottleneck(p["dark5"]["spp"], x5)
    d5 = csp_layer(p["dark5"]["csp"], [x5])
    return d3, d4, d5                             # ('dark3', 'dark4', 'dark5')


def yolopafpn(params, x_nchw):
    x = jnp.transpose(x_nchw, (0, 2, 3, 1)).astype(jnp.float32)   # NCHW -> NHWC
    x2, x1, x0 = csp_darknet(params["backbone"], x)

    fpn_out0 = base_conv(params["lateral_conv0"], [x0])
    f_out0 = csp_layer(params["C3_p4"], [upsample2x(fpn_out0), x1])     # fused concat

    fpn_out1 = base_conv(params["reduce_conv1"], [f_out0])
    pan_out2 = csp_layer(params["C3_p3"], [upsample2x(fpn_out1), x2])   # fused concat

    p_out1 = base_conv(params["bu_conv2"], [pan_out2])
    pan_out1 = csp_layer(params["C3_n3"], [p_out1, fpn_out1])           # fused concat

    p_out0 = base_conv(params["bu_conv1"], [pan_out1])
    pan_out0 = csp_layer(params["C3_n4"], [p_out0, fpn_out0])           # fused concat

    def to_nchw(act):
        arr, c = act
        return jnp.transpose(arr[..., :c], (0, 3, 1, 2)).astype(jnp.float32)

    return to_nchw(pan_out2), to_nchw(pan_out1), to_nchw(pan_out0)


# ----------------------------------------------------------------------------
if __name__ == "__main__":
    key = jax.random.PRNGKey(0)
    kparam, kinput = jax.random.split(key)

    # Small but structurally faithful configuration:
    # depth=0.34 -> 1 bottleneck per FPN CSP (3 in dark3/dark4), width=0.125 -> channels 8..128.
    depth, width = 0.34, 0.125
    params = init_yolopafpn(KeyGen(kparam), depth, width)

    x = jax.random.normal(kinput, (2, 3, 64, 64), jnp.float32)  # NCHW input (PyTorch convention)

    fwd = jax.jit(lambda inp: yolopafpn(params, inp))
    outs = jax.block_until_ready(fwd(x))

    # Expected shapes (NCHW): strides 8 / 16 / 32 of the 64x64 input.
    assert outs[0].shape == (2, int(256 * width), 8, 8), outs[0].shape
    assert outs[1].shape == (2, int(512 * width), 4, 4), outs[1].shape
    assert outs[2].shape == (2, int(1024 * width), 2, 2), outs[2].shape
    assert all(bool(jnp.all(jnp.isfinite(o))) for o in outs)

    print("KERNEL_OK")
</pallas_src>

<mosaic_0001>
module attributes {stable_mosaic.version = 11 : i64} {
  func.func @_conv_bn_silu_kernel(%arg0: i32, %arg1: memref<512x108xbf16, #tpu.memory_space<vmem>>, %arg2: memref<108x128xbf16, #tpu.memory_space<vmem>>, %arg3: memref<1x128xf32, #tpu.memory_space<vmem>>, %arg4: memref<512x128xbf16, #tpu.memory_space<vmem>>) attributes {dimension_semantics = [#tpu.dimension_semantics<parallel>], iteration_bounds = array<i64: 4>, scalar_prefetch = 0 : i64, scratch_operands = 0 : i64, tpu.core_type = #tpu.core_type<tc>, window_params = [{transform_indices = @transform_0, window_bounds = array<i64: 512, 108>}, {pipeline_mode = #tpu.pipeline_mode<synchronous>, transform_indices = @transform_1, window_bounds = array<i64: 108, 128>}, {pipeline_mode = #tpu.pipeline_mode<synchronous>, transform_indices = @transform_2, window_bounds = array<i64: 1, 128>}, {transform_indices = @transform_3, window_bounds = array<i64: 512, 128>}]} {
    %c0 = arith.constant 0 : index
    %c0_0 = arith.constant 0 : index
    %0 = vector.load %arg1[%c0, %c0_0] : memref<512x108xbf16, #tpu.memory_space<vmem>>, vector<512x108xbf16>
    %c0_1 = arith.constant 0 : index
    %c0_2 = arith.constant 0 : index
    %1 = vector.load %arg2[%c0_1, %c0_2] : memref<108x128xbf16, #tpu.memory_space<vmem>>, vector<108x128xbf16>
    %cst = arith.constant dense<0.000000e+00> : vector<512x128xf32>
    %2 = tpu.matmul %0, %1, %cst {dimension_numbers = #tpu.dot_dimension_numbers<[1], [0], [0], [1], [0, 0, 1, 1], [], []>} : vector<512x108xbf16>, vector<108x128xbf16>, vector<512x128xf32> -> vector<512x128xf32>
    %c0_3 = arith.constant 0 : index
    %c0_4 = arith.constant 0 : index
    %3 = vector.load %arg3[%c0_3, %c0_4] : memref<1x128xf32, #tpu.memory_space<vmem>>, vector<1x128xf32>
    %4 = vector.broadcast %3 : vector<1x128xf32> to vector<512x128xf32>
    %5 = arith.addf %2, %4 : vector<512x128xf32>
    %cst_5 = arith.constant -3.000000e+01 : f32
    %6 = vector.broadcast %cst_5 : f32 to vector<512x128xf32>
    %7 = arith.maximumf %5, %6 : vector<512x128xf32>
    %cst_6 = arith.constant 0.000000e+00 : f32
    %8 = vector.broadcast %cst_6 : f32 to vector<512x128xf32>
    %9 = arith.subf %8, %7 : vector<512x128xf32>
    %10 = math.exp %9 : vector<512x128xf32>
    %cst_7 = arith.constant 1.000000e+00 : f32
    %11 = vector.broadcast %cst_7 : f32 to vector<512x128xf32>
    %12 = arith.addf %11, %10 : vector<512x128xf32>
    %13 = tpu.reciprocal %12 {approx = true} : vector<512x128xf32> -> vector<512x128xf32>
    %14 = arith.mulf %5, %13 : vector<512x128xf32>
    %15 = arith.truncf %14 : vector<512x128xf32> to vector<512x128xbf16>
    %c0_8 = arith.constant 0 : index
    %c0_9 = arith.constant 0 : index
    %16 = vector.load %arg4[%c0_8, %c0_9] : memref<512x128xbf16, #tpu.memory_space<vmem>>, vector<512x128xbf16>
    tpu.vector_store %arg4[%c0_8, %c0_9], %15 {strides = array<i32>} : memref<512x128xbf16, #tpu.memory_space<vmem>>, vector<512x128xbf16>,
    return
  }
  func.func @transform_0(%arg0: i32) -> (i32, i32) {
    %c0_i32 = arith.constant 0 : i32
    %c0_i32_0 = arith.constant 0 : i32
    return %arg0, %c0_i32 : i32, i32
  }
  func.func @transform_1(%arg0: i32) -> (i32, i32) {
    %c0_i32 = arith.constant 0 : i32
    %c0_i32_0 = arith.constant 0 : i32
    %c0_i32_1 = arith.constant 0 : i32
    return %c0_i32, %c0_i32_0 : i32, i32
  }
  func.func @transform_2(%arg0: i32) -> (i32, i32) {
    %c0_i32 = arith.constant 0 : i32
    %c0_i32_0 = arith.constant 0 : i32
    %c0_i32_1 = arith.constant 0 : i32
    return %c0_i32, %c0_i32_0 : i32, i32
  }
  func.func @transform_3(%arg0: i32) -> (i32, i32) {
    %c0_i32 = arith.constant 0 : i32
    %c0_i32_0 = arith.constant 0 : i32
    return %arg0, %c0_i32 : i32, i32
  }
}

module attributes {stable_mosaic.version = 11 : i64} {
  func.func @_conv_bn_silu_kernel(%arg0: i32, %arg1: memref<512x128xbf16, #tpu.memory_space<vmem>>, %arg2: memref<128x128xbf16, #tpu.memory_space<vmem>>, %arg3: memref<1x128xf32, #tpu.memory_space<vmem>>, %arg4: memref<512x128xbf16, #tpu.memory_space<vmem>>) attributes {dimension_semantics = [#tpu.dimension_semantics<parallel>], iteration_bounds = array<i64: 1>, scalar_prefetch = 0 : i64, scratch_operands = 0 : i64, tpu.core_type = #tpu.core_type<tc>, window_params = [{transform_indices = @transform_0, window_bounds = array<i64: 512, 128>}, {pipeline_mode = #tpu.pipeline_mode<synchronous>, transform_indices = @transform_1, window_bounds = array<i64: 128, 128>}, {pipeline_mode = #tpu.pipeline_mode<synchronous>, transform_indices = @transform_2, window_bounds = array<i64: 1, 128>}, {transform_indices = @transform_3, window_bounds = array<i64: 512, 128>}]} {
    %c0 = arith.constant 0 : index
    %c0_0 = arith.constant 0 : index
    %0 = vector.load %arg1[%c0, %c0_0] : memref<512x128xbf16, #tpu.memory_space<vmem>>, vector<512x128xbf16>
    %c0_1 = arith.constant 0 : index
    %c0_2 = arith.constant 0 : index
    %1 = vector.load %arg2[%c0_1, %c0_2] : memref<128x128xbf16, #tpu.memory_space<vmem>>, vector<128x128xbf16>
    %cst = arith.constant dense<0.000000e+00> : vector<512x128xf32>
    %2 = tpu.matmul %0, %1, %cst {dimension_numbers = #tpu.dot_dimension_numbers<[1], [0], [0], [1], [0, 0, 1, 1], [], []>} : vector<512x128xbf16>, vector<128x128xbf16>, vector<512x128xf32> -> vector<512x128xf32>
    %c0_3 = arith.constant 0 : index
    %c0_4 = arith.constant 0 : index
    %3 = vector.load %arg3[%c0_3, %c0_4] : memref<1x128xf32, #tpu.memory_space<vmem>>, vector<1x128xf32>
    %4 = vector.broadcast %3 : vector<1x128xf32> to vector<512x128xf32>
    %5 = arith.addf %2, %4 : vector<512x128xf32>
    %cst_5 = arith.constant -3.000000e+01 : f32
    %6 = vector.broadcast %cst_5 : f32 to vector<512x128xf32>
    %7 = arith.maximumf %5, %6 : vector<512x128xf32>
    %cst_6 = arith.constant 0.000000e+00 : f32
    %8 = vector.broadcast %cst_6 : f32 to vector<512x128xf32>
    %9 = arith.subf %8, %7 : vector<512x128xf32>
    %10 = math.exp %9 : vector<512x128xf32>
    %cst_7 = arith.constant 1.000000e+00 : f32
    %11 = vector.broadcast %cst_7 : f32 to vector<512x128xf32>
    %12 = arith.addf %11, %10 : vector<512x128xf32>
    %13 = tpu.reciprocal %12 {approx = true} : vector<512x128xf32> -> vector<512x128xf32>
    %14 = arith.mulf %5, %13 : vector<512x128xf32>
    %15 = arith.truncf %14 : vector<512x128xf32> to vector<512x128xbf16>
    %c0_8 = arith.constant 0 : index
    %c0_9 = arith.constant 0 : index
    %16 = vector.load %arg4[%c0_8, %c0_9] : memref<512x128xbf16, #tpu.memory_space<vmem>>, vector<512x128xbf16>
    tpu.vector_store %arg4[%c0_8, %c0_9], %15 {strides = array<i32>} : memref<512x128xbf16, #tpu.memory_space<vmem>>, vector<512x128xbf16>,
    return
  }
  func.func @transform_0(%arg0: i32) -> (i32, i32) {
    %c0_i32 = arith.constant 0 : i32
    %c0_i32_0 = arith.constant 0 : i32
    return %arg0, %c0_i32 : i32, i32
  }
  func.func @transform_1(%arg0: i32) -> (i32, i32) {
    %c0_i32 = arith.constant 0 : i32
    %c0_i32_0 = arith.constant 0 : i32
    %c0_i32_1 = arith.constant 0 : i32
    return %c0_i32, %c0_i32_0 : i32, i32
  }
  func.func @transform_2(%arg0: i32) -> (i32, i32) {
    %c0_i32 = arith.constant 0 : i32
    %c0_i32_0 = arith.constant 0 : i32
    %c0_i32_1 = arith.constant 0 : i32
    return %c0_i32, %c0_i32_0 : i32, i32
  }
  func.func @transform_3(%arg0: i32) -> (i32, i32) {
    %c0_i32 = arith.constant 0 : i32
    %c0_i32_0 = arith.constant 0 : i32
    return %arg0, %c0_i32 : i32, i32
  }
}

module attributes {stable_mosaic.version = 11 : i64} {
  func.func @_conv_bn_silu_kernel(%arg0: i32, %arg1: memref<512x72xbf16, #tpu.memory_space<vmem>>, %arg2: memref<72x128xbf16, #tpu.memory_space<vmem>>, %arg3: memref<1x128xf32, #tpu.memory_space<vmem>>, %arg4: memref<512x128xbf16, #tpu.memory_space<vmem>>) attributes {dimension_semantics = [#tpu.dimension_semantics<parallel>], iteration_bounds = array<i64: 1>, scalar_prefetch = 0 : i64, scratch_operands = 0 : i64, tpu.core_type = #tpu.core_type<tc>, window_params = [{transform_indices = @transform_0, window_bounds = array<i64: 512, 72>}, {pipeline_mode = #tpu.pipeline_mode<synchronous>, transform_indices = @transform_1, window_bounds = array<i64: 72, 128>}, {pipeline_mode = #tpu.pipeline_mode<synchronous>, transform_indices = @transform_2, window_bounds = array<i64: 1, 128>}, {transform_indices = @transform_3, window_bounds = array<i64: 512, 128>}]} {
    %c0 = arith.constant 0 : index
    %c0_0 = arith.constant 0 : index
    %0 = vector.load %arg1[%c0, %c0_0] : memref<512x72xbf16, #tpu.memory_space<vmem>>, vector<512x72xbf16>
    %c0_1 = arith.constant 0 : index
    %c0_2 = arith.constant 0 : index
    %1 = vector.load %arg2[%c0_1, %c0_2] : memref<72x128xbf16, #tpu.memory_space<vmem>>, vector<72x128xbf16>
    %cst = arith.constant dense<0.000000e+00> : vector<512x128xf32>
    %2 = tpu.matmul %0, %1, %cst {dimension_numbers = #tpu.dot_dimension_numbers<[1], [0], [0], [1], [0, 0, 1, 1], [], []>} : vector<512x72xbf16>, vector<72x128xbf16>, vector<512x128xf32> -> vector<512x128xf32>
    %c0_3 = arith.constant 0 : index
    %c0_4 = arith.constant 0 : index
    %3 = vector.load %arg3[%c0_3, %c0_4] : memref<1x128xf32, #tpu.memory_space<vmem>>, vector<1x128xf32>
    %4 = vector.broadcast %3 : vector<1x128xf32> to vector<512x128xf32>
    %5 = arith.addf %2, %4 : vector<512x128xf32>
    %cst_5 = arith.constant -3.000000e+01 : f32
    %6 = vector.broadcast %cst_5 : f32 to vector<512x128xf32>
    %7 = arith.maximumf %5, %6 : vector<512x128xf32>
    %cst_6 = arith.constant 0.000000e+00 : f32
    %8 = vector.broadcast %cst_6 : f32 to vector<512x128xf32>
    %9 = arith.subf %8, %7 : vector<512x128xf32>
    %10 = math.exp %9 : vector<512x128xf32>
    %cst_7 = arith.constant 1.000000e+00 : f32
    %11 = vector.broadcast %cst_7 : f32 to vector<512x128xf32>
    %12 = arith.addf %11, %10 : vector<512x128xf32>
    %13 = tpu.reciprocal %12 {approx = true} : vector<512x128xf32> -> vector<512x128xf32>
    %14 = arith.mulf %5, %13 : vector<512x128xf32>
    %15 = arith.truncf %14 : vector<512x128xf32> to vector<512x128xbf16>
    %c0_8 = arith.constant 0 : index
    %c0_9 = arith.constant 0 : index
    %16 = vector.load %arg4[%c0_8, %c0_9] : memref<512x128xbf16, #tpu.memory_space<vmem>>, vector<512x128xbf16>
    tpu.vector_store %arg4[%c0_8, %c0_9], %15 {strides = array<i32>} : memref<512x128xbf16, #tpu.memory_space<vmem>>, vector<512x128xbf16>,
    return
  }
  func.func @transform_0(%arg0: i32) -> (i32, i32) {
    %c0_i32 = arith.constant 0 : i32
    %c0_i32_0 = arith.constant 0 : i32
    return %arg0, %c0_i32 : i32, i32
  }
  func.func @transform_1(%arg0: i32) -> (i32, i32) {
    %c0_i32 = arith.constant 0 : i32
    %c0_i32_0 = arith.constant 0 : i32
    %c0_i32_1 = arith.constant 0 : i32
    return %c0_i32, %c0_i32_0 : i32, i32
  }
  func.func @transform_2(%arg0: i32) -> (i32, i32) {
    %c0_i32 = arith.constant 0 : i32
    %c0_i32_0 = arith.constant 0 : i32
    %c0_i32_1 = arith.constant 0 : i32
    return %c0_i32, %c0_i32_0 : i32, i32
  }
  func.func @transform_3(%arg0: i32) -> (i32, i32) {
    %c0_i32 = arith.constant 0 : i32
    %c0_i32_0 = arith.constant 0 : i32
    return %arg0, %c0_i32 : i32, i32
  }
}

module attributes {stable_mosaic.version = 11 : i64} {
  func.func @_conv_bn_silu_kernel(%arg0: i32, %arg1: memref<512x128xbf16, #tpu.memory_space<vmem>>, %arg2: memref<128x128xbf16, #tpu.memory_space<vmem>>, %arg3: memref<512x128xbf16, #tpu.memory_space<vmem>>, %arg4: memref<128x128xbf16, #tpu.memory_space<vmem>>, %arg5: memref<1x128xf32, #tpu.memory_space<vmem>>, %arg6: memref<512x128xbf16, #tpu.memory_space<vmem>>) attributes {dimension_semantics = [#tpu.dimension_semantics<parallel>], iteration_bounds = array<i64: 1>, scalar_prefetch = 0 : i64, scratch_operands = 0 : i64, tpu.core_type = #tpu.core_type<tc>, window_params = [{transform_indices = @transform_0, window_bounds = array<i64: 512, 128>}, {pipeline_mode = #tpu.pipeline_mode<synchronous>, transform_indices = @transform_1, window_bounds = array<i64: 128, 128>}, {transform_indices = @transform_2, window_bounds = array<i64: 512, 128>}, {pipeline_mode = #tpu.pipeline_mode<synchronous>, transform_indices = @transform_3, window_bounds = array<i64: 128, 128>}, {pipeline_mode = #tpu.pipeline_mode<synchronous>, transform_indices = @transform_4, window_bounds = array<i64: 1, 128>}, {transform_indices = @transform_5, window_bounds = array<i64: 512, 128>}]} {
    %c0 = arith.constant 0 : index
    %c0_0 = arith.constant 0 : index
    %0 = vector.load %arg1[%c0, %c0_0] : memref<512x128xbf16, #tpu.memory_space<vmem>>, vector<512x128xbf16>
    %c0_1 = arith.constant 0 : index
    %c0_2 = arith.constant 0 : index
    %1 = vector.load %arg2[%c0_1, %c0_2] : memref<128x128xbf16, #tpu.memory_space<vmem>>, vector<128x128xbf16>
    %cst = arith.constant dense<0.000000e+00> : vector<512x128xf32>
    %2 = tpu.matmul %0, %1, %cst {dimension_numbers = #tpu.dot_dimension_numbers<[1], [0], [0], [1], [0, 0, 1, 1], [], []>} : vector<512x128xbf16>, vector<128x128xbf16>, vector<512x128xf32> -> vector<512x128xf32>
    %c0_3 = arith.constant 0 : index
    %c0_4 = arith.constant 0 : index
    %3 = vector.load %arg3[%c0_3, %c0_4] : memref<512x128xbf16, #tpu.memory_space<vmem>>, vector<512x128xbf16>
    %c0_5 = arith.constant 0 : index
    %c0_6 = arith.constant 0 : index
    %4 = vector.load %arg4[%c0_5, %c0_6] : memref<128x128xbf16, #tpu.memory_space<vmem>>, vector<128x128xbf16>
    %cst_7 = arith.constant dense<0.000000e+00> : vector<512x128xf32>
    %5 = tpu.matmul %3, %4, %cst_7 {dimension_numbers = #tpu.dot_dimension_numbers<[1], [0], [0], [1], [0, 0, 1, 1], [], []>} : vector<512x128xbf16>, vector<128x128xbf16>, vector<512x128xf32> -> vector<512x128xf32>
    %6 = arith.addf %2, %5 : vector<512x128xf32>
    %c0_8 = arith.constant 0 : index
    %c0_9 = arith.constant 0 : index
    %7 = vector.load %arg5[%c0_8, %c0_9] : memref<1x128xf32, #tpu.memory_space<vmem>>, vector<1x128xf32>
    %8 = vector.broadcast %7 : vector<1x128xf32> to vector<512x128xf32>
    %9 = arith.addf %6, %8 : vector<512x128xf32>
    %cst_10 = arith.constant -3.000000e+01 : f32
    %10 = vector.broadcast %cst_10 : f32 to vector<512x128xf32>
    %11 = arith.maximumf %9, %10 : vector<512x128xf32>
    %cst_11 = arith.constant 0.000000e+00 : f32
    %12 = vector.broadcast %cst_11 : f32 to vector<512x128xf32>
    %13 = arith.subf %12, %11 : vector<512x128xf32>
    %14 = math.exp %13 : vector<512x128xf32>
    %cst_12 = arith.constant 1.000000e+00 : f32
    %15 = vector.broadcast %cst_12 : f32 to vector<512x128xf32>
    %16 = arith.addf %15, %14 : vector<512x128xf32>
    %17 = tpu.reciprocal %16 {approx = true} : vector<512x128xf32> -> vector<512x128xf32>
    %18 = arith.mulf %9, %17 : vector<512x128xf32>
    %19 = arith.truncf %18 : vector<512x128xf32> to vector<512x128xbf16>
    %c0_13 = arith.constant 0 : index
    %c0_14 = arith.constant 0 : index
    %20 = vector.load %arg6[%c0_13, %c0_14] : memref<512x128xbf16, #tpu.memory_space<vmem>>, vector<512x128xbf16>
    tpu.vector_store %arg6[%c0_13, %c0_14], %19 {strides = array<i32>} : memref<512x128xbf16, #tpu.memory_space<vmem>>, vector<512x128xbf16>,
    return
  }
  func.func @transform_0(%arg0: i32) -> (i32, i32) {
    %c0_i32 = arith.constant 0 : i32
    %c0_i32_0 = arith.constant 0 : i32
    return %arg0, %c0_i32 : i32, i32
  }
  func.func @transform_1(%arg0: i32) -> (i32, i32) {
    %c0_i32 = arith.constant 0 : i32
    %c0_i32_0 = arith.constant 0 : i32
    %c0_i32_1 = arith.constant 0 : i32
    return %c0_i32, %c0_i32_0 : i32, i32
  }
  func.func @transform_2(%arg0: i32) -> (i32, i32) {
    %c0_i32 = arith.constant 0 : i32
    %c0_i32_0 = arith.constant 0 : i32
    return %arg0, %c0_i32 : i32, i32
  }
  func.func @transform_3(%arg0: i32) -> (i32, i32) {
    %c0_i32 = arith.constant 0 : i32
    %c0_i32_0 = arith.constant 0 : i32
    %c0_i32_1 = arith.constant 0 : i32
    return %c0_i32, %c0_i32_0 : i32, i32
  }
  func.func @transform_4(%arg0: i32) -> (i32, i32) {
    %c0_i32 = arith.constant 0 : i32
    %c0_i32_0 = arith.constant 0 : i32
    %c0_i32_1 = arith.constant 0 : i32
    return %c0_i32, %c0_i32_0 : i32, i32
  }
  func.func @transform_5(%arg0: i32) -> (i32, i32) {
    %c0_i32 = arith.constant 0 : i32
    %c0_i32_0 = arith.constant 0 : i32
    return %arg0, %c0_i32 : i32, i32
  }
}

module attributes {stable_mosaic.version = 11 : i64} {
  func.func @_conv_bn_silu_kernel(%arg0: i32, %arg1: memref<128x144xbf16, #tpu.memory_space<vmem>>, %arg2: memref<144x128xbf16, #tpu.memory_space<vmem>>, %arg3: memref<1x128xf32, #tpu.memory_space<vmem>>, %arg4: memref<128x128xbf16, #tpu.memory_space<vmem>>) attributes {dimension_semantics = [#tpu.dimension_semantics<parallel>], iteration_bounds = array<i64: 1>, scalar_prefetch = 0 : i64, scratch_operands = 0 : i64, tpu.core_type = #tpu.core_type<tc>, window_params = [{transform_indices = @transform_0, window_bounds = array<i64: 128, 144>}, {pipeline_mode = #tpu.pipeline_mode<synchronous>, transform_indices = @transform_1, window_bounds = array<i64: 144, 128>}, {pipeline_mode = #tpu.pipeline_mode<synchronous>, transform_indices = @transform_2, window_bounds = array<i64: 1, 128>}, {transform_indices = @transform_3, window_bounds = array<i64: 128, 128>}]} {
    %c0 = arith.constant 0 : index
    %c0_0 = arith.constant 0 : index
    %0 = vector.load %arg1[%c0, %c0_0] : memref<128x144xbf16, #tpu.memory_space<vmem>>, vector<128x144xbf16>
    %c0_1 = arith.constant 0 : index
    %c0_2 = arith.constant 0 : index
    %1 = vector.load %arg2[%c0_1, %c0_2] : memref<144x128xbf16, #tpu.memory_space<vmem>>, vector<144x128xbf16>
    %cst = arith.constant dense<0.000000e+00> : vector<128x128xf32>
    %2 = tpu.matmul %0, %1, %cst {dimension_numbers = #tpu.dot_dimension_numbers<[1], [0], [0], [1], [0, 0, 1, 1], [], []>} : vector<128x144xbf16>, vector<144x128xbf16>, vector<128x128xf32> -> vector<128x128xf32>
    %c0_3 = arith.constant 0 : index
    %c0_4 = arith.constant 0 : index
    %3 = vector.load %arg3[%c0_3, %c0_4] : memref<1x128xf32, #tpu.memory_space<vmem>>, vector<1x128xf32>
    %4 = vector.broadcast %3 : vector<1x128xf32> to vector<128x128xf32>
    %5 = arith.addf %2, %4 : vector<128x128xf32>
    %cst_5 = arith.constant -3.000000e+01 : f32
    %6 = vector.broadcast %cst_5 : f32 to vector<128x128xf32>
    %7 = arith.maximumf %5, %6 : vector<128x128xf32>
    %cst_6 = arith.constant 0.000000e+00 : f32
    %8 = vector.broadcast %cst_6 : f32 to vector<128x128xf32>
    %9 = arith.subf %8, %7 : vector<128x128xf32>
    %10 = math.exp %9 : vector<128x128xf32>
    %cst_7 = arith.constant 1.000000e+00 : f32
    %11 = vector.broadcast %cst_7 : f32 to vector<128x128xf32>
    %12 = arith.addf %11, %10 : vector<128x128xf32>
    %13 = tpu.reciprocal %12 {approx = true} : vector<128x128xf32> -> vector<128x128xf32>
    %14 = arith.mulf %5, %13 : vector<128x128xf32>
    %15 = arith.truncf %14 : vector<128x128xf32> to vector<128x128xbf16>
    %c0_8 = arith.constant 0 : index
    %c0_9 = arith.constant 0 : index
    %16 = vector.load %arg4[%c0_8, %c0_9] : memref<128x128xbf16, #tpu.memory_space<vmem>>, vector<128x128xbf16>
    tpu.vector_store %arg4[%c0_8, %c0_9], %15 {strides = array<i32>} : memref<128x128xbf16, #tpu.memory_space<vmem>>, vector<128x128xbf16>,
    return
  }
  func.func @transform_0(%arg0: i32) -> (i32, i32) {
    %c0_i32 = arith.constant 0 : i32
    %c0_i32_0 = arith.constant 0 : i32
    return %arg0, %c0_i32 : i32, i32
  }
  func.func @transform_1(%arg0: i32) -> (i32, i32) {
    %c0_i32 = arith.constant 0 : i32
    %c0_i32_0 = arith.constant 0 : i32
    %c0_i32_1 = arith.constant 0 : i32
    return %c0_i32, %c0_i32_0 : i32, i32
  }
  func.func @transform_2(%arg0: i32) -> (i32, i32) {
    %c0_i32 = arith.constant 0 : i32
    %c0_i32_0 = arith.constant 0 : i32
    %c0_i32_1 = arith.constant 0 : i32
    return %c0_i32, %c0_i32_0 : i32, i32
  }
  func.func @transform_3(%arg0: i32) -> (i32, i32) {
    %c0_i32 = arith.constant 0 : i32
    %c0_i32_0 = arith.constant 0 : i32
    return %arg0, %c0_i32 : i32, i32
  }
}

module attributes {stable_mosaic.version = 11 : i64} {
  func.func @_conv_bn_silu_kernel(%arg0: i32, %arg1: memref<128x128xbf16, #tpu.memory_space<vmem>>, %arg2: memref<128x128xbf16, #tpu.memory_space<vmem>>, %arg3: memref<1x128xf32, #tpu.memory_space<vmem>>, %arg4: memref<128x128xbf16, #tpu.memory_space<vmem>>) attributes {dimension_semantics = [#tpu.dimension_semantics<parallel>], iteration_bounds = array<i64: 1>, scalar_prefetch = 0 : i64, scratch_operands = 0 : i64, tpu.core_type = #tpu.core_type<tc>, window_params = [{transform_indices = @transform_0, window_bounds = array<i64: 128, 128>}, {pipeline_mode = #tpu.pipeline_mode<synchronous>, transform_indices = @transform_1, window_bounds = array<i64: 128, 128>}, {pipeline_mode = #tpu.pipeline_mode<synchronous>, transform_indices = @transform_2, window_bounds = array<i64: 1, 128>}, {transform_indices = @transform_3, window_bounds = array<i64: 128, 128>}]} {
    %c0 = arith.constant 0 : index
    %c0_0 = arith.constant 0 : index
    %0 = vector.load %arg1[%c0, %c0_0] : memref<128x128xbf16, #tpu.memory_space<vmem>>, vector<128x128xbf16>
    %c0_1 = arith.constant 0 : index
    %c0_2 = arith.constant 0 : index
    %1 = vector.load %arg2[%c0_1, %c0_2] : memref<128x128xbf16, #tpu.memory_space<vmem>>, vector<128x128xbf16>
    %cst = arith.constant dense<0.000000e+00> : vector<128x128xf32>
    %2 = tpu.matmul %0, %1, %cst {dimension_numbers = #tpu.dot_dimension_numbers<[1], [0], [0], [1], [0, 0, 1, 1], [], []>} : vector<128x128xbf16>, vector<128x128xbf16>, vector<128x128xf32> -> vector<128x128xf32>
    %c0_3 = arith.constant 0 : index
    %c0_4 = arith.constant 0 : index
    %3 = vector.load %arg3[%c0_3, %c0_4] : memref<1x128xf32, #tpu.memory_space<vmem>>, vector<1x128xf32>
    %4 = vector.broadcast %3 : vector<1x128xf32> to vector<128x128xf32>
    %5 = arith.addf %2, %4 : vector<128x128xf32>
    %cst_5 = arith.constant -3.000000e+01 : f32
    %6 = vector.broadcast %cst_5 : f32 to vector<128x128xf32>
    %7 = arith.maximumf %5, %6 : vector<128x128xf32>
    %cst_6 = arith.constant 0.000000e+00 : f32
    %8 = vector.broadcast %cst_6 : f32 to vector<128x128xf32>
    %9 = arith.subf %8, %7 : vector<128x128xf32>
    %10 = math.exp %9 : vector<128x128xf32>
    %cst_7 = arith.constant 1.000000e+00 : f32
    %11 = vector.broadcast %cst_7 : f32 to vector<128x128xf32>
    %12 = arith.addf %11, %10 : vector<128x128xf32>
    %13 = tpu.reciprocal %12 {approx = true} : vector<128x128xf32> -> vector<128x128xf32>
    %14 = arith.mulf %5, %13 : vector<128x128xf32>
    %15 = arith.truncf %14 : vector<128x128xf32> to vector<128x128xbf16>
    %c0_8 = arith.constant 0 : index
    %c0_9 = arith.constant 0 : index
    %16 = vector.load %arg4[%c0_8, %c0_9] : memref<128x128xbf16, #tpu.memory_space<vmem>>, vector<128x128xbf16>
    tpu.vector_store %arg4[%c0_8, %c0_9], %15 {strides = array<i32>} : memref<128x128xbf16, #tpu.memory_space<vmem>>, vector<128x128xbf16>,
    return
  }
  func.func @transform_0(%arg0: i32) -> (i32, i32) {
    %c0_i32 = arith.constant 0 : i32
    %c0_i32_0 = arith.constant 0 : i32
    return %arg0, %c0_i32 : i32, i32
  }
  func.func @transform_1(%arg0: i32) -> (i32, i32) {
    %c0_i32 = arith.constant 0 : i32
    %c0_i32_0 = arith.constant 0 : i32
    %c0_i32_1 = arith.constant 0 : i32
    return %c0_i32, %c0_i32_0 : i32, i32
  }
  func.func @transform_2(%arg0: i32) -> (i32, i32) {
    %c0_i32 = arith.constant 0 : i32
    %c0_i32_0 = arith.constant 0 : i32
    %c0_i32_1 = arith.constant 0 : i32
    return %c0_i32, %c0_i32_0 : i32, i32
  }
  func.func @transform_3(%arg0: i32) -> (i32, i32) {
    %c0_i32 = arith.constant 0 : i32
    %c0_i32_0 = arith.constant 0 : i32
    return %arg0, %c0_i32 : i32, i32
  }
}

module attributes {stable_mosaic.version = 11 : i64} {
  func.func @_conv_bn_silu_kernel(%arg0: i32, %arg1: memref<128x128xbf16, #tpu.memory_space<vmem>>, %arg2: memref<128x128xbf16, #tpu.memory_space<vmem>>, %arg3: memref<128x128xbf16, #tpu.memory_space<vmem>>, %arg4: memref<128x128xbf16, #tpu.memory_space<vmem>>, %arg5: memref<1x128xf32, #tpu.memory_space<vmem>>, %arg6: memref<128x128xbf16, #tpu.memory_space<vmem>>) attributes {dimension_semantics = [#tpu.dimension_semantics<parallel>], iteration_bounds = array<i64: 1>, scalar_prefetch = 0 : i64, scratch_operands = 0 : i64, tpu.core_type = #tpu.core_type<tc>, window_params = [{transform_indices = @transform_0, window_bounds = array<i64: 128, 128>}, {pipeline_mode = #tpu.pipeline_mode<synchronous>, transform_indices = @transform_1, window_bounds = array<i64: 128, 128>}, {transform_indices = @transform_2, window_bounds = array<i64: 128, 128>}, {pipeline_mode = #tpu.pipeline_mode<synchronous>, transform_indices = @transform_3, window_bounds = array<i64: 128, 128>}, {pipeline_mode = #tpu.pipeline_mode<synchronous>, transform_indices = @transform_4, window_bounds = array<i64: 1, 128>}, {transform_indices = @transform_5, window_bounds = array<i64: 128, 128>}]} {
    %c0 = arith.constant 0 : index
    %c0_0 = arith.constant 0 : index
    %0 = vector.load %arg1[%c0, %c0_0] : memref<128x128xbf16, #tpu.memory_space<vmem>>, vector<128x128xbf16>
    %c0_1 = arith.constant 0 : index
    %c0_2 = arith.constant 0 : index
    %1 = vector.load %arg2[%c0_1, %c0_2] : memref<128x128xbf16, #tpu.memory_space<vmem>>, vector<128x128xbf16>
    %cst = arith.constant dense<0.000000e+00> : vector<128x128xf32>
    %2 = tpu.matmul %0, %1, %cst {dimension_numbers = #tpu.dot_dimension_numbers<[1], [0], [0], [1], [0, 0, 1, 1], [], []>} : vector<128x128xbf16>, vector<128x128xbf16>, vector<128x128xf32> -> vector<128x128xf32>
    %c0_3 = arith.constant 0 : index
    %c0_4 = arith.constant 0 : index
    %3 = vector.load %arg3[%c0_3, %c0_4] : memref<128x128xbf16, #tpu.memory_space<vmem>>, vector<128x128xbf16>
    %c0_5 = arith.constant 0 : index
    %c0_6 = arith.constant 0 : index
    %4 = vector.load %arg4[%c0_5, %c0_6] : memref<128x128xbf16, #tpu.memory_space<vmem>>, vector<128x128xbf16>
    %cst_7 = arith.constant dense<0.000000e+00> : vector<128x128xf32>
    %5 = tpu.matmul %3, %4, %cst_7 {dimension_numbers = #tpu.dot_dimension_numbers<[1], [0], [0], [1], [0, 0, 1, 1], [], []>} : vector<128x128xbf16>, vector<128x128xbf16>, vector<128x128xf32> -> vector<128x128xf32>
    %6 = arith.addf %2, %5 : vector<128x128xf32>
    %c0_8 = arith.constant 0 : index
    %c0_9 = arith.constant 0 : index
    %7 = vector.load %arg5[%c0_8, %c0_9] : memref<1x128xf32, #tpu.memory_space<vmem>>, vector<1x128xf32>
    %8 = vector.broadcast %7 : vector<1x128xf32> to vector<128x128xf32>
    %9 = arith.addf %6, %8 : vector<128x128xf32>
    %cst_10 = arith.constant -3.000000e+01 : f32
    %10 = vector.broadcast %cst_10 : f32 to vector<128x128xf32>
    %11 = arith.maximumf %9, %10 : vector<128x128xf32>
    %cst_11 = arith.constant 0.000000e+00 : f32
    %12 = vector.broadcast %cst_11 : f32 to vector<128x128xf32>
    %13 = arith.subf %12, %11 : vector<128x128xf32>
    %14 = math.exp %13 : vector<128x128xf32>
    %cst_12 = arith.constant 1.000000e+00 : f32
    %15 = vector.broadcast %cst_12 : f32 to vector<128x128xf32>
    %16 = arith.addf %15, %14 : vector<128x128xf32>
    %17 = tpu.reciprocal %16 {approx = true} : vector<128x128xf32> -> vector<128x128xf32>
    %18 = arith.mulf %9, %17 : vector<128x128xf32>
    %19 = arith.truncf %18 : vector<128x128xf32> to vector<128x128xbf16>
    %c0_13 = arith.constant 0 : index
    %c0_14 = arith.constant 0 : index
    %20 = vector.load %arg6[%c0_13, %c0_14] : memref<128x128xbf16, #tpu.memory_space<vmem>>, vector<128x128xbf16>
    tpu.vector_store %arg6[%c0_13, %c0_14], %19 {strides = array<i32>} : memref<128x128xbf16, #tpu.memory_space<vmem>>, vector<128x128xbf16>,
    return
  }
  func.func @transform_0(%arg0: i32) -> (i32, i32) {
    %c0_i32 = arith.constant 0 : i32
    %c0_i32_0 = arith.constant 0 : i32
    return %arg0, %c0_i32 : i32, i32
  }
  func.func @transform_1(%arg0: i32) -> (i32, i32) {
    %c0_i32 = arith.constant 0 : i32
    %c0_i32_0 = arith.constant 0 : i32
    %c0_i32_1 = arith.constant 0 : i32
    return %c0_i32, %c0_i32_0 : i32, i32
  }
  func.func @transform_2(%arg0: i32) -> (i32, i32) {
    %c0_i32 = arith.constant 0 : i32
    %c0_i32_0 = arith.constant 0 : i32
    return %arg0, %c0_i32 : i32, i32
  }
  func.func @transform_3(%arg0: i32) -> (i32, i32) {
    %c0_i32 = arith.constant 0 : i32
    %c0_i32_0 = arith.constant 0 : i32
    %c0_i32_1 = arith.constant 0 : i32
    return %c0_i32, %c0_i32_0 : i32, i32
  }
  func.func @transform_4(%arg0: i32) -> (i32, i32) {
    %c0_i32 = arith.constant 0 : i32
    %c0_i32_0 = arith.constant 0 : i32
    %c0_i32_1 = arith.constant 0 : i32
    return %c0_i32, %c0_i32_0 : i32, i32
  }
  func.func @transform_5(%arg0: i32) -> (i32, i32) {
    %c0_i32 = arith.constant 0 : i32
    %c0_i32_0 = arith.constant 0 : i32
    return %arg0, %c0_i32 : i32, i32
  }
}

module attributes {stable_mosaic.version = 11 : i64} {
  func.func @_conv_bn_silu_kernel(%arg0: i32, %arg1: memref<32x128xbf16, #tpu.memory_space<vmem>>, %arg2: memref<128x128xbf16, #tpu.memory_space<vmem>>, %arg3: memref<1x128xf32, #tpu.memory_space<vmem>>, %arg4: memref<32x128xbf16, #tpu.memory_space<vmem>>) attributes {dimension_semantics = [#tpu.dimension_semantics<parallel>], iteration_bounds = array<i64: 1>, scalar_prefetch = 0 : i64, scratch_operands = 0 : i64, tpu.core_type = #tpu.core_type<tc>, window_params = [{transform_indices = @transform_0, window_bounds = array<i64: 32, 128>}, {pipeline_mode = #tpu.pipeline_mode<synchronous>, transform_indices = @transform_1, window_bounds = array<i64: 128, 128>}, {pipeline_mode = #tpu.pipeline_mode<synchronous>, transform_indices = @transform_2, window_bounds = array<i64: 1, 128>}, {transform_indices = @transform_3, window_bounds = array<i64: 32, 128>}]} {
    %c0 = arith.constant 0 : index
    %c0_0 = arith.constant 0 : index
    %0 = vector.load %arg1[%c0, %c0_0] : memref<32x128xbf16, #tpu.memory_space<vmem>>, vector<32x128xbf16>
    %c0_1 = arith.constant 0 : index
    %c0_2 = arith.constant 0 : index
    %1 = vector.load %arg2[%c0_1, %c0_2] : memref<128x128xbf16, #tpu.memory_space<vmem>>, vector<128x128xbf16>
    %cst = arith.constant dense<0.000000e+00> : vector<32x128xf32>
    %2 = tpu.matmul %0, %1, %cst {dimension_numbers = #tpu.dot_dimension_numbers<[1], [0], [0], [1], [0, 0, 1, 1], [], []>} : vector<32x128xbf16>, vector<128x128xbf16>, vector<32x128xf32> -> vector<32x128xf32>
    %c0_3 = arith.constant 0 : index
    %c0_4 = arith.constant 0 : index
    %3 = vector.load %arg3[%c0_3, %c0_4] : memref<1x128xf32, #tpu.memory_space<vmem>>, vector<1x128xf32>
    %4 = vector.broadcast %3 : vector<1x128xf32> to vector<32x128xf32>
    %5 = arith.addf %2, %4 : vector<32x128xf32>
    %cst_5 = arith.constant -3.000000e+01 : f32
    %6 = vector.broadcast %cst_5 : f32 to vector<32x128xf32>
    %7 = arith.maximumf %5, %6 : vector<32x128xf32>
    %cst_6 = arith.constant 0.000000e+00 : f32
    %8 = vector.broadcast %cst_6 : f32 to vector<32x128xf32>
    %9 = arith.subf %8, %7 : vector<32x128xf32>
    %10 = math.exp %9 : vector<32x128xf32>
    %cst_7 = arith.constant 1.000000e+00 : f32
    %11 = vector.broadcast %cst_7 : f32 to vector<32x128xf32>
    %12 = arith.addf %11, %10 : vector<32x128xf32>
    %13 = tpu.reciprocal %12 {approx = true} : vector<32x128xf32> -> vector<32x128xf32>
    %14 = arith.mulf %5, %13 : vector<32x128xf32>
    %15 = arith.truncf %14 : vector<32x128xf32> to vector<32x128xbf16>
    %c0_8 = arith.constant 0 : index
    %c0_9 = arith.constant 0 : index
    %16 = vector.load %arg4[%c0_8, %c0_9] : memref<32x128xbf16, #tpu.memory_space<vmem>>, vector<32x128xbf16>
    tpu.vector_store %arg4[%c0_8, %c0_9], %15 {strides = array<i32>} : memref<32x128xbf16, #tpu.memory_space<vmem>>, vector<32x128xbf16>,
    return
  }
  func.func @transform_0(%arg0: i32) -> (i32, i32) {
    %c0_i32 = arith.constant 0 : i32
    %c0_i32_0 = arith.constant 0 : i32
    return %arg0, %c0_i32 : i32, i32
  }
  func.func @transform_1(%arg0: i32) -> (i32, i32) {
    %c0_i32 = arith.constant 0 : i32
    %c0_i32_0 = arith.constant 0 : i32
    %c0_i32_1 = arith.constant 0 : i32
    return %c0_i32, %c0_i32_0 : i32, i32
  }
  func.func @transform_2(%arg0: i32) -> (i32, i32) {
    %c0_i32 = arith.constant 0 : i32
    %c0_i32_0 = arith.constant 0 : i32
    %c0_i32_1 = arith.constant 0 : i32
    return %c0_i32, %c0_i32_0 : i32, i32
  }
  func.func @transform_3(%arg0: i32) -> (i32, i32) {
    %c0_i32 = arith.constant 0 : i32
    %c0_i32_0 = arith.constant 0 : i32
    return %arg0, %c0_i32 : i32, i32
  }
}

module attributes {stable_mosaic.version = 11 : i64} {
  func.func @_conv_bn_silu_kernel(%arg0: i32, %arg1: memref<32x288xbf16, #tpu.memory_space<vmem>>, %arg2: memref<288x128xbf16, #tpu.memory_space<vmem>>, %arg3: memref<1x128xf32, #tpu.memory_space<vmem>>, %arg4: memref<32x128xbf16, #tpu.memory_space<vmem>>) attributes {dimension_semantics = [#tpu.dimension_semantics<parallel>], iteration_bounds = array<i64: 1>, scalar_prefetch = 0 : i64, scratch_operands = 0 : i64, tpu.core_type = #tpu.core_type<tc>, window_params = [{transform_indices = @transform_0, window_bounds = array<i64: 32, 288>}, {pipeline_mode = #tpu.pipeline_mode<synchronous>, transform_indices = @transform_1, window_bounds = array<i64: 288, 128>}, {pipeline_mode = #tpu.pipeline_mode<synchronous>, transform_indices = @transform_2, window_bounds = array<i64: 1, 128>}, {transform_indices = @transform_3, window_bounds = array<i64: 32, 128>}]} {
    %c0 = arith.constant 0 : index
    %c0_0 = arith.constant 0 : index
    %0 = vector.load %arg1[%c0, %c0_0] : memref<32x288xbf16, #tpu.memory_space<vmem>>, vector<32x288xbf16>
    %c0_1 = arith.constant 0 : index
    %c0_2 = arith.constant 0 : index
    %1 = vector.load %arg2[%c0_1, %c0_2] : memref<288x128xbf16, #tpu.memory_space<vmem>>, vector<288x128xbf16>
    %cst = arith.constant dense<0.000000e+00> : vector<32x128xf32>
    %2 = tpu.matmul %0, %1, %cst {dimension_numbers = #tpu.dot_dimension_numbers<[1], [0], [0], [1], [0, 0, 1, 1], [], []>} : vector<32x288xbf16>, vector<288x128xbf16>, vector<32x128xf32> -> vector<32x128xf32>
    %c0_3 = arith.constant 0 : index
    %c0_4 = arith.constant 0 : index
    %3 = vector.load %arg3[%c0_3, %c0_4] : memref<1x128xf32, #tpu.memory_space<vmem>>, vector<1x128xf32>
    %4 = vector.broadcast %3 : vector<1x128xf32> to vector<32x128xf32>
    %5 = arith.addf %2, %4 : vector<32x128xf32>
    %cst_5 = arith.constant -3.000000e+01 : f32
    %6 = vector.broadcast %cst_5 : f32 to vector<32x128xf32>
    %7 = arith.maximumf %5, %6 : vector<32x128xf32>
    %cst_6 = arith.constant 0.000000e+00 : f32
    %8 = vector.broadcast %cst_6 : f32 to vector<32x128xf32>
    %9 = arith.subf %8, %7 : vector<32x128xf32>
    %10 = math.exp %9 : vector<32x128xf32>
    %cst_7 = arith.constant 1.000000e+00 : f32
    %11 = vector.broadcast %cst_7 : f32 to vector<32x128xf32>
    %12 = arith.addf %11, %10 : vector<32x128xf32>
    %13 = tpu.reciprocal %12 {approx = true} : vector<32x128xf32> -> vector<32x128xf32>
    %14 = arith.mulf %5, %13 : vector<32x128xf32>
    %15 = arith.truncf %14 : vector<32x128xf32> to vector<32x128xbf16>
    %c0_8 = arith.constant 0 : index
    %c0_9 = arith.constant 0 : index
    %16 = vector.load %arg4[%c0_8, %c0_9] : memref<32x128xbf16, #tpu.memory_space<vmem>>, vector<32x128xbf16>
    tpu.vector_store %arg4[%c0_8, %c0_9], %15 {strides = array<i32>} : memref<32x128xbf16, #tpu.memory_space<vmem>>, vector<32x128xbf16>,
    return
  }
  func.func @transform_0(%arg0: i32) -> (i32, i32) {
    %c0_i32 = arith.constant 0 : i32
    %c0_i32_0 = arith.constant 0 : i32
    return %arg0, %c0_i32 : i32, i32
  }
  func.func @transform_1(%arg0: i32) -> (i32, i32) {
    %c0_i32 = arith.constant 0 : i32
    %c0_i32_0 = arith.constant 0 : i32
    %c0_i32_1 = arith.constant 0 : i32
    return %c0_i32, %c0_i32_0 : i32, i32
  }
  func.func @transform_2(%arg0: i32) -> (i32, i32) {
    %c0_i32 = arith.constant 0 : i32
    %c0_i32_0 = arith.constant 0 : i32
    %c0_i32_1 = arith.constant 0 : i32
    return %c0_i32, %c0_i32_0 : i32, i32
  }
  func.func @transform_3(%arg0: i32) -> (i32, i32) {
    %c0_i32 = arith.constant 0 : i32
    %c0_i32_0 = arith.constant 0 : i32
    return %arg0, %c0_i32 : i32, i32
  }
}

module attributes {stable_mosaic.version = 11 : i64} {
  func.func @_conv_bn_silu_kernel(%arg0: i32, %arg1: memref<32x128xbf16, #tpu.memory_space<vmem>>, %arg2: memref<128x128xbf16, #tpu.memory_space<vmem>>, %arg3: memref<32x128xbf16, #tpu.memory_space<vmem>>, %arg4: memref<128x128xbf16, #tpu.memory_space<vmem>>, %arg5: memref<1x128xf32, #tpu.memory_space<vmem>>, %arg6: memref<32x128xbf16, #tpu.memory_space<vmem>>) attributes {dimension_semantics = [#tpu.dimension_semantics<parallel>], iteration_bounds = array<i64: 1>, scalar_prefetch = 0 : i64, scratch_operands = 0 : i64, tpu.core_type = #tpu.core_type<tc>, window_params = [{transform_indices = @transform_0, window_bounds = array<i64: 32, 128>}, {pipeline_mode = #tpu.pipeline_mode<synchronous>, transform_indices = @transform_1, window_bounds = array<i64: 128, 128>}, {transform_indices = @transform_2, window_bounds = array<i64: 32, 128>}, {pipeline_mode = #tpu.pipeline_mode<synchronous>, transform_indices = @transform_3, window_bounds = array<i64: 128, 128>}, {pipeline_mode = #tpu.pipeline_mode<synchronous>, transform_indices = @transform_4, window_bounds = array<i64: 1, 128>}, {transform_indices = @transform_5, window_bounds = array<i64: 32, 128>}]} {
    %c0 = arith.constant 0 : index
    %c0_0 = arith.constant 0 : index
    %0 = vector.load %arg1[%c0, %c0_0] : memref<32x128xbf16, #tpu.memory_space<vmem>>, vector<32x128xbf16>
    %c0_1 = arith.constant 0 : index
    %c0_2 = arith.constant 0 : index
    %1 = vector.load %arg2[%c0_1, %c0_2] : memref<128x128xbf16, #tpu.memory_space<vmem>>, vector<128x128xbf16>
    %cst = arith.constant dense<0.000000e+00> : vector<32x128xf32>
    %2 = tpu.matmul %0, %1, %cst {dimension_numbers = #tpu.dot_dimension_numbers<[1], [0], [0], [1], [0, 0, 1, 1], [], []>} : vector<32x128xbf16>, vector<128x128xbf16>, vector<32x128xf32> -> vector<32x128xf32>
    %c0_3 = arith.constant 0 : index
    %c0_4 = arith.constant 0 : index
    %3 = vector.load %arg3[%c0_3, %c0_4] : memref<32x128xbf16, #tpu.memory_space<vmem>>, vector<32x128xbf16>
    %c0_5 = arith.constant 0 : index
    %c0_6 = arith.constant 0 : index
    %4 = vector.load %arg4[%c0_5, %c0_6] : memref<128x128xbf16, #tpu.memory_space<vmem>>, vector<128x128xbf16>
    %cst_7 = arith.constant dense<0.000000e+00> : vector<32x128xf32>
    %5 = tpu.matmul %3, %4, %cst_7 {dimension_numbers = #tpu.dot_dimension_numbers<[1], [0], [0], [1], [0, 0, 1, 1], [], []>} : vector<32x128xbf16>, vector<128x128xbf16>, vector<32x128xf32> -> vector<32x128xf32>
    %6 = arith.addf %2, %5 : vector<32x128xf32>
    %c0_8 = arith.constant 0 : index
    %c0_9 = arith.constant 0 : index
    %7 = vector.load %arg5[%c0_8, %c0_9] : memref<1x128xf32, #tpu.memory_space<vmem>>, vector<1x128xf32>
    %8 = vector.broadcast %7 : vector<1x128xf32> to vector<32x128xf32>
    %9 = arith.addf %6, %8 : vector<32x128xf32>
    %cst_10 = arith.constant -3.000000e+01 : f32
    %10 = vector.broadcast %cst_10 : f32 to vector<32x128xf32>
    %11 = arith.maximumf %9, %10 : vector<32x128xf32>
    %cst_11 = arith.constant 0.000000e+00 : f32
    %12 = vector.broadcast %cst_11 : f32 to vector<32x128xf32>
    %13 = arith.subf %12, %11 : vector<32x128xf32>
    %14 = math.exp %13 : vector<32x128xf32>
    %cst_12 = arith.constant 1.000000e+00 : f32
    %15 = vector.broadcast %cst_12 : f32 to vector<32x128xf32>
    %16 = arith.addf %15, %14 : vector<32x128xf32>
    %17 = tpu.reciprocal %16 {approx = true} : vector<32x128xf32> -> vector<32x128xf32>
    %18 = arith.mulf %9, %17 : vector<32x128xf32>
    %19 = arith.truncf %18 : vector<32x128xf32> to vector<32x128xbf16>
    %c0_13 = arith.constant 0 : index
    %c0_14 = arith.constant 0 : index
    %20 = vector.load %arg6[%c0_13, %c0_14] : memref<32x128xbf16, #tpu.memory_space<vmem>>, vector<32x128xbf16>
    tpu.vector_store %arg6[%c0_13, %c0_14], %19 {strides = array<i32>} : memref<32x128xbf16, #tpu.memory_space<vmem>>, vector<32x128xbf16>,
    return
  }
  func.func @transform_0(%arg0: i32) -> (i32, i32) {
    %c0_i32 = arith.constant 0 : i32
    %c0_i32_0 = arith.constant 0 : i32
    return %arg0, %c0_i32 : i32, i32
  }
  func.func @transform_1(%arg0: i32) -> (i32, i32) {
    %c0_i32 = arith.constant 0 : i32
    %c0_i32_0 = arith.constant 0 : i32
    %c0_i32_1 = arith.constant 0 : i32
    return %c0_i32, %c0_i32_0 : i32, i32
  }
  func.func @transform_2(%arg0: i32) -> (i32, i32) {
    %c0_i32 = arith.constant 0 : i32
    %c0_i32_0 = arith.constant 0 : i32
    return %arg0, %c0_i32 : i32, i32
  }
  func.func @transform_3(%arg0: i32) -> (i32, i32) {
    %c0_i32 = arith.constant 0 : i32
    %c0_i32_0 = arith.constant 0 : i32
    %c0_i32_1 = arith.constant 0 : i32
    return %c0_i32, %c0_i32_0 : i32, i32
  }
  func.func @transform_4(%arg0: i32) -> (i32, i32) {
    %c0_i32 = arith.constant 0 : i32
    %c0_i32_0 = arith.constant 0 : i32
    %c0_i32_1 = arith.constant 0 : i32
    return %c0_i32, %c0_i32_0 : i32, i32
  }
  func.func @transform_5(%arg0: i32) -> (i32, i32) {
    %c0_i32 = arith.constant 0 : i32
    %c0_i32_0 = arith.constant 0 : i32
    return %arg0, %c0_i32 : i32, i32
  }
}

module attributes {stable_mosaic.version = 11 : i64} {
  func.func @_conv_bn_silu_kernel(%arg0: i32, %arg1: memref<8x576xbf16, #tpu.memory_space<vmem>>, %arg2: memref<576x128xbf16, #tpu.memory_space<vmem>>, %arg3: memref<1x128xf32, #tpu.memory_space<vmem>>, %arg4: memref<8x128xbf16, #tpu.memory_space<vmem>>) attributes {dimension_semantics = [#tpu.dimension_semantics<parallel>], iteration_bounds = array<i64: 1>, scalar_prefetch = 0 : i64, scratch_operands = 0 : i64, tpu.core_type = #tpu.core_type<tc>, window_params = [{transform_indices = @transform_0, window_bounds = array<i64: 8, 576>}, {pipeline_mode = #tpu.pipeline_mode<synchronous>, transform_indices = @transform_1, window_bounds = array<i64: 576, 128>}, {pipeline_mode = #tpu.pipeline_mode<synchronous>, transform_indices = @transform_2, window_bounds = array<i64: 1, 128>}, {transform_indices = @transform_3, window_bounds = array<i64: 8, 128>}]} {
    %c0 = arith.constant 0 : index
    %c0_0 = arith.constant 0 : index
    %0 = vector.load %arg1[%c0, %c0_0] : memref<8x576xbf16, #tpu.memory_space<vmem>>, vector<8x576xbf16>
    %c0_1 = arith.constant 0 : index
    %c0_2 = arith.constant 0 : index
    %1 = vector.load %arg2[%c0_1, %c0_2] : memref<576x128xbf16, #tpu.memory_space<vmem>>, vector<576x128xbf16>
    %cst = arith.constant dense<0.000000e+00> : vector<8x128xf32>
    %2 = tpu.matmul %0, %1, %cst {dimension_numbers = #tpu.dot_dimension_numbers<[1], [0], [0], [1], [0, 0, 1, 1], [], []>} : vector<8x576xbf16>, vector<576x128xbf16>, vector<8x128xf32> -> vector<8x128xf32>
    %c0_3 = arith.constant 0 : index
    %c0_4 = arith.constant 0 : index
    %3 = vector.load %arg3[%c0_3, %c0_4] : memref<1x128xf32, #tpu.memory_space<vmem>>, vector<1x128xf32>
    %4 = vector.broadcast %3 : vector<1x128xf32> to vector<8x128xf32>
    %5 = arith.addf %2, %4 : vector<8x128xf32>
    %cst_5 = arith.constant -3.000000e+01 : f32
    %6 = vector.broadcast %cst_5 : f32 to vector<8x128xf32>
    %7 = arith.maximumf %5, %6 : vector<8x128xf32>
    %cst_6 = arith.constant 0.000000e+00 : f32
    %8 = vector.broadcast %cst_6 : f32 to vector<8x128xf32>
    %9 = arith.subf %8, %7 : vector<8x128xf32>
    %10 = math.exp %9 : vector<8x128xf32>
    %cst_7 = arith.constant 1.000000e+00 : f32
    %11 = vector.broadcast %cst_7 : f32 to vector<8x128xf32>
    %12 = arith.addf %11, %10 : vector<8x128xf32>
    %13 = tpu.reciprocal %12 {approx = true} : vector<8x128xf32> -> vector<8x128xf32>
    %14 = arith.mulf %5, %13 : vector<8x128xf32>
    %15 = arith.truncf %14 : vector<8x128xf32> to vector<8x128xbf16>
    %c0_8 = arith.constant 0 : index
    %c0_9 = arith.constant 0 : index
    %16 = vector.load %arg4[%c0_8, %c0_9] : memref<8x128xbf16, #tpu.memory_space<vmem>>, vector<8x128xbf16>
    tpu.vector_store %arg4[%c0_8, %c0_9], %15 {strides = array<i32>} : memref<8x128xbf16, #tpu.memory_space<vmem>>, vector<8x128xbf16>,
    return
  }
  func.func @transform_0(%arg0: i32) -> (i32, i32) {
    %c0_i32 = arith.constant 0 : i32
    %c0_i32_0 = arith.constant 0 : i32
    return %arg0, %c0_i32 : i32, i32
  }
  func.func @transform_1(%arg0: i32) -> (i32, i32) {
    %c0_i32 = arith.constant 0 : i32
    %c0_i32_0 = arith.constant 0 : i32
    %c0_i32_1 = arith.constant 0 : i32
    return %c0_i32, %c0_i32_0 : i32, i32
  }
  func.func @transform_2(%arg0: i32) -> (i32, i32) {
    %c0_i32 = arith.constant 0 : i32
    %c0_i32_0 = arith.constant 0 : i32
    %c0_i32_1 = arith.constant 0 : i32
    return %c0_i32, %c0_i32_0 : i32, i32
  }
  func.func @transform_3(%arg0: i32) -> (i32, i32) {
    %c0_i32 = arith.constant 0 : i32
    %c0_i32_0 = arith.constant 0 : i32
    return %arg0, %c0_i32 : i32, i32
  }
}

module attributes {stable_mosaic.version = 11 : i64} {
  func.func @_conv_bn_silu_kernel(%arg0: i32, %arg1: memref<8x128xbf16, #tpu.memory_space<vmem>>, %arg2: memref<128x128xbf16, #tpu.memory_space<vmem>>, %arg3: memref<1x128xf32, #tpu.memory_space<vmem>>, %arg4: memref<8x128xbf16, #tpu.memory_space<vmem>>) attributes {dimension_semantics = [#tpu.dimension_semantics<parallel>], iteration_bounds = array<i64: 1>, scalar_prefetch = 0 : i64, scratch_operands = 0 : i64, tpu.core_type = #tpu.core_type<tc>, window_params = [{transform_indices = @transform_0, window_bounds = array<i64: 8, 128>}, {pipeline_mode = #tpu.pipeline_mode<synchronous>, transform_indices = @transform_1, window_bounds = array<i64: 128, 128>}, {pipeline_mode = #tpu.pipeline_mode<synchronous>, transform_indices = @transform_2, window_bounds = array<i64: 1, 128>}, {transform_indices = @transform_3, window_bounds = array<i64: 8, 128>}]} {
    %c0 = arith.constant 0 : index
    %c0_0 = arith.constant 0 : index
    %0 = vector.load %arg1[%c0, %c0_0] : memref<8x128xbf16, #tpu.memory_space<vmem>>, vector<8x128xbf16>
    %c0_1 = arith.constant 0 : index
    %c0_2 = arith.constant 0 : index
    %1 = vector.load %arg2[%c0_1, %c0_2] : memref<128x128xbf16, #tpu.memory_space<vmem>>, vector<128x128xbf16>
    %cst = arith.constant dense<0.000000e+00> : vector<8x128xf32>
    %2 = tpu.matmul %0, %1, %cst {dimension_numbers = #tpu.dot_dimension_numbers<[1], [0], [0], [1], [0, 0, 1, 1], [], []>} : vector<8x128xbf16>, vector<128x128xbf16>, vector<8x128xf32> -> vector<8x128xf32>
    %c0_3 = arith.constant 0 : index
    %c0_4 = arith.constant 0 : index
    %3 = vector.load %arg3[%c0_3, %c0_4] : memref<1x128xf32, #tpu.memory_space<vmem>>, vector<1x128xf32>
    %4 = vector.broadcast %3 : vector<1x128xf32> to vector<8x128xf32>
    %5 = arith.addf %2, %4 : vector<8x128xf32>
    %cst_5 = arith.constant -3.000000e+01 : f32
    %6 = vector.broadcast %cst_5 : f32 to vector<8x128xf32>
    %7 = arith.maximumf %5, %6 : vector<8x128xf32>
    %cst_6 = arith.constant 0.000000e+00 : f32
    %8 = vector.broadcast %cst_6 : f32 to vector<8x128xf32>
    %9 = arith.subf %8, %7 : vector<8x128xf32>
    %10 = math.exp %9 : vector<8x128xf32>
    %cst_7 = arith.constant 1.000000e+00 : f32
    %11 = vector.broadcast %cst_7 : f32 to vector<8x128xf32>
    %12 = arith.addf %11, %10 : vector<8x128xf32>
    %13 = tpu.reciprocal %12 {approx = true} : vector<8x128xf32> -> vector<8x128xf32>
    %14 = arith.mulf %5, %13 : vector<8x128xf32>
    %15 = arith.truncf %14 : vector<8x128xf32> to vector<8x128xbf16>
    %c0_8 = arith.constant 0 : index
    %c0_9 = arith.constant 0 : index
    %16 = vector.load %arg4[%c0_8, %c0_9] : memref<8x128xbf16, #tpu.memory_space<vmem>>, vector<8x128xbf16>
    tpu.vector_store %arg4[%c0_8, %c0_9], %15 {strides = array<i32>} : memref<8x128xbf16, #tpu.memory_space<vmem>>, vector<8x128xbf16>,
    return
  }
  func.func @transform_0(%arg0: i32) -> (i32, i32) {
    %c0_i32 = arith.constant 0 : i32
    %c0_i32_0 = arith.constant 0 : i32
    return %arg0, %c0_i32 : i32, i32
  }
  func.func @transform_1(%arg0: i32) -> (i32, i32) {
    %c0_i32 = arith.constant 0 : i32
    %c0_i32_0 = arith.constant 0 : i32
    %c0_i32_1 = arith.constant 0 : i32
    return %c0_i32, %c0_i32_0 : i32, i32
  }
  func.func @transform_2(%arg0: i32) -> (i32, i32) {
    %c0_i32 = arith.constant 0 : i32
    %c0_i32_0 = arith.constant 0 : i32
    %c0_i32_1 = arith.constant 0 : i32
    return %c0_i32, %c0_i32_0 : i32, i32
  }
  func.func @transform_3(%arg0: i32) -> (i32, i32) {
    %c0_i32 = arith.constant 0 : i32
    %c0_i32_0 = arith.constant 0 : i32
    return %arg0, %c0_i32 : i32, i32
  }
}

module attributes {stable_mosaic.version = 11 : i64} {
  func.func @_conv_bn_silu_kernel(%arg0: i32, %arg1: memref<8x128xbf16, #tpu.memory_space<vmem>>, %arg2: memref<128x128xbf16, #tpu.memory_space<vmem>>, %arg3: memref<8x128xbf16, #tpu.memory_space<vmem>>, %arg4: memref<128x128xbf16, #tpu.memory_space<vmem>>, %arg5: memref<8x128xbf16, #tpu.memory_space<vmem>>, %arg6: memref<128x128xbf16, #tpu.memory_space<vmem>>, %arg7: memref<8x128xbf16, #tpu.memory_space<vmem>>, %arg8: memref<128x128xbf16, #tpu.memory_space<vmem>>, %arg9: memref<1x128xf32, #tpu.memory_space<vmem>>, %arg10: memref<8x128xbf16, #tpu.memory_space<vmem>>) attributes {dimension_semantics = [#tpu.dimension_semantics<parallel>], iteration_bounds = array<i64: 1>, scalar_prefetch = 0 : i64, scratch_operands = 0 : i64, tpu.core_type = #tpu.core_type<tc>, window_params = [{transform_indices = @transform_0, window_bounds = array<i64: 8, 128>}, {pipeline_mode = #tpu.pipeline_mode<synchronous>, transform_indices = @transform_1, window_bounds = array<i64: 128, 128>}, {transform_indices = @transform_2, window_bounds = array<i64: 8, 128>}, {pipeline_mode = #tpu.pipeline_mode<synchronous>, transform_indices = @transform_3, window_bounds = array<i64: 128, 128>}, {transform_indices = @transform_4, window_bounds = array<i64: 8, 128>}, {pipeline_mode = #tpu.pipeline_mode<synchronous>, transform_indices = @transform_5, window_bounds = array<i64: 128, 128>}, {transform_indices = @transform_6, window_bounds = array<i64: 8, 128>}, {pipeline_mode = #tpu.pipeline_mode<synchronous>, transform_indices = @transform_7, window_bounds = array<i64: 128, 128>}, {pipeline_mode = #tpu.pipeline_mode<synchronous>, transform_indices = @transform_8, window_bounds = array<i64: 1, 128>}, {transform_indices = @transform_9, window_bounds = array<i64: 8, 128>}]} {
    %c0 = arith.constant 0 : index
    %c0_0 = arith.constant 0 : index
    %0 = vector.load %arg1[%c0, %c0_0] : memref<8x128xbf16, #tpu.memory_space<vmem>>, vector<8x128xbf16>
    %c0_1 = arith.constant 0 : index
    %c0_2 = arith.constant 0 : index
    %1 = vector.load %arg2[%c0_1, %c0_2] : memref<128x128xbf16, #tpu.memory_space<vmem>>, vector<128x128xbf16>
    %cst = arith.constant dense<0.000000e+00> : vector<8x128xf32>
    %2 = tpu.matmul %0, %1, %cst {dimension_numbers = #tpu.dot_dimension_numbers<[1], [0], [0], [1], [0, 0, 1, 1], [], []>} : vector<8x128xbf16>, vector<128x128xbf16>, vector<8x128xf32> -> vector<8x128xf32>
    %c0_3 = arith.constant 0 : index
    %c0_4 = arith.constant 0 : index
    %3 = vector.load %arg3[%c0_3, %c0_4] : memref<8x128xbf16, #tpu.memory_space<vmem>>, vector<8x128xbf16>
    %c0_5 = arith.constant 0 : index
    %c0_6 = arith.constant 0 : index
    %4 = vector.load %arg4[%c0_5, %c0_6] : memref<128x128xbf16, #tpu.memory_space<vmem>>, vector<128x128xbf16>
    %cst_7 = arith.constant dense<0.000000e+00> : vector<8x128xf32>
    %5 = tpu.matmul %3, %4, %cst_7 {dimension_numbers = #tpu.dot_dimension_numbers<[1], [0], [0], [1], [0, 0, 1, 1], [], []>} : vector<8x128xbf16>, vector<128x128xbf16>, vector<8x128xf32> -> vector<8x128xf32>
    %6 = arith.addf %2, %5 : vector<8x128xf32>
    %c0_8 = arith.constant 0 : index
    %c0_9 = arith.constant 0 : index
    %7 = vector.load %arg5[%c0_8, %c0_9] : memref<8x128xbf16, #tpu.memory_space<vmem>>, vector<8x128xbf16>
    %c0_10 = arith.constant 0 : index
    %c0_11 = arith.constant 0 : index
    %8 = vector.load %arg6[%c0_10, %c0_11] : memref<128x128xbf16, #tpu.memory_space<vmem>>, vector<128x128xbf16>
    %cst_12 = arith.constant dense<0.000000e+00> : vector<8x128xf32>
    %9 = tpu.matmul %7, %8, %cst_12 {dimension_numbers = #tpu.dot_dimension_numbers<[1], [0], [0], [1], [0, 0, 1, 1], [], []>} : vector<8x128xbf16>, vector<128x128xbf16>, vector<8x128xf32> -> vector<8x128xf32>
    %10 = arith.addf %6, %9 : vector<8x128xf32>
    %c0_13 = arith.constant 0 : index
    %c0_14 = arith.constant 0 : index
    %11 = vector.load %arg7[%c0_13, %c0_14] : memref<8x128xbf16, #tpu.memory_space<vmem>>, vector<8x128xbf16>
    %c0_15 = arith.constant 0 : index
    %c0_16 = arith.constant 0 : index
    %12 = vector.load %arg8[%c0_15, %c0_16] : memref<128x128xbf16, #tpu.memory_space<vmem>>, vector<128x128xbf16>
    %cst_17 = arith.constant dense<0.000000e+00> : vector<8x128xf32>
    %13 = tpu.matmul %11, %12, %cst_17 {dimension_numbers = #tpu.dot_dimension_numbers<[1], [0], [0], [1], [0, 0, 1, 1], [], []>} : vector<8x128xbf16>, vector<128x128xbf16>, vector<8x128xf32> -> vector<8x128xf32>
    %14 = arith.addf %10, %13 : vector<8x128xf32>
    %c0_18 = arith.constant 0 : index
    %c0_19 = arith.constant 0 : index
    %15 = vector.load %arg9[%c0_18, %c0_19] : memref<1x128xf32, #tpu.memory_space<vmem>>, vector<1x128xf32>
    %16 = vector.broadcast %15 : vector<1x128xf32> to vector<8x128xf32>
    %17 = arith.addf %14, %16 : vector<8x128xf32>
    %cst_20 = arith.constant -3.000000e+01 : f32
    %18 = vector.broadcast %cst_20 : f32 to vector<8x128xf32>
    %19 = arith.maximumf %17, %18 : vector<8x128xf32>
    %cst_21 = arith.constant 0.000000e+00 : f32
    %20 = vector.broadcast %cst_21 : f32 to vector<8x128xf32>
    %21 = arith.subf %20, %19 : vector<8x128xf32>
    %22 = math.exp %21 : vector<8x128xf32>
    %cst_22 = arith.constant 1.000000e+00 : f32
    %23 = vector.broadcast %cst_22 : f32 to vector<8x128xf32>
    %24 = arith.addf %23, %22 : vector<8x128xf32>
    %25 = tpu.reciprocal %24 {approx = true} : vector<8x128xf32> -> vector<8x128xf32>
    %26 = arith.mulf %17, %25 : vector<8x128xf32>
    %27 = arith.truncf %26 : vector<8x128xf32> to vector<8x128xbf16>
    %c0_23 = arith.constant 0 : index
    %c0_24 = arith.constant 0 : index
    %28 = vector.load %arg10[%c0_23, %c0_24] : memref<8x128xbf16, #tpu.memory_space<vmem>>, vector<8x128xbf16>
    tpu.vector_store %arg10[%c0_23, %c0_24], %27 {strides = array<i32>} : memref<8x128xbf16, #tpu.memory_space<vmem>>, vector<8x128xbf16>,
    return
  }
  func.func @transform_0(%arg0: i32) -> (i32, i32) {
    %c0_i32 = arith.constant 0 : i32
    %c0_i32_0 = arith.constant 0 : i32
    return %arg0, %c0_i32 : i32, i32
  }
  func.func @transform_1(%arg0: i32) -> (i32, i32) {
    %c0_i32 = arith.constant 0 : i32
    %c0_i32_0 = arith.constant 0 : i32
    %c0_i32_1 = arith.constant 0 : i32
    return %c0_i32, %c0_i32_0 : i32, i32
  }
  func.func @transform_2(%arg0: i32) -> (i32, i32) {
    %c0_i32 = arith.constant 0 : i32
    %c0_i32_0 = arith.constant 0 : i32
    return %arg0, %c0_i32 : i32, i32
  }
  func.func @transform_3(%arg0: i32) -> (i32, i32) {
    %c0_i32 = arith.constant 0 : i32
    %c0_i32_0 = arith.constant 0 : i32
    %c0_i32_1 = arith.constant 0 : i32
    return %c0_i32, %c0_i32_0 : i32, i32
  }
  func.func @transform_4(%arg0: i32) -> (i32, i32) {
    %c0_i32 = arith.constant 0 : i32
    %c0_i32_0 = arith.constant 0 : i32
    return %arg0, %c0_i32 : i32, i32
  }
  func.func @transform_5(%arg0: i32) -> (i32, i32) {
    %c0_i32 = arith.constant 0 : i32
    %c0_i32_0 = arith.constant 0 : i32
    %c0_i32_1 = arith.constant 0 : i32
    return %c0_i32, %c0_i32_0 : i32, i32
  }
  func.func @transform_6(%arg0: i32) -> (i32, i32) {
    %c0_i32 = arith.constant 0 : i32
    %c0_i32_0 = arith.constant 0 : i32
    return %arg0, %c0_i32 : i32, i32
  }
  func.func @transform_7(%arg0: i32) -> (i32, i32) {
    %c0_i32 = arith.constant 0 : i32
    %c0_i32_0 = arith.constant 0 : i32
    %c0_i32_1 = arith.constant 0 : i32
    return %c0_i32, %c0_i32_0 : i32, i32
  }
  func.func @transform_8(%arg0: i32) -> (i32, i32) {
    %c0_i32 = arith.constant 0 : i32
    %c0_i32_0 = arith.constant 0 : i32
    %c0_i32_1 = arith.constant 0 : i32
    return %c0_i32, %c0_i32_0 : i32, i32
  }
  func.func @transform_9(%arg0: i32) -> (i32, i32) {
    %c0_i32 = arith.constant 0 : i32
    %c0_i32_0 = arith.constant 0 : i32
    return %arg0, %c0_i32 : i32, i32
  }
}

module attributes {stable_mosaic.version = 11 : i64} {
  func.func @_spp_pool_kernel(%arg0: i32, %arg1: memref<1x14x14x128xbf16, #tpu.memory_space<vmem>>, %arg2: memref<1x2x2x128xbf16, #tpu.memory_space<vmem>>, %arg3: memref<1x2x2x128xbf16, #tpu.memory_space<vmem>>, %arg4: memref<1x2x2x128xbf16, #tpu.memory_space<vmem>>) attributes {dimension_semantics = [#tpu.dimension_semantics<parallel>], iteration_bounds = array<i64: 2>, scalar_prefetch = 0 : i64, scratch_operands = 0 : i64, tpu.core_type = #tpu.core_type<tc>, window_params = [{transform_indices = @transform_0, window_bounds = array<i64: 1, 14, 14, 128>}, {transform_indices = @transform_1, window_bounds = array<i64: 1, 2, 2, 128>}, {transform_indices = @transform_2, window_bounds = array<i64: 1, 2, 2, 128>}, {transform_indices = @transform_3, window_bounds = array<i64: 1, 2, 2, 128>}]} {
    %c0 = arith.constant 0 : index
    %c0_0 = arith.constant 0 : index
    %c0_1 = arith.constant 0 : index
    %c0_2 = arith.constant 0 : index
    %0 = vector.load %arg1[%c0, %c0_0, %c0_1, %c0_2] : memref<1x14x14x128xbf16, #tpu.memory_space<vmem>>, vector<1x14x14x128xbf16>
    %1 = arith.extf %0 : vector<1x14x14x128xbf16> to vector<1x14x14x128xf32>
    %2 = vector.extract_strided_slice %1 {offsets = [0, 0, 0, 0], sizes = [1, 10, 14, 128], strides = [1, 1, 1, 1]} : vector<1x14x14x128xf32> to vector<1x10x14x128xf32>
    %3 = vector.extract_strided_slice %1 {offsets = [0, 1, 0, 0], sizes = [1, 10, 14, 128], strides = [1, 1, 1, 1]} : vector<1x14x14x128xf32> to vector<1x10x14x128xf32>
    %4 = arith.maximumf %2, %3 : vector<1x10x14x128xf32>
    %5 = vector.extract_strided_slice %1 {offsets = [0, 2, 0, 0], sizes = [1, 10, 14, 128], strides = [1, 1, 1, 1]} : vector<1x14x14x128xf32> to vector<1x10x14x128xf32>
    %6 = arith.maximumf %4, %5 : vector<1x10x14x128xf32>
    %7 = vector.extract_strided_slice %1 {offsets = [0, 3, 0, 0], sizes = [1, 10, 14, 128], strides = [1, 1, 1, 1]} : vector<1x14x14x128xf32> to vector<1x10x14x128xf32>
    %8 = arith.maximumf %6, %7 : vector<1x10x14x128xf32>
    %9 = vector.extract_strided_slice %1 {offsets = [0, 4, 0, 0], sizes = [1, 10, 14, 128], strides = [1, 1, 1, 1]} : vector<1x14x14x128xf32> to vector<1x10x14x128xf32>
    %10 = arith.maximumf %8, %9 : vector<1x10x14x128xf32>
    %11 = vector.extract_strided_slice %10 {offsets = [0, 0, 0, 0], sizes = [1, 10, 10, 128], strides = [1, 1, 1, 1]} : vector<1x10x14x128xf32> to vector<1x10x10x128xf32>
    %12 = vector.extract_strided_slice %10 {offsets = [0, 0, 1, 0], sizes = [1, 10, 10, 128], strides = [1, 1, 1, 1]} : vector<1x10x14x128xf32> to vector<1x10x10x128xf32>
    %13 = arith.maximumf %11, %12 : vector<1x10x10x128xf32>
    %14 = vector.extract_strided_slice %10 {offsets = [0, 0, 2, 0], sizes = [1, 10, 10, 128], strides = [1, 1, 1, 1]} : vector<1x10x14x128xf32> to vector<1x10x10x128xf32>
    %15 = arith.maximumf %13, %14 : vector<1x10x10x128xf32>
    %16 = vector.extract_strided_slice %10 {offsets = [0, 0, 3, 0], sizes = [1, 10, 10, 128], strides = [1, 1, 1, 1]} : vector<1x10x14x128xf32> to vector<1x10x10x128xf32>
    %17 = arith.maximumf %15, %16 : vector<1x10x10x128xf32>
    %18 = vector.extract_strided_slice %10 {offsets = [0, 0, 4, 0], sizes = [1, 10, 10, 128], strides = [1, 1, 1, 1]} : vector<1x10x14x128xf32> to vector<1x10x10x128xf32>
    %19 = arith.maximumf %17, %18 : vector<1x10x10x128xf32>
    %20 = vector.extract_strided_slice %19 {offsets = [0, 0, 0, 0], sizes = [1, 6, 10, 128], strides = [1, 1, 1, 1]} : vector<1x10x10x128xf32> to vector<1x6x10x128xf32>
    %21 = vector.extract_strided_slice %19 {offsets = [0, 1, 0, 0], sizes = [1, 6, 10, 128], strides = [1, 1, 1, 1]} : vector<1x10x10x128xf32> to vector<1x6x10x128xf32>
    %22 = arith.maximumf %20, %21 : vector<1x6x10x128xf32>
    %23 = vector.extract_strided_slice %19 {offsets = [0, 2, 0, 0], sizes = [1, 6, 10, 128], strides = [1, 1, 1, 1]} : vector<1x10x10x128xf32> to vector<1x6x10x128xf32>
    %24 = arith.maximumf %22, %23 : vector<1x6x10x128xf32>
    %25 = vector.extract_strided_slice %19 {offsets = [0, 3, 0, 0], sizes = [1, 6, 10, 128], strides = [1, 1, 1, 1]} : vector<1x10x10x128xf32> to vector<1x6x10x128xf32>
    %26 = arith.maximumf %24, %25 : vector<1x6x10x128xf32>
    %27 = vector.extract_strided_slice %19 {offsets = [0, 4, 0, 0], sizes = [1, 6, 10, 128], strides = [1, 1, 1, 1]} : vector<1x10x10x128xf32> to vector<1x6x10x128xf32>
    %28 = arith.maximumf %26, %27 : vector<1x6x10x128xf32>
    %29 = vector.extract_strided_slice %28 {offsets = [0, 0, 0, 0], sizes = [1, 6, 6, 128], strides = [1, 1, 1, 1]} : vector<1x6x10x128xf32> to vector<1x6x6x128xf32>
    %30 = vector.extract_strided_slice %28 {offsets = [0, 0, 1, 0], sizes = [1, 6, 6, 128], strides = [1, 1, 1, 1]} : vector<1x6x10x128xf32> to vector<1x6x6x128xf32>
    %31 = arith.maximumf %29, %30 : vector<1x6x6x128xf32>
    %32 = vector.extract_strided_slice %28 {offsets = [0, 0, 2, 0], sizes = [1, 6, 6, 128], strides = [1, 1, 1, 1]} : vector<1x6x10x128xf32> to vector<1x6x6x128xf32>
    %33 = arith.maximumf %31, %32 : vector<1x6x6x128xf32>
    %34 = vector.extract_strided_slice %28 {offsets = [0, 0, 3, 0], sizes = [1, 6, 6, 128], strides = [1, 1, 1, 1]} : vector<1x6x10x128xf32> to vector<1x6x6x128xf32>
    %35 = arith.maximumf %33, %34 : vector<1x6x6x128xf32>
    %36 = vector.extract_strided_slice %28 {offsets = [0, 0, 4, 0], sizes = [1, 6, 6, 128], strides = [1, 1, 1, 1]} : vector<1x6x10x128xf32> to vector<1x6x6x128xf32>
    %37 = arith.maximumf %35, %36 : vector<1x6x6x128xf32>
    %38 = vector.extract_strided_slice %37 {offsets = [0, 0, 0, 0], sizes = [1, 2, 6, 128], strides = [1, 1, 1, 1]} : vector<1x6x6x128xf32> to vector<1x2x6x128xf32>
    %39 = vector.extract_strided_slice %37 {offsets = [0, 1, 0, 0], sizes = [1, 2, 6, 128], strides = [1, 1, 1, 1]} : vector<1x6x6x128xf32> to vector<1x2x6x128xf32>
    %40 = arith.maximumf %38, %39 : vector<1x2x6x128xf32>
    %41 = vector.extract_strided_slice %37 {offsets = [0, 2, 0, 0], sizes = [1, 2, 6, 128], strides = [1, 1, 1, 1]} : vector<1x6x6x128xf32> to vector<1x2x6x128xf32>
    %42 = arith.maximumf %40, %41 : vector<1x2x6x128xf32>
    %43 = vector.extract_strided_slice %37 {offsets = [0, 3, 0, 0], sizes = [1, 2, 6, 128], strides = [1, 1, 1, 1]} : vector<1x6x6x128xf32> to vector<1x2x6x128xf32>
    %44 = arith.maximumf %42, %43 : vector<1x2x6x128xf32>
    %45 = vector.extract_strided_slice %37 {offsets = [0, 4, 0, 0], sizes = [1, 2, 6, 128], strides = [1, 1, 1, 1]} : vector<1x6x6x128xf32> to vector<1x2x6x128xf32>
    %46 = arith.maximumf %44, %45 : vector<1x2x6x128xf32>
    %47 = vector.extract_strided_slice %46 {offsets = [0, 0, 0, 0], sizes = [1, 2, 2, 128], strides = [1, 1, 1, 1]} : vector<1x2x6x128xf32> to vector<1x2x2x128xf32>
    %48 = vector.extract_strided_slice %46 {offsets = [0, 0, 1, 0], sizes = [1, 2, 2, 128], strides = [1, 1, 1, 1]} : vector<1x2x6x128xf32> to vector<1x2x2x128xf32>
    %49 = arith.maximumf %47, %48 : vector<1x2x2x128xf32>
    %50 = vector.extract_strided_slice %46 {offsets = [0, 0, 2, 0], sizes = [1, 2, 2, 128], strides = [1, 1, 1, 1]} : vector<1x2x6x128xf32> to vector<1x2x2x128xf32>
    %51 = arith.maximumf %49, %50 : vector<1x2x2x128xf32>
    %52 = vector.extract_strided_slice %46 {offsets = [0, 0, 3, 0], sizes = [1, 2, 2, 128], strides = [1, 1, 1, 1]} : vector<1x2x6x128xf32> to vector<1x2x2x128xf32>
    %53 = arith.maximumf %51, %52 : vector<1x2x2x128xf32>
    %54 = vector.extract_strided_slice %46 {offsets = [0, 0, 4, 0], sizes = [1, 2, 2, 128], strides = [1, 1, 1, 1]} : vector<1x2x6x128xf32> to vector<1x2x2x128xf32>
    %55 = arith.maximumf %53, %54 : vector<1x2x2x128xf32>
    %56 = vector.extract_strided_slice %19 {offsets = [0, 4, 4, 0], sizes = [1, 2, 2, 128], strides = [1, 1, 1, 1]} : vector<1x10x10x128xf32> to vector<1x2x2x128xf32>
    %57 = arith.truncf %56 : vector<1x2x2x128xf32> to vector<1x2x2x128xbf16>
    %c0_3 = arith.constant 0 : index
    %c0_4 = arith.constant 0 : index
    %c0_5 = arith.constant 0 : index
    %c0_6 = arith.constant 0 : index
    %58 = vector.load %arg2[%c0_3, %c0_4, %c0_5, %c0_6] : memref<1x2x2x128xbf16, #tpu.memory_space<vmem>>, vector<1x2x2x128xbf16>
    tpu.vector_store %arg2[%c0_3, %c0_4, %c0_5, %c0_6], %57 {strides = array<i32>} : memref<1x2x2x128xbf16, #tpu.memory_space<vmem>>, vector<1x2x2x128xbf16>,
    %59 = vector.extract_strided_slice %37 {offsets = [0, 2, 2, 0], sizes = [1, 2, 2, 128], strides = [1, 1, 1, 1]} : vector<1x6x6x128xf32> to vector<1x2x2x128xf32>
    %60 = arith.truncf %59 : vector<1x2x2x128xf32> to vector<1x2x2x128xbf16>
    %c0_7 = arith.constant 0 : index
    %c0_8 = arith.constant 0 : index
    %c0_9 = arith.constant 0 : index
    %c0_10 = arith.constant 0 : index
    %61 = vector.load %arg3[%c0_7, %c0_8, %c0_9, %c0_10] : memref<1x2x2x128xbf16, #tpu.memory_space<vmem>>, vector<1x2x2x128xbf16>
    tpu.vector_store %arg3[%c0_7, %c0_8, %c0_9, %c0_10], %60 {strides = array<i32>} : memref<1x2x2x128xbf16, #tpu.memory_space<vmem>>, vector<1x2x2x128xbf16>,
    %62 = arith.truncf %55 : vector<1x2x2x128xf32> to vector<1x2x2x128xbf16>
    %c0_11 = arith.constant 0 : index
    %c0_12 = arith.constant 0 : index
    %c0_13 = arith.constant 0 : index
    %c0_14 = arith.constant 0 : index
    %63 = vector.load %arg4[%c0_11, %c0_12, %c0_13, %c0_14] : memref<1x2x2x128xbf16, #tpu.memory_space<vmem>>, vector<1x2x2x128xbf16>
    tpu.vector_store %arg4[%c0_11, %c0_12, %c0_13, %c0_14], %62 {strides = array<i32>} : memref<1x2x2x128xbf16, #tpu.memory_space<vmem>>, vector<1x2x2x128xbf16>,
    return
  }
  func.func @transform_0(%arg0: i32) -> (i32, i32, i32, i32) {
    %c0_i32 = arith.constant 0 : i32
    %c0_i32_0 = arith.constant 0 : i32
    %c0_i32_1 = arith.constant 0 : i32
    %c0_i32_2 = arith.constant 0 : i32
    return %arg0, %c0_i32, %c0_i32_0, %c0_i32_1 : i32, i32, i32, i32
  }
  func.func @transform_1(%arg0: i32) -> (i32, i32, i32, i32) {
    %c0_i32 = arith.constant 0 : i32
    %c0_i32_0 = arith.constant 0 : i32
    %c0_i32_1 = arith.constant 0 : i32
    %c0_i32_2 = arith.constant 0 : i32
    return %arg0, %c0_i32, %c0_i32_0, %c0_i32_1 : i32, i32, i32, i32
  }
  func.func @transform_2(%arg0: i32) -> (i32, i32, i32, i32) {
    %c0_i32 = arith.constant 0 : i32
    %c0_i32_0 = arith.constant 0 : i32
    %c0_i32_1 = arith.constant 0 : i32
    %c0_i32_2 = arith.constant 0 : i32
    return %arg0, %c0_i32, %c0_i32_0, %c0_i32_1 : i32, i32, i32, i32
  }
  func.func @transform_3(%arg0: i32) -> (i32, i32, i32, i32) {
    %c0_i32 = arith.constant 0 : i32
    %c0_i32_0 = arith.constant 0 : i32
    %c0_i32_1 = arith.constant 0 : i32
    %c0_i32_2 = arith.constant 0 : i32
    return %arg0, %c0_i32, %c0_i32_0, %c0_i32_1 : i32, i32, i32, i32
  }
}

module attributes {stable_mosaic.version = 11 : i64} {
  func.func @_conv_bn_silu_kernel(%arg0: i32, %arg1: memref<8x128xbf16, #tpu.memory_space<vmem>>, %arg2: memref<128x128xbf16, #tpu.memory_space<vmem>>, %arg3: memref<8x128xbf16, #tpu.memory_space<vmem>>, %arg4: memref<128x128xbf16, #tpu.memory_space<vmem>>, %arg5: memref<1x128xf32, #tpu.memory_space<vmem>>, %arg6: memref<8x128xbf16, #tpu.memory_space<vmem>>) attributes {dimension_semantics = [#tpu.dimension_semantics<parallel>], iteration_bounds = array<i64: 1>, scalar_prefetch = 0 : i64, scratch_operands = 0 : i64, tpu.core_type = #tpu.core_type<tc>, window_params = [{transform_indices = @transform_0, window_bounds = array<i64: 8, 128>}, {pipeline_mode = #tpu.pipeline_mode<synchronous>, transform_indices = @transform_1, window_bounds = array<i64: 128, 128>}, {transform_indices = @transform_2, window_bounds = array<i64: 8, 128>}, {pipeline_mode = #tpu.pipeline_mode<synchronous>, transform_indices = @transform_3, window_bounds = array<i64: 128, 128>}, {pipeline_mode = #tpu.pipeline_mode<synchronous>, transform_indices = @transform_4, window_bounds = array<i64: 1, 128>}, {transform_indices = @transform_5, window_bounds = array<i64: 8, 128>}]} {
    %c0 = arith.constant 0 : index
    %c0_0 = arith.constant 0 : index
    %0 = vector.load %arg1[%c0, %c0_0] : memref<8x128xbf16, #tpu.memory_space<vmem>>, vector<8x128xbf16>
    %c0_1 = arith.constant 0 : index
    %c0_2 = arith.constant 0 : index
    %1 = vector.load %arg2[%c0_1, %c0_2] : memref<128x128xbf16, #tpu.memory_space<vmem>>, vector<128x128xbf16>
    %cst = arith.constant dense<0.000000e+00> : vector<8x128xf32>
    %2 = tpu.matmul %0, %1, %cst {dimension_numbers = #tpu.dot_dimension_numbers<[1], [0], [0], [1], [0, 0, 1, 1], [], []>} : vector<8x128xbf16>, vector<128x128xbf16>, vector<8x128xf32> -> vector<8x128xf32>
    %c0_3 = arith.constant 0 : index
    %c0_4 = arith.constant 0 : index
    %3 = vector.load %arg3[%c0_3, %c0_4] : memref<8x128xbf16, #tpu.memory_space<vmem>>, vector<8x128xbf16>
    %c0_5 = arith.constant 0 : index
    %c0_6 = arith.constant 0 : index
    %4 = vector.load %arg4[%c0_5, %c0_6] : memref<128x128xbf16, #tpu.memory_space<vmem>>, vector<128x128xbf16>
    %cst_7 = arith.constant dense<0.000000e+00> : vector<8x128xf32>
    %5 = tpu.matmul %3, %4, %cst_7 {dimension_numbers = #tpu.dot_dimension_numbers<[1], [0], [0], [1], [0, 0, 1, 1], [], []>} : vector<8x128xbf16>, vector<128x128xbf16>, vector<8x128xf32> -> vector<8x128xf32>
    %6 = arith.addf %2, %5 : vector<8x128xf32>
    %c0_8 = arith.constant 0 : index
    %c0_9 = arith.constant 0 : index
    %7 = vector.load %arg5[%c0_8, %c0_9] : memref<1x128xf32, #tpu.memory_space<vmem>>, vector<1x128xf32>
    %8 = vector.broadcast %7 : vector<1x128xf32> to vector<8x128xf32>
    %9 = arith.addf %6, %8 : vector<8x128xf32>
    %cst_10 = arith.constant -3.000000e+01 : f32
    %10 = vector.broadcast %cst_10 : f32 to vector<8x128xf32>
    %11 = arith.maximumf %9, %10 : vector<8x128xf32>
    %cst_11 = arith.constant 0.000000e+00 : f32
    %12 = vector.broadcast %cst_11 : f32 to vector<8x128xf32>
    %13 = arith.subf %12, %11 : vector<8x128xf32>
    %14 = math.exp %13 : vector<8x128xf32>
    %cst_12 = arith.constant 1.000000e+00 : f32
    %15 = vector.broadcast %cst_12 : f32 to vector<8x128xf32>
    %16 = arith.addf %15, %14 : vector<8x128xf32>
    %17 = tpu.reciprocal %16 {approx = true} : vector<8x128xf32> -> vector<8x128xf32>
    %18 = arith.mulf %9, %17 : vector<8x128xf32>
    %19 = arith.truncf %18 : vector<8x128xf32> to vector<8x128xbf16>
    %c0_13 = arith.constant 0 : index
    %c0_14 = arith.constant 0 : index
    %20 = vector.load %arg6[%c0_13, %c0_14] : memref<8x128xbf16, #tpu.memory_space<vmem>>, vector<8x128xbf16>
    tpu.vector_store %arg6[%c0_13, %c0_14], %19 {strides = array<i32>} : memref<8x128xbf16, #tpu.memory_space<vmem>>, vector<8x128xbf16>,
    return
  }
  func.func @transform_0(%arg0: i32) -> (i32, i32) {
    %c0_i32 = arith.constant 0 : i32
    %c0_i32_0 = arith.constant 0 : i32
    return %arg0, %c0_i32 : i32, i32
  }
  func.func @transform_1(%arg0: i32) -> (i32, i32) {
    %c0_i32 = arith.constant 0 : i32
    %c0_i32_0 = arith.constant 0 : i32
    %c0_i32_1 = arith.constant 0 : i32
    return %c0_i32, %c0_i32_0 : i32, i32
  }
  func.func @transform_2(%arg0: i32) -> (i32, i32) {
    %c0_i32 = arith.constant 0 : i32
    %c0_i32_0 = arith.constant 0 : i32
    return %arg0, %c0_i32 : i32, i32
  }
  func.func @transform_3(%arg0: i32) -> (i32, i32) {
    %c0_i32 = arith.constant 0 : i32
    %c0_i32_0 = arith.constant 0 : i32
    %c0_i32_1 = arith.constant 0 : i32
    return %c0_i32, %c0_i32_0 : i32, i32
  }
  func.func @transform_4(%arg0: i32) -> (i32, i32) {
    %c0_i32 = arith.constant 0 : i32
    %c0_i32_0 = arith.constant 0 : i32
    %c0_i32_1 = arith.constant 0 : i32
    return %c0_i32, %c0_i32_0 : i32, i32
  }
  func.func @transform_5(%arg0: i32) -> (i32, i32) {
    %c0_i32 = arith.constant 0 : i32
    %c0_i32_0 = arith.constant 0 : i32
    return %arg0, %c0_i32 : i32, i32
  }
}

</mosaic_0001>

<bundles_post_ra>
// kernel: _lambda_.60
= control target key start
LH: loop header
LB: loop body
LE: loop exit
PB: predicated region body
PF: predicated region fallthrough
CT: control target
= control target key end

     0   :  { %s2542_s12 = smov 0   ;;  %s3203_s0 = inlined_call_operand.vmem [shape: bf16[2048,108], index: 0, kind: input, shape index: {}]   ;;  %s3204_s1 = inlined_call_operand.vmem [shape: bf16[108,128], index: 1, kind: input, shape index: {}]   ;;  %s3205_s2 = inlined_call_operand.vmem [shape: f32[1,128], index: 2, kind: input, shape index: {}]   ;;  %s3206_s3 = inlined_call_operand.vmem [shape: bf16[2048,128], index: 3, kind: output, shape index: {}]  }
   0x1 LB: > { %s1675_s13 = sadd.s32 4294967295, %s2520_s12   ;;  %p1679_p0 = scmp.ge.s32.totalorder %s2520_s12, 1  ;;  %s2520_s12 = sphi %s2542_s12, %s13_s12  }
   0x2   : > { %p138_p1 = scmp.lt.s32.totalorder %s2520_s12, 5 }
   0x4   : > { %p139_p2 = pnand %p1679_p0, %p138_p1 }
   0x6   : > { %142 = sbr.rel (%p139_p2) target bundleno = 423 (0x1a7), region = 32 }
   0xd   : > { %v2218_v0 = vld [vmem:[%s3204_s1] sm:$0xff]   ;;  %v2219_v1 = vld [vmem:[%s3204_s1 + $0x8] sm:$0xff]   ;;  %s1680_s18 = sshll.u32 %s1675_s13, 6  ;;  %v2220_v2 = vld [vmem:[%s3204_s1 + $0x10] sm:$0xff]   ;;  %vm461_vm0 = vcmask 883712   ;;  %vm558_vm1 = vcmask 1045504  }
   0xe   : > { %2116 = vmatprep.subr.bf16.mxu0 %v2218_v0  ;;  %2194 = vmatprep.subr.bf16.mxu1 %v2218_v0  ;;  %p163_p3 = scmp.lt.s32.totalorder %s1680_s18, 255  ;;  %v2221_v3 = vld [vmem:[%s3204_s1 + $0x18] sm:$0xff]   ;;  %v2222_v6 = vld [vmem:[%s3204_s1 + $0x20] sm:$0xff]   ;;  %v2223_v7 = vld [vmem:[%s3204_s1 + $0x28] sm:$0xff]  }
   0xf   : > { %2117 = vmatpush3.bf16.msra.mxu0 %v2218_v0  ;;  %2201 = vmatpush3.bf16.msra.mxu1 %v2218_v0  ;;  %v2224_v8 = vld [vmem:[%s3204_s1 + $0x30] sm:$0x3f]   ;;  %v2648_v40 = vld [vmem:[%s3205_s2] ss:$0 sm:$0xff] }
  0x10   : > { %2118 = vmatprep.subr.bf16.mxu0 %v2219_v1  ;;  %2195 = vmatprep.subr.bf16.mxu1 %v2219_v1  ;;  %s3230_s18 = smov (!%p163_p3, %s1680_s18), 255  ;;  %v560_v9 = vsel %vm558_vm1, %v2224_v8, 0 }
  0x11   : > { %s1681_s21 = sshll.u32 %s3230_s18, 2 }
  0x12   : > { %s2570_s26 = scalar_lea.vmem %s3203_s0, %s1681_s21  ;;  %s2826_s10 = scalar_lea.vmem %s3206_s3, %s1681_s21 }
  0x13   : > { %2119 = vmatpush3.bf16.msra.mxu0 %v2219_v1  ;;  %2202 = vmatpush3.bf16.msra.mxu1 %v2219_v1  ;;  %v2225_v4 = vld [vmem:[%s2570_s26] sm:$0xff]   ;;  %v2227_v10 = vld [vmem:[%s2570_s26 + $0x8] sm:$0xff]   ;;  %v2229_v12 = vld [vmem:[%s2570_s26 + $0x10] sm:$0xff]  }
  0x14   : > { %2120 = vmatprep.subr.bf16.mxu0 %v2220_v2  ;;  %2196 = vmatprep.subr.bf16.mxu1 %v2220_v2  ;;  %v2226_v5 = vld [vmem:[%s2570_s26 + $0x80] sm:$0xff]   ;;  %v2228_v11 = vld [vmem:[%s2570_s26 + $0x88] sm:$0xff]   ;;  %v2230_v13 = vld [vmem:[%s2570_s26 + $0x90] sm:$0xff]  }
  0x15   : > { %2130 = vmatprep.mubr.msk.bf16.mxu0 %vm461_vm0, %v2225_v4  ;;  %2162 = vmatprep.mubr.msk.bf16.mxu1 %vm461_vm0, %v2226_v5  ;;  %v2231_v14 = vld [vmem:[%s2570_s26 + $0x18] sm:$0xff]   ;;  %v2233_v16 = vld [vmem:[%s2570_s26 + $0x20] sm:$0xff]   ;;  %v2235_v18 = vld [vmem:[%s2570_s26 + $0x28] sm:$0xff]  }
  0x16   : > { %v2232_v15 = vld [vmem:[%s2570_s26 + $0x98] sm:$0xff]   ;;  %v2234_v17 = vld [vmem:[%s2570_s26 + $0xa0] sm:$0xff]   ;;  %v2236_v19 = vld [vmem:[%s2570_s26 + $0xa8] sm:$0xff]  }
  0x17   : > { %2121 = vmatpush3.bf16.msra.mxu0 %v2220_v2  ;;  %2203 = vmatpush3.bf16.msra.mxu1 %v2220_v2  ;;  %v2237_v20 = vld [vmem:[%s2570_s26 + $0x30] sm:$0xff]   ;;  %v2239_v22 = vld [vmem:[%s2570_s26 + $0x38] sm:$0xff]   ;;  %v2241_v24 = vld [vmem:[%s2570_s26 + $0x40] sm:$0xff]  }
  0x18   : > { %2122 = vmatprep.subr.bf16.mxu0 %v2221_v3  ;;  %2197 = vmatprep.subr.bf16.mxu1 %v2221_v3  ;;  %v2238_v21 = vld [vmem:[%s2570_s26 + $0xb0] sm:$0xff]   ;;  %v2240_v23 = vld [vmem:[%s2570_s26 + $0xb8] sm:$0xff]   ;;  %v2242_v25 = vld [vmem:[%s2570_s26 + $0xc0] sm:$0xff]  }
  0x19   : > { %v2243_v26 = vld [vmem:[%s2570_s26 + $0x48] sm:$0xff]   ;;  %v2245_v28 = vld [vmem:[%s2570_s26 + $0x50] sm:$0xff]   ;;  %v2247_v30 = vld [vmem:[%s2570_s26 + $0x58] sm:$0xff]  }
  0x1a   : > { %v2244_v27 = vld [vmem:[%s2570_s26 + $0xc8] sm:$0xff]   ;;  %v2246_v29 = vld [vmem:[%s2570_s26 + $0xd0] sm:$0xff]   ;;  %v2248_v31 = vld [vmem:[%s2570_s26 + $0xd8] sm:$0xff]  }
  0x1b   : > { %2123 = vmatpush3.bf16.msra.mxu0 %v2221_v3  ;;  %2204 = vmatpush3.bf16.msra.mxu1 %v2221_v3  ;;  %v2249_v32 = vld [vmem:[%s2570_s26 + $0x60] sm:$0xff]   ;;  %v2251_v34 = vld [vmem:[%s2570_s26 + $0x68] sm:$0xff]   ;;  %v2253_v36 = vld [vmem:[%s2570_s26 + $0x70] sm:$0xff]  }
  0x1c   : > { %2124 = vmatprep.subr.bf16.mxu0 %v2222_v6  ;;  %2198 = vmatprep.subr.bf16.mxu1 %v2222_v6  ;;  %v2250_v33 = vld [vmem:[%s2570_s26 + $0xe0] sm:$0xff]   ;;  %v2252_v35 = vld [vmem:[%s2570_s26 + $0xe8] sm:$0xff]   ;;  %v2254_v37 = vld [vmem:[%s2570_s26 + $0xf0] sm:$0xff]  }
  0x1d   : > { %v2255_v38 = vld [vmem:[%s2570_s26 + $0x78] sm:$0xff]  }
  0x1e   : > { %v2256_v39 = vld [vmem:[%s2570_s26 + $0xf8] sm:$0xff]  }
  0x1f   : > { %2125 = vmatpush3.bf16.msra.mxu0 %v2222_v6  ;;  %2205 = vmatpush3.bf16.msra.mxu1 %v2222_v6 }
  0x20   : > { %2126 = vmatprep.subr.bf16.mxu0 %v2223_v7  ;;  %2199 = vmatprep.subr.bf16.mxu1 %v2223_v7 }
  0x23   : > { %2127 = vmatpush3.bf16.msra.mxu0 %v2223_v7  ;;  %2206 = vmatpush3.bf16.msra.mxu1 %v2223_v7 }
  0x24   : > { %2208 = vmatprep.subr.msk.bf16.mxu0 %vm558_vm1, %v2224_v8  ;;  %2209 = vmatprep.subr.msk.bf16.mxu1 %vm558_vm1, %v2224_v8 }
  0x27   : > { %2129 = vmatpush3.bf16.msra.mxu0 %v560_v9  ;;  %2207 = vmatpush3.bf16.msra.mxu1 %v560_v9 }
  0x2a   : > { %2131 = vmatmul.mubr.msk.bf16.vlgmr.msra.gmra.mrb[0].mxu0 %vm461_vm0, %v2227_v10  ;;  %2163 = vmatmul.mubr.msk.bf16.vlgmr.msra.gmra.mrb[0].mxu1 %vm461_vm0, %v2228_v11 }
  0x2b   : > { %2134 = vmatprep.mubr.msk.bf16.mxu0 %vm461_vm0, %v2229_v12  ;;  %2166 = vmatprep.mubr.msk.bf16.mxu1 %vm461_vm0, %v2230_v13 }
  0x32   : > { %2135 = vmatmul.mubr.msk.bf16.gmra.mrb[4].mxu0 %vm461_vm0, %v2231_v14  ;;  %2167 = vmatmul.mubr.msk.bf16.gmra.mrb[4].mxu1 %vm461_vm0, %v2232_v15 }
  0x33   : > { %2138 = vmatprep.mubr.msk.bf16.mxu0 %vm461_vm0, %v2233_v16  ;;  %2170 = vmatprep.mubr.msk.bf16.mxu1 %vm461_vm0, %v2234_v17 }
  0x3a   : > { %2139 = vmatmul.mubr.msk.bf16.gmra.mrb[8].mxu0 %vm461_vm0, %v2235_v18  ;;  %2171 = vmatmul.mubr.msk.bf16.gmra.mrb[8].mxu1 %vm461_vm0, %v2236_v19 }
  0x3b   : > { %2142 = vmatprep.mubr.msk.bf16.mxu0 %vm461_vm0, %v2237_v20  ;;  %2174 = vmatprep.mubr.msk.bf16.mxu1 %vm461_vm0, %v2238_v21 }
  0x42   : > { %2143 = vmatmul.mubr.msk.bf16.gmra.mrb[12].mxu0 %vm461_vm0, %v2239_v22  ;;  %2175 = vmatmul.mubr.msk.bf16.gmra.mrb[12].mxu1 %vm461_vm0, %v2240_v23 }
  0x43   : > { %2146 = vmatprep.mubr.msk.bf16.mxu0 %vm461_vm0, %v2241_v24  ;;  %2178 = vmatprep.mubr.msk.bf16.mxu1 %vm461_vm0, %v2242_v25 }
  0x4a   : > { %2147 = vmatmul.mubr.msk.bf16.gmra.mrb[16].mxu0 %vm461_vm0, %v2243_v26  ;;  %2179 = vmatmul.mubr.msk.bf16.gmra.mrb[16].mxu1 %vm461_vm0, %v2244_v27 }
  0x4b   : > { %2150 = vmatprep.mubr.msk.bf16.mxu0 %vm461_vm0, %v2245_v28  ;;  %2182 = vmatprep.mubr.msk.bf16.mxu1 %vm461_vm0, %v2246_v29 }
  0x52   : > { %2151 = vmatmul.mubr.msk.bf16.gmra.mrb[20].mxu0 %vm461_vm0, %v2247_v30  ;;  %2183 = vmatmul.mubr.msk.bf16.gmra.mrb[20].mxu1 %vm461_vm0, %v2248_v31 }
  0x53   : > { %2154 = vmatprep.mubr.msk.bf16.mxu0 %vm461_vm0, %v2249_v32  ;;  %2186 = vmatprep.mubr.msk.bf16.mxu1 %vm461_vm0, %v2250_v33 }
  0x5a   : > { %2155 = vmatmul.mubr.msk.bf16.gmra.mrb[24].mxu0 %vm461_vm0, %v2251_v34  ;;  %2187 = vmatmul.mubr.msk.bf16.gmra.mrb[24].mxu1 %vm461_vm0, %v2252_v35 }
  0x5b   : > { %2158 = vmatprep.mubr.msk.bf16.mxu0 %vm461_vm0, %v2253_v36  ;;  %2190 = vmatprep.mubr.msk.bf16.mxu1 %vm461_vm0, %v2254_v37 }
  0x62   : > { %2159 = vmatmul.mubr.msk.bf16.gmra.mrb[28].mxu0 %vm461_vm0, %v2255_v38  ;;  %2191 = vmatmul.mubr.msk.bf16.gmra.mrb[28].mxu1 %vm461_vm0, %v2256_v39 }
  0xfd   : > { %v2132_v41 = vpop.f32.mrb[0].mxu0  ;;  %v2164_v42 = vpop.f32.mrb[0].mxu1 }
  0xfe   : > { %v2651_v43 = vadd.f32 %v2132_v41, %v2648_v40  ;;  %v2654_v44 = vadd.f32 %v2164_v42, %v2648_v40  ;;  %v596_v45 = vpop.f32.mrb[1].mxu0  ;;  %v724_v46 = vpop.f32.mrb[1].mxu1 }
  0xff   : > { %v2657_v47 = vadd.f32 %v2648_v40, %v596_v45  ;;  %v2660_v48 = vadd.f32 %v2648_v40, %v724_v46  ;;  %v2133_v49 = vpop.f32.mrb[2].mxu0  ;;  %v2165_v50 = vpop.f32.mrb[2].mxu1 }
 0x100   : > { %v853_v51 = vmax.f32 %v2651_v43, -30.0  ;;  %v885_v52 = vmax.f32 %v2654_v44, -30.0  ;;  %v2665_v53 = vadd.f32 %v2133_v49, %v2648_v40  ;;  %v2668_v54 = vadd.f32 %v2165_v50, %v2648_v40  ;;  %v599_v55 = vpop.f32.mrb[3].mxu0  ;;  %v727_v56 = vpop.f32.mrb[3].mxu1 }
 0x101   : > { %v851_v57 = vmax.f32 %v2657_v47, -30.0  ;;  %v883_v58 = vmax.f32 %v2660_v48, -30.0  ;;  %v2673_v59 = vadd.f32 %v2648_v40, %v599_v55  ;;  %v2676_v60 = vadd.f32 %v2648_v40, %v727_v56 }
 0x102   : > { %v917_v61 = vsub.f32 0.0, %v853_v51  ;;  %v949_v62 = vsub.f32 0.0, %v885_v52  ;;  %v854_v63 = vmax.f32 %v2665_v53, -30.0  ;;  %v886_v0 = vmax.f32 %v2668_v54, -30.0 }
 0x103   : > { %v915_v1 = vsub.f32 0.0, %v851_v57  ;;  %v947_v2 = vsub.f32 0.0, %v883_v58  ;;  %v852_v3 = vmax.f32 %v2673_v59, -30.0  ;;  %v884_v4 = vmax.f32 %v2676_v60, -30.0 }
 0x104   : > { %v983_v5 = vmul.f32 1.442695, %v917_v61  ;;  %v1047_v6 = vmul.f32 1.442695, %v949_v62  ;;  %v918_v7 = vsub.f32 0.0, %v854_v63  ;;  %v950_v8 = vsub.f32 0.0, %v886_v0 }
 0x105   : > { %v979_v9 = vmul.f32 1.442695, %v915_v1  ;;  %v1043_v10 = vmul.f32 1.442695, %v947_v2  ;;  %v916_v11 = vsub.f32 0.0, %v852_v3  ;;  %v948_v12 = vsub.f32 0.0, %v884_v4 }
 0x106   : > { %2257 = vpow2.f32 %v983_v5  ;;  %v985_v13 = vmul.f32 1.442695, %v918_v7  ;;  %v1049_v14 = vmul.f32 1.442695, %v950_v8  ;;  %v2136_v15 = vpop.f32.mrb[4].mxu0  ;;  %v2168_v16 = vpop.f32.mrb[4].mxu1 }
 0x107   : > { %2259 = vpow2.f32 %v1047_v6  ;;  %v981_v17 = vmul.f32 1.442695, %v916_v11  ;;  %v1045_v18 = vmul.f32 1.442695, %v948_v12  ;;  %v2683_v19 = vadd.f32 %v2136_v15, %v2648_v40  ;;  %v612_v20 = vpop.f32.mrb[5].mxu0  ;;  %v740_v21 = vpop.f32.mrb[5].mxu1 }
 0x108   : > { %2261 = vpow2.f32 %v979_v9  ;;  %v2686_v22 = vadd.f32 %v2168_v16, %v2648_v40  ;;  %v2689_v23 = vadd.f32 %v2648_v40, %v612_v20  ;;  %v2692_v24 = vadd.f32 %v2648_v40, %v740_v21  ;;  %v2137_v25 = vpop.f32.mrb[6].mxu0  ;;  %v2169_v26 = vpop.f32.mrb[6].mxu1 }
 0x109   : > { %2263 = vpow2.f32 %v1043_v10  ;;  %v857_v27 = vmax.f32 %v2683_v19, -30.0  ;;  %v2696_v28 = vadd.f32 %v2137_v25, %v2648_v40  ;;  %v2699_v29 = vadd.f32 %v2169_v26, %v2648_v40  ;;  %v615_v30 = vpop.f32.mrb[7].mxu0  ;;  %v743_v31 = vpop.f32.mrb[7].mxu1 }
 0x10a   : > { %2265 = vpow2.f32 %v985_v13  ;;  %v889_v32 = vmax.f32 %v2686_v22, -30.0  ;;  %v855_v33 = vmax.f32 %v2689_v23, -30.0  ;;  %v887_v34 = vmax.f32 %v2692_v24, -30.0 }
 0x10b   : > { %2267 = vpow2.f32 %v1049_v14  ;;  %v921_v35 = vsub.f32 0.0, %v857_v27  ;;  %v858_v36 = vmax.f32 %v2696_v28, -30.0  ;;  %v890_v37 = vmax.f32 %v2699_v29, -30.0 }
 0x10c   : > { %2269 = vpow2.f32 %v981_v17  ;;  %v953_v38 = vsub.f32 0.0, %v889_v32  ;;  %v919_v39 = vsub.f32 0.0, %v855_v33  ;;  %v951_v41 = vsub.f32 0.0, %v887_v34 }
 0x10d   : > { %2271 = vpow2.f32 %v1045_v18  ;;  %v991_v42 = vmul.f32 1.442695, %v921_v35  ;;  %v922_v45 = vsub.f32 0.0, %v858_v36  ;;  %v954_v46 = vsub.f32 0.0, %v890_v37  ;;  %v2140_v49 = vpop.f32.mrb[8].mxu0  ;;  %v2172_v50 = vpop.f32.mrb[8].mxu1 }
 0x10e   : > { %v1055_v51 = vmul.f32 1.442695, %v953_v38  ;;  %v987_v52 = vmul.f32 1.442695, %v919_v39  ;;  %v1051_v55 = vmul.f32 1.442695, %v951_v41  ;;  %v2707_v56 = vadd.f32 %v2648_v40, %v615_v30 }
 0x10f   : > { %2273 = vpow2.f32 %v991_v42  ;;  %v2709_v57 = vmul.f32 1.442695, %v922_v45  ;;  %v2711_v58 = vmul.f32 1.442695, %v954_v46  ;;  %v2714_v61 = vadd.f32 %v2648_v40, %v743_v31  ;;  %v628_v62 = vpop.f32.mrb[9].mxu0  ;;  %v756_v63 = vpop.f32.mrb[9].mxu1 }
 0x110   : > { %v2258_v0 = vpop.eup %2257  ;;  %2275 = vpow2.f32 %v1055_v51  ;;  %v856_v1 = vmax.f32 %v2707_v56, -30.0  ;;  %v2718_v2 = vadd.f32 %v2140_v49, %v2648_v40  ;;  %v2721_v3 = vadd.f32 %v2172_v50, %v2648_v40  ;;  %v2141_v4 = vpop.f32.mrb[10].mxu0 }
 0x111   : > { %v2173_v5 = vpop.f32.mrb[10].mxu1  ;;  %v2260_v6 = vpop.eup %2259  ;;  %v1109_v7 = vadd.f32 1.0, %v2258_v0  ;;  %2277 = vpow2.f32 %v987_v52  ;;  %v888_v8 = vmax.f32 %v2714_v61, -30.0  ;;  %v2725_v9 = vadd.f32 %v2648_v40, %v628_v62 }
 0x112   : > { %v631_v10 = vpop.f32.mrb[11].mxu0  ;;  %v2727_v11 = vpop.f32.mrb[11].mxu1  ;;  %v1141_v13 = vadd.f32 1.0, %v2260_v6  ;;  %2279 = vpow2.f32 %v1051_v55  ;;  %v920_v14 = vsub.f32 0.0, %v856_v1  ;;  %v861_v15 = vmax.f32 %v2718_v2, -30.0 }
 0x113   : > { %v2262_v12 = vpop.eup %2261  ;;  %2281 = vrcp.f32 %v1109_v7  ;;  %v952_v18 = vsub.f32 0.0, %v888_v8  ;;  %v893_v20 = vmax.f32 %v2721_v3, -30.0  ;;  %v859_v39 = vmax.f32 %v2725_v9, -30.0 }
 0x114   : > { %v2264_v16 = vpop.eup %2263  ;;  %v1107_v17 = vadd.f32 1.0, %v2262_v12  ;;  %2283 = vrcp.f32 %v1141_v13  ;;  %v2731_v26 = vmul.f32 1.442695, %v920_v14  ;;  %v925_v27 = vsub.f32 0.0, %v861_v15 }
 0x115   : > { %v2266_v21 = vpop.eup %2265  ;;  %v1139_v25 = vadd.f32 1.0, %v2264_v16  ;;  %v2733_v32 = vmul.f32 1.442695, %v952_v18  ;;  %v957_v33 = vsub.f32 0.0, %v893_v20  ;;  %v2735_v34 = vpop.f32.mrb[12].mxu0  ;;  %v2749_v50 = vadd.f32 %v2648_v40, %v756_v63 }
 0x116   : > { %v2268_v30 = vpop.eup %2267  ;;  %2285 = vrcp.f32 %v1107_v17  ;;  %v1110_v31 = vadd.f32 1.0, %v2266_v21  ;;  %v2737_v35 = vpop.f32.mrb[12].mxu1  ;;  %v2739_v38 = vmul.f32 1.442695, %v925_v27  ;;  %v923_v62 = vsub.f32 0.0, %v859_v39 }
 0x117   : > { %v2270_v36 = vpop.eup %2269  ;;  %2287 = vrcp.f32 %v1139_v25  ;;  %v1142_v37 = vadd.f32 1.0, %v2268_v30  ;;  %v2742_v41 = vpop.f32.mrb[13].mxu0  ;;  %v2746_v49 = vmul.f32 1.442695, %v957_v33  ;;  %v2756_v0 = vadd.f32 %v2141_v4, %v2648_v40 }
 0x118   : > { %v2744_v42 = vpop.f32.mrb[13].mxu1  ;;  %v2272_v45 = vpop.eup %2271  ;;  %2289 = vrcp.f32 %v1110_v31  ;;  %v1108_v46 = vadd.f32 1.0, %v2270_v36  ;;  %v891_v8 = vmax.f32 %v2749_v50, -30.0  ;;  %v2764_v63 = vadd.f32 %v2173_v5, %v2648_v40 }
 0x119   : > { %v2751_v51 = vpop.f32.mrb[14].mxu0  ;;  %v2753_v52 = vpop.f32.mrb[14].mxu1  ;;  %2291 = vrcp.f32 %v1142_v37  ;;  %v1140_v55 = vadd.f32 1.0, %v2272_v45  ;;  %v2767_v12 = vadd.f32 %v2648_v40, %v631_v10  ;;  %v2769_v15 = vmul.f32 1.442695, %v923_v62 }
 0x11a   : > { %v2758_v1 = vpop.f32.mrb[15].mxu0  ;;  %v2760_v6 = vpop.f32.mrb[15].mxu1  ;;  %2293 = vrcp.f32 %v1108_v46  ;;  %v862_v4 = vmax.f32 %v2756_v0, -30.0  ;;  %v955_v18 = vsub.f32 0.0, %v891_v8  ;;  %v894_v20 = vmax.f32 %v2764_v63, -30.0 }
 0x11b   : > { %v2274_v7 = vpop.eup %2273  ;;  %2295 = vrcp.f32 %v1140_v55  ;;  %v860_v10 = vmax.f32 %v2767_v12, -30.0 }
 0x11c   : > { %v2276_v13 = vpop.eup %2275  ;;  %v1113_v14 = vadd.f32 1.0, %v2274_v7  ;;  %2297 = vpow2.f32 %v2709_v57  ;;  %v926_v25 = vsub.f32 0.0, %v862_v4  ;;  %v1059_v31 = vmul.f32 1.442695, %v955_v18 }
 0x11d   : > { %v2278_v16 = vpop.eup %2277  ;;  %v1145_v17 = vadd.f32 1.0, %v2276_v13  ;;  %v958_v33 = vsub.f32 0.0, %v894_v20  ;;  %v2775_v36 = vpop.f32.mrb[16].mxu0  ;;  %v924_v46 = vsub.f32 0.0, %v860_v10 }
 0x11e   : > { %v2280_v21 = vpop.eup %2279  ;;  %2299 = vrcp.f32 %v1113_v14  ;;  %v1111_v5 = vadd.f32 1.0, %v2278_v16  ;;  %v2777_v37 = vpop.f32.mrb[16].mxu1  ;;  %v1001_v45 = vmul.f32 1.442695, %v926_v25  ;;  %v2789_v14 = vadd.f32 %v2648_v40, %v2727_v11 }
 0x11f   : > { %v2282_v27 = vpop.eup %2281  ;;  %2301 = vrcp.f32 %v1145_v17  ;;  %v1143_v30 = vadd.f32 1.0, %v2280_v21  ;;  %v2780_v55 = vpop.f32.mrb[17].mxu0  ;;  %v2785_v13 = vmul.f32 1.442695, %v958_v33  ;;  %v2797_v18 = vmul.f32 1.442695, %v924_v46 }
 0x120   : > { %v2284_v39 = vpop.eup %2283  ;;  %v1237_v57 = vmul.f32 %v2282_v27, %v2651_v43  ;;  %2303 = vrcp.f32 %v1111_v5  ;;  %v2782_v62 = vpop.f32.mrb[17].mxu1  ;;  %v2819_v27 = vadd.f32 %v2648_v40, %v2742_v41 }
 0x121   : > { %v2286_v7 = vpop.eup %2285  ;;  %v1269_v8 = vmul.f32 %v2284_v39, %v2654_v44  ;;  %2305 = vrcp.f32 %v1143_v30  ;;  %v2791_v4 = vpop.f32.mrb[18].mxu0  ;;  %v2801_v44 = vadd.f32 %v2735_v34, %v2648_v40 }
 0x122   : > { %v2793_v43 = vpop.f32.mrb[18].mxu1  ;;  %v2288_v16 = vpop.eup %2287  ;;  %v1235_v17 = vmul.f32 %v2286_v7, %v2657_v47  ;;  %2307 = vpow2.f32 %v2711_v58  ;;  %v892_v47 = vmax.f32 %v2789_v14, -30.0  ;;  %v2812_v58 = vadd.f32 %v2737_v35, %v2648_v40 }
 0x123   : > { %v2803_v20 = vpop.f32.mrb[19].mxu0  ;;  %v2805_v11 = vpop.f32.mrb[19].mxu1  ;;  %v1267_v5 = vmul.f32 %v2288_v16, %v2660_v48  ;;  %2309 = vpow2.f32 %v2731_v26  ;;  %v865_v34 = vmax.f32 %v2801_v44, -30.0 }
 0x124   : > { %v2290_v21 = vpop.eup %2289  ;;  %2311 = vpow2.f32 %v2733_v32  ;;  %v897_v32 = vmax.f32 %v2812_v58, -30.0 }
 0x125   : > { %v2292_v25 = vpop.eup %2291  ;;  %v1238_v10 = vmul.f32 %v2290_v21, %v2665_v53  ;;  %2313 = vpow2.f32 %v2739_v38  ;;  %v956_v53 = vsub.f32 0.0, %v892_v47  ;;  %v929_v33 = vsub.f32 0.0, %v865_v34  ;;  %v2835_v38 = vpop.f32.mrb[20].mxu0 }
 0x126   : > { %v2294_v48 = vpop.eup %2293  ;;  %v1270_v26 = vmul.f32 %v2292_v25, %v2668_v54  ;;  %2315 = vpow2.f32 %v2746_v49  ;;  %v2837_v16 = vpop.f32.mrb[20].mxu1 }
 0x127   : > { %v2296_v35 = vpop.eup %2295  ;;  %v1894_v30 = vpack.c.bf16 %v1238_v10, %v1237_v57  ;;  %v1236_v41 = vmul.f32 %v2294_v48, %v2673_v59  ;;  %2317 = vpow2.f32 %v2769_v15  ;;  %v1061_v54 = vmul.f32 1.442695, %v956_v53  ;;  %v2840_v47 = vpop.f32.mrb[21].mxu0 }
 0x128   : > { %v2298_v39 = vpop.eup %2297  ;;  %v1974_v46 = vpack.c.bf16 %v1270_v26, %v1269_v8  ;;  %v1268_v7 = vmul.f32 %v2296_v35, %v2676_v60  ;;  %2319 = vpow2.f32 %v1059_v31  ;;  %v1007_v49 = vmul.f32 1.442695, %v929_v33  ;;  %v2842_v25 = vpop.f32.mrb[21].mxu1 }
 0x129   : > { %v2300_v21 = vpop.eup %2299  ;;  %2046 = vst [vmem:[%s2826_s10 + $0x8] sm:$0xff] %v1894_v30   ;;  %v1889_v57 = vpack.c.bf16 %v1236_v41, %v1235_v17  ;;  %v1114_v59 = vadd.f32 1.0, %v2298_v39  ;;  %2321 = vpow2.f32 %v1001_v45  ;;  %v961_v10 = vsub.f32 0.0, %v897_v32  ;;  %v2848_v34 = vpop.f32.mrb[22].mxu0 }
 0x12a   : > { %v2302_v8 = vpop.eup %2301  ;;  %2062 = vst [vmem:[%s2826_s10 + $0x88] sm:$0xff] %v1974_v46   ;;  %v1969_v60 = vpack.c.bf16 %v1268_v7, %v1267_v5  ;;  %v2846_v15 = vmul.f32 %v2300_v21, %v2683_v19  ;;  %v2850_v48 = vpop.f32.mrb[22].mxu1  ;;  %v863_v26 = vmax.f32 %v2819_v27, -30.0  ;;  %v2859_v5 = vadd.f32 %v2648_v40, %v2744_v42 }
 0x12b   : > { %v2304_v17 = vpop.eup %2303  ;;  %1890 = vst [vmem:[%s2826_s10] sm:$0xff] %v1889_v57   ;;  %v2854_v31 = vmul.f32 %v2302_v8, %v2686_v22  ;;  %2323 = vrcp.f32 %v1114_v59  ;;  %v2861_v19 = vpop.f32.mrb[23].mxu0  ;;  %v2870_v22 = vmul.f32 1.442695, %v961_v10  ;;  %v2874_v35 = vadd.f32 %v2751_v51, %v2648_v40 }
 0x12c   : > { %v2863_v45 = vpop.f32.mrb[23].mxu1  ;;  %v2306_v53 = vpop.eup %2305  ;;  %2061 = vst [vmem:[%s2826_s10 + $0x80] sm:$0xff] %v1969_v60   ;;  %v2867_v32 = vmul.f32 %v2304_v17, %v2689_v23  ;;  %2325 = vpow2.f32 %v2785_v13  ;;  %v927_v41 = vsub.f32 0.0, %v863_v26  ;;  %v895_v33 = vmax.f32 %v2859_v5, -30.0 }
 0x12d   : > { %v2308_v30 = vpop.eup %2307  ;;  %v2877_v42 = vmul.f32 %v2306_v53, %v2692_v24  ;;  %2327 = vpow2.f32 %v2797_v18  ;;  %v866_v13 = vmax.f32 %v2874_v35, -30.0  ;;  %v2884_v46 = vadd.f32 %v2753_v52, %v2648_v40  ;;  %v2889_v60 = vpop.f32.mrb[24].mxu0 }
 0x12e   : > { %v2310_v39 = vpop.eup %2309  ;;  %v1146_v23 = vadd.f32 1.0, %v2308_v30  ;;  %2329 = vpow2.f32 %v1061_v54  ;;  %v2886_v21 = vmul.f32 1.442695, %v927_v41  ;;  %v959_v24 = vsub.f32 0.0, %v895_v33  ;;  %3207 = vst [vmem:[#allocation2_spill] sm:$0xff] %v2889_v60  ;;  %v2891_v54 = vpop.f32.mrb[24].mxu1 }
 0x12f   : > { %v2312_v51 = vpop.eup %2311  ;;  %v1112_v7 = vadd.f32 1.0, %v2310_v39  ;;  %2331 = vpow2.f32 %v1007_v49  ;;  %v930_v59 = vsub.f32 0.0, %v866_v13  ;;  %v898_v8 = vmax.f32 %v2884_v46, -30.0  ;;  %3208 = vst [vmem:[#allocation3_spill] sm:$0xff] %v2891_v54  ;;  %v2899_v26 = vpop.f32.mrb[25].mxu0 }
 0x130   : > { %v2314_v57 = vpop.eup %2313  ;;  %2333 = vrcp.f32 %v1146_v23  ;;  %v1144_v18 = vadd.f32 1.0, %v2312_v51  ;;  %v2893_v17 = vmul.f32 1.442695, %v959_v24  ;;  %v2897_v49 = vadd.f32 %v2648_v40, %v2758_v1  ;;  %3209 = vst [vmem:[#allocation4_spill] sm:$0xff] %v2899_v26  ;;  %v2901_v53 = vpop.f32.mrb[25].mxu1 }
 0x131   : > { %v2316_v10 = vpop.eup %2315  ;;  %2335 = vrcp.f32 %v1112_v7  ;;  %v1117_v52 = vadd.f32 1.0, %v2314_v57  ;;  %3210 = vst [vmem:[#allocation5_spill] sm:$0xff] %v2901_v53  ;;  %v2903_v33 = vmul.f32 1.442695, %v930_v59  ;;  %v962_v39 = vsub.f32 0.0, %v898_v8  ;;  %v2905_v23 = vpop.f32.mrb[26].mxu0 }
 0x132   : > { %v2318_v30 = vpop.eup %2317  ;;  %2337 = vrcp.f32 %v1144_v18  ;;  %v1149_v41 = vadd.f32 1.0, %v2316_v10  ;;  %3211 = vst [vmem:[#allocation6_spill] sm:$0xff] %v2905_v23  ;;  %v2907_v13 = vpop.f32.mrb[26].mxu1  ;;  %v864_v1 = vmax.f32 %v2897_v49, -30.0  ;;  %v2912_v24 = vadd.f32 %v2648_v40, %v2760_v6 }
 0x133   : > { %3212 = vst [vmem:[#allocation7_spill] sm:$0xff] %v2907_v13  ;;  %v2320_v51 = vpop.eup %2319  ;;  %2339 = vrcp.f32 %v1117_v52  ;;  %v1115_v7 = vadd.f32 1.0, %v2318_v30  ;;  %v2914_v57 = vpop.f32.mrb[27].mxu0  ;;  %v2918_v10 = vmul.f32 1.442695, %v962_v39  ;;  %v2922_v13 = vadd.f32 %v2775_v36, %v2648_v40 }
 0x134   : > { %3213 = vst [vmem:[#allocation8_spill] sm:$0xff] %v2914_v57  ;;  %v2916_v18 = vpop.f32.mrb[27].mxu1  ;;  %v2322_v59 = vpop.eup %2321  ;;  %2341 = vrcp.f32 %v1149_v41  ;;  %v1147_v8 = vadd.f32 1.0, %v2320_v51  ;;  %v928_v23 = vsub.f32 0.0, %v864_v1  ;;  %v896_v6 = vmax.f32 %v2912_v24, -30.0 }
 0x135   : > { %3214 = vst [vmem:[#allocation9_spill] sm:$0xff] %v2916_v18  ;;  %v2324_v52 = vpop.eup %2323  ;;  %2343 = vrcp.f32 %v1115_v7  ;;  %v1118_v30 = vadd.f32 1.0, %v2322_v59  ;;  %v869_v18 = vmax.f32 %v2922_v13, -30.0  ;;  %v2929_v41 = vadd.f32 %v2777_v37, %v2648_v40 }
 0x136   : > { %v2326_v53 = vpop.eup %2325  ;;  %v1242_v57 = vmul.f32 %v2324_v52, %v2696_v28  ;;  %2345 = vrcp.f32 %v1147_v8  ;;  %v1005_v51 = vmul.f32 1.442695, %v928_v23  ;;  %v960_v26 = vsub.f32 0.0, %v896_v6  ;;  %v2933_v8 = vpop.f32.mrb[28].mxu0 }
 0x137   : > { %v2328_v39 = vpop.eup %2327  ;;  %2347 = vrcp.f32 %v1118_v30  ;;  %v1150_v36 = vadd.f32 1.0, %v2326_v53  ;;  %v933_v28 = vsub.f32 0.0, %v869_v18  ;;  %v2935_v52 = vpop.f32.mrb[28].mxu1  ;;  %v901_v53 = vmax.f32 %v2929_v41, -30.0 }
 0x138   : > { %v2330_v7 = vpop.eup %2329  ;;  %v1904_v1 = vpack.c.bf16 %v1242_v57, %v2846_v15  ;;  %v1116_v59 = vadd.f32 1.0, %v2328_v39  ;;  %2349 = vpow2.f32 %v2870_v22  ;;  %v1069_v60 = vmul.f32 1.442695, %v960_v26  ;;  %v2938_v23 = vpop.f32.mrb[29].mxu0 }
 0x139   : > { %v2332_v54 = vpop.eup %2331  ;;  %2351 = vrcp.f32 %v1150_v36  ;;  %v1148_v37 = vadd.f32 1.0, %v2330_v7  ;;  %v2940_v30 = vpop.f32.mrb[29].mxu1  ;;  %v1015_v22 = vmul.f32 1.442695, %v933_v28  ;;  %v2945_v57 = vadd.f32 %v2648_v40, %v2780_v55 }
 0x13a   : > { %3215 = vst [vmem:[#allocation10_spill] sm:$0xff] %v2940_v30  ;;  %v2334_v6 = vpop.eup %2333  ;;  %2048 = vst [vmem:[%s2826_s10 + $0x18] sm:$0xff] %v1904_v1   ;;  %2353 = vrcp.f32 %v1116_v59  ;;  %v1121_v15 = vadd.f32 1.0, %v2332_v54  ;;  %v2947_v18 = vpop.f32.mrb[30].mxu0  ;;  %v965_v7 = vsub.f32 0.0, %v901_v53  ;;  %v2954_v30 = vadd.f32 %v2648_v40, %v2782_v62 }
 0x13b   : > { %v2949_v39 = vpop.f32.mrb[30].mxu1  ;;  %v2336_v26 = vpop.eup %2335  ;;  %v1274_v36 = vmul.f32 %v2334_v6, %v2699_v29  ;;  %2355 = vrcp.f32 %v1148_v37  ;;  %v867_v28 = vmax.f32 %v2945_v57, -30.0  ;;  %v2964_v29 = vadd.f32 %v2791_v4, %v2648_v40 }
 0x13c   : > { %v2956_v1 = vpop.f32.mrb[31].mxu0  ;;  %v2958_v54 = vpop.f32.mrb[31].mxu1  ;;  %v1240_v55 = vmul.f32 %v2336_v26, %v2707_v56  ;;  %2357 = vrcp.f32 %v1121_v15  ;;  %v1079_v6 = vmul.f32 1.442695, %v965_v7 }
 0x13d   : > { %3216 = vst [vmem:[#allocation11_spill] sm:$0xff] %v2956_v1  ;;  %3217 = vst [vmem:[#allocation12_spill] sm:$0xff] %v2958_v54  ;;  %v2338_v59 = vpop.eup %2337  ;;  %v1984_v53 = vpack.c.bf16 %v1274_v36, %v2854_v31  ;;  %2359 = vpow2.f32 %v2886_v21  ;;  %v931_v15 = vsub.f32 0.0, %v867_v28 }
 0x13e   : > { %v2340_v37 = vpop.eup %2339  ;;  %v1272_v62 = vmul.f32 %v2338_v59, %v2714_v61  ;;  %v1899_v1 = vpack.c.bf16 %v1240_v55, %v2867_v32  ;;  %2361 = vpow2.f32 %v2893_v17  ;;  %v899_v61 = vmax.f32 %v2954_v30, -30.0 }
 0x13f   : > { %v2342_v54 = vpop.eup %2341  ;;  %v1245_v56 = vmul.f32 %v2340_v37, %v2718_v2  ;;  %2064 = vst [vmem:[%s2826_s10 + $0x98] sm:$0xff] %v1984_v53   ;;  %2363 = vpow2.f32 %v2903_v33  ;;  %v1011_v2 = vmul.f32 1.442695, %v931_v15  ;;  %v870_v17 = vmax.f32 %v2964_v29, -30.0 }
 0x140   : > { %v2344_v4 = vpop.eup %2343  ;;  %v1979_v26 = vpack.c.bf16 %v1272_v62, %v2877_v42  ;;  %v1277_v31 = vmul.f32 %v2342_v54, %v2721_v3  ;;  %2047 = vst [vmem:[%s2826_s10 + $0x10] sm:$0xff] %v1899_v1   ;;  %2365 = vpow2.f32 %v2918_v10  ;;  %v963_v42 = vsub.f32 0.0, %v899_v61 }
 0x141   : > { %v2346_v21 = vpop.eup %2345  ;;  %v1243_v32 = vmul.f32 %v2344_v4, %v2725_v9  ;;  %2367 = vpow2.f32 %v1005_v51  ;;  %v2985_v3 = vadd.f32 %v2793_v43, %v2648_v40  ;;  %v934_v9 = vsub.f32 0.0, %v870_v17 }
 0x142   : > { %v2348_v36 = vpop.eup %2347  ;;  %2063 = vst [vmem:[%s2826_s10 + $0x90] sm:$0xff] %v1979_v26   ;;  %v1275_v7 = vmul.f32 %v2346_v21, %v2749_v50  ;;  %2369 = vpow2.f32 %v1069_v60  ;;  %v2990_v10 = vadd.f32 %v2648_v40, %v2803_v20  ;;  %v1075_v50 = vmul.f32 1.442695, %v963_v42 }
 0x143   : > { %v2350_v33 = vpop.eup %2349  ;;  %v1246_v1 = vmul.f32 %v2348_v36, %v2756_v0  ;;  %2371 = vpow2.f32 %v1015_v22  ;;  %v902_v51 = vmax.f32 %v2985_v3, -30.0  ;;  %v1017_v37 = vmul.f32 1.442695, %v934_v9 }
 0x144   : > { %v2352_v54 = vpop.eup %2351  ;;  %v1153_v59 = vadd.f32 1.0, %v2350_v33  ;;  %2373 = vpow2.f32 %v1079_v6  ;;  %v868_v53 = vmax.f32 %v2990_v10, -30.0 }
 0x145   : > { %v2354_v55 = vpop.eup %2353  ;;  %v1914_v28 = vpack.c.bf16 %v1246_v1, %v1245_v56  ;;  %v1278_v43 = vmul.f32 %v2352_v54, %v2764_v63  ;;  %v966_v20 = vsub.f32 0.0, %v902_v51  ;;  %v3000_v63 = vadd.f32 %v2648_v40, %v2805_v11 }
 0x146   : > { %v2356_v0 = vpop.eup %2355  ;;  %v1244_v60 = vmul.f32 %v2354_v55, %v2767_v12  ;;  %2375 = vrcp.f32 %v1153_v59  ;;  %v932_v21 = vsub.f32 0.0, %v868_v53 }
 0x147   : > { %v2358_v62 = vpop.eup %2357  ;;  %2050 = vst [vmem:[%s2826_s10 + $0x28] sm:$0xff] %v1914_v28   ;;  %v1994_v22 = vpack.c.bf16 %v1278_v43, %v1277_v31  ;;  %v1276_v15 = vmul.f32 %v2356_v0, %v2789_v14  ;;  %2377 = vpow2.f32 %v1011_v2  ;;  %v1081_v4 = vmul.f32 1.442695, %v966_v20 }
 0x148   : > { %v2360_v6 = vpop.eup %2359  ;;  %v1909_v56 = vpack.c.bf16 %v1244_v60, %v1243_v32  ;;  %v3003_v12 = vmul.f32 %v2358_v62, %v2801_v44  ;;  %2379 = vpow2.f32 %v1075_v50  ;;  %v900_v11 = vmax.f32 %v3000_v63, -30.0 }
 0x149   : > { %v2362_v26 = vpop.eup %2361  ;;  %2066 = vst [vmem:[%s2826_s10 + $0xa8] sm:$0xff] %v1994_v22   ;;  %v1989_v61 = vpack.c.bf16 %v1276_v15, %v1275_v7  ;;  %v1119_v31 = vadd.f32 1.0, %v2360_v6  ;;  %2381 = vpow2.f32 %v1017_v37  ;;  %v3010_v32 = vadd.f32 %v2835_v38, %v2648_v40 }
 0x14a   : > { %v2364_v14 = vpop.eup %2363  ;;  %2049 = vst [vmem:[%s2826_s10 + $0x20] sm:$0xff] %v1909_v56   ;;  %v1151_v2 = vadd.f32 1.0, %v2362_v26  ;;  %2383 = vpow2.f32 %v1081_v4  ;;  %v1013_v36 = vmul.f32 1.442695, %v932_v21  ;;  %v3015_v7 = vadd.f32 %v2837_v16, %v2648_v40 }
 0x14b   : > { %v2366_v44 = vpop.eup %2365  ;;  %2065 = vst [vmem:[%s2826_s10 + $0xa0] sm:$0xff] %v1989_v61   ;;  %2385 = vrcp.f32 %v1119_v31  ;;  %v1122_v17 = vadd.f32 1.0, %v2364_v14  ;;  %v964_v1 = vsub.f32 0.0, %v900_v11  ;;  %v873_v9 = vmax.f32 %v3010_v32, -30.0 }
 0x14c   : > { %v2368_v42 = vpop.eup %2367  ;;  %2387 = vrcp.f32 %v1151_v2  ;;  %v1154_v33 = vadd.f32 1.0, %v2366_v44  ;;  %v905_v38 = vmax.f32 %v3015_v7, -30.0  ;;  %v3021_v50 = vadd.f32 %v2648_v40, %v2840_v47 }
 0x14d   : > { %v2370_v54 = vpop.eup %2369  ;;  %2389 = vrcp.f32 %v1122_v17  ;;  %v1120_v59 = vadd.f32 1.0, %v2368_v42  ;;  %v1077_v16 = vmul.f32 1.442695, %v964_v1  ;;  %v937_v28 = vsub.f32 0.0, %v873_v9 }
 0x14e   : > { %v2372_v51 = vpop.eup %2371  ;;  %2391 = vrcp.f32 %v1154_v33  ;;  %v1152_v55 = vadd.f32 1.0, %v2370_v54  ;;  %v969_v0 = vsub.f32 0.0, %v905_v38  ;;  %v871_v60 = vmax.f32 %v3021_v50, -30.0 }
 0x14f   : > { %v2374_v43 = vpop.eup %2373  ;;  %2393 = vrcp.f32 %v1120_v59  ;;  %v1125_v37 = vadd.f32 1.0, %v2372_v51  ;;  %v1023_v62 = vmul.f32 1.442695, %v937_v28  ;;  %v3026_v22 = vadd.f32 %v2648_v40, %v2842_v25 }
 0x150   : > { %v2376_v20 = vpop.eup %2375  ;;  %2395 = vrcp.f32 %v1152_v55  ;;  %v1157_v53 = vadd.f32 1.0, %v2374_v43  ;;  %v1087_v6 = vmul.f32 1.442695, %v969_v0  ;;  %v935_v56 = vsub.f32 0.0, %v871_v60 }
 0x151   : > { %v2378_v47 = vpop.eup %2377  ;;  %v1281_v15 = vmul.f32 %v2376_v20, %v2812_v58  ;;  %2397 = vrcp.f32 %v1125_v37  ;;  %v903_v61 = vmax.f32 %v3026_v22, -30.0  ;;  %v3032_v31 = vadd.f32 %v2848_v34, %v2648_v40 }
 0x152   : > { %v2380_v4 = vpop.eup %2379  ;;  %2399 = vrcp.f32 %v1157_v53  ;;  %v1123_v26 = vadd.f32 1.0, %v2378_v47  ;;  %v1019_v25 = vmul.f32 1.442695, %v935_v56  ;;  %v3036_v2 = vadd.f32 %v2850_v48, %v2648_v40 }
 0x153   : > { %v2382_v21 = vpop.eup %2381  ;;  %v1155_v14 = vadd.f32 1.0, %v2380_v4  ;;  %2401 = vpow2.f32 %v1013_v36  ;;  %v967_v44 = vsub.f32 0.0, %v903_v61  ;;  %v874_v17 = vmax.f32 %v3032_v31, -30.0 }
 0x154   : > { %v2384_v58 = vpop.eup %2383  ;;  %2403 = vrcp.f32 %v1123_v26  ;;  %v1126_v11 = vadd.f32 1.0, %v2382_v21  ;;  %v906_v34 = vmax.f32 %v3036_v2, -30.0  ;;  %v3042_v1 = vadd.f32 %v2648_v40, %v2861_v19 }
 0x155   : > { %v2386_v42 = vpop.eup %2385  ;;  %2405 = vrcp.f32 %v1155_v14  ;;  %v1158_v33 = vadd.f32 1.0, %v2384_v58  ;;  %v1083_v48 = vmul.f32 1.442695, %v967_v44  ;;  %v938_v54 = vsub.f32 0.0, %v874_v17  ;;  %v3220_v17 = vld [vmem:[#allocation4_spill] sm:$0xff] }
 0x156   : > { %v2388_v36 = vpop.eup %2387  ;;  %v1247_v9 = vmul.f32 %v2386_v42, %v2819_v27  ;;  %2407 = vrcp.f32 %v1126_v11  ;;  %v970_v51 = vsub.f32 0.0, %v906_v34  ;;  %v872_v55 = vmax.f32 %v3042_v1, -30.0 }
 0x157   : > { %v2390_v59 = vpop.eup %2389  ;;  %v1279_v38 = vmul.f32 %v2388_v36, %v2859_v5  ;;  %2409 = vrcp.f32 %v1158_v33  ;;  %v1025_v37 = vmul.f32 1.442695, %v938_v54  ;;  %v3050_v19 = vadd.f32 %v2648_v40, %v2863_v45 }
 0x158   : > { %v2392_v28 = vpop.eup %2391  ;;  %v1250_v43 = vmul.f32 %v2390_v59, %v2874_v35  ;;  %2411 = vpow2.f32 %v1077_v16  ;;  %v1089_v60 = vmul.f32 1.442695, %v970_v51  ;;  %v936_v5 = vsub.f32 0.0, %v872_v55 }
 0x159   : > { %v2394_v27 = vpop.eup %2393  ;;  %v1282_v0 = vmul.f32 %v2392_v28, %v2884_v46  ;;  %2413 = vpow2.f32 %v1023_v62  ;;  %v904_v35 = vmax.f32 %v3050_v19, -30.0 }
 0x15a   : > { %v2396_v20 = vpop.eup %2395  ;;  %v1924_v53 = vpack.c.bf16 %v1250_v43, %v3003_v12  ;;  %v1248_v47 = vmul.f32 %v2394_v27, %v2897_v49  ;;  %2415 = vpow2.f32 %v1087_v6  ;;  %v1021_v45 = vmul.f32 1.442695, %v936_v5  ;;  %v3222_v43 = vld [vmem:[#allocation6_spill] sm:$0xff] }
 0x15b   : > { %v2398_v16 = vpop.eup %2397  ;;  %v2004_v56 = vpack.c.bf16 %v1282_v0, %v1281_v15  ;;  %v1280_v40 = vmul.f32 %v2396_v20, %v2912_v24  ;;  %2417 = vpow2.f32 %v1019_v25  ;;  %v968_v4 = vsub.f32 0.0, %v904_v35  ;;  %v3063_v15 = vld [vmem:[%s3205_s2] ss:$0 sm:$0xff]  ;;  %v3219_v25 = vld [vmem:[#allocation3_spill] sm:$0xff] }
 0x15c   : > { %v2400_v46 = vpop.eup %2399  ;;  %2052 = vst [vmem:[%s2826_s10 + $0x38] sm:$0xff] %v1924_v53   ;;  %v1919_v62 = vpack.c.bf16 %v1248_v47, %v1247_v9  ;;  %2419 = vpow2.f32 %v1083_v48  ;;  %v1253_v49 = vmul.f32 %v2398_v16, %v2922_v13  ;;  %v3218_v24 = vld [vmem:[#allocation2_spill] sm:$0xff]  ;;  %v3072_v58 = vadd.f32 %v3063_v15, %v3219_v25  ;;  %v3221_v9 = vld [vmem:[#allocation5_spill] sm:$0xff] }
 0x15d   : > { %v2402_v26 = vpop.eup %2401  ;;  %2068 = vst [vmem:[%s2826_s10 + $0xb8] sm:$0xff] %v2004_v56   ;;  %v1999_v12 = vpack.c.bf16 %v1280_v40, %v1279_v38  ;;  %2421 = vpow2.f32 %v1025_v37  ;;  %v3067_v6 = vadd.f32 %v3063_v15, %v3218_v24  ;;  %v1085_v14 = vmul.f32 1.442695, %v968_v4  ;;  %v3223_v4 = vld [vmem:[#allocation7_spill] sm:$0xff] }
 0x15e   : > { %v2404_v61 = vpop.eup %2403  ;;  %2051 = vst [vmem:[%s2826_s10 + $0x30] sm:$0xff] %v1919_v62   ;;  %v1124_v21 = vadd.f32 1.0, %v2402_v26  ;;  %2423 = vpow2.f32 %v1089_v60  ;;  %v1285_v11 = vmul.f32 %v2400_v46, %v2929_v41  ;;  %v3079_v42 = vadd.f32 %v3063_v15, %v3220_v17 }
 0x15f   : > { %v2406_v13 = vpop.eup %2405  ;;  %2067 = vst [vmem:[%s2826_s10 + $0xb0] sm:$0xff] %v1999_v12   ;;  %2425 = vpow2.f32 %v1021_v45  ;;  %v877_v44 = vmax.f32 %v3067_v6, -30.0  ;;  %v3082_v34 = vmul.f32 %v2404_v61, %v2945_v57  ;;  %v909_v36 = vmax.f32 %v3072_v58, -30.0  ;;  %v3224_v61 = vld [vmem:[#allocation8_spill] sm:$0xff] }
 0x160   : > { %v2408_v33 = vpop.eup %2407  ;;  %2427 = vrcp.f32 %v1124_v21  ;;  %v3087_v48 = vadd.f32 %v3063_v15, %v3221_v9  ;;  %v875_v38 = vmax.f32 %v3079_v42, -30.0  ;;  %v3095_v37 = vadd.f32 %v3063_v15, %v3222_v43 }
 0x161   : > { %v2410_v54 = vpop.eup %2409  ;;  %v1254_v41 = vmul.f32 %v2408_v33, %v2964_v29  ;;  %2429 = vpow2.f32 %v1085_v14  ;;  %v941_v59 = vsub.f32 0.0, %v877_v44  ;;  %v973_v57 = vsub.f32 0.0, %v909_v36 }
 0x162   : > { %v2412_v51 = vpop.eup %2411  ;;  %v1286_v55 = vmul.f32 %v2410_v54, %v2985_v3  ;;  %v907_v28 = vmax.f32 %v3087_v48, -30.0  ;;  %v3098_v0 = vmul.f32 %v2406_v13, %v2954_v30  ;;  %v939_v5 = vsub.f32 0.0, %v875_v38 }
 0x163   : > { %v2414_v27 = vpop.eup %2413  ;;  %v1934_v29 = vpack.c.bf16 %v1254_v41, %v1253_v49  ;;  %v1156_v60 = vadd.f32 1.0, %v2412_v51  ;;  %v1031_v35 = vmul.f32 1.442695, %v941_v59  ;;  %v1095_v3 = vmul.f32 1.442695, %v973_v57 }
 0x164   : > { %v2416_v20 = vpop.eup %2415  ;;  %v2014_v53 = vpack.c.bf16 %v1286_v55, %v1285_v11  ;;  %v1129_v47 = vadd.f32 1.0, %v2414_v27  ;;  %v971_v40 = vsub.f32 0.0, %v907_v28  ;;  %v878_v45 = vmax.f32 %v3095_v37, -30.0  ;;  %v3225_v11 = vld [vmem:[#allocation9_spill] sm:$0xff] }
 0x165   : > { %v2418_v16 = vpop.eup %2417  ;;  %2054 = vst [vmem:[%s2826_s10 + $0x48] sm:$0xff] %v1934_v29   ;;  %2431 = vrcp.f32 %v1156_v60  ;;  %v1161_v56 = vadd.f32 1.0, %v2416_v20  ;;  %v1027_v62 = vmul.f32 1.442695, %v939_v5  ;;  %v3105_v26 = vadd.f32 %v3063_v15, %v3223_v4 }
 0x166   : > { %v2420_v46 = vpop.eup %2419  ;;  %2070 = vst [vmem:[%s2826_s10 + $0xc8] sm:$0xff] %v2014_v53   ;;  %2433 = vrcp.f32 %v1129_v47  ;;  %v1127_v30 = vadd.f32 1.0, %v2418_v16  ;;  %v942_v24 = vsub.f32 0.0, %v878_v45  ;;  %v3109_v21 = vadd.f32 %v3063_v15, %v3224_v61 }
 0x167   : > { %v2422_v12 = vpop.eup %2421  ;;  %2435 = vrcp.f32 %v1161_v56  ;;  %v1159_v49 = vadd.f32 1.0, %v2420_v46  ;;  %v910_v13 = vmax.f32 %v3105_v26, -30.0  ;;  %v3114_v44 = vadd.f32 %v3063_v15, %v3225_v11  ;;  %v3226_v56 = vld [vmem:[#allocation10_spill] sm:$0xff] }
 0x168   : > { %v2424_v14 = vpop.eup %2423  ;;  %2437 = vrcp.f32 %v1127_v30  ;;  %v1130_v25 = vadd.f32 1.0, %v2422_v12  ;;  %v1091_v36 = vmul.f32 1.442695, %v971_v40  ;;  %v876_v9 = vmax.f32 %v3109_v21, -30.0 }
 0x169   : > { %v2426_v17 = vpop.eup %2425  ;;  %2439 = vrcp.f32 %v1159_v49  ;;  %v1162_v33 = vadd.f32 1.0, %v2424_v14  ;;  %v974_v59 = vsub.f32 0.0, %v910_v13  ;;  %v908_v38 = vmax.f32 %v3114_v44, -30.0 }
 0x16a   : > { %v2428_v54 = vpop.eup %2427  ;;  %2441 = vrcp.f32 %v1130_v25  ;;  %v1128_v41 = vadd.f32 1.0, %v2426_v17  ;;  %v940_v57 = vsub.f32 0.0, %v876_v9  ;;  %v3121_v28 = vadd.f32 %v3063_v15, %v2933_v8 }
 0x16b   : > { %v2430_v51 = vpop.eup %2429  ;;  %v1252_v55 = vmul.f32 %v2428_v54, %v2990_v10  ;;  %2443 = vrcp.f32 %v1162_v33  ;;  %v1033_v27 = vmul.f32 1.442695, %v942_v24  ;;  %v1097_v29 = vmul.f32 1.442695, %v974_v59 }
 0x16c   : > { %2445 = vrcp.f32 %v1128_v41  ;;  %v1160_v43 = vadd.f32 1.0, %v2430_v51  ;;  %v972_v5 = vsub.f32 0.0, %v908_v38  ;;  %v881_v20 = vmax.f32 %v3121_v28, -30.0 }
 0x16d   : > { %v1929_v60 = vpack.c.bf16 %v1252_v55, %v3082_v34  ;;  %2447 = vpow2.f32 %v1031_v35  ;;  %v1029_v53 = vmul.f32 1.442695, %v940_v57  ;;  %v3127_v10 = vadd.f32 %v3063_v15, %v2935_v52 }
 0x16e   : > { %2449 = vrcp.f32 %v1160_v43  ;;  %v3131_v8 = vadd.f32 %v3063_v15, %v2938_v23  ;;  %v945_v16 = vsub.f32 0.0, %v881_v20  ;;  %v3136_v34 = vadd.f32 %v3063_v15, %v3226_v56 }
 0x16f   : > { %v2432_v47 = vpop.eup %2431  ;;  %2053 = vst [vmem:[%s2826_s10 + $0x40] sm:$0xff] %v1929_v60   ;;  %2451 = vpow2.f32 %v1095_v3  ;;  %v3140_v35 = vadd.f32 %v3063_v15, %v2947_v18  ;;  %v913_v23 = vmax.f32 %v3127_v10, -30.0  ;;  %v1093_v3 = vmul.f32 1.442695, %v972_v5 }
 0x170   : > { %v2434_v40 = vpop.eup %2433  ;;  %v1284_v52 = vmul.f32 %v2432_v47, %v3000_v63  ;;  %2453 = vpow2.f32 %v1027_v62  ;;  %v879_v45 = vmax.f32 %v3131_v8, -30.0  ;;  %v1039_v12 = vmul.f32 1.442695, %v945_v16 }
 0x171   : > { %v2436_v46 = vpop.eup %2435  ;;  %2455 = vpow2.f32 %v1091_v36  ;;  %v977_v49 = vsub.f32 0.0, %v913_v23  ;;  %v1257_v24 = vmul.f32 %v2434_v40, %v3010_v32  ;;  %v911_v14 = vmax.f32 %v3136_v34, -30.0 }
 0x172   : > { %v2438_v30 = vpop.eup %2437  ;;  %v2009_v4 = vpack.c.bf16 %v1284_v52, %v3098_v0  ;;  %2457 = vpow2.f32 %v1033_v27  ;;  %v943_v63 = vsub.f32 0.0, %v879_v45  ;;  %v882_v25 = vmax.f32 %v3140_v35, -30.0 }
 0x173   : > { %v2440_v18 = vpop.eup %2439  ;;  %2459 = vpow2.f32 %v1097_v29  ;;  %v1103_v61 = vmul.f32 1.442695, %v977_v49  ;;  %v1289_v11 = vmul.f32 %v2436_v46, %v3015_v7  ;;  %v1255_v32 = vmul.f32 %v2438_v30, %v3021_v50  ;;  %v3228_v29 = vld [vmem:[#allocation12_spill] sm:$0xff] }
 0x174   : > { %v2442_v62 = vpop.eup %2441  ;;  %2069 = vst [vmem:[%s2826_s10 + $0xc0] sm:$0xff] %v2009_v4   ;;  %2461 = vpow2.f32 %v1029_v53  ;;  %v1035_v17 = vmul.f32 1.442695, %v943_v63  ;;  %v946_v9 = vsub.f32 0.0, %v882_v25  ;;  %v1287_v41 = vmul.f32 %v2440_v18, %v3026_v22  ;;  %v3227_v22 = vld [vmem:[#allocation11_spill] sm:$0xff] }
 0x175   : > { %v2444_v13 = vpop.eup %2443  ;;  %v1258_v0 = vmul.f32 %v2442_v62, %v3032_v31  ;;  %2463 = vpow2.f32 %v1093_v3  ;;  %v3158_v7 = vadd.f32 %v3063_v15, %v2949_v39  ;;  %v3164_v27 = vadd.f32 %v3063_v15, %v3227_v22 }
 0x176   : > { %v2446_v33 = vpop.eup %2445  ;;  %v1290_v36 = vmul.f32 %v2444_v13, %v3036_v2  ;;  %2465 = vpow2.f32 %v1039_v12  ;;  %v1041_v50 = vmul.f32 1.442695, %v946_v9  ;;  %v3169_v60 = vadd.f32 %v3063_v15, %v3228_v29 }
 0x177   : > { %v2448_v54 = vpop.eup %2447  ;;  %v1944_v59 = vpack.c.bf16 %v1258_v0, %v1257_v24  ;;  %v1256_v38 = vmul.f32 %v2446_v33, %v3042_v1  ;;  %2467 = vpow2.f32 %v1103_v61  ;;  %v975_v56 = vsub.f32 0.0, %v911_v14 }
 0x178   : > { %v2450_v31 = vpop.eup %2449  ;;  %v2024_v51 = vpack.c.bf16 %v1290_v36, %v1289_v11  ;;  %v1133_v55 = vadd.f32 1.0, %v2448_v54  ;;  %2469 = vpow2.f32 %v1035_v17  ;;  %v880_v23 = vmax.f32 %v3164_v27, -30.0 }
 0x179   : > { %v2452_v2 = vpop.eup %2451  ;;  %2056 = vst [vmem:[%s2826_s10 + $0x58] sm:$0xff] %v1944_v59   ;;  %v1939_v57 = vpack.c.bf16 %v1256_v38, %v1255_v32  ;;  %v1288_v43 = vmul.f32 %v2450_v31, %v3050_v19  ;;  %v914_v19 = vmax.f32 %v3158_v7, -30.0  ;;  %v912_v46 = vmax.f32 %v3169_v60, -30.0 }
 0x17a   : > { %v2454_v1 = vpop.eup %2453  ;;  %2072 = vst [vmem:[%s2826_s10 + $0xd8] sm:$0xff] %v2024_v51   ;;  %2471 = vrcp.f32 %v1133_v55  ;;  %v1165_v39 = vadd.f32 1.0, %v2452_v2  ;;  %v1099_v18 = vmul.f32 1.442695, %v975_v56  ;;  %v944_v24 = vsub.f32 0.0, %v880_v23 }
 0x17b   : > { %v2456_v5 = vpop.eup %2455  ;;  %2055 = vst [vmem:[%s2826_s10 + $0x50] sm:$0xff] %v1939_v57   ;;  %v2019_v20 = vpack.c.bf16 %v1288_v43, %v1287_v41  ;;  %v1131_v53 = vadd.f32 1.0, %v2454_v1  ;;  %2473 = vpow2.f32 %v1041_v50  ;;  %v978_v4 = vsub.f32 0.0, %v914_v19 }
 0x17c   : > { %v2458_v47 = vpop.eup %2457  ;;  %2475 = vrcp.f32 %v1165_v39  ;;  %v1163_v16 = vadd.f32 1.0, %v2456_v5  ;;  %v976_v61 = vsub.f32 0.0, %v912_v46  ;;  %v1037_v0 = vmul.f32 1.442695, %v944_v24 }
 0x17d   : > { %v2460_v40 = vpop.eup %2459  ;;  %2071 = vst [vmem:[%s2826_s10 + $0xd0] sm:$0xff] %v2019_v20   ;;  %2477 = vrcp.f32 %v1131_v53  ;;  %v1134_v52 = vadd.f32 1.0, %v2458_v47  ;;  %v1105_v25 = vmul.f32 1.442695, %v978_v4 }
 0x17e   : > { %v2462_v45 = vpop.eup %2461  ;;  %2479 = vrcp.f32 %v1163_v16  ;;  %v1166_v15 = vadd.f32 1.0, %v2460_v40  ;;  %v1101_v32 = vmul.f32 1.442695, %v976_v61 }
 0x17f   : > { %v2464_v3 = vpop.eup %2463  ;;  %2481 = vrcp.f32 %v1134_v52  ;;  %v1132_v30 = vadd.f32 1.0, %v2462_v45 }
 0x180   : > { %v2466_v12 = vpop.eup %2465  ;;  %2483 = vrcp.f32 %v1166_v15  ;;  %v1164_v49 = vadd.f32 1.0, %v2464_v3 }
 0x181   : > { %2485 = vrcp.f32 %v1132_v30  ;;  %v2468_v63 = vpop.eup %2467  ;;  %v1137_v62 = vadd.f32 1.0, %v2466_v12 }
 0x182   : > { %2487 = vrcp.f32 %v1164_v49  ;;  %v2470_v14 = vpop.eup %2469  ;;  %v1169_v29 = vadd.f32 1.0, %v2468_v63 }
 0x183   : > { %2489 = vpow2.f32 %v1099_v18 }
 0x184   : > { %v2472_v13 = vpop.eup %2471  ;;  %2491 = vrcp.f32 %v1137_v62 }
 0x185   : > { %v2474_v11 = vpop.eup %2473  ;;  %2493 = vpow2.f32 %v1105_v25  ;;  %v1261_v59 = vmul.f32 %v2472_v13, %v3067_v6 }
 0x186   : > { %v2476_v17 = vpop.eup %2475  ;;  %v1138_v33 = vadd.f32 1.0, %v2474_v11 }
 0x187   : > { %v2478_v36 = vpop.eup %2477  ;;  %v1293_v51 = vmul.f32 %v2476_v17, %v3072_v58 }
 0x188   : > { %v2480_v9 = vpop.eup %2479  ;;  %2495 = vrcp.f32 %v1138_v33  ;;  %v1259_v2 = vmul.f32 %v2478_v36, %v3079_v42 }
 0x189   : > { %v2482_v54 = vpop.eup %2481  ;;  %2497 = vpow2.f32 %v1037_v0  ;;  %v1291_v22 = vmul.f32 %v2480_v9, %v3087_v48 }
 0x18a   : > { %v2484_v41 = vpop.eup %2483  ;;  %v1262_v38 = vmul.f32 %v2482_v54, %v3095_v37  ;;  %2499 = vpow2.f32 %v1101_v32 }
 0x18b   : > { %v2486_v31 = vpop.eup %2485  ;;  %v1294_v55 = vmul.f32 %v2484_v41, %v3105_v26  ;;  %v1135_v26 = vadd.f32 1.0, %v2470_v14  ;;  %2501 = vrcp.f32 %v1169_v29 }
 0x18c   : > { %v2488_v50 = vpop.eup %2487  ;;  %v1954_v57 = vpack.c.bf16 %v1262_v38, %v1261_v59  ;;  %v1260_v43 = vmul.f32 %v2486_v31, %v3109_v21 }
 0x18d   : > { %v2034_v6 = vpack.c.bf16 %v1294_v55, %v1293_v51  ;;  %v1292_v37 = vmul.f32 %v2488_v50, %v3114_v44  ;;  %v2490_v1 = vpop.eup %2489  ;;  %2503 = vrcp.f32 %v1135_v26 }
 0x18e   : > { %2058 = vst [vmem:[%s2826_s10 + $0x68] sm:$0xff] %v1954_v57   ;;  %v1949_v39 = vpack.c.bf16 %v1260_v43, %v1259_v2  ;;  %v2492_v5 = vpop.eup %2491  ;;  %v1167_v42 = vadd.f32 1.0, %v2490_v1 }
 0x18f   : > { %2074 = vst [vmem:[%s2826_s10 + $0xe8] sm:$0xff] %v2034_v6   ;;  %v2029_v58 = vpack.c.bf16 %v1292_v37, %v1291_v22  ;;  %v2494_v20 = vpop.eup %2493  ;;  %v1265_v19 = vmul.f32 %v2492_v5, %v3121_v28 }
 0x190   : > { %2057 = vst [vmem:[%s2826_s10 + $0x60] sm:$0xff] %v1949_v39   ;;  %v1170_v21 = vadd.f32 1.0, %v2494_v20 }
 0x191   : > { %2073 = vst [vmem:[%s2826_s10 + $0xe0] sm:$0xff] %v2029_v58  }
 0x192   : > { %v2496_v53 = vpop.eup %2495  ;;  %2505 = vrcp.f32 %v1170_v21 }
 0x193   : > { %v2498_v48 = vpop.eup %2497  ;;  %v1266_v44 = vmul.f32 %v2496_v53, %v3140_v35  ;;  %2507 = vrcp.f32 %v1167_v42 }
 0x194   : > { %v2500_v47 = vpop.eup %2499  ;;  %v1136_v16 = vadd.f32 1.0, %v2498_v48 }
 0x195   : > { %v1964_v56 = vpack.c.bf16 %v1266_v44, %v1265_v19  ;;  %v1168_v40 = vadd.f32 1.0, %v2500_v47  ;;  %v2502_v52 = vpop.eup %2501 }
 0x196   : > { %2509 = vrcp.f32 %v1136_v16  ;;  %v1297_v28 = vmul.f32 %v2502_v52, %v3127_v10 }
 0x197   : > { %2060 = vst [vmem:[%s2826_s10 + $0x78] sm:$0xff] %v1964_v56   ;;  %2511 = vrcp.f32 %v1168_v40  ;;  %v2504_v23 = vpop.eup %2503 }
 0x198   : > { %v1263_v30 = vmul.f32 %v2504_v23, %v3131_v8 }
 0x19c   : > { %v2506_v45 = vpop.eup %2505 }
 0x19d   : > { %v2508_v15 = vpop.eup %2507  ;;  %v1298_v35 = vmul.f32 %v2506_v45, %v3158_v7 }
 0x19e   : > { %v1295_v49 = vmul.f32 %v2508_v15, %v3136_v34 }
 0x19f   : > { %v2044_v4 = vpack.c.bf16 %v1298_v35, %v1297_v28 }
 0x1a0   : > { %v2510_v46 = vpop.eup %2509 }
 0x1a1   : > { %v2512_v3 = vpop.eup %2511  ;;  %v1264_v12 = vmul.f32 %v2510_v46, %v3164_v27  ;;  %2076 = vst [vmem:[%s2826_s10 + $0xf8] sm:$0xff] %v2044_v4  }
 0x1a2   : > { %v1296_v18 = vmul.f32 %v2512_v3, %v3169_v60 }
 0x1a3   : > { %v1959_v24 = vpack.c.bf16 %v1264_v12, %v1263_v30 }
 0x1a4   : > { %v2039_v63 = vpack.c.bf16 %v1296_v18, %v1295_v49 }
 0x1a5   : > { %2059 = vst [vmem:[%s2826_s10 + $0x70] sm:$0xff] %v1959_v24  }
 0x1a6   : > { %2075 = vst [vmem:[%s2826_s10 + $0xf0] sm:$0xff] %v2039_v63  }
 0x1a7 PF: > { %s13_s12 = sadd.s32 1, %s2520_s12  }
 0x1a8   : > { %p10_p4 = scmp.ge.s32.totalorder %s13_s12, 6  }
 0x1aa   :  { %12 = sbr.rel (!%p10_p4) target bundleno = 1 (0x1), region = 62 }

// kernel: _lambda_.62
= control target key start
LH: loop header
LB: loop body
LE: loop exit
PB: predicated region body
PF: predicated region fallthrough
CT: control target
= control target key end

     0   :  { %s2948_s1 = inlined_call_operand.vmem [shape: bf16[128,128], index: 1, kind: input, shape index: {}]   ;;  %s2949_s0 = inlined_call_operand.vmem [shape: bf16[512,128], index: 0, kind: input, shape index: {}]   ;;  %s2950_s2 = inlined_call_operand.vmem [shape: f32[1,128], index: 2, kind: input, shape index: {}]   ;;  %s2951_s3 = inlined_call_operand.vmem [shape: bf16[512,128], index: 3, kind: output, shape index: {}]  }
   0x1   :  { %v1899_v0 = vld [vmem:[%s2948_s1] sm:$0xff]   ;;  %v1900_v1 = vld [vmem:[%s2948_s1 + $0x8] sm:$0xff]   ;;  %v1901_v2 = vld [vmem:[%s2948_s1 + $0x10] sm:$0xff]  }
   0x2   :  { %1803 = vmatprep.subr.bf16.mxu0 %v1899_v0  ;;  %1883 = vmatprep.subr.bf16.mxu1 %v1899_v0  ;;  %v1902_v3 = vld [vmem:[%s2948_s1 + $0x18] sm:$0xff]   ;;  %v1907_v4 = vld [vmem:[%s2949_s0] sm:$0xff]   ;;  %v1904_v7 = vld [vmem:[%s2948_s1 + $0x28] sm:$0xff]  }
   0x3   :  { %1804 = vmatpush3.bf16.msra.mxu0 %v1899_v0  ;;  %1891 = vmatpush3.bf16.msra.mxu1 %v1899_v0  ;;  %v1908_v5 = vld [vmem:[%s2949_s0 + $0x80] sm:$0xff]   ;;  %v1905_v8 = vld [vmem:[%s2948_s1 + $0x30] sm:$0xff]   ;;  %v1906_v9 = vld [vmem:[%s2948_s1 + $0x38] sm:$0xff]  }
   0x4   :  { %1805 = vmatprep.subr.bf16.mxu0 %v1900_v1  ;;  %1884 = vmatprep.subr.bf16.mxu1 %v1900_v1  ;;  %v1903_v6 = vld [vmem:[%s2948_s1 + $0x20] sm:$0xff]   ;;  %v1909_v10 = vld [vmem:[%s2949_s0 + $0x8] sm:$0xff]   ;;  %v1911_v12 = vld [vmem:[%s2949_s0 + $0x10] sm:$0xff]  }
   0x5   :  { %1819 = vmatprep.mubr.bf16.mxu0 %v1907_v4  ;;  %1851 = vmatprep.mubr.bf16.mxu1 %v1908_v5  ;;  %v1910_v11 = vld [vmem:[%s2949_s0 + $0x88] sm:$0xff]   ;;  %v1912_v13 = vld [vmem:[%s2949_s0 + $0x90] sm:$0xff]   ;;  %v1913_v14 = vld [vmem:[%s2949_s0 + $0x18] sm:$0xff]  }
   0x6   :  { %v1914_v15 = vld [vmem:[%s2949_s0 + $0x98] sm:$0xff]   ;;  %v1915_v16 = vld [vmem:[%s2949_s0 + $0x20] sm:$0xff]   ;;  %v1917_v18 = vld [vmem:[%s2949_s0 + $0x28] sm:$0xff]  }
   0x7   :  { %1806 = vmatpush3.bf16.msra.mxu0 %v1900_v1  ;;  %1892 = vmatpush3.bf16.msra.mxu1 %v1900_v1  ;;  %v1916_v17 = vld [vmem:[%s2949_s0 + $0xa0] sm:$0xff]   ;;  %v1918_v19 = vld [vmem:[%s2949_s0 + $0xa8] sm:$0xff]   ;;  %v1919_v20 = vld [vmem:[%s2949_s0 + $0x30] sm:$0xff]  }
   0x8   :  { %1807 = vmatprep.subr.bf16.mxu0 %v1901_v2  ;;  %1885 = vmatprep.subr.bf16.mxu1 %v1901_v2  ;;  %v1920_v21 = vld [vmem:[%s2949_s0 + $0xb0] sm:$0xff]   ;;  %v1921_v22 = vld [vmem:[%s2949_s0 + $0x38] sm:$0xff]   ;;  %v1923_v24 = vld [vmem:[%s2949_s0 + $0x40] sm:$0xff]  }
   0x9   :  { %v1922_v23 = vld [vmem:[%s2949_s0 + $0xb8] sm:$0xff]   ;;  %v1924_v25 = vld [vmem:[%s2949_s0 + $0xc0] sm:$0xff]   ;;  %v1925_v26 = vld [vmem:[%s2949_s0 + $0x48] sm:$0xff]  }
   0xa   :  { %v1926_v27 = vld [vmem:[%s2949_s0 + $0xc8] sm:$0xff]   ;;  %v1927_v28 = vld [vmem:[%s2949_s0 + $0x50] sm:$0xff]   ;;  %v1929_v30 = vld [vmem:[%s2949_s0 + $0x58] sm:$0xff]  }
   0xb   :  { %1808 = vmatpush3.bf16.msra.mxu0 %v1901_v2  ;;  %1893 = vmatpush3.bf16.msra.mxu1 %v1901_v2  ;;  %v1928_v29 = vld [vmem:[%s2949_s0 + $0xd0] sm:$0xff]   ;;  %v1930_v31 = vld [vmem:[%s2949_s0 + $0xd8] sm:$0xff]   ;;  %v1931_v32 = vld [vmem:[%s2949_s0 + $0x60] sm:$0xff]  }
   0xc   :  { %1809 = vmatprep.subr.bf16.mxu0 %v1902_v3  ;;  %1886 = vmatprep.subr.bf16.mxu1 %v1902_v3  ;;  %v1932_v33 = vld [vmem:[%s2949_s0 + $0xe0] sm:$0xff]   ;;  %v1933_v34 = vld [vmem:[%s2949_s0 + $0x68] sm:$0xff]   ;;  %v1935_v36 = vld [vmem:[%s2949_s0 + $0x70] sm:$0xff]  }
   0xd   :  { %v1934_v35 = vld [vmem:[%s2949_s0 + $0xe8] sm:$0xff]   ;;  %v1936_v37 = vld [vmem:[%s2949_s0 + $0xf0] sm:$0xff]   ;;  %v1937_v38 = vld [vmem:[%s2949_s0 + $0x78] sm:$0xff]  }
   0xe   :  { %v1938_v39 = vld [vmem:[%s2949_s0 + $0xf8] sm:$0xff]   ;;  %v2339_v40 = vld [vmem:[%s2950_s2] ss:$0 sm:$0xff] }
   0xf   :  { %1810 = vmatpush3.bf16.msra.mxu0 %v1902_v3  ;;  %1894 = vmatpush3.bf16.msra.mxu1 %v1902_v3 }
  0x10   :  { %1811 = vmatprep.subr.bf16.mxu0 %v1903_v6  ;;  %1887 = vmatprep.subr.bf16.mxu1 %v1903_v6 }
  0x13   :  { %1812 = vmatpush3.bf16.msra.mxu0 %v1903_v6  ;;  %1895 = vmatpush3.bf16.msra.mxu1 %v1903_v6 }
  0x14   :  { %1813 = vmatprep.subr.bf16.mxu0 %v1904_v7  ;;  %1888 = vmatprep.subr.bf16.mxu1 %v1904_v7 }
  0x17   :  { %1814 = vmatpush3.bf16.msra.mxu0 %v1904_v7  ;;  %1896 = vmatpush3.bf16.msra.mxu1 %v1904_v7 }
  0x18   :  { %1815 = vmatprep.subr.bf16.mxu0 %v1905_v8  ;;  %1889 = vmatprep.subr.bf16.mxu1 %v1905_v8 }
  0x1b   :  { %1816 = vmatpush3.bf16.msra.mxu0 %v1905_v8  ;;  %1897 = vmatpush3.bf16.msra.mxu1 %v1905_v8 }
  0x1c   :  { %1817 = vmatprep.subr.bf16.mxu0 %v1906_v9  ;;  %1890 = vmatprep.subr.bf16.mxu1 %v1906_v9 }
  0x1f   :  { %1818 = vmatpush3.bf16.msra.mxu0 %v1906_v9  ;;  %1898 = vmatpush3.bf16.msra.mxu1 %v1906_v9 }
  0x22   :  { %1820 = vmatmul.mubr.bf16.vlgmr.msra.gmra.mrb[0].mxu0 %v1909_v10  ;;  %1852 = vmatmul.mubr.bf16.vlgmr.msra.gmra.mrb[0].mxu1 %v1910_v11 }
  0x23   :  { %1823 = vmatprep.mubr.bf16.mxu0 %v1911_v12  ;;  %1855 = vmatprep.mubr.bf16.mxu1 %v1912_v13 }
  0x2a   :  { %1824 = vmatmul.mubr.bf16.gmra.mrb[4].mxu0 %v1913_v14  ;;  %1856 = vmatmul.mubr.bf16.gmra.mrb[4].mxu1 %v1914_v15 }
  0x2b   :  { %1827 = vmatprep.mubr.bf16.mxu0 %v1915_v16  ;;  %1859 = vmatprep.mubr.bf16.mxu1 %v1916_v17 }
  0x32   :  { %1828 = vmatmul.mubr.bf16.gmra.mrb[8].mxu0 %v1917_v18  ;;  %1860 = vmatmul.mubr.bf16.gmra.mrb[8].mxu1 %v1918_v19 }
  0x33   :  { %1831 = vmatprep.mubr.bf16.mxu0 %v1919_v20  ;;  %1863 = vmatprep.mubr.bf16.mxu1 %v1920_v21 }
  0x3a   :  { %1832 = vmatmul.mubr.bf16.gmra.mrb[12].mxu0 %v1921_v22  ;;  %1864 = vmatmul.mubr.bf16.gmra.mrb[12].mxu1 %v1922_v23 }
  0x3b   :  { %1835 = vmatprep.mubr.bf16.mxu0 %v1923_v24  ;;  %1867 = vmatprep.mubr.bf16.mxu1 %v1924_v25 }
  0x42   :  { %1836 = vmatmul.mubr.bf16.gmra.mrb[16].mxu0 %v1925_v26  ;;  %1868 = vmatmul.mubr.bf16.gmra.mrb[16].mxu1 %v1926_v27 }
  0x43   :  { %1839 = vmatprep.mubr.bf16.mxu0 %v1927_v28  ;;  %1871 = vmatprep.mubr.bf16.mxu1 %v1928_v29 }
  0x4a   :  { %1840 = vmatmul.mubr.bf16.gmra.mrb[20].mxu0 %v1929_v30  ;;  %1872 = vmatmul.mubr.bf16.gmra.mrb[20].mxu1 %v1930_v31 }
  0x4b   :  { %1843 = vmatprep.mubr.bf16.mxu0 %v1931_v32  ;;  %1875 = vmatprep.mubr.bf16.mxu1 %v1932_v33 }
  0x52   :  { %1844 = vmatmul.mubr.bf16.gmra.mrb[24].mxu0 %v1933_v34  ;;  %1876 = vmatmul.mubr.bf16.gmra.mrb[24].mxu1 %v1934_v35 }
  0x53   :  { %1847 = vmatprep.mubr.bf16.mxu0 %v1935_v36  ;;  %1879 = vmatprep.mubr.bf16.mxu1 %v1936_v37 }
  0x5a   :  { %1848 = vmatmul.mubr.bf16.gmra.mrb[28].mxu0 %v1937_v38  ;;  %1880 = vmatmul.mubr.bf16.gmra.mrb[28].mxu1 %v1938_v39 }
  0xf5   :  { %v1821_v41 = vpop.f32.mrb[0].mxu0  ;;  %v1853_v42 = vpop.f32.mrb[0].mxu1 }
  0xf6   :  { %v2342_v43 = vadd.f32 %v1821_v41, %v2339_v40  ;;  %v2345_v44 = vadd.f32 %v1853_v42, %v2339_v40  ;;  %v376_v45 = vpop.f32.mrb[1].mxu0  ;;  %v504_v46 = vpop.f32.mrb[1].mxu1 }
  0xf7   :  { %v2348_v47 = vadd.f32 %v2339_v40, %v376_v45  ;;  %v2351_v48 = vadd.f32 %v2339_v40, %v504_v46  ;;  %v1822_v49 = vpop.f32.mrb[2].mxu0  ;;  %v1854_v50 = vpop.f32.mrb[2].mxu1 }
  0xf8   :  { %v633_v51 = vmax.f32 %v2342_v43, -30.0  ;;  %v665_v52 = vmax.f32 %v2345_v44, -30.0  ;;  %v2356_v53 = vadd.f32 %v1822_v49, %v2339_v40  ;;  %v2359_v54 = vadd.f32 %v1854_v50, %v2339_v40  ;;  %v379_v55 = vpop.f32.mrb[3].mxu0  ;;  %v507_v56 = vpop.f32.mrb[3].mxu1 }
  0xf9   :  { %v631_v57 = vmax.f32 %v2348_v47, -30.0  ;;  %v663_v58 = vmax.f32 %v2351_v48, -30.0  ;;  %v2364_v59 = vadd.f32 %v2339_v40, %v379_v55  ;;  %v2367_v60 = vadd.f32 %v2339_v40, %v507_v56 }
  0xfa   :  { %v697_v61 = vsub.f32 0.0, %v633_v51  ;;  %v729_v62 = vsub.f32 0.0, %v665_v52  ;;  %v634_v63 = vmax.f32 %v2356_v53, -30.0  ;;  %v666_v0 = vmax.f32 %v2359_v54, -30.0 }
  0xfb   :  { %v695_v1 = vsub.f32 0.0, %v631_v57  ;;  %v727_v2 = vsub.f32 0.0, %v663_v58  ;;  %v632_v3 = vmax.f32 %v2364_v59, -30.0  ;;  %v664_v4 = vmax.f32 %v2367_v60, -30.0 }
  0xfc   :  { %v763_v5 = vmul.f32 1.442695, %v697_v61  ;;  %v827_v6 = vmul.f32 1.442695, %v729_v62  ;;  %v698_v7 = vsub.f32 0.0, %v634_v63  ;;  %v730_v8 = vsub.f32 0.0, %v666_v0 }
  0xfd   :  { %v759_v9 = vmul.f32 1.442695, %v695_v1  ;;  %v823_v10 = vmul.f32 1.442695, %v727_v2  ;;  %v696_v11 = vsub.f32 0.0, %v632_v3  ;;  %v728_v12 = vsub.f32 0.0, %v664_v4 }
  0xfe   :  { %1939 = vpow2.f32 %v763_v5  ;;  %v765_v13 = vmul.f32 1.442695, %v698_v7  ;;  %v829_v14 = vmul.f32 1.442695, %v730_v8  ;;  %v1825_v15 = vpop.f32.mrb[4].mxu0  ;;  %v1857_v16 = vpop.f32.mrb[4].mxu1 }
  0xff   :  { %1941 = vpow2.f32 %v827_v6  ;;  %v761_v17 = vmul.f32 1.442695, %v696_v11  ;;  %v825_v18 = vmul.f32 1.442695, %v728_v12  ;;  %v2374_v19 = vadd.f32 %v1825_v15, %v2339_v40  ;;  %v392_v20 = vpop.f32.mrb[5].mxu0  ;;  %v520_v21 = vpop.f32.mrb[5].mxu1 }
 0x100   :  { %1943 = vpow2.f32 %v759_v9  ;;  %v2377_v22 = vadd.f32 %v1857_v16, %v2339_v40  ;;  %v2380_v23 = vadd.f32 %v2339_v40, %v392_v20  ;;  %v2383_v24 = vadd.f32 %v2339_v40, %v520_v21  ;;  %v1826_v25 = vpop.f32.mrb[6].mxu0  ;;  %v1858_v26 = vpop.f32.mrb[6].mxu1 }
 0x101   :  { %1945 = vpow2.f32 %v823_v10  ;;  %v637_v27 = vmax.f32 %v2374_v19, -30.0  ;;  %v2387_v28 = vadd.f32 %v1826_v25, %v2339_v40  ;;  %v2390_v29 = vadd.f32 %v1858_v26, %v2339_v40  ;;  %v395_v30 = vpop.f32.mrb[7].mxu0  ;;  %v523_v31 = vpop.f32.mrb[7].mxu1 }
 0x102   :  { %1947 = vpow2.f32 %v765_v13  ;;  %v669_v32 = vmax.f32 %v2377_v22, -30.0  ;;  %v635_v33 = vmax.f32 %v2380_v23, -30.0  ;;  %v667_v34 = vmax.f32 %v2383_v24, -30.0 }
 0x103   :  { %1949 = vpow2.f32 %v829_v14  ;;  %v701_v35 = vsub.f32 0.0, %v637_v27  ;;  %v638_v36 = vmax.f32 %v2387_v28, -30.0  ;;  %v670_v37 = vmax.f32 %v2390_v29, -30.0 }
 0x104   :  { %1951 = vpow2.f32 %v761_v17  ;;  %v733_v38 = vsub.f32 0.0, %v669_v32  ;;  %v699_v39 = vsub.f32 0.0, %v635_v33  ;;  %v731_v41 = vsub.f32 0.0, %v667_v34 }
 0x105   :  { %1953 = vpow2.f32 %v825_v18  ;;  %v771_v42 = vmul.f32 1.442695, %v701_v35  ;;  %v702_v45 = vsub.f32 0.0, %v638_v36  ;;  %v734_v46 = vsub.f32 0.0, %v670_v37  ;;  %v1829_v49 = vpop.f32.mrb[8].mxu0  ;;  %v1861_v50 = vpop.f32.mrb[8].mxu1 }
 0x106   :  { %v835_v51 = vmul.f32 1.442695, %v733_v38  ;;  %v767_v52 = vmul.f32 1.442695, %v699_v39  ;;  %v831_v55 = vmul.f32 1.442695, %v731_v41  ;;  %v2398_v56 = vadd.f32 %v2339_v40, %v395_v30 }
 0x107   :  { %1955 = vpow2.f32 %v771_v42  ;;  %v2400_v57 = vmul.f32 1.442695, %v702_v45  ;;  %v2402_v58 = vmul.f32 1.442695, %v734_v46  ;;  %v2405_v61 = vadd.f32 %v2339_v40, %v523_v31  ;;  %v408_v62 = vpop.f32.mrb[9].mxu0  ;;  %v536_v63 = vpop.f32.mrb[9].mxu1 }
 0x108   :  { %v1940_v0 = vpop.eup %1939  ;;  %1957 = vpow2.f32 %v835_v51  ;;  %v636_v1 = vmax.f32 %v2398_v56, -30.0  ;;  %v2409_v2 = vadd.f32 %v1829_v49, %v2339_v40  ;;  %v2412_v3 = vadd.f32 %v1861_v50, %v2339_v40  ;;  %v1830_v4 = vpop.f32.mrb[10].mxu0 }
 0x109   :  { %v1862_v5 = vpop.f32.mrb[10].mxu1  ;;  %v1942_v6 = vpop.eup %1941  ;;  %v889_v7 = vadd.f32 1.0, %v1940_v0  ;;  %1959 = vpow2.f32 %v767_v52  ;;  %v668_v8 = vmax.f32 %v2405_v61, -30.0  ;;  %v2416_v9 = vadd.f32 %v2339_v40, %v408_v62 }
 0x10a   :  { %v411_v10 = vpop.f32.mrb[11].mxu0  ;;  %v2418_v11 = vpop.f32.mrb[11].mxu1  ;;  %v921_v13 = vadd.f32 1.0, %v1942_v6  ;;  %1961 = vpow2.f32 %v831_v55  ;;  %v700_v14 = vsub.f32 0.0, %v636_v1  ;;  %v641_v15 = vmax.f32 %v2409_v2, -30.0 }
 0x10b   :  { %v1944_v12 = vpop.eup %1943  ;;  %1963 = vrcp.f32 %v889_v7  ;;  %v732_v18 = vsub.f32 0.0, %v668_v8  ;;  %v673_v20 = vmax.f32 %v2412_v3, -30.0  ;;  %v639_v39 = vmax.f32 %v2416_v9, -30.0 }
 0x10c   :  { %v1946_v16 = vpop.eup %1945  ;;  %v887_v17 = vadd.f32 1.0, %v1944_v12  ;;  %1965 = vrcp.f32 %v921_v13  ;;  %v2422_v26 = vmul.f32 1.442695, %v700_v14  ;;  %v705_v27 = vsub.f32 0.0, %v641_v15 }
 0x10d   :  { %v1948_v21 = vpop.eup %1947  ;;  %v919_v25 = vadd.f32 1.0, %v1946_v16  ;;  %v2424_v32 = vmul.f32 1.442695, %v732_v18  ;;  %v737_v33 = vsub.f32 0.0, %v673_v20  ;;  %v2426_v34 = vpop.f32.mrb[12].mxu0  ;;  %v2440_v50 = vadd.f32 %v2339_v40, %v536_v63 }
 0x10e   :  { %v1950_v30 = vpop.eup %1949  ;;  %1967 = vrcp.f32 %v887_v17  ;;  %v890_v31 = vadd.f32 1.0, %v1948_v21  ;;  %v2428_v35 = vpop.f32.mrb[12].mxu1  ;;  %v2430_v38 = vmul.f32 1.442695, %v705_v27  ;;  %v703_v62 = vsub.f32 0.0, %v639_v39 }
 0x10f   :  { %v1952_v36 = vpop.eup %1951  ;;  %1969 = vrcp.f32 %v919_v25  ;;  %v922_v37 = vadd.f32 1.0, %v1950_v30  ;;  %v2433_v41 = vpop.f32.mrb[13].mxu0  ;;  %v2437_v49 = vmul.f32 1.442695, %v737_v33  ;;  %v2447_v0 = vadd.f32 %v1830_v4, %v2339_v40 }
 0x110   :  { %v2435_v42 = vpop.f32.mrb[13].mxu1  ;;  %v1954_v45 = vpop.eup %1953  ;;  %1971 = vrcp.f32 %v890_v31  ;;  %v888_v46 = vadd.f32 1.0, %v1952_v36  ;;  %v671_v8 = vmax.f32 %v2440_v50, -30.0  ;;  %v2455_v63 = vadd.f32 %v1862_v5, %v2339_v40 }
 0x111   :  { %v2442_v51 = vpop.f32.mrb[14].mxu0  ;;  %v2444_v52 = vpop.f32.mrb[14].mxu1  ;;  %1973 = vrcp.f32 %v922_v37  ;;  %v920_v55 = vadd.f32 1.0, %v1954_v45  ;;  %v2458_v12 = vadd.f32 %v2339_v40, %v411_v10  ;;  %v2460_v15 = vmul.f32 1.442695, %v703_v62 }
 0x112   :  { %v2449_v1 = vpop.f32.mrb[15].mxu0  ;;  %v2451_v6 = vpop.f32.mrb[15].mxu1  ;;  %1975 = vrcp.f32 %v888_v46  ;;  %v642_v4 = vmax.f32 %v2447_v0, -30.0  ;;  %v735_v18 = vsub.f32 0.0, %v671_v8  ;;  %v674_v20 = vmax.f32 %v2455_v63, -30.0 }
 0x113   :  { %v1956_v7 = vpop.eup %1955  ;;  %1977 = vrcp.f32 %v920_v55  ;;  %v640_v10 = vmax.f32 %v2458_v12, -30.0 }
 0x114   :  { %v1958_v13 = vpop.eup %1957  ;;  %v893_v14 = vadd.f32 1.0, %v1956_v7  ;;  %1979 = vpow2.f32 %v2400_v57  ;;  %v706_v25 = vsub.f32 0.0, %v642_v4  ;;  %v839_v31 = vmul.f32 1.442695, %v735_v18 }
 0x115   :  { %v1960_v16 = vpop.eup %1959  ;;  %v925_v17 = vadd.f32 1.0, %v1958_v13  ;;  %v738_v33 = vsub.f32 0.0, %v674_v20  ;;  %v2466_v36 = vpop.f32.mrb[16].mxu0  ;;  %v704_v46 = vsub.f32 0.0, %v640_v10 }
 0x116   :  { %v1962_v21 = vpop.eup %1961  ;;  %1981 = vrcp.f32 %v893_v14  ;;  %v891_v5 = vadd.f32 1.0, %v1960_v16  ;;  %v2468_v37 = vpop.f32.mrb[16].mxu1  ;;  %v781_v45 = vmul.f32 1.442695, %v706_v25  ;;  %v2480_v14 = vadd.f32 %v2339_v40, %v2418_v11 }
 0x117   :  { %v1964_v27 = vpop.eup %1963  ;;  %1983 = vrcp.f32 %v925_v17  ;;  %v923_v30 = vadd.f32 1.0, %v1962_v21  ;;  %v2471_v55 = vpop.f32.mrb[17].mxu0  ;;  %v2476_v13 = vmul.f32 1.442695, %v738_v33  ;;  %v2488_v18 = vmul.f32 1.442695, %v704_v46 }
 0x118   :  { %v1966_v39 = vpop.eup %1965  ;;  %v1017_v57 = vmul.f32 %v1964_v27, %v2342_v43  ;;  %1985 = vrcp.f32 %v891_v5  ;;  %v2473_v62 = vpop.f32.mrb[17].mxu1  ;;  %v672_v25 = vmax.f32 %v2480_v14, -30.0  ;;  %v2510_v27 = vadd.f32 %v2339_v40, %v2433_v41 }
 0x119   :  { %v1968_v7 = vpop.eup %1967  ;;  %v1049_v8 = vmul.f32 %v1966_v39, %v2345_v44  ;;  %1987 = vrcp.f32 %v923_v30  ;;  %v2482_v4 = vpop.f32.mrb[18].mxu0  ;;  %v2492_v44 = vadd.f32 %v2426_v34, %v2339_v40 }
 0x11a   :  { %v2484_v43 = vpop.f32.mrb[18].mxu1  ;;  %v1970_v16 = vpop.eup %1969  ;;  %v1015_v17 = vmul.f32 %v1968_v7, %v2348_v47  ;;  %1989 = vpow2.f32 %v2402_v58  ;;  %v2503_v47 = vadd.f32 %v2428_v35, %v2339_v40  ;;  %v736_v30 = vsub.f32 0.0, %v672_v25 }
 0x11b   :  { %v2494_v20 = vpop.f32.mrb[19].mxu0  ;;  %v2496_v21 = vpop.f32.mrb[19].mxu1  ;;  %v1047_v5 = vmul.f32 %v1970_v16, %v2351_v48  ;;  %1991 = vpow2.f32 %v2422_v26  ;;  %v645_v34 = vmax.f32 %v2492_v44, -30.0 }
 0x11c   :  { %v1972_v11 = vpop.eup %1971  ;;  %1993 = vpow2.f32 %v2424_v32  ;;  %v677_v35 = vmax.f32 %v2503_v47, -30.0  ;;  %v841_v16 = vmul.f32 1.442695, %v736_v30 }
 0x11d   :  { %v1974_v58 = vpop.eup %1973  ;;  %v1018_v10 = vmul.f32 %v1972_v11, %v2356_v53  ;;  %1995 = vpow2.f32 %v2430_v38  ;;  %v709_v32 = vsub.f32 0.0, %v645_v34  ;;  %v2521_v38 = vpop.f32.mrb[20].mxu1 }
 0x11e   :  { %v1976_v48 = vpop.eup %1975  ;;  %v1050_v26 = vmul.f32 %v1974_v58, %v2359_v54  ;;  %1997 = vpow2.f32 %v2437_v49  ;;  %v2519_v54 = vpop.f32.mrb[20].mxu0 }
 0x11f   :  { %v1978_v33 = vpop.eup %1977  ;;  %v1580_v39 = vpack.c.bf16 %v1018_v10, %v1017_v57  ;;  %v1016_v53 = vmul.f32 %v1976_v48, %v2364_v59  ;;  %1999 = vpow2.f32 %v2460_v15  ;;  %v787_v49 = vmul.f32 1.442695, %v709_v32  ;;  %v2526_v25 = vpop.f32.mrb[21].mxu0 }
 0x120   :  { %v1980_v46 = vpop.eup %1979  ;;  %v1660_v7 = vpack.c.bf16 %v1050_v26, %v1049_v8  ;;  %v1048_v41 = vmul.f32 %v1978_v33, %v2367_v60  ;;  %2001 = vpow2.f32 %v839_v31  ;;  %v2528_v8 = vpop.f32.mrb[21].mxu1  ;;  %v741_v10 = vsub.f32 0.0, %v677_v35 }
 0x121   :  { %v1982_v11 = vpop.eup %1981  ;;  %1732 = vst [vmem:[%s2951_s3 + $0x8] sm:$0xff] %v1580_v39   ;;  %v1575_v59 = vpack.c.bf16 %v1016_v53, %v1015_v17  ;;  %v894_v57 = vadd.f32 1.0, %v1980_v46  ;;  %2003 = vpow2.f32 %v781_v45  ;;  %v2536_v34 = vpop.f32.mrb[22].mxu0 }
 0x122   :  { %v1984_v60 = vpop.eup %1983  ;;  %1748 = vst [vmem:[%s2951_s3 + $0x88] sm:$0xff] %v1660_v7   ;;  %v1655_v15 = vpack.c.bf16 %v1048_v41, %v1047_v5  ;;  %v2534_v58 = vmul.f32 %v1982_v11, %v2374_v19  ;;  %v2538_v17 = vpop.f32.mrb[22].mxu1  ;;  %v643_v5 = vmax.f32 %v2510_v27, -30.0  ;;  %v2549_v19 = vadd.f32 %v2339_v40, %v2435_v42 }
 0x123   :  { %v1986_v31 = vpop.eup %1985  ;;  %1576 = vst [vmem:[%s2951_s3] sm:$0xff] %v1575_v59   ;;  %v2544_v48 = vmul.f32 %v1984_v60, %v2377_v22  ;;  %2005 = vrcp.f32 %v894_v57  ;;  %v2551_v45 = vpop.f32.mrb[23].mxu0  ;;  %v2562_v22 = vmul.f32 1.442695, %v741_v10  ;;  %v2566_v42 = vadd.f32 %v2442_v51, %v2339_v40 }
 0x124   :  { %v2553_v26 = vpop.f32.mrb[23].mxu1  ;;  %v1988_v30 = vpop.eup %1987  ;;  %1747 = vst [vmem:[%s2951_s3 + $0x80] sm:$0xff] %v1655_v15   ;;  %v2559_v35 = vmul.f32 %v1986_v31, %v2380_v23  ;;  %2007 = vpow2.f32 %v2476_v13  ;;  %v707_v53 = vsub.f32 0.0, %v643_v5  ;;  %v675_v32 = vmax.f32 %v2549_v19, -30.0 }
 0x125   :  { %v1990_v33 = vpop.eup %1989  ;;  %v2569_v39 = vmul.f32 %v1988_v30, %v2383_v24  ;;  %2009 = vpow2.f32 %v2488_v18  ;;  %v646_v13 = vmax.f32 %v2566_v42, -30.0  ;;  %v2576_v7 = vadd.f32 %v2444_v52, %v2339_v40  ;;  %v2581_v15 = vpop.f32.mrb[24].mxu0 }
 0x126   :  { %v1992_v46 = vpop.eup %1991  ;;  %v926_v23 = vadd.f32 1.0, %v1990_v33  ;;  %2011 = vpow2.f32 %v841_v16  ;;  %v2578_v11 = vmul.f32 1.442695, %v707_v53  ;;  %v739_v24 = vsub.f32 0.0, %v675_v32  ;;  %2952 = vst [vmem:[#allocation2_spill] sm:$0xff] %v2581_v15  ;;  %v2583_v16 = vpop.f32.mrb[24].mxu1 }
 0x127   :  { %v1994_v51 = vpop.eup %1993  ;;  %v892_v41 = vadd.f32 1.0, %v1992_v46  ;;  %2013 = vpow2.f32 %v787_v49  ;;  %v710_v57 = vsub.f32 0.0, %v646_v13  ;;  %v678_v60 = vmax.f32 %v2576_v7, -30.0  ;;  %2953 = vst [vmem:[#allocation3_spill] sm:$0xff] %v2583_v16  ;;  %v2591_v5 = vpop.f32.mrb[25].mxu0 }
 0x128   :  { %v1996_v59 = vpop.eup %1995  ;;  %2015 = vrcp.f32 %v926_v23  ;;  %v924_v18 = vadd.f32 1.0, %v1994_v51  ;;  %v2585_v31 = vmul.f32 1.442695, %v739_v24  ;;  %v2589_v49 = vadd.f32 %v2339_v40, %v2449_v1  ;;  %2954 = vst [vmem:[#allocation4_spill] sm:$0xff] %v2591_v5  ;;  %v2593_v30 = vpop.f32.mrb[25].mxu1 }
 0x129   :  { %v1998_v10 = vpop.eup %1997  ;;  %2017 = vrcp.f32 %v892_v41  ;;  %v897_v52 = vadd.f32 1.0, %v1996_v59  ;;  %2955 = vst [vmem:[#allocation5_spill] sm:$0xff] %v2593_v30  ;;  %v2595_v32 = vmul.f32 1.442695, %v710_v57  ;;  %v742_v46 = vsub.f32 0.0, %v678_v60  ;;  %v2597_v23 = vpop.f32.mrb[26].mxu0 }
 0x12a   :  { %v2000_v33 = vpop.eup %1999  ;;  %2019 = vrcp.f32 %v924_v18  ;;  %v929_v53 = vadd.f32 1.0, %v1998_v10  ;;  %2956 = vst [vmem:[#allocation6_spill] sm:$0xff] %v2597_v23  ;;  %v2599_v13 = vpop.f32.mrb[26].mxu1  ;;  %v644_v1 = vmax.f32 %v2589_v49, -30.0  ;;  %v2604_v24 = vadd.f32 %v2339_v40, %v2451_v6 }
 0x12b   :  { %2957 = vst [vmem:[#allocation7_spill] sm:$0xff] %v2599_v13  ;;  %v2002_v51 = vpop.eup %2001  ;;  %2021 = vrcp.f32 %v897_v52  ;;  %v895_v41 = vadd.f32 1.0, %v2000_v33  ;;  %v2606_v59 = vpop.f32.mrb[27].mxu0  ;;  %v2610_v10 = vmul.f32 1.442695, %v742_v46  ;;  %v2614_v13 = vadd.f32 %v2466_v36, %v2339_v40 }
 0x12c   :  { %2958 = vst [vmem:[#allocation8_spill] sm:$0xff] %v2606_v59  ;;  %v2608_v18 = vpop.f32.mrb[27].mxu1  ;;  %v2004_v57 = vpop.eup %2003  ;;  %2023 = vrcp.f32 %v929_v53  ;;  %v927_v60 = vadd.f32 1.0, %v2002_v51  ;;  %v708_v23 = vsub.f32 0.0, %v644_v1  ;;  %v676_v6 = vmax.f32 %v2604_v24, -30.0 }
 0x12d   :  { %2959 = vst [vmem:[#allocation9_spill] sm:$0xff] %v2608_v18  ;;  %v2006_v52 = vpop.eup %2005  ;;  %2025 = vrcp.f32 %v895_v41  ;;  %v898_v33 = vadd.f32 1.0, %v2004_v57  ;;  %v649_v18 = vmax.f32 %v2614_v13, -30.0  ;;  %v2621_v53 = vadd.f32 %v2468_v37, %v2339_v40 }
 0x12e   :  { %v2008_v30 = vpop.eup %2007  ;;  %v1022_v59 = vmul.f32 %v2006_v52, %v2387_v28  ;;  %2027 = vrcp.f32 %v927_v60  ;;  %v785_v51 = vmul.f32 1.442695, %v708_v23  ;;  %v740_v5 = vsub.f32 0.0, %v676_v6  ;;  %v2625_v28 = vpop.f32.mrb[28].mxu0 }
 0x12f   :  { %v2010_v46 = vpop.eup %2009  ;;  %2029 = vrcp.f32 %v898_v33  ;;  %v930_v36 = vadd.f32 1.0, %v2008_v30  ;;  %v713_v16 = vsub.f32 0.0, %v649_v18  ;;  %v2627_v60 = vpop.f32.mrb[28].mxu1  ;;  %v681_v33 = vmax.f32 %v2621_v53, -30.0 }
 0x130   :  { %v2012_v41 = vpop.eup %2011  ;;  %v1590_v1 = vpack.c.bf16 %v1022_v59, %v2534_v58  ;;  %v896_v57 = vadd.f32 1.0, %v2010_v46  ;;  %2031 = vpow2.f32 %v2562_v22  ;;  %v849_v15 = vmul.f32 1.442695, %v740_v5  ;;  %v2630_v30 = vpop.f32.mrb[29].mxu0 }
 0x131   :  { %v2014_v52 = vpop.eup %2013  ;;  %2033 = vrcp.f32 %v930_v36  ;;  %v928_v37 = vadd.f32 1.0, %v2012_v41  ;;  %v2632_v23 = vpop.f32.mrb[29].mxu1  ;;  %v795_v22 = vmul.f32 1.442695, %v713_v16  ;;  %v2639_v59 = vadd.f32 %v2339_v40, %v2471_v55 }
 0x132   :  { %2960 = vst [vmem:[#allocation10_spill] sm:$0xff] %v2632_v23  ;;  %v2016_v6 = vpop.eup %2015  ;;  %1734 = vst [vmem:[%s2951_s3 + $0x18] sm:$0xff] %v1590_v1   ;;  %2035 = vrcp.f32 %v896_v57  ;;  %v901_v58 = vadd.f32 1.0, %v2014_v52  ;;  %v2641_v18 = vpop.f32.mrb[30].mxu0  ;;  %v745_v41 = vsub.f32 0.0, %v681_v33  ;;  %v2648_v23 = vadd.f32 %v2339_v40, %v2473_v62 }
 0x133   :  { %v2643_v5 = vpop.f32.mrb[30].mxu1  ;;  %v2018_v46 = vpop.eup %2017  ;;  %v1054_v36 = vmul.f32 %v2016_v6, %v2390_v29  ;;  %2037 = vrcp.f32 %v928_v37  ;;  %v647_v52 = vmax.f32 %v2639_v59, -30.0 }
 0x134   :  { %2961 = vst [vmem:[#allocation11_spill] sm:$0xff] %v2643_v5  ;;  %v2650_v1 = vpop.f32.mrb[31].mxu0  ;;  %v2652_v16 = vpop.f32.mrb[31].mxu1  ;;  %v1020_v55 = vmul.f32 %v2018_v46, %v2398_v56  ;;  %2039 = vrcp.f32 %v901_v58  ;;  %v2658_v5 = vadd.f32 %v2482_v4, %v2339_v40  ;;  %v859_v33 = vmul.f32 1.442695, %v745_v41 }
 0x135   :  { %2962 = vst [vmem:[#allocation12_spill] sm:$0xff] %v2652_v16  ;;  %v2020_v57 = vpop.eup %2019  ;;  %v1670_v37 = vpack.c.bf16 %v1054_v36, %v2544_v48  ;;  %2041 = vpow2.f32 %v2578_v11  ;;  %v711_v58 = vsub.f32 0.0, %v647_v52  ;;  %v679_v48 = vmax.f32 %v2648_v23, -30.0 }
 0x136   :  { %v2022_v29 = vpop.eup %2021  ;;  %v1052_v62 = vmul.f32 %v2020_v57, %v2405_v61  ;;  %v1585_v16 = vpack.c.bf16 %v1020_v55, %v2559_v35  ;;  %2043 = vpow2.f32 %v2585_v31  ;;  %v650_v31 = vmax.f32 %v2658_v5, -30.0 }
 0x137   :  { %v2024_v6 = vpop.eup %2023  ;;  %v1025_v56 = vmul.f32 %v2022_v29, %v2409_v2  ;;  %1750 = vst [vmem:[%s2951_s3 + $0x98] sm:$0xff] %v1670_v37   ;;  %2045 = vpow2.f32 %v2595_v32  ;;  %v791_v35 = vmul.f32 1.442695, %v711_v58  ;;  %v2685_v32 = vadd.f32 %v2484_v43, %v2339_v40 }
 0x138   :  { %v2026_v46 = vpop.eup %2025  ;;  %v1665_v4 = vpack.c.bf16 %v1052_v62, %v2569_v39  ;;  %v1057_v61 = vmul.f32 %v2024_v6, %v2412_v3  ;;  %1733 = vst [vmem:[%s2951_s3 + $0x10] sm:$0xff] %v1585_v16   ;;  %2047 = vpow2.f32 %v2610_v10  ;;  %v743_v39 = vsub.f32 0.0, %v679_v48 }
 0x139   :  { %v2028_v11 = vpop.eup %2027  ;;  %v1023_v2 = vmul.f32 %v2026_v46, %v2416_v9  ;;  %2049 = vpow2.f32 %v785_v51  ;;  %v714_v10 = vsub.f32 0.0, %v650_v31  ;;  %v2690_v16 = vadd.f32 %v2339_v40, %v2494_v20 }
 0x13a   :  { %v2030_v36 = vpop.eup %2029  ;;  %1749 = vst [vmem:[%s2951_s3 + $0x90] sm:$0xff] %v1665_v4   ;;  %v1055_v3 = vmul.f32 %v2028_v11, %v2440_v50  ;;  %2051 = vpow2.f32 %v849_v15  ;;  %v855_v52 = vmul.f32 1.442695, %v743_v39  ;;  %v682_v50 = vmax.f32 %v2685_v32, -30.0 }
 0x13b   :  { %v2032_v41 = vpop.eup %2031  ;;  %v1026_v9 = vmul.f32 %v2030_v36, %v2447_v0  ;;  %2053 = vpow2.f32 %v795_v22  ;;  %v797_v37 = vmul.f32 1.442695, %v714_v10  ;;  %v648_v20 = vmax.f32 %v2690_v16, -30.0 }
 0x13c   :  { %v2034_v57 = vpop.eup %2033  ;;  %v933_v55 = vadd.f32 1.0, %v2032_v41  ;;  %2055 = vpow2.f32 %v859_v33  ;;  %v746_v15 = vsub.f32 0.0, %v682_v50 }
 0x13d   :  { %v2036_v51 = vpop.eup %2035  ;;  %v1600_v29 = vpack.c.bf16 %v1026_v9, %v1025_v56  ;;  %v1058_v43 = vmul.f32 %v2034_v57, %v2455_v63  ;;  %v2702_v63 = vadd.f32 %v2339_v40, %v2496_v21 }
 0x13e   :  { %v2038_v62 = vpop.eup %2037  ;;  %v1024_v0 = vmul.f32 %v2036_v51, %v2458_v12  ;;  %2057 = vrcp.f32 %v933_v55  ;;  %v861_v46 = vmul.f32 1.442695, %v746_v15 }
 0x13f   :  { %v2040_v6 = vpop.eup %2039  ;;  %1736 = vst [vmem:[%s2951_s3 + $0x28] sm:$0xff] %v1600_v29   ;;  %v1680_v22 = vpack.c.bf16 %v1058_v43, %v1057_v61  ;;  %v1056_v58 = vmul.f32 %v2038_v62, %v2480_v14  ;;  %2059 = vpow2.f32 %v791_v35  ;;  %v712_v14 = vsub.f32 0.0, %v648_v20 }
 0x140   :  { %v2042_v33 = vpop.eup %2041  ;;  %v1595_v56 = vpack.c.bf16 %v1024_v0, %v1023_v2  ;;  %v2705_v12 = vmul.f32 %v2040_v6, %v2492_v44  ;;  %2061 = vpow2.f32 %v855_v52  ;;  %v680_v44 = vmax.f32 %v2702_v63, -30.0 }
 0x141   :  { %v2044_v4 = vpop.eup %2043  ;;  %1752 = vst [vmem:[%s2951_s3 + $0xa8] sm:$0xff] %v1680_v22   ;;  %v1675_v61 = vpack.c.bf16 %v1056_v58, %v1055_v3  ;;  %v899_v48 = vadd.f32 1.0, %v2042_v33  ;;  %2063 = vpow2.f32 %v797_v37  ;;  %v2716_v2 = vadd.f32 %v2519_v54, %v2339_v40 }
 0x142   :  { %v2046_v11 = vpop.eup %2045  ;;  %1735 = vst [vmem:[%s2951_s3 + $0x20] sm:$0xff] %v1595_v56   ;;  %v931_v21 = vadd.f32 1.0, %v2044_v4  ;;  %2065 = vpow2.f32 %v861_v46  ;;  %v793_v36 = vmul.f32 1.442695, %v712_v14  ;;  %v2723_v3 = vadd.f32 %v2521_v38, %v2339_v40 }
 0x143   :  { %v2048_v35 = vpop.eup %2047  ;;  %1751 = vst [vmem:[%s2951_s3 + $0xa0] sm:$0xff] %v1675_v61   ;;  %2067 = vrcp.f32 %v899_v48  ;;  %v902_v31 = vadd.f32 1.0, %v2046_v11  ;;  %v744_v9 = vsub.f32 0.0, %v680_v44  ;;  %v653_v10 = vmax.f32 %v2716_v2, -30.0 }
 0x144   :  { %v2050_v39 = vpop.eup %2049  ;;  %2069 = vrcp.f32 %v931_v21  ;;  %v934_v41 = vadd.f32 1.0, %v2048_v35  ;;  %v685_v55 = vmax.f32 %v2723_v3, -30.0  ;;  %v2729_v52 = vadd.f32 %v2339_v40, %v2526_v25 }
 0x145   :  { %v2052_v54 = vpop.eup %2051  ;;  %2071 = vrcp.f32 %v902_v31  ;;  %v900_v57 = vadd.f32 1.0, %v2050_v39  ;;  %v857_v38 = vmul.f32 1.442695, %v744_v9  ;;  %v717_v29 = vsub.f32 0.0, %v653_v10 }
 0x146   :  { %v2054_v50 = vpop.eup %2053  ;;  %2073 = vrcp.f32 %v934_v41  ;;  %v932_v51 = vadd.f32 1.0, %v2052_v54  ;;  %v749_v62 = vsub.f32 0.0, %v685_v55  ;;  %v651_v0 = vmax.f32 %v2729_v52, -30.0 }
 0x147   :  { %v2056_v43 = vpop.eup %2055  ;;  %2075 = vrcp.f32 %v900_v57  ;;  %v905_v37 = vadd.f32 1.0, %v2054_v50  ;;  %v803_v6 = vmul.f32 1.442695, %v717_v29  ;;  %v2734_v22 = vadd.f32 %v2339_v40, %v2528_v8 }
 0x148   :  { %v2058_v15 = vpop.eup %2057  ;;  %2077 = vrcp.f32 %v932_v51  ;;  %v937_v20 = vadd.f32 1.0, %v2056_v43  ;;  %v867_v33 = vmul.f32 1.442695, %v749_v62  ;;  %v715_v56 = vsub.f32 0.0, %v651_v0 }
 0x149   :  { %v2060_v25 = vpop.eup %2059  ;;  %v1061_v58 = vmul.f32 %v2058_v15, %v2503_v47  ;;  %2079 = vrcp.f32 %v905_v37  ;;  %v683_v61 = vmax.f32 %v2734_v22, -30.0  ;;  %v2740_v48 = vadd.f32 %v2536_v34, %v2339_v40 }
 0x14a   :  { %v2062_v46 = vpop.eup %2061  ;;  %2081 = vrcp.f32 %v937_v20  ;;  %v903_v4 = vadd.f32 1.0, %v2060_v25  ;;  %v799_v8 = vmul.f32 1.442695, %v715_v56  ;;  %v2744_v21 = vadd.f32 %v2538_v17, %v2339_v40 }
 0x14b   :  { %v2064_v14 = vpop.eup %2063  ;;  %v935_v11 = vadd.f32 1.0, %v2062_v46  ;;  %2083 = vpow2.f32 %v793_v36  ;;  %v747_v35 = vsub.f32 0.0, %v683_v61  ;;  %v654_v31 = vmax.f32 %v2740_v48, -30.0 }
 0x14c   :  { %v2066_v47 = vpop.eup %2065  ;;  %2085 = vrcp.f32 %v903_v4  ;;  %v906_v44 = vadd.f32 1.0, %v2064_v14  ;;  %v686_v34 = vmax.f32 %v2744_v21, -30.0  ;;  %v2750_v9 = vadd.f32 %v2339_v40, %v2551_v45 }
 0x14d   :  { %v2068_v39 = vpop.eup %2067  ;;  %2087 = vrcp.f32 %v935_v11  ;;  %v938_v41 = vadd.f32 1.0, %v2066_v47  ;;  %v863_v17 = vmul.f32 1.442695, %v747_v35  ;;  %v718_v54 = vsub.f32 0.0, %v654_v31  ;;  %v2965_v31 = vld [vmem:[#allocation4_spill] sm:$0xff] }
 0x14e   :  { %v2070_v36 = vpop.eup %2069  ;;  %v1027_v10 = vmul.f32 %v2068_v39, %v2510_v27  ;;  %2089 = vrcp.f32 %v906_v44  ;;  %v750_v50 = vsub.f32 0.0, %v686_v34  ;;  %v652_v51 = vmax.f32 %v2750_v9, -30.0 }
 0x14f   :  { %v2072_v57 = vpop.eup %2071  ;;  %v1059_v55 = vmul.f32 %v2070_v36, %v2549_v19  ;;  %2091 = vrcp.f32 %v938_v41  ;;  %v805_v37 = vmul.f32 1.442695, %v718_v54  ;;  %v2758_v45 = vadd.f32 %v2339_v40, %v2553_v26 }
 0x150   :  { %v2074_v29 = vpop.eup %2073  ;;  %v1030_v43 = vmul.f32 %v2072_v57, %v2566_v42  ;;  %2093 = vpow2.f32 %v857_v38  ;;  %v869_v0 = vmul.f32 1.442695, %v750_v50  ;;  %v716_v15 = vsub.f32 0.0, %v652_v51 }
 0x151   :  { %v2076_v27 = vpop.eup %2075  ;;  %v1062_v62 = vmul.f32 %v2074_v29, %v2576_v7  ;;  %2095 = vpow2.f32 %v803_v6  ;;  %v684_v42 = vmax.f32 %v2758_v45, -30.0 }
 0x152   :  { %v2078_v19 = vpop.eup %2077  ;;  %v1610_v20 = vpack.c.bf16 %v1030_v43, %v2705_v12  ;;  %v1028_v25 = vmul.f32 %v2076_v27, %v2589_v49  ;;  %2097 = vpow2.f32 %v867_v33  ;;  %v801_v40 = vmul.f32 1.442695, %v716_v15  ;;  %v2963_v33 = vld [vmem:[#allocation2_spill] sm:$0xff] }
 0x153   :  { %v2080_v38 = vpop.eup %2079  ;;  %v1690_v56 = vpack.c.bf16 %v1062_v62, %v1061_v58  ;;  %v1060_v46 = vmul.f32 %v2078_v19, %v2604_v24  ;;  %2099 = vpow2.f32 %v799_v8  ;;  %v748_v6 = vsub.f32 0.0, %v684_v42  ;;  %v2775_v24 = vld [vmem:[%s2950_s2] ss:$0 sm:$0xff]  ;;  %v2964_v8 = vld [vmem:[#allocation3_spill] sm:$0xff] }
 0x154   :  { %v2082_v26 = vpop.eup %2081  ;;  %1738 = vst [vmem:[%s2951_s3 + $0x38] sm:$0xff] %v1610_v20   ;;  %v1605_v7 = vpack.c.bf16 %v1028_v25, %v1027_v10  ;;  %2101 = vpow2.f32 %v863_v17  ;;  %v1033_v58 = vmul.f32 %v2080_v38, %v2614_v13  ;;  %v2779_v4 = vadd.f32 %v2775_v24, %v2963_v33  ;;  %v2966_v10 = vld [vmem:[#allocation5_spill] sm:$0xff]  ;;  %v2967_v43 = vld [vmem:[#allocation6_spill] sm:$0xff] }
 0x155   :  { %v2084_v12 = vpop.eup %2083  ;;  %1754 = vst [vmem:[%s2951_s3 + $0xb8] sm:$0xff] %v1690_v56   ;;  %v1685_v49 = vpack.c.bf16 %v1060_v46, %v1059_v55  ;;  %2103 = vpow2.f32 %v805_v37  ;;  %v865_v11 = vmul.f32 1.442695, %v748_v6  ;;  %v2786_v13 = vadd.f32 %v2775_v24, %v2964_v8  ;;  %v2968_v6 = vld [vmem:[#allocation7_spill] sm:$0xff] }
 0x156   :  { %v2086_v61 = vpop.eup %2085  ;;  %1737 = vst [vmem:[%s2951_s3 + $0x30] sm:$0xff] %v1605_v7   ;;  %v904_v14 = vadd.f32 1.0, %v2084_v12  ;;  %2105 = vpow2.f32 %v869_v0  ;;  %v1065_v44 = vmul.f32 %v2082_v26, %v2621_v53  ;;  %v657_v35 = vmax.f32 %v2779_v4, -30.0 }
 0x157   :  { %v2088_v47 = vpop.eup %2087  ;;  %1753 = vst [vmem:[%s2951_s3 + $0xb0] sm:$0xff] %v1685_v49   ;;  %2107 = vpow2.f32 %v801_v40  ;;  %v2795_v39 = vadd.f32 %v2775_v24, %v2965_v31  ;;  %v2798_v34 = vmul.f32 %v2086_v61, %v2639_v59  ;;  %v689_v36 = vmax.f32 %v2786_v13, -30.0  ;;  %v2969_v61 = vld [vmem:[#allocation8_spill] sm:$0xff] }
 0x158   :  { %v2090_v41 = vpop.eup %2089  ;;  %2109 = vrcp.f32 %v904_v14  ;;  %v2803_v17 = vadd.f32 %v2775_v24, %v2966_v10  ;;  %v721_v57 = vsub.f32 0.0, %v657_v35  ;;  %v2811_v37 = vadd.f32 %v2775_v24, %v2967_v43 }
 0x159   :  { %v2092_v54 = vpop.eup %2091  ;;  %v1034_v53 = vmul.f32 %v2090_v41, %v2658_v5  ;;  %2111 = vpow2.f32 %v865_v11  ;;  %v655_v55 = vmax.f32 %v2795_v39, -30.0  ;;  %v753_v29 = vsub.f32 0.0, %v689_v36 }
 0x15a   :  { %v2094_v50 = vpop.eup %2093  ;;  %v1066_v51 = vmul.f32 %v2092_v54, %v2685_v32  ;;  %v687_v59 = vmax.f32 %v2803_v17, -30.0  ;;  %v2814_v62 = vmul.f32 %v2088_v47, %v2648_v23  ;;  %v811_v42 = vmul.f32 1.442695, %v721_v57 }
 0x15b   :  { %v2096_v27 = vpop.eup %2095  ;;  %v1620_v0 = vpack.c.bf16 %v1034_v53, %v1033_v58  ;;  %v936_v5 = vadd.f32 1.0, %v2094_v50  ;;  %v719_v15 = vsub.f32 0.0, %v655_v55  ;;  %v875_v38 = vmul.f32 1.442695, %v753_v29 }
 0x15c   :  { %v2098_v19 = vpop.eup %2097  ;;  %v1700_v20 = vpack.c.bf16 %v1066_v51, %v1065_v44  ;;  %v909_v25 = vadd.f32 1.0, %v2096_v27  ;;  %v751_v46 = vsub.f32 0.0, %v687_v59  ;;  %v658_v40 = vmax.f32 %v2811_v37, -30.0  ;;  %v2970_v44 = vld [vmem:[#allocation9_spill] sm:$0xff] }
 0x15d   :  { %v2100_v32 = vpop.eup %2099  ;;  %1740 = vst [vmem:[%s2951_s3 + $0x48] sm:$0xff] %v1620_v0   ;;  %2113 = vrcp.f32 %v936_v5  ;;  %v941_v56 = vadd.f32 1.0, %v2098_v19  ;;  %v807_v7 = vmul.f32 1.442695, %v719_v15  ;;  %v2825_v12 = vadd.f32 %v2775_v24, %v2968_v6 }
 0x15e   :  { %v2102_v23 = vpop.eup %2101  ;;  %1756 = vst [vmem:[%s2951_s3 + $0xc8] sm:$0xff] %v1700_v20   ;;  %2115 = vrcp.f32 %v909_v25  ;;  %v907_v26 = vadd.f32 1.0, %v2100_v32  ;;  %v722_v33 = vsub.f32 0.0, %v658_v40  ;;  %v2829_v14 = vadd.f32 %v2775_v24, %v2969_v61 }
 0x15f   :  { %v2104_v49 = vpop.eup %2103  ;;  %2117 = vrcp.f32 %v941_v56  ;;  %v939_v58 = vadd.f32 1.0, %v2102_v23  ;;  %v690_v47 = vmax.f32 %v2825_v12, -30.0  ;;  %v2834_v35 = vadd.f32 %v2775_v24, %v2970_v44 }
 0x160   :  { %v2106_v11 = vpop.eup %2105  ;;  %2119 = vrcp.f32 %v907_v26  ;;  %v910_v8 = vadd.f32 1.0, %v2104_v49  ;;  %v871_v36 = vmul.f32 1.442695, %v751_v46  ;;  %v656_v10 = vmax.f32 %v2829_v14, -30.0 }
 0x161   :  { %v2108_v31 = vpop.eup %2107  ;;  %2121 = vrcp.f32 %v939_v58  ;;  %v942_v41 = vadd.f32 1.0, %v2106_v11  ;;  %v754_v57 = vsub.f32 0.0, %v690_v47  ;;  %v688_v55 = vmax.f32 %v2834_v35, -30.0 }
 0x162   :  { %v2110_v54 = vpop.eup %2109  ;;  %2123 = vrcp.f32 %v910_v8  ;;  %v908_v53 = vadd.f32 1.0, %v2108_v31  ;;  %v720_v29 = vsub.f32 0.0, %v656_v10  ;;  %v2841_v59 = vadd.f32 %v2775_v24, %v2625_v28 }
 0x163   :  { %v2112_v50 = vpop.eup %2111  ;;  %v1032_v51 = vmul.f32 %v2110_v54, %v2690_v16  ;;  %2125 = vrcp.f32 %v942_v41  ;;  %v813_v27 = vmul.f32 1.442695, %v722_v33  ;;  %v877_v0 = vmul.f32 1.442695, %v754_v57 }
 0x164   :  { %2127 = vrcp.f32 %v908_v53  ;;  %v940_v43 = vadd.f32 1.0, %v2112_v50  ;;  %v752_v15 = vsub.f32 0.0, %v688_v55  ;;  %v661_v19 = vmax.f32 %v2841_v59, -30.0  ;;  %v2972_v50 = vld [vmem:[#allocation11_spill] sm:$0xff] }
 0x165   :  { %v1615_v5 = vpack.c.bf16 %v1032_v51, %v2798_v34  ;;  %2129 = vpow2.f32 %v811_v42  ;;  %v809_v20 = vmul.f32 1.442695, %v720_v29  ;;  %v2847_v16 = vadd.f32 %v2775_v24, %v2627_v60  ;;  %v2971_v42 = vld [vmem:[#allocation10_spill] sm:$0xff] }
 0x166   :  { %2131 = vrcp.f32 %v940_v43  ;;  %v2851_v28 = vadd.f32 %v2775_v24, %v2630_v30  ;;  %v725_v34 = vsub.f32 0.0, %v661_v19  ;;  %v2858_v32 = vadd.f32 %v2775_v24, %v2971_v42 }
 0x167   :  { %v2114_v25 = vpop.eup %2113  ;;  %1739 = vst [vmem:[%s2951_s3 + $0x40] sm:$0xff] %v1615_v5   ;;  %2133 = vpow2.f32 %v875_v38  ;;  %v2862_v56 = vadd.f32 %v2775_v24, %v2641_v18  ;;  %v693_v30 = vmax.f32 %v2847_v16, -30.0  ;;  %v873_v38 = vmul.f32 1.442695, %v752_v15  ;;  %v2973_v5 = vld [vmem:[#allocation12_spill] sm:$0xff] }
 0x168   :  { %v2116_v60 = vpop.eup %2115  ;;  %v1064_v46 = vmul.f32 %v2114_v25, %v2702_v63  ;;  %2135 = vpow2.f32 %v807_v7  ;;  %v659_v40 = vmax.f32 %v2851_v28, -30.0  ;;  %v819_v49 = vmul.f32 1.442695, %v725_v34 }
 0x169   :  { %v2118_v23 = vpop.eup %2117  ;;  %2137 = vpow2.f32 %v871_v36  ;;  %v757_v58 = vsub.f32 0.0, %v693_v30  ;;  %v1037_v18 = vmul.f32 %v2116_v60, %v2716_v2  ;;  %v691_v11 = vmax.f32 %v2858_v32, -30.0 }
 0x16a   :  { %v2120_v26 = vpop.eup %2119  ;;  %v1695_v6 = vpack.c.bf16 %v1064_v46, %v2814_v62  ;;  %2139 = vpow2.f32 %v813_v27  ;;  %v723_v61 = vsub.f32 0.0, %v659_v40  ;;  %v662_v8 = vmax.f32 %v2862_v56, -30.0 }
 0x16b   :  { %v2122_v33 = vpop.eup %2121  ;;  %2141 = vpow2.f32 %v877_v0  ;;  %v883_v7 = vmul.f32 1.442695, %v757_v58  ;;  %v1069_v47 = vmul.f32 %v2118_v23, %v2723_v3  ;;  %v1035_v41 = vmul.f32 %v2120_v26, %v2729_v52 }
 0x16c   :  { %v2124_v63 = vpop.eup %2123  ;;  %1755 = vst [vmem:[%s2951_s3 + $0xc0] sm:$0xff] %v1695_v6   ;;  %2143 = vpow2.f32 %v809_v20  ;;  %v815_v2 = vmul.f32 1.442695, %v723_v61  ;;  %v726_v10 = vsub.f32 0.0, %v662_v8  ;;  %v1067_v53 = vmul.f32 %v2122_v33, %v2734_v22 }
 0x16d   :  { %v2126_v62 = vpop.eup %2125  ;;  %v1038_v44 = vmul.f32 %v2124_v63, %v2740_v48  ;;  %2145 = vpow2.f32 %v873_v38  ;;  %v2882_v3 = vadd.f32 %v2775_v24, %v2972_v50  ;;  %v2897_v15 = vadd.f32 %v2775_v24, %v2973_v5 }
 0x16e   :  { %v2128_v31 = vpop.eup %2127  ;;  %v1070_v36 = vmul.f32 %v2126_v62, %v2744_v21  ;;  %2147 = vpow2.f32 %v819_v49  ;;  %v821_v43 = vmul.f32 1.442695, %v726_v10  ;;  %v755_v42 = vsub.f32 0.0, %v691_v11 }
 0x16f   :  { %v2130_v54 = vpop.eup %2129  ;;  %v1630_v57 = vpack.c.bf16 %v1038_v44, %v1037_v18  ;;  %v1036_v55 = vmul.f32 %v2128_v31, %v2750_v9  ;;  %2149 = vpow2.f32 %v883_v7  ;;  %v2890_v9 = vadd.f32 %v2775_v24, %v2650_v1 }
 0x170   :  { %v2132_v48 = vpop.eup %2131  ;;  %v1710_v51 = vpack.c.bf16 %v1070_v36, %v1069_v47  ;;  %v913_v29 = vadd.f32 1.0, %v2130_v54  ;;  %2151 = vpow2.f32 %v815_v2  ;;  %v694_v1 = vmax.f32 %v2882_v3, -30.0 }
 0x171   :  { %v2134_v52 = vpop.eup %2133  ;;  %1742 = vst [vmem:[%s2951_s3 + $0x58] sm:$0xff] %v1630_v57   ;;  %v1625_v21 = vpack.c.bf16 %v1036_v55, %v1035_v41  ;;  %v1068_v22 = vmul.f32 %v2132_v48, %v2758_v45  ;;  %v660_v46 = vmax.f32 %v2890_v9, -30.0  ;;  %v692_v23 = vmax.f32 %v2897_v15, -30.0 }
 0x172   :  { %v2136_v27 = vpop.eup %2135  ;;  %1758 = vst [vmem:[%s2951_s3 + $0xd8] sm:$0xff] %v1710_v51   ;;  %2153 = vrcp.f32 %v913_v29  ;;  %v945_v0 = vadd.f32 1.0, %v2134_v52  ;;  %v758_v6 = vsub.f32 0.0, %v694_v1  ;;  %v879_v33 = vmul.f32 1.442695, %v755_v42 }
 0x173   :  { %v2138_v19 = vpop.eup %2137  ;;  %1741 = vst [vmem:[%s2951_s3 + $0x50] sm:$0xff] %v1625_v21   ;;  %v1705_v45 = vpack.c.bf16 %v1068_v22, %v1067_v53  ;;  %v911_v20 = vadd.f32 1.0, %v2136_v27  ;;  %2155 = vpow2.f32 %v821_v43  ;;  %v724_v18 = vsub.f32 0.0, %v660_v46 }
 0x174   :  { %v2140_v25 = vpop.eup %2139  ;;  %2157 = vrcp.f32 %v945_v0  ;;  %v943_v34 = vadd.f32 1.0, %v2138_v19  ;;  %v756_v7 = vsub.f32 0.0, %v692_v23  ;;  %v885_v8 = vmul.f32 1.442695, %v758_v6 }
 0x175   :  { %v2142_v60 = vpop.eup %2141  ;;  %1757 = vst [vmem:[%s2951_s3 + $0xd0] sm:$0xff] %v1705_v45   ;;  %2159 = vrcp.f32 %v911_v20  ;;  %v914_v24 = vadd.f32 1.0, %v2140_v25  ;;  %v817_v44 = vmul.f32 1.442695, %v724_v18 }
 0x176   :  { %v2144_v30 = vpop.eup %2143  ;;  %2161 = vrcp.f32 %v943_v34  ;;  %v946_v40 = vadd.f32 1.0, %v2142_v60  ;;  %v881_v41 = vmul.f32 1.442695, %v756_v7 }
 0x177   :  { %v2146_v38 = vpop.eup %2145  ;;  %2163 = vrcp.f32 %v914_v24  ;;  %v912_v26 = vadd.f32 1.0, %v2144_v30 }
 0x178   :  { %v2148_v49 = vpop.eup %2147  ;;  %2165 = vrcp.f32 %v946_v40  ;;  %v944_v58 = vadd.f32 1.0, %v2146_v38 }
 0x179   :  { %2167 = vrcp.f32 %v912_v26  ;;  %v2150_v61 = vpop.eup %2149  ;;  %v917_v63 = vadd.f32 1.0, %v2148_v49 }
 0x17a   :  { %2169 = vrcp.f32 %v944_v58  ;;  %v2152_v11 = vpop.eup %2151 }
 0x17b   :  { %2171 = vpow2.f32 %v879_v33 }
 0x17c   :  { %v2154_v62 = vpop.eup %2153  ;;  %2173 = vrcp.f32 %v917_v63 }
 0x17d   :  { %v2156_v47 = vpop.eup %2155  ;;  %2175 = vpow2.f32 %v885_v8  ;;  %v1041_v57 = vmul.f32 %v2154_v62, %v2779_v4 }
 0x17e   :  { %v2158_v2 = vpop.eup %2157  ;;  %v918_v31 = vadd.f32 1.0, %v2156_v47 }
 0x17f   :  { %v2160_v36 = vpop.eup %2159  ;;  %v1073_v48 = vmul.f32 %v2158_v2, %v2786_v13  ;;  %v949_v13 = vadd.f32 1.0, %v2150_v61 }
 0x180   :  { %v2162_v10 = vpop.eup %2161  ;;  %2177 = vrcp.f32 %v918_v31  ;;  %v1039_v43 = vmul.f32 %v2160_v36, %v2795_v39 }
 0x181   :  { %v2164_v54 = vpop.eup %2163  ;;  %2179 = vpow2.f32 %v817_v44  ;;  %v1071_v22 = vmul.f32 %v2162_v10, %v2803_v17 }
 0x182   :  { %v2166_v53 = vpop.eup %2165  ;;  %v1042_v55 = vmul.f32 %v2164_v54, %v2811_v37  ;;  %2181 = vpow2.f32 %v881_v41 }
 0x183   :  { %v2168_v50 = vpop.eup %2167  ;;  %v1074_v51 = vmul.f32 %v2166_v53, %v2825_v12  ;;  %v915_v12 = vadd.f32 1.0, %v2152_v11  ;;  %2183 = vrcp.f32 %v949_v13 }
 0x184   :  { %v2170_v29 = vpop.eup %2169  ;;  %v1640_v52 = vpack.c.bf16 %v1042_v55, %v1041_v57  ;;  %v1040_v21 = vmul.f32 %v2168_v50, %v2829_v14 }
 0x185   :  { %v1720_v27 = vpack.c.bf16 %v1074_v51, %v1073_v48  ;;  %v1072_v0 = vmul.f32 %v2170_v29, %v2834_v35  ;;  %v2172_v4 = vpop.eup %2171  ;;  %2185 = vrcp.f32 %v915_v12 }
 0x186   :  { %1744 = vst [vmem:[%s2951_s3 + $0x68] sm:$0xff] %v1640_v52   ;;  %v1635_v37 = vpack.c.bf16 %v1040_v21, %v1039_v43  ;;  %v2174_v5 = vpop.eup %2173  ;;  %v947_v14 = vadd.f32 1.0, %v2172_v4 }
 0x187   :  { %1760 = vst [vmem:[%s2951_s3 + $0xe8] sm:$0xff] %v1720_v27   ;;  %v1715_v39 = vpack.c.bf16 %v1072_v0, %v1071_v22  ;;  %v2176_v17 = vpop.eup %2175  ;;  %v1045_v20 = vmul.f32 %v2174_v5, %v2841_v59 }
 0x188   :  { %1743 = vst [vmem:[%s2951_s3 + $0x60] sm:$0xff] %v1635_v37   ;;  %v950_v19 = vadd.f32 1.0, %v2176_v17 }
 0x189   :  { %1759 = vst [vmem:[%s2951_s3 + $0xe0] sm:$0xff] %v1715_v39  }
 0x18a   :  { %v2178_v35 = vpop.eup %2177  ;;  %2187 = vrcp.f32 %v950_v19 }
 0x18b   :  { %v2180_v45 = vpop.eup %2179  ;;  %v1046_v1 = vmul.f32 %v2178_v35, %v2862_v56  ;;  %2189 = vrcp.f32 %v947_v14 }
 0x18c   :  { %v2182_v25 = vpop.eup %2181  ;;  %v916_v34 = vadd.f32 1.0, %v2180_v45 }
 0x18d   :  { %v1650_v42 = vpack.c.bf16 %v1046_v1, %v1045_v20  ;;  %v948_v60 = vadd.f32 1.0, %v2182_v25  ;;  %v2184_v24 = vpop.eup %2183 }
 0x18e   :  { %2191 = vrcp.f32 %v916_v34  ;;  %v1077_v59 = vmul.f32 %v2184_v24, %v2847_v16 }
 0x18f   :  { %1746 = vst [vmem:[%s2951_s3 + $0x78] sm:$0xff] %v1650_v42   ;;  %2193 = vrcp.f32 %v948_v60  ;;  %v2186_v46 = vpop.eup %2185 }
 0x190   :  { %v1043_v26 = vmul.f32 %v2186_v46, %v2851_v28 }
 0x194   :  { %v2188_v30 = vpop.eup %2187 }
 0x195   :  { %v2190_v40 = vpop.eup %2189  ;;  %v1078_v56 = vmul.f32 %v2188_v30, %v2882_v3 }
 0x196   :  { %v1075_v58 = vmul.f32 %v2190_v40, %v2858_v32 }
 0x197   :  { %v1730_v6 = vpack.c.bf16 %v1078_v56, %v1077_v59 }
 0x198   :  { %v2192_v23 = vpop.eup %2191 }
 0x199   :  { %v2194_v38 = vpop.eup %2193  ;;  %v1044_v49 = vmul.f32 %v2192_v23, %v2890_v9  ;;  %1762 = vst [vmem:[%s2951_s3 + $0xf8] sm:$0xff] %v1730_v6  }
 0x19a   :  { %v1076_v33 = vmul.f32 %v2194_v38, %v2897_v15 }
 0x19b   :  { %v1645_v18 = vpack.c.bf16 %v1044_v49, %v1043_v26 }
 0x19c   :  { %v1725_v61 = vpack.c.bf16 %v1076_v33, %v1075_v58 }
 0x19d   :  { %1745 = vst [vmem:[%s2951_s3 + $0x70] sm:$0xff] %v1645_v18  }
 0x19e   :  { %1761 = vst [vmem:[%s2951_s3 + $0xf0] sm:$0xff] %v1725_v61  }

// kernel: _lambda_.61
= control target key start
LH: loop header
LB: loop body
LE: loop exit
PB: predicated region body
PF: predicated region fallthrough
CT: control target
= control target key end

     0   :  { %vm282_vm0 = vcmask 588800   ;;  %vm379_vm1 = vcmask 1043456   ;;  %s3025_s1 = inlined_call_operand.vmem [shape: bf16[72,128], index: 1, kind: input, shape index: {}]   ;;  %s3026_s0 = inlined_call_operand.vmem [shape: bf16[512,72], index: 0, kind: input, shape index: {}]   ;;  %s3027_s2 = inlined_call_operand.vmem [shape: f32[1,128], index: 2, kind: input, shape index: {}]   ;;  %s3028_s3 = inlined_call_operand.vmem [shape: bf16[512,128], index: 3, kind: output, shape index: {}]  }
   0x1   :  { %v1956_v0 = vld [vmem:[%s3025_s1] sm:$0xff]   ;;  %v1957_v1 = vld [vmem:[%s3025_s1 + $0x8] sm:$0xff]   ;;  %v1958_v2 = vld [vmem:[%s3025_s1 + $0x10] sm:$0xff]  }
   0x2   :  { %1870 = vmatprep.subr.bf16.mxu0 %v1956_v0  ;;  %1944 = vmatprep.subr.bf16.mxu1 %v1956_v0  ;;  %v1961_v3 = vld [vmem:[%s3026_s0] sm:$0xff]   ;;  %v1959_v5 = vld [vmem:[%s3025_s1 + $0x18] sm:$0xff]   ;;  %v1963_v8 = vld [vmem:[%s3026_s0 + $0x8] sm:$0xff]  }
   0x3   :  { %1871 = vmatpush3.bf16.msra.mxu0 %v1956_v0  ;;  %1949 = vmatpush3.bf16.msra.mxu1 %v1956_v0  ;;  %v1962_v4 = vld [vmem:[%s3026_s0 + $0x80] sm:$0xff]   ;;  %v1964_v9 = vld [vmem:[%s3026_s0 + $0x88] sm:$0xff]   ;;  %v1965_v10 = vld [vmem:[%s3026_s0 + $0x10] sm:$0xff]  }
   0x4   :  { %1872 = vmatprep.subr.bf16.mxu0 %v1957_v1  ;;  %1945 = vmatprep.subr.bf16.mxu1 %v1957_v1  ;;  %v1960_v6 = vld [vmem:[%s3025_s1 + $0x20] ss:$0 sps:$4 sm:$0xff]   ;;  %v1966_v11 = vld [vmem:[%s3026_s0 + $0x90] sm:$0xff]   ;;  %v1967_v12 = vld [vmem:[%s3026_s0 + $0x18] sm:$0xff]  }
   0x5   :  { %1880 = vmatprep.mubr.msk.bf16.mxu0 %vm282_vm0, %v1961_v3  ;;  %1912 = vmatprep.mubr.msk.bf16.mxu1 %vm282_vm0, %v1962_v4  ;;  %v381_v7 = vsel %vm379_vm1, %v1960_v6, 0  ;;  %v1968_v13 = vld [vmem:[%s3026_s0 + $0x98] sm:$0xff]   ;;  %v1969_v14 = vld [vmem:[%s3026_s0 + $0x20] sm:$0xff]   ;;  %v1971_v16 = vld [vmem:[%s3026_s0 + $0x28] sm:$0xff]  }
   0x6   :  { %v1970_v15 = vld [vmem:[%s3026_s0 + $0xa0] sm:$0xff]   ;;  %v1972_v17 = vld [vmem:[%s3026_s0 + $0xa8] sm:$0xff]   ;;  %v1973_v18 = vld [vmem:[%s3026_s0 + $0x30] sm:$0xff]  }
   0x7   :  { %1873 = vmatpush3.bf16.msra.mxu0 %v1957_v1  ;;  %1950 = vmatpush3.bf16.msra.mxu1 %v1957_v1  ;;  %v1974_v19 = vld [vmem:[%s3026_s0 + $0xb0] sm:$0xff]   ;;  %v1975_v20 = vld [vmem:[%s3026_s0 + $0x38] sm:$0xff]   ;;  %v1977_v22 = vld [vmem:[%s3026_s0 + $0x40] sm:$0xff]  }
   0x8   :  { %1874 = vmatprep.subr.bf16.mxu0 %v1958_v2  ;;  %1946 = vmatprep.subr.bf16.mxu1 %v1958_v2  ;;  %v1976_v21 = vld [vmem:[%s3026_s0 + $0xb8] sm:$0xff]   ;;  %v1978_v23 = vld [vmem:[%s3026_s0 + $0xc0] sm:$0xff]   ;;  %v1979_v24 = vld [vmem:[%s3026_s0 + $0x48] sm:$0xff]  }
   0x9   :  { %v1980_v25 = vld [vmem:[%s3026_s0 + $0xc8] sm:$0xff]   ;;  %v1981_v26 = vld [vmem:[%s3026_s0 + $0x50] sm:$0xff]   ;;  %v1983_v28 = vld [vmem:[%s3026_s0 + $0x58] sm:$0xff]  }
   0xa   :  { %v1982_v27 = vld [vmem:[%s3026_s0 + $0xd0] sm:$0xff]   ;;  %v1984_v29 = vld [vmem:[%s3026_s0 + $0xd8] sm:$0xff]   ;;  %v1985_v30 = vld [vmem:[%s3026_s0 + $0x60] sm:$0xff]  }
   0xb   :  { %1875 = vmatpush3.bf16.msra.mxu0 %v1958_v2  ;;  %1951 = vmatpush3.bf16.msra.mxu1 %v1958_v2  ;;  %v1986_v31 = vld [vmem:[%s3026_s0 + $0xe0] sm:$0xff]   ;;  %v1987_v32 = vld [vmem:[%s3026_s0 + $0x68] sm:$0xff]   ;;  %v1989_v34 = vld [vmem:[%s3026_s0 + $0x70] sm:$0xff]  }
   0xc   :  { %1876 = vmatprep.subr.bf16.mxu0 %v1959_v5  ;;  %1947 = vmatprep.subr.bf16.mxu1 %v1959_v5  ;;  %v1988_v33 = vld [vmem:[%s3026_s0 + $0xe8] sm:$0xff]   ;;  %v1990_v35 = vld [vmem:[%s3026_s0 + $0xf0] sm:$0xff]   ;;  %v1991_v36 = vld [vmem:[%s3026_s0 + $0x78] sm:$0xff]  }
   0xd   :  { %v1992_v37 = vld [vmem:[%s3026_s0 + $0xf8] sm:$0xff]   ;;  %v2416_v38 = vld [vmem:[%s3027_s2] ss:$0 sm:$0xff] }
   0xf   :  { %1877 = vmatpush3.bf16.msra.mxu0 %v1959_v5  ;;  %1952 = vmatpush3.bf16.msra.mxu1 %v1959_v5 }
  0x10   :  { %1954 = vmatprep.subr.msk.bf16.mxu0 %vm379_vm1, %v1960_v6  ;;  %1955 = vmatprep.subr.msk.bf16.mxu1 %vm379_vm1, %v1960_v6 }
  0x13   :  { %1879 = vmatpush3.bf16.msra.mxu0 %v381_v7  ;;  %1953 = vmatpush3.bf16.msra.mxu1 %v381_v7 }
  0x16   :  { %1881 = vmatmul.mubr.msk.bf16.vlgmr.msra.gmra.mrb[0].mxu0 %vm282_vm0, %v1963_v8  ;;  %1913 = vmatmul.mubr.msk.bf16.vlgmr.msra.gmra.mrb[0].mxu1 %vm282_vm0, %v1964_v9 }
  0x17   :  { %1884 = vmatprep.mubr.msk.bf16.mxu0 %vm282_vm0, %v1965_v10  ;;  %1916 = vmatprep.mubr.msk.bf16.mxu1 %vm282_vm0, %v1966_v11 }
  0x1e   :  { %1885 = vmatmul.mubr.msk.bf16.gmra.mrb[4].mxu0 %vm282_vm0, %v1967_v12  ;;  %1917 = vmatmul.mubr.msk.bf16.gmra.mrb[4].mxu1 %vm282_vm0, %v1968_v13 }
  0x1f   :  { %1888 = vmatprep.mubr.msk.bf16.mxu0 %vm282_vm0, %v1969_v14  ;;  %1920 = vmatprep.mubr.msk.bf16.mxu1 %vm282_vm0, %v1970_v15 }
  0x26   :  { %1889 = vmatmul.mubr.msk.bf16.gmra.mrb[8].mxu0 %vm282_vm0, %v1971_v16  ;;  %1921 = vmatmul.mubr.msk.bf16.gmra.mrb[8].mxu1 %vm282_vm0, %v1972_v17 }
  0x27   :  { %1892 = vmatprep.mubr.msk.bf16.mxu0 %vm282_vm0, %v1973_v18  ;;  %1924 = vmatprep.mubr.msk.bf16.mxu1 %vm282_vm0, %v1974_v19 }
  0x2e   :  { %1893 = vmatmul.mubr.msk.bf16.gmra.mrb[12].mxu0 %vm282_vm0, %v1975_v20  ;;  %1925 = vmatmul.mubr.msk.bf16.gmra.mrb[12].mxu1 %vm282_vm0, %v1976_v21 }
  0x2f   :  { %1896 = vmatprep.mubr.msk.bf16.mxu0 %vm282_vm0, %v1977_v22  ;;  %1928 = vmatprep.mubr.msk.bf16.mxu1 %vm282_vm0, %v1978_v23 }
  0x36   :  { %1897 = vmatmul.mubr.msk.bf16.gmra.mrb[16].mxu0 %vm282_vm0, %v1979_v24  ;;  %1929 = vmatmul.mubr.msk.bf16.gmra.mrb[16].mxu1 %vm282_vm0, %v1980_v25 }
  0x37   :  { %1900 = vmatprep.mubr.msk.bf16.mxu0 %vm282_vm0, %v1981_v26  ;;  %1932 = vmatprep.mubr.msk.bf16.mxu1 %vm282_vm0, %v1982_v27 }
  0x3e   :  { %1901 = vmatmul.mubr.msk.bf16.gmra.mrb[20].mxu0 %vm282_vm0, %v1983_v28  ;;  %1933 = vmatmul.mubr.msk.bf16.gmra.mrb[20].mxu1 %vm282_vm0, %v1984_v29 }
  0x3f   :  { %1904 = vmatprep.mubr.msk.bf16.mxu0 %vm282_vm0, %v1985_v30  ;;  %1936 = vmatprep.mubr.msk.bf16.mxu1 %vm282_vm0, %v1986_v31 }
  0x46   :  { %1905 = vmatmul.mubr.msk.bf16.gmra.mrb[24].mxu0 %vm282_vm0, %v1987_v32  ;;  %1937 = vmatmul.mubr.msk.bf16.gmra.mrb[24].mxu1 %vm282_vm0, %v1988_v33 }
  0x47   :  { %1908 = vmatprep.mubr.msk.bf16.mxu0 %vm282_vm0, %v1989_v34  ;;  %1940 = vmatprep.mubr.msk.bf16.mxu1 %vm282_vm0, %v1990_v35 }
  0x4e   :  { %1909 = vmatmul.mubr.msk.bf16.gmra.mrb[28].mxu0 %vm282_vm0, %v1991_v36  ;;  %1941 = vmatmul.mubr.msk.bf16.gmra.mrb[28].mxu1 %vm282_vm0, %v1992_v37 }
  0xe9   :  { %v1882_v39 = vpop.f32.mrb[0].mxu0  ;;  %v1914_v40 = vpop.f32.mrb[0].mxu1 }
  0xea   :  { %v2419_v41 = vadd.f32 %v1882_v39, %v2416_v38  ;;  %v2422_v42 = vadd.f32 %v1914_v40, %v2416_v38  ;;  %v417_v43 = vpop.f32.mrb[1].mxu0  ;;  %v545_v44 = vpop.f32.mrb[1].mxu1 }
  0xeb   :  { %v2425_v45 = vadd.f32 %v2416_v38, %v417_v43  ;;  %v2428_v46 = vadd.f32 %v2416_v38, %v545_v44  ;;  %v1883_v47 = vpop.f32.mrb[2].mxu0  ;;  %v1915_v48 = vpop.f32.mrb[2].mxu1 }
  0xec   :  { %v674_v49 = vmax.f32 %v2419_v41, -30.0  ;;  %v706_v50 = vmax.f32 %v2422_v42, -30.0  ;;  %v2433_v51 = vadd.f32 %v1883_v47, %v2416_v38  ;;  %v2436_v52 = vadd.f32 %v1915_v48, %v2416_v38  ;;  %v420_v53 = vpop.f32.mrb[3].mxu0  ;;  %v548_v54 = vpop.f32.mrb[3].mxu1 }
  0xed   :  { %v672_v55 = vmax.f32 %v2425_v45, -30.0  ;;  %v704_v56 = vmax.f32 %v2428_v46, -30.0  ;;  %v2441_v57 = vadd.f32 %v2416_v38, %v420_v53  ;;  %v2444_v58 = vadd.f32 %v2416_v38, %v548_v54 }
  0xee   :  { %v738_v59 = vsub.f32 0.0, %v674_v49  ;;  %v770_v60 = vsub.f32 0.0, %v706_v50  ;;  %v675_v61 = vmax.f32 %v2433_v51, -30.0  ;;  %v707_v62 = vmax.f32 %v2436_v52, -30.0 }
  0xef   :  { %v736_v63 = vsub.f32 0.0, %v672_v55  ;;  %v768_v0 = vsub.f32 0.0, %v704_v56  ;;  %v673_v1 = vmax.f32 %v2441_v57, -30.0  ;;  %v705_v2 = vmax.f32 %v2444_v58, -30.0 }
  0xf0   :  { %v804_v3 = vmul.f32 1.442695, %v738_v59  ;;  %v868_v4 = vmul.f32 1.442695, %v770_v60  ;;  %v739_v5 = vsub.f32 0.0, %v675_v61  ;;  %v771_v6 = vsub.f32 0.0, %v707_v62 }
  0xf1   :  { %v800_v7 = vmul.f32 1.442695, %v736_v63  ;;  %v864_v8 = vmul.f32 1.442695, %v768_v0  ;;  %v737_v9 = vsub.f32 0.0, %v673_v1  ;;  %v769_v10 = vsub.f32 0.0, %v705_v2 }
  0xf2   :  { %1993 = vpow2.f32 %v804_v3  ;;  %v806_v11 = vmul.f32 1.442695, %v739_v5  ;;  %v870_v12 = vmul.f32 1.442695, %v771_v6  ;;  %v1886_v13 = vpop.f32.mrb[4].mxu0  ;;  %v1918_v14 = vpop.f32.mrb[4].mxu1 }
  0xf3   :  { %1995 = vpow2.f32 %v868_v4  ;;  %v802_v15 = vmul.f32 1.442695, %v737_v9  ;;  %v866_v16 = vmul.f32 1.442695, %v769_v10  ;;  %v2451_v17 = vadd.f32 %v1886_v13, %v2416_v38  ;;  %v433_v18 = vpop.f32.mrb[5].mxu0  ;;  %v561_v19 = vpop.f32.mrb[5].mxu1 }
  0xf4   :  { %1997 = vpow2.f32 %v800_v7  ;;  %v2454_v20 = vadd.f32 %v1918_v14, %v2416_v38  ;;  %v2457_v21 = vadd.f32 %v2416_v38, %v433_v18  ;;  %v2460_v22 = vadd.f32 %v2416_v38, %v561_v19  ;;  %v1887_v23 = vpop.f32.mrb[6].mxu0  ;;  %v1919_v24 = vpop.f32.mrb[6].mxu1 }
  0xf5   :  { %1999 = vpow2.f32 %v864_v8  ;;  %v678_v25 = vmax.f32 %v2451_v17, -30.0  ;;  %v2464_v26 = vadd.f32 %v1887_v23, %v2416_v38  ;;  %v2467_v27 = vadd.f32 %v1919_v24, %v2416_v38  ;;  %v436_v28 = vpop.f32.mrb[7].mxu0  ;;  %v564_v29 = vpop.f32.mrb[7].mxu1 }
  0xf6   :  { %2001 = vpow2.f32 %v806_v11  ;;  %v710_v30 = vmax.f32 %v2454_v20, -30.0  ;;  %v676_v31 = vmax.f32 %v2457_v21, -30.0  ;;  %v708_v32 = vmax.f32 %v2460_v22, -30.0 }
  0xf7   :  { %2003 = vpow2.f32 %v870_v12  ;;  %v742_v33 = vsub.f32 0.0, %v678_v25  ;;  %v679_v34 = vmax.f32 %v2464_v26, -30.0  ;;  %v711_v35 = vmax.f32 %v2467_v27, -30.0 }
  0xf8   :  { %2005 = vpow2.f32 %v802_v15  ;;  %v774_v36 = vsub.f32 0.0, %v710_v30  ;;  %v740_v37 = vsub.f32 0.0, %v676_v31  ;;  %v772_v39 = vsub.f32 0.0, %v708_v32 }
  0xf9   :  { %2007 = vpow2.f32 %v866_v16  ;;  %v812_v40 = vmul.f32 1.442695, %v742_v33  ;;  %v743_v43 = vsub.f32 0.0, %v679_v34  ;;  %v775_v44 = vsub.f32 0.0, %v711_v35  ;;  %v1890_v47 = vpop.f32.mrb[8].mxu0  ;;  %v1922_v48 = vpop.f32.mrb[8].mxu1 }
  0xfa   :  { %v876_v49 = vmul.f32 1.442695, %v774_v36  ;;  %v808_v50 = vmul.f32 1.442695, %v740_v37  ;;  %v872_v53 = vmul.f32 1.442695, %v772_v39  ;;  %v2475_v54 = vadd.f32 %v2416_v38, %v436_v28 }
  0xfb   :  { %2009 = vpow2.f32 %v812_v40  ;;  %v2477_v55 = vmul.f32 1.442695, %v743_v43  ;;  %v2479_v56 = vmul.f32 1.442695, %v775_v44  ;;  %v2482_v59 = vadd.f32 %v2416_v38, %v564_v29  ;;  %v449_v60 = vpop.f32.mrb[9].mxu0  ;;  %v577_v61 = vpop.f32.mrb[9].mxu1 }
  0xfc   :  { %v1994_v62 = vpop.eup %1993  ;;  %2011 = vpow2.f32 %v876_v49  ;;  %v677_v63 = vmax.f32 %v2475_v54, -30.0  ;;  %v2486_v0 = vadd.f32 %v1890_v47, %v2416_v38  ;;  %v2489_v1 = vadd.f32 %v1922_v48, %v2416_v38  ;;  %v1891_v2 = vpop.f32.mrb[10].mxu0 }
  0xfd   :  { %v1923_v3 = vpop.f32.mrb[10].mxu1  ;;  %v1996_v4 = vpop.eup %1995  ;;  %v930_v5 = vadd.f32 1.0, %v1994_v62  ;;  %2013 = vpow2.f32 %v808_v50  ;;  %v709_v6 = vmax.f32 %v2482_v59, -30.0  ;;  %v2493_v7 = vadd.f32 %v2416_v38, %v449_v60 }
  0xfe   :  { %v452_v8 = vpop.f32.mrb[11].mxu0  ;;  %v2495_v9 = vpop.f32.mrb[11].mxu1  ;;  %v962_v11 = vadd.f32 1.0, %v1996_v4  ;;  %2015 = vpow2.f32 %v872_v53  ;;  %v741_v12 = vsub.f32 0.0, %v677_v63  ;;  %v682_v13 = vmax.f32 %v2486_v0, -30.0 }
  0xff   :  { %v1998_v10 = vpop.eup %1997  ;;  %2017 = vrcp.f32 %v930_v5  ;;  %v773_v16 = vsub.f32 0.0, %v709_v6  ;;  %v714_v18 = vmax.f32 %v2489_v1, -30.0  ;;  %v680_v37 = vmax.f32 %v2493_v7, -30.0 }
 0x100   :  { %v2000_v14 = vpop.eup %1999  ;;  %v928_v15 = vadd.f32 1.0, %v1998_v10  ;;  %2019 = vrcp.f32 %v962_v11  ;;  %v2499_v24 = vmul.f32 1.442695, %v741_v12  ;;  %v746_v25 = vsub.f32 0.0, %v682_v13 }
 0x101   :  { %v2002_v19 = vpop.eup %2001  ;;  %v960_v23 = vadd.f32 1.0, %v2000_v14  ;;  %v2501_v30 = vmul.f32 1.442695, %v773_v16  ;;  %v778_v31 = vsub.f32 0.0, %v714_v18  ;;  %v2503_v32 = vpop.f32.mrb[12].mxu0  ;;  %v2517_v48 = vadd.f32 %v2416_v38, %v577_v61 }
 0x102   :  { %v2004_v28 = vpop.eup %2003  ;;  %2021 = vrcp.f32 %v928_v15  ;;  %v931_v29 = vadd.f32 1.0, %v2002_v19  ;;  %v2505_v33 = vpop.f32.mrb[12].mxu1  ;;  %v2507_v36 = vmul.f32 1.442695, %v746_v25  ;;  %v744_v60 = vsub.f32 0.0, %v680_v37 }
 0x103   :  { %v2006_v34 = vpop.eup %2005  ;;  %2023 = vrcp.f32 %v960_v23  ;;  %v963_v35 = vadd.f32 1.0, %v2004_v28  ;;  %v2510_v39 = vpop.f32.mrb[13].mxu0  ;;  %v2514_v47 = vmul.f32 1.442695, %v778_v31  ;;  %v2524_v62 = vadd.f32 %v1891_v2, %v2416_v38 }
 0x104   :  { %v2512_v40 = vpop.f32.mrb[13].mxu1  ;;  %v2008_v43 = vpop.eup %2007  ;;  %2025 = vrcp.f32 %v931_v29  ;;  %v929_v44 = vadd.f32 1.0, %v2006_v34  ;;  %v712_v6 = vmax.f32 %v2517_v48, -30.0  ;;  %v2532_v61 = vadd.f32 %v1923_v3, %v2416_v38 }
 0x105   :  { %v2519_v49 = vpop.f32.mrb[14].mxu0  ;;  %v2521_v50 = vpop.f32.mrb[14].mxu1  ;;  %2027 = vrcp.f32 %v963_v35  ;;  %v961_v53 = vadd.f32 1.0, %v2008_v43  ;;  %v2535_v10 = vadd.f32 %v2416_v38, %v452_v8  ;;  %v2537_v13 = vmul.f32 1.442695, %v744_v60 }
 0x106   :  { %v2526_v63 = vpop.f32.mrb[15].mxu0  ;;  %v2528_v4 = vpop.f32.mrb[15].mxu1  ;;  %2029 = vrcp.f32 %v929_v44  ;;  %v683_v2 = vmax.f32 %v2524_v62, -30.0  ;;  %v776_v16 = vsub.f32 0.0, %v712_v6  ;;  %v715_v18 = vmax.f32 %v2532_v61, -30.0 }
 0x107   :  { %v2010_v5 = vpop.eup %2009  ;;  %2031 = vrcp.f32 %v961_v53  ;;  %v681_v8 = vmax.f32 %v2535_v10, -30.0 }
 0x108   :  { %v2012_v11 = vpop.eup %2011  ;;  %v934_v12 = vadd.f32 1.0, %v2010_v5  ;;  %2033 = vpow2.f32 %v2477_v55  ;;  %v747_v23 = vsub.f32 0.0, %v683_v2  ;;  %v880_v29 = vmul.f32 1.442695, %v776_v16 }
 0x109   :  { %v2014_v14 = vpop.eup %2013  ;;  %v966_v15 = vadd.f32 1.0, %v2012_v11  ;;  %v779_v31 = vsub.f32 0.0, %v715_v18  ;;  %v2543_v34 = vpop.f32.mrb[16].mxu0  ;;  %v745_v44 = vsub.f32 0.0, %v681_v8 }
 0x10a   :  { %v2016_v19 = vpop.eup %2015  ;;  %2035 = vrcp.f32 %v934_v12  ;;  %v932_v3 = vadd.f32 1.0, %v2014_v14  ;;  %v2545_v35 = vpop.f32.mrb[16].mxu1  ;;  %v822_v43 = vmul.f32 1.442695, %v747_v23  ;;  %v2557_v12 = vadd.f32 %v2416_v38, %v2495_v9 }
 0x10b   :  { %v2018_v25 = vpop.eup %2017  ;;  %2037 = vrcp.f32 %v966_v15  ;;  %v964_v28 = vadd.f32 1.0, %v2016_v19  ;;  %v2548_v53 = vpop.f32.mrb[17].mxu0  ;;  %v2553_v11 = vmul.f32 1.442695, %v779_v31  ;;  %v2565_v16 = vmul.f32 1.442695, %v745_v44 }
 0x10c   :  { %v2020_v37 = vpop.eup %2019  ;;  %v1058_v55 = vmul.f32 %v2018_v25, %v2419_v41  ;;  %2039 = vrcp.f32 %v932_v3  ;;  %v2550_v60 = vpop.f32.mrb[17].mxu1  ;;  %v713_v23 = vmax.f32 %v2557_v12, -30.0  ;;  %v2587_v25 = vadd.f32 %v2416_v38, %v2510_v39 }
 0x10d   :  { %v2022_v5 = vpop.eup %2021  ;;  %v1090_v6 = vmul.f32 %v2020_v37, %v2422_v42  ;;  %2041 = vrcp.f32 %v964_v28  ;;  %v2559_v2 = vpop.f32.mrb[18].mxu0  ;;  %v2569_v42 = vadd.f32 %v2503_v32, %v2416_v38 }
 0x10e   :  { %v2561_v41 = vpop.f32.mrb[18].mxu1  ;;  %v2024_v14 = vpop.eup %2023  ;;  %v1056_v15 = vmul.f32 %v2022_v5, %v2425_v45  ;;  %2043 = vpow2.f32 %v2479_v56  ;;  %v2580_v45 = vadd.f32 %v2505_v33, %v2416_v38  ;;  %v777_v28 = vsub.f32 0.0, %v713_v23 }
 0x10f   :  { %v2571_v18 = vpop.f32.mrb[19].mxu0  ;;  %v2573_v19 = vpop.f32.mrb[19].mxu1  ;;  %v1088_v3 = vmul.f32 %v2024_v14, %v2428_v46  ;;  %2045 = vpow2.f32 %v2499_v24  ;;  %v686_v32 = vmax.f32 %v2569_v42, -30.0 }
 0x110   :  { %v2026_v9 = vpop.eup %2025  ;;  %2047 = vpow2.f32 %v2501_v30  ;;  %v718_v33 = vmax.f32 %v2580_v45, -30.0  ;;  %v882_v14 = vmul.f32 1.442695, %v777_v28 }
 0x111   :  { %v2028_v56 = vpop.eup %2027  ;;  %v1059_v8 = vmul.f32 %v2026_v9, %v2433_v51  ;;  %2049 = vpow2.f32 %v2507_v36  ;;  %v750_v30 = vsub.f32 0.0, %v686_v32  ;;  %v2598_v36 = vpop.f32.mrb[20].mxu1 }
 0x112   :  { %v2030_v46 = vpop.eup %2029  ;;  %v1091_v24 = vmul.f32 %v2028_v56, %v2436_v52  ;;  %2051 = vpow2.f32 %v2514_v47  ;;  %v2596_v52 = vpop.f32.mrb[20].mxu0 }
 0x113   :  { %v2032_v31 = vpop.eup %2031  ;;  %v1650_v37 = vpack.c.bf16 %v1059_v8, %v1058_v55  ;;  %v1057_v51 = vmul.f32 %v2030_v46, %v2441_v57  ;;  %2053 = vpow2.f32 %v2537_v13  ;;  %v828_v47 = vmul.f32 1.442695, %v750_v30  ;;  %v2603_v23 = vpop.f32.mrb[21].mxu0 }
 0x114   :  { %v2034_v44 = vpop.eup %2033  ;;  %v1730_v5 = vpack.c.bf16 %v1091_v24, %v1090_v6  ;;  %v1089_v39 = vmul.f32 %v2032_v31, %v2444_v58  ;;  %2055 = vpow2.f32 %v880_v29  ;;  %v2605_v6 = vpop.f32.mrb[21].mxu1  ;;  %v782_v8 = vsub.f32 0.0, %v718_v33 }
 0x115   :  { %v2036_v9 = vpop.eup %2035  ;;  %1802 = vst [vmem:[%s3028_s3 + $0x8] sm:$0xff] %v1650_v37   ;;  %v1645_v57 = vpack.c.bf16 %v1057_v51, %v1056_v15  ;;  %v935_v55 = vadd.f32 1.0, %v2034_v44  ;;  %2057 = vpow2.f32 %v822_v43  ;;  %v2613_v32 = vpop.f32.mrb[22].mxu0 }
 0x116   :  { %v2038_v58 = vpop.eup %2037  ;;  %1818 = vst [vmem:[%s3028_s3 + $0x88] sm:$0xff] %v1730_v5   ;;  %v1725_v13 = vpack.c.bf16 %v1089_v39, %v1088_v3  ;;  %v2611_v56 = vmul.f32 %v2036_v9, %v2451_v17  ;;  %v2615_v15 = vpop.f32.mrb[22].mxu1  ;;  %v684_v3 = vmax.f32 %v2587_v25, -30.0  ;;  %v2626_v17 = vadd.f32 %v2416_v38, %v2512_v40 }
 0x117   :  { %v2040_v29 = vpop.eup %2039  ;;  %1646 = vst [vmem:[%s3028_s3] sm:$0xff] %v1645_v57   ;;  %v2621_v46 = vmul.f32 %v2038_v58, %v2454_v20  ;;  %2059 = vrcp.f32 %v935_v55  ;;  %v2628_v43 = vpop.f32.mrb[23].mxu0  ;;  %v2639_v20 = vmul.f32 1.442695, %v782_v8  ;;  %v2643_v40 = vadd.f32 %v2519_v49, %v2416_v38 }
 0x118   :  { %v2630_v24 = vpop.f32.mrb[23].mxu1  ;;  %v2042_v28 = vpop.eup %2041  ;;  %1817 = vst [vmem:[%s3028_s3 + $0x80] sm:$0xff] %v1725_v13   ;;  %v2636_v33 = vmul.f32 %v2040_v29, %v2457_v21  ;;  %2061 = vpow2.f32 %v2553_v11  ;;  %v748_v51 = vsub.f32 0.0, %v684_v3  ;;  %v716_v30 = vmax.f32 %v2626_v17, -30.0 }
 0x119   :  { %v2044_v31 = vpop.eup %2043  ;;  %v2646_v37 = vmul.f32 %v2042_v28, %v2460_v22  ;;  %2063 = vpow2.f32 %v2565_v16  ;;  %v687_v11 = vmax.f32 %v2643_v40, -30.0  ;;  %v2653_v5 = vadd.f32 %v2521_v50, %v2416_v38  ;;  %v2658_v13 = vpop.f32.mrb[24].mxu0 }
 0x11a   :  { %v2046_v44 = vpop.eup %2045  ;;  %v967_v21 = vadd.f32 1.0, %v2044_v31  ;;  %2065 = vpow2.f32 %v882_v14  ;;  %v2655_v9 = vmul.f32 1.442695, %v748_v51  ;;  %v780_v22 = vsub.f32 0.0, %v716_v30  ;;  %3029 = vst [vmem:[#allocation2_spill] sm:$0xff] %v2658_v13  ;;  %v2660_v14 = vpop.f32.mrb[24].mxu1 }
 0x11b   :  { %v2048_v49 = vpop.eup %2047  ;;  %v933_v39 = vadd.f32 1.0, %v2046_v44  ;;  %2067 = vpow2.f32 %v828_v47  ;;  %v751_v55 = vsub.f32 0.0, %v687_v11  ;;  %v719_v58 = vmax.f32 %v2653_v5, -30.0  ;;  %3030 = vst [vmem:[#allocation3_spill] sm:$0xff] %v2660_v14  ;;  %v2668_v3 = vpop.f32.mrb[25].mxu0 }
 0x11c   :  { %v2050_v57 = vpop.eup %2049  ;;  %2069 = vrcp.f32 %v967_v21  ;;  %v965_v16 = vadd.f32 1.0, %v2048_v49  ;;  %v2662_v29 = vmul.f32 1.442695, %v780_v22  ;;  %v2666_v47 = vadd.f32 %v2416_v38, %v2526_v63  ;;  %3031 = vst [vmem:[#allocation4_spill] sm:$0xff] %v2668_v3  ;;  %v2670_v28 = vpop.f32.mrb[25].mxu1 }
 0x11d   :  { %v2052_v8 = vpop.eup %2051  ;;  %2071 = vrcp.f32 %v933_v39  ;;  %v938_v50 = vadd.f32 1.0, %v2050_v57  ;;  %3032 = vst [vmem:[#allocation5_spill] sm:$0xff] %v2670_v28  ;;  %v2672_v30 = vmul.f32 1.442695, %v751_v55  ;;  %v783_v44 = vsub.f32 0.0, %v719_v58  ;;  %v2674_v21 = vpop.f32.mrb[26].mxu0 }
 0x11e   :  { %v2054_v31 = vpop.eup %2053  ;;  %2073 = vrcp.f32 %v965_v16  ;;  %v970_v51 = vadd.f32 1.0, %v2052_v8  ;;  %3033 = vst [vmem:[#allocation6_spill] sm:$0xff] %v2674_v21  ;;  %v2676_v11 = vpop.f32.mrb[26].mxu1  ;;  %v685_v63 = vmax.f32 %v2666_v47, -30.0  ;;  %v2681_v22 = vadd.f32 %v2416_v38, %v2528_v4 }
 0x11f   :  { %3034 = vst [vmem:[#allocation7_spill] sm:$0xff] %v2676_v11  ;;  %v2056_v49 = vpop.eup %2055  ;;  %2075 = vrcp.f32 %v938_v50  ;;  %v936_v39 = vadd.f32 1.0, %v2054_v31  ;;  %v2683_v57 = vpop.f32.mrb[27].mxu0  ;;  %v2687_v8 = vmul.f32 1.442695, %v783_v44  ;;  %v2691_v11 = vadd.f32 %v2543_v34, %v2416_v38 }
 0x120   :  { %3035 = vst [vmem:[#allocation8_spill] sm:$0xff] %v2683_v57  ;;  %v2685_v16 = vpop.f32.mrb[27].mxu1  ;;  %v2058_v55 = vpop.eup %2057  ;;  %2077 = vrcp.f32 %v970_v51  ;;  %v968_v58 = vadd.f32 1.0, %v2056_v49  ;;  %v749_v21 = vsub.f32 0.0, %v685_v63  ;;  %v717_v4 = vmax.f32 %v2681_v22, -30.0 }
 0x121   :  { %3036 = vst [vmem:[#allocation9_spill] sm:$0xff] %v2685_v16  ;;  %v2060_v50 = vpop.eup %2059  ;;  %2079 = vrcp.f32 %v936_v39  ;;  %v939_v31 = vadd.f32 1.0, %v2058_v55  ;;  %v690_v16 = vmax.f32 %v2691_v11, -30.0  ;;  %v2698_v51 = vadd.f32 %v2545_v35, %v2416_v38 }
 0x122   :  { %v2062_v28 = vpop.eup %2061  ;;  %v1063_v57 = vmul.f32 %v2060_v50, %v2464_v26  ;;  %2081 = vrcp.f32 %v968_v58  ;;  %v826_v49 = vmul.f32 1.442695, %v749_v21  ;;  %v781_v3 = vsub.f32 0.0, %v717_v4  ;;  %v2702_v26 = vpop.f32.mrb[28].mxu0 }
 0x123   :  { %v2064_v44 = vpop.eup %2063  ;;  %2083 = vrcp.f32 %v939_v31  ;;  %v971_v34 = vadd.f32 1.0, %v2062_v28  ;;  %v754_v14 = vsub.f32 0.0, %v690_v16  ;;  %v2704_v58 = vpop.f32.mrb[28].mxu1  ;;  %v722_v31 = vmax.f32 %v2698_v51, -30.0 }
 0x124   :  { %v2066_v39 = vpop.eup %2065  ;;  %v1660_v63 = vpack.c.bf16 %v1063_v57, %v2611_v56  ;;  %v937_v55 = vadd.f32 1.0, %v2064_v44  ;;  %2085 = vpow2.f32 %v2639_v20  ;;  %v890_v13 = vmul.f32 1.442695, %v781_v3  ;;  %v2707_v28 = vpop.f32.mrb[29].mxu0 }
 0x125   :  { %v2068_v50 = vpop.eup %2067  ;;  %2087 = vrcp.f32 %v971_v34  ;;  %v969_v35 = vadd.f32 1.0, %v2066_v39  ;;  %v2709_v21 = vpop.f32.mrb[29].mxu1  ;;  %v836_v20 = vmul.f32 1.442695, %v754_v14  ;;  %v2716_v57 = vadd.f32 %v2416_v38, %v2548_v53 }
 0x126   :  { %3037 = vst [vmem:[#allocation10_spill] sm:$0xff] %v2709_v21  ;;  %v2070_v4 = vpop.eup %2069  ;;  %1804 = vst [vmem:[%s3028_s3 + $0x18] sm:$0xff] %v1660_v63   ;;  %2089 = vrcp.f32 %v937_v55  ;;  %v942_v56 = vadd.f32 1.0, %v2068_v50  ;;  %v2718_v16 = vpop.f32.mrb[30].mxu0  ;;  %v786_v39 = vsub.f32 0.0, %v722_v31  ;;  %v2725_v21 = vadd.f32 %v2416_v38, %v2550_v60 }
 0x127   :  { %v2720_v3 = vpop.f32.mrb[30].mxu1  ;;  %v2072_v44 = vpop.eup %2071  ;;  %v1095_v34 = vmul.f32 %v2070_v4, %v2467_v27  ;;  %2091 = vrcp.f32 %v969_v35  ;;  %v688_v50 = vmax.f32 %v2716_v57, -30.0 }
 0x128   :  { %3038 = vst [vmem:[#allocation11_spill] sm:$0xff] %v2720_v3  ;;  %v2727_v63 = vpop.f32.mrb[31].mxu0  ;;  %v2729_v14 = vpop.f32.mrb[31].mxu1  ;;  %v1061_v53 = vmul.f32 %v2072_v44, %v2475_v54  ;;  %2093 = vrcp.f32 %v942_v56  ;;  %v2735_v3 = vadd.f32 %v2559_v2, %v2416_v38  ;;  %v900_v31 = vmul.f32 1.442695, %v786_v39 }
 0x129   :  { %3039 = vst [vmem:[#allocation12_spill] sm:$0xff] %v2729_v14  ;;  %v2074_v55 = vpop.eup %2073  ;;  %v1740_v35 = vpack.c.bf16 %v1095_v34, %v2621_v46  ;;  %2095 = vpow2.f32 %v2655_v9  ;;  %v752_v56 = vsub.f32 0.0, %v688_v50  ;;  %v720_v46 = vmax.f32 %v2725_v21, -30.0 }
 0x12a   :  { %v2076_v27 = vpop.eup %2075  ;;  %v1093_v60 = vmul.f32 %v2074_v55, %v2482_v59  ;;  %v1655_v14 = vpack.c.bf16 %v1061_v53, %v2636_v33  ;;  %2097 = vpow2.f32 %v2662_v29  ;;  %v691_v29 = vmax.f32 %v2735_v3, -30.0 }
 0x12b   :  { %v2078_v4 = vpop.eup %2077  ;;  %v1066_v54 = vmul.f32 %v2076_v27, %v2486_v0  ;;  %1820 = vst [vmem:[%s3028_s3 + $0x98] sm:$0xff] %v1740_v35   ;;  %2099 = vpow2.f32 %v2672_v30  ;;  %v832_v33 = vmul.f32 1.442695, %v752_v56  ;;  %v2762_v30 = vadd.f32 %v2561_v41, %v2416_v38 }
 0x12c   :  { %v2080_v44 = vpop.eup %2079  ;;  %v1735_v2 = vpack.c.bf16 %v1093_v60, %v2646_v37  ;;  %v1098_v59 = vmul.f32 %v2078_v4, %v2489_v1  ;;  %1803 = vst [vmem:[%s3028_s3 + $0x10] sm:$0xff] %v1655_v14   ;;  %2101 = vpow2.f32 %v2687_v8  ;;  %v784_v37 = vsub.f32 0.0, %v720_v46 }
 0x12d   :  { %v2082_v9 = vpop.eup %2081  ;;  %v1064_v0 = vmul.f32 %v2080_v44, %v2493_v7  ;;  %2103 = vpow2.f32 %v826_v49  ;;  %v755_v8 = vsub.f32 0.0, %v691_v29  ;;  %v2767_v14 = vadd.f32 %v2416_v38, %v2571_v18 }
 0x12e   :  { %v2084_v34 = vpop.eup %2083  ;;  %1819 = vst [vmem:[%s3028_s3 + $0x90] sm:$0xff] %v1735_v2   ;;  %v1096_v1 = vmul.f32 %v2082_v9, %v2517_v48  ;;  %2105 = vpow2.f32 %v890_v13  ;;  %v896_v50 = vmul.f32 1.442695, %v784_v37  ;;  %v723_v48 = vmax.f32 %v2762_v30, -30.0 }
 0x12f   :  { %v2086_v39 = vpop.eup %2085  ;;  %v1067_v7 = vmul.f32 %v2084_v34, %v2524_v62  ;;  %2107 = vpow2.f32 %v836_v20  ;;  %v838_v35 = vmul.f32 1.442695, %v755_v8  ;;  %v689_v18 = vmax.f32 %v2767_v14, -30.0 }
 0x130   :  { %v2088_v55 = vpop.eup %2087  ;;  %v974_v53 = vadd.f32 1.0, %v2086_v39  ;;  %2109 = vpow2.f32 %v900_v31  ;;  %v787_v13 = vsub.f32 0.0, %v723_v48 }
 0x131   :  { %v2090_v49 = vpop.eup %2089  ;;  %v1670_v27 = vpack.c.bf16 %v1067_v7, %v1066_v54  ;;  %v1099_v41 = vmul.f32 %v2088_v55, %v2532_v61  ;;  %v2779_v61 = vadd.f32 %v2416_v38, %v2573_v19 }
 0x132   :  { %v2092_v60 = vpop.eup %2091  ;;  %v1065_v62 = vmul.f32 %v2090_v49, %v2535_v10  ;;  %2111 = vrcp.f32 %v974_v53  ;;  %v902_v44 = vmul.f32 1.442695, %v787_v13 }
 0x133   :  { %v2094_v4 = vpop.eup %2093  ;;  %1806 = vst [vmem:[%s3028_s3 + $0x28] sm:$0xff] %v1670_v27   ;;  %v1750_v20 = vpack.c.bf16 %v1099_v41, %v1098_v59  ;;  %v1097_v56 = vmul.f32 %v2092_v60, %v2557_v12  ;;  %2113 = vpow2.f32 %v832_v33  ;;  %v753_v12 = vsub.f32 0.0, %v689_v18 }
 0x134   :  { %v2096_v31 = vpop.eup %2095  ;;  %v1665_v54 = vpack.c.bf16 %v1065_v62, %v1064_v0  ;;  %v2782_v10 = vmul.f32 %v2094_v4, %v2569_v42  ;;  %2115 = vpow2.f32 %v896_v50  ;;  %v721_v42 = vmax.f32 %v2779_v61, -30.0 }
 0x135   :  { %v2098_v2 = vpop.eup %2097  ;;  %1822 = vst [vmem:[%s3028_s3 + $0xa8] sm:$0xff] %v1750_v20   ;;  %v1745_v59 = vpack.c.bf16 %v1097_v56, %v1096_v1  ;;  %v940_v46 = vadd.f32 1.0, %v2096_v31  ;;  %2117 = vpow2.f32 %v838_v35  ;;  %v2793_v0 = vadd.f32 %v2596_v52, %v2416_v38 }
 0x136   :  { %v2100_v9 = vpop.eup %2099  ;;  %1805 = vst [vmem:[%s3028_s3 + $0x20] sm:$0xff] %v1665_v54   ;;  %v972_v19 = vadd.f32 1.0, %v2098_v2  ;;  %2119 = vpow2.f32 %v902_v44  ;;  %v834_v34 = vmul.f32 1.442695, %v753_v12  ;;  %v2800_v1 = vadd.f32 %v2598_v36, %v2416_v38 }
 0x137   :  { %v2102_v33 = vpop.eup %2101  ;;  %1821 = vst [vmem:[%s3028_s3 + $0xa0] sm:$0xff] %v1745_v59   ;;  %2121 = vrcp.f32 %v940_v46  ;;  %v943_v29 = vadd.f32 1.0, %v2100_v9  ;;  %v785_v7 = vsub.f32 0.0, %v721_v42  ;;  %v694_v8 = vmax.f32 %v2793_v0, -30.0 }
 0x138   :  { %v2104_v37 = vpop.eup %2103  ;;  %2123 = vrcp.f32 %v972_v19  ;;  %v975_v39 = vadd.f32 1.0, %v2102_v33  ;;  %v726_v53 = vmax.f32 %v2800_v1, -30.0  ;;  %v2806_v50 = vadd.f32 %v2416_v38, %v2603_v23 }
 0x139   :  { %v2106_v52 = vpop.eup %2105  ;;  %2125 = vrcp.f32 %v943_v29  ;;  %v941_v55 = vadd.f32 1.0, %v2104_v37  ;;  %v898_v36 = vmul.f32 1.442695, %v785_v7  ;;  %v758_v27 = vsub.f32 0.0, %v694_v8 }
 0x13a   :  { %v2108_v48 = vpop.eup %2107  ;;  %2127 = vrcp.f32 %v975_v39  ;;  %v973_v49 = vadd.f32 1.0, %v2106_v52  ;;  %v790_v60 = vsub.f32 0.0, %v726_v53  ;;  %v692_v62 = vmax.f32 %v2806_v50, -30.0 }
 0x13b   :  { %v2110_v41 = vpop.eup %2109  ;;  %2129 = vrcp.f32 %v941_v55  ;;  %v946_v35 = vadd.f32 1.0, %v2108_v48  ;;  %v844_v4 = vmul.f32 1.442695, %v758_v27  ;;  %v2811_v20 = vadd.f32 %v2416_v38, %v2605_v6 }
 0x13c   :  { %v2112_v13 = vpop.eup %2111  ;;  %2131 = vrcp.f32 %v973_v49  ;;  %v978_v18 = vadd.f32 1.0, %v2110_v41  ;;  %v908_v31 = vmul.f32 1.442695, %v790_v60  ;;  %v756_v54 = vsub.f32 0.0, %v692_v62 }
 0x13d   :  { %v2114_v23 = vpop.eup %2113  ;;  %v1102_v56 = vmul.f32 %v2112_v13, %v2580_v45  ;;  %2133 = vrcp.f32 %v946_v35  ;;  %v724_v59 = vmax.f32 %v2811_v20, -30.0  ;;  %v2817_v46 = vadd.f32 %v2613_v32, %v2416_v38 }
 0x13e   :  { %v2116_v44 = vpop.eup %2115  ;;  %2135 = vrcp.f32 %v978_v18  ;;  %v944_v2 = vadd.f32 1.0, %v2114_v23  ;;  %v840_v6 = vmul.f32 1.442695, %v756_v54  ;;  %v2821_v19 = vadd.f32 %v2615_v15, %v2416_v38 }
 0x13f   :  { %v2118_v12 = vpop.eup %2117  ;;  %v976_v9 = vadd.f32 1.0, %v2116_v44  ;;  %2137 = vpow2.f32 %v834_v34  ;;  %v788_v33 = vsub.f32 0.0, %v724_v59  ;;  %v695_v29 = vmax.f32 %v2817_v46, -30.0 }
 0x140   :  { %v2120_v45 = vpop.eup %2119  ;;  %2139 = vrcp.f32 %v944_v2  ;;  %v947_v42 = vadd.f32 1.0, %v2118_v12  ;;  %v727_v32 = vmax.f32 %v2821_v19, -30.0  ;;  %v2827_v7 = vadd.f32 %v2416_v38, %v2628_v43 }
 0x141   :  { %v2122_v37 = vpop.eup %2121  ;;  %2141 = vrcp.f32 %v976_v9  ;;  %v979_v39 = vadd.f32 1.0, %v2120_v45  ;;  %v904_v15 = vmul.f32 1.442695, %v788_v33  ;;  %v759_v52 = vsub.f32 0.0, %v695_v29  ;;  %v3042_v29 = vld [vmem:[#allocation4_spill] sm:$0xff] }
 0x142   :  { %v2124_v34 = vpop.eup %2123  ;;  %v1068_v8 = vmul.f32 %v2122_v37, %v2587_v25  ;;  %2143 = vrcp.f32 %v947_v42  ;;  %v791_v48 = vsub.f32 0.0, %v727_v32  ;;  %v693_v49 = vmax.f32 %v2827_v7, -30.0 }
 0x143   :  { %v2126_v55 = vpop.eup %2125  ;;  %v1100_v53 = vmul.f32 %v2124_v34, %v2626_v17  ;;  %2145 = vrcp.f32 %v979_v39  ;;  %v846_v35 = vmul.f32 1.442695, %v759_v52  ;;  %v2835_v43 = vadd.f32 %v2416_v38, %v2630_v24 }
 0x144   :  { %v2128_v27 = vpop.eup %2127  ;;  %v1071_v41 = vmul.f32 %v2126_v55, %v2643_v40  ;;  %2147 = vpow2.f32 %v898_v36  ;;  %v910_v62 = vmul.f32 1.442695, %v791_v48  ;;  %v757_v13 = vsub.f32 0.0, %v693_v49 }
 0x145   :  { %v2130_v25 = vpop.eup %2129  ;;  %v1103_v60 = vmul.f32 %v2128_v27, %v2653_v5  ;;  %2149 = vpow2.f32 %v844_v4  ;;  %v725_v40 = vmax.f32 %v2835_v43, -30.0 }
 0x146   :  { %v2132_v17 = vpop.eup %2131  ;;  %v1680_v18 = vpack.c.bf16 %v1071_v41, %v2782_v10  ;;  %v1069_v23 = vmul.f32 %v2130_v25, %v2666_v47  ;;  %2151 = vpow2.f32 %v908_v31  ;;  %v842_v38 = vmul.f32 1.442695, %v757_v13  ;;  %v3040_v31 = vld [vmem:[#allocation2_spill] sm:$0xff] }
 0x147   :  { %v2134_v36 = vpop.eup %2133  ;;  %v1760_v54 = vpack.c.bf16 %v1103_v60, %v1102_v56  ;;  %v1101_v44 = vmul.f32 %v2132_v17, %v2681_v22  ;;  %2153 = vpow2.f32 %v840_v6  ;;  %v789_v4 = vsub.f32 0.0, %v725_v40  ;;  %v2852_v22 = vld [vmem:[%s3027_s2] ss:$0 sm:$0xff]  ;;  %v3041_v6 = vld [vmem:[#allocation3_spill] sm:$0xff] }
 0x148   :  { %v2136_v24 = vpop.eup %2135  ;;  %1808 = vst [vmem:[%s3028_s3 + $0x38] sm:$0xff] %v1680_v18   ;;  %v1675_v5 = vpack.c.bf16 %v1069_v23, %v1068_v8  ;;  %2155 = vpow2.f32 %v904_v15  ;;  %v1074_v56 = vmul.f32 %v2134_v36, %v2691_v11  ;;  %v2856_v2 = vadd.f32 %v2852_v22, %v3040_v31  ;;  %v3043_v8 = vld [vmem:[#allocation5_spill] sm:$0xff]  ;;  %v3044_v41 = vld [vmem:[#allocation6_spill] sm:$0xff] }
 0x149   :  { %v2138_v10 = vpop.eup %2137  ;;  %1824 = vst [vmem:[%s3028_s3 + $0xb8] sm:$0xff] %v1760_v54   ;;  %v1755_v47 = vpack.c.bf16 %v1101_v44, %v1100_v53  ;;  %2157 = vpow2.f32 %v846_v35  ;;  %v906_v9 = vmul.f32 1.442695, %v789_v4  ;;  %v2863_v11 = vadd.f32 %v2852_v22, %v3041_v6  ;;  %v3045_v4 = vld [vmem:[#allocation7_spill] sm:$0xff] }
 0x14a   :  { %v2140_v59 = vpop.eup %2139  ;;  %1807 = vst [vmem:[%s3028_s3 + $0x30] sm:$0xff] %v1675_v5   ;;  %v945_v12 = vadd.f32 1.0, %v2138_v10  ;;  %2159 = vpow2.f32 %v910_v62  ;;  %v1106_v42 = vmul.f32 %v2136_v24, %v2698_v51  ;;  %v698_v33 = vmax.f32 %v2856_v2, -30.0 }
 0x14b   :  { %v2142_v45 = vpop.eup %2141  ;;  %1823 = vst [vmem:[%s3028_s3 + $0xb0] sm:$0xff] %v1755_v47   ;;  %2161 = vpow2.f32 %v842_v38  ;;  %v2872_v37 = vadd.f32 %v2852_v22, %v3042_v29  ;;  %v2875_v32 = vmul.f32 %v2140_v59, %v2716_v57  ;;  %v730_v34 = vmax.f32 %v2863_v11, -30.0  ;;  %v3046_v59 = vld [vmem:[#allocation8_spill] sm:$0xff] }
 0x14c   :  { %v2144_v39 = vpop.eup %2143  ;;  %2163 = vrcp.f32 %v945_v12  ;;  %v2880_v15 = vadd.f32 %v2852_v22, %v3043_v8  ;;  %v762_v55 = vsub.f32 0.0, %v698_v33  ;;  %v2888_v35 = vadd.f32 %v2852_v22, %v3044_v41 }
 0x14d   :  { %v2146_v52 = vpop.eup %2145  ;;  %v1075_v51 = vmul.f32 %v2144_v39, %v2735_v3  ;;  %2165 = vpow2.f32 %v906_v9  ;;  %v696_v53 = vmax.f32 %v2872_v37, -30.0  ;;  %v794_v27 = vsub.f32 0.0, %v730_v34 }
 0x14e   :  { %v2148_v48 = vpop.eup %2147  ;;  %v1107_v49 = vmul.f32 %v2146_v52, %v2762_v30  ;;  %v728_v57 = vmax.f32 %v2880_v15, -30.0  ;;  %v2891_v60 = vmul.f32 %v2142_v45, %v2725_v21  ;;  %v852_v40 = vmul.f32 1.442695, %v762_v55 }
 0x14f   :  { %v2150_v25 = vpop.eup %2149  ;;  %v1690_v62 = vpack.c.bf16 %v1075_v51, %v1074_v56  ;;  %v977_v3 = vadd.f32 1.0, %v2148_v48  ;;  %v760_v13 = vsub.f32 0.0, %v696_v53  ;;  %v916_v36 = vmul.f32 1.442695, %v794_v27 }
 0x150   :  { %v2152_v17 = vpop.eup %2151  ;;  %v1770_v18 = vpack.c.bf16 %v1107_v49, %v1106_v42  ;;  %v950_v23 = vadd.f32 1.0, %v2150_v25  ;;  %v792_v44 = vsub.f32 0.0, %v728_v57  ;;  %v699_v38 = vmax.f32 %v2888_v35, -30.0  ;;  %v3047_v42 = vld [vmem:[#allocation9_spill] sm:$0xff] }
 0x151   :  { %v2154_v30 = vpop.eup %2153  ;;  %1810 = vst [vmem:[%s3028_s3 + $0x48] sm:$0xff] %v1690_v62   ;;  %2167 = vrcp.f32 %v977_v3  ;;  %v982_v54 = vadd.f32 1.0, %v2152_v17  ;;  %v848_v5 = vmul.f32 1.442695, %v760_v13  ;;  %v2902_v10 = vadd.f32 %v2852_v22, %v3045_v4 }
 0x152   :  { %v2156_v21 = vpop.eup %2155  ;;  %1826 = vst [vmem:[%s3028_s3 + $0xc8] sm:$0xff] %v1770_v18   ;;  %2169 = vrcp.f32 %v950_v23  ;;  %v948_v24 = vadd.f32 1.0, %v2154_v30  ;;  %v763_v31 = vsub.f32 0.0, %v699_v38  ;;  %v2906_v12 = vadd.f32 %v2852_v22, %v3046_v59 }
 0x153   :  { %v2158_v47 = vpop.eup %2157  ;;  %2171 = vrcp.f32 %v982_v54  ;;  %v980_v56 = vadd.f32 1.0, %v2156_v21  ;;  %v731_v45 = vmax.f32 %v2902_v10, -30.0  ;;  %v2911_v33 = vadd.f32 %v2852_v22, %v3047_v42 }
 0x154   :  { %v2160_v9 = vpop.eup %2159  ;;  %2173 = vrcp.f32 %v948_v24  ;;  %v951_v6 = vadd.f32 1.0, %v2158_v47  ;;  %v912_v34 = vmul.f32 1.442695, %v792_v44  ;;  %v697_v8 = vmax.f32 %v2906_v12, -30.0 }
 0x155   :  { %v2162_v29 = vpop.eup %2161  ;;  %2175 = vrcp.f32 %v980_v56  ;;  %v983_v39 = vadd.f32 1.0, %v2160_v9  ;;  %v795_v55 = vsub.f32 0.0, %v731_v45  ;;  %v729_v53 = vmax.f32 %v2911_v33, -30.0 }
 0x156   :  { %v2164_v52 = vpop.eup %2163  ;;  %2177 = vrcp.f32 %v951_v6  ;;  %v949_v51 = vadd.f32 1.0, %v2162_v29  ;;  %v761_v27 = vsub.f32 0.0, %v697_v8  ;;  %v2918_v57 = vadd.f32 %v2852_v22, %v2702_v26 }
 0x157   :  { %v2166_v48 = vpop.eup %2165  ;;  %v1073_v49 = vmul.f32 %v2164_v52, %v2767_v14  ;;  %2179 = vrcp.f32 %v983_v39  ;;  %v854_v25 = vmul.f32 1.442695, %v763_v31  ;;  %v918_v62 = vmul.f32 1.442695, %v795_v55 }
 0x158   :  { %2181 = vrcp.f32 %v949_v51  ;;  %v981_v41 = vadd.f32 1.0, %v2166_v48  ;;  %v793_v13 = vsub.f32 0.0, %v729_v53  ;;  %v702_v17 = vmax.f32 %v2918_v57, -30.0  ;;  %v3049_v48 = vld [vmem:[#allocation11_spill] sm:$0xff] }
 0x159   :  { %v1685_v3 = vpack.c.bf16 %v1073_v49, %v2875_v32  ;;  %2183 = vpow2.f32 %v852_v40  ;;  %v850_v18 = vmul.f32 1.442695, %v761_v27  ;;  %v2924_v14 = vadd.f32 %v2852_v22, %v2704_v58  ;;  %v3048_v40 = vld [vmem:[#allocation10_spill] sm:$0xff] }
 0x15a   :  { %2185 = vrcp.f32 %v981_v41  ;;  %v2928_v26 = vadd.f32 %v2852_v22, %v2707_v28  ;;  %v766_v32 = vsub.f32 0.0, %v702_v17  ;;  %v2935_v30 = vadd.f32 %v2852_v22, %v3048_v40 }
 0x15b   :  { %v2168_v23 = vpop.eup %2167  ;;  %1809 = vst [vmem:[%s3028_s3 + $0x40] sm:$0xff] %v1685_v3   ;;  %2187 = vpow2.f32 %v916_v36  ;;  %v2939_v54 = vadd.f32 %v2852_v22, %v2718_v16  ;;  %v734_v28 = vmax.f32 %v2924_v14, -30.0  ;;  %v914_v36 = vmul.f32 1.442695, %v793_v13  ;;  %v3050_v3 = vld [vmem:[#allocation12_spill] sm:$0xff] }
 0x15c   :  { %v2170_v58 = vpop.eup %2169  ;;  %v1105_v44 = vmul.f32 %v2168_v23, %v2779_v61  ;;  %2189 = vpow2.f32 %v848_v5  ;;  %v700_v38 = vmax.f32 %v2928_v26, -30.0  ;;  %v860_v47 = vmul.f32 1.442695, %v766_v32 }
 0x15d   :  { %v2172_v21 = vpop.eup %2171  ;;  %2191 = vpow2.f32 %v912_v34  ;;  %v798_v56 = vsub.f32 0.0, %v734_v28  ;;  %v1078_v16 = vmul.f32 %v2170_v58, %v2793_v0  ;;  %v732_v9 = vmax.f32 %v2935_v30, -30.0 }
 0x15e   :  { %v2174_v24 = vpop.eup %2173  ;;  %v1765_v4 = vpack.c.bf16 %v1105_v44, %v2891_v60  ;;  %2193 = vpow2.f32 %v854_v25  ;;  %v764_v59 = vsub.f32 0.0, %v700_v38  ;;  %v703_v6 = vmax.f32 %v2939_v54, -30.0 }
 0x15f   :  { %v2176_v31 = vpop.eup %2175  ;;  %2195 = vpow2.f32 %v918_v62  ;;  %v924_v5 = vmul.f32 1.442695, %v798_v56  ;;  %v1110_v45 = vmul.f32 %v2172_v21, %v2800_v1  ;;  %v1076_v39 = vmul.f32 %v2174_v24, %v2806_v50 }
 0x160   :  { %v2178_v61 = vpop.eup %2177  ;;  %1825 = vst [vmem:[%s3028_s3 + $0xc0] sm:$0xff] %v1765_v4   ;;  %2197 = vpow2.f32 %v850_v18  ;;  %v856_v0 = vmul.f32 1.442695, %v764_v59  ;;  %v767_v8 = vsub.f32 0.0, %v703_v6  ;;  %v1108_v51 = vmul.f32 %v2176_v31, %v2811_v20 }
 0x161   :  { %v2180_v60 = vpop.eup %2179  ;;  %v1079_v42 = vmul.f32 %v2178_v61, %v2817_v46  ;;  %2199 = vpow2.f32 %v914_v36  ;;  %v2959_v1 = vadd.f32 %v2852_v22, %v3049_v48  ;;  %v2974_v13 = vadd.f32 %v2852_v22, %v3050_v3 }
 0x162   :  { %v2182_v29 = vpop.eup %2181  ;;  %v1111_v34 = vmul.f32 %v2180_v60, %v2821_v19  ;;  %2201 = vpow2.f32 %v860_v47  ;;  %v862_v41 = vmul.f32 1.442695, %v767_v8  ;;  %v796_v40 = vsub.f32 0.0, %v732_v9 }
 0x163   :  { %v2184_v52 = vpop.eup %2183  ;;  %v1700_v55 = vpack.c.bf16 %v1079_v42, %v1078_v16  ;;  %v1077_v53 = vmul.f32 %v2182_v29, %v2827_v7  ;;  %2203 = vpow2.f32 %v924_v5  ;;  %v2967_v7 = vadd.f32 %v2852_v22, %v2727_v63 }
 0x164   :  { %v2186_v46 = vpop.eup %2185  ;;  %v1780_v49 = vpack.c.bf16 %v1111_v34, %v1110_v45  ;;  %v954_v27 = vadd.f32 1.0, %v2184_v52  ;;  %2205 = vpow2.f32 %v856_v0  ;;  %v735_v63 = vmax.f32 %v2959_v1, -30.0 }
 0x165   :  { %v2188_v50 = vpop.eup %2187  ;;  %1812 = vst [vmem:[%s3028_s3 + $0x58] sm:$0xff] %v1700_v55   ;;  %v1695_v19 = vpack.c.bf16 %v1077_v53, %v1076_v39  ;;  %v1109_v20 = vmul.f32 %v2186_v46, %v2835_v43  ;;  %v701_v44 = vmax.f32 %v2967_v7, -30.0  ;;  %v733_v21 = vmax.f32 %v2974_v13, -30.0 }
 0x166   :  { %v2190_v25 = vpop.eup %2189  ;;  %1828 = vst [vmem:[%s3028_s3 + $0xd8] sm:$0xff] %v1780_v49   ;;  %2207 = vrcp.f32 %v954_v27  ;;  %v986_v62 = vadd.f32 1.0, %v2188_v50  ;;  %v799_v4 = vsub.f32 0.0, %v735_v63  ;;  %v920_v31 = vmul.f32 1.442695, %v796_v40 }
 0x167   :  { %v2192_v17 = vpop.eup %2191  ;;  %1811 = vst [vmem:[%s3028_s3 + $0x50] sm:$0xff] %v1695_v19   ;;  %v1775_v43 = vpack.c.bf16 %v1109_v20, %v1108_v51  ;;  %v952_v18 = vadd.f32 1.0, %v2190_v25  ;;  %2209 = vpow2.f32 %v862_v41  ;;  %v765_v16 = vsub.f32 0.0, %v701_v44 }
 0x168   :  { %v2194_v23 = vpop.eup %2193  ;;  %2211 = vrcp.f32 %v986_v62  ;;  %v984_v32 = vadd.f32 1.0, %v2192_v17  ;;  %v797_v5 = vsub.f32 0.0, %v733_v21  ;;  %v926_v6 = vmul.f32 1.442695, %v799_v4 }
 0x169   :  { %v2196_v58 = vpop.eup %2195  ;;  %1827 = vst [vmem:[%s3028_s3 + $0xd0] sm:$0xff] %v1775_v43   ;;  %2213 = vrcp.f32 %v952_v18  ;;  %v955_v22 = vadd.f32 1.0, %v2194_v23  ;;  %v858_v42 = vmul.f32 1.442695, %v765_v16 }
 0x16a   :  { %v2198_v28 = vpop.eup %2197  ;;  %2215 = vrcp.f32 %v984_v32  ;;  %v987_v38 = vadd.f32 1.0, %v2196_v58  ;;  %v922_v39 = vmul.f32 1.442695, %v797_v5 }
 0x16b   :  { %v2200_v36 = vpop.eup %2199  ;;  %2217 = vrcp.f32 %v955_v22  ;;  %v953_v24 = vadd.f32 1.0, %v2198_v28 }
 0x16c   :  { %v2202_v47 = vpop.eup %2201  ;;  %2219 = vrcp.f32 %v987_v38  ;;  %v985_v56 = vadd.f32 1.0, %v2200_v36 }
 0x16d   :  { %2221 = vrcp.f32 %v953_v24  ;;  %v2204_v59 = vpop.eup %2203  ;;  %v958_v61 = vadd.f32 1.0, %v2202_v47 }
 0x16e   :  { %2223 = vrcp.f32 %v985_v56  ;;  %v2206_v9 = vpop.eup %2205 }
 0x16f   :  { %2225 = vpow2.f32 %v920_v31 }
 0x170   :  { %v2208_v60 = vpop.eup %2207  ;;  %2227 = vrcp.f32 %v958_v61 }
 0x171   :  { %v2210_v45 = vpop.eup %2209  ;;  %2229 = vpow2.f32 %v926_v6  ;;  %v1082_v55 = vmul.f32 %v2208_v60, %v2856_v2 }
 0x172   :  { %v2212_v0 = vpop.eup %2211  ;;  %v959_v29 = vadd.f32 1.0, %v2210_v45 }
 0x173   :  { %v2214_v34 = vpop.eup %2213  ;;  %v1114_v46 = vmul.f32 %v2212_v0, %v2863_v11  ;;  %v990_v11 = vadd.f32 1.0, %v2204_v59 }
 0x174   :  { %v2216_v8 = vpop.eup %2215  ;;  %2231 = vrcp.f32 %v959_v29  ;;  %v1080_v41 = vmul.f32 %v2214_v34, %v2872_v37 }
 0x175   :  { %v2218_v52 = vpop.eup %2217  ;;  %2233 = vpow2.f32 %v858_v42  ;;  %v1112_v20 = vmul.f32 %v2216_v8, %v2880_v15 }
 0x176   :  { %v2220_v51 = vpop.eup %2219  ;;  %v1083_v53 = vmul.f32 %v2218_v52, %v2888_v35  ;;  %2235 = vpow2.f32 %v922_v39 }
 0x177   :  { %v2222_v48 = vpop.eup %2221  ;;  %v1115_v49 = vmul.f32 %v2220_v51, %v2902_v10  ;;  %v956_v10 = vadd.f32 1.0, %v2206_v9  ;;  %2237 = vrcp.f32 %v990_v11 }
 0x178   :  { %v2224_v27 = vpop.eup %2223  ;;  %v1710_v50 = vpack.c.bf16 %v1083_v53, %v1082_v55  ;;  %v1081_v19 = vmul.f32 %v2222_v48, %v2906_v12 }
 0x179   :  { %v1790_v25 = vpack.c.bf16 %v1115_v49, %v1114_v46  ;;  %v1113_v62 = vmul.f32 %v2224_v27, %v2911_v33  ;;  %v2226_v2 = vpop.eup %2225  ;;  %2239 = vrcp.f32 %v956_v10 }
 0x17a   :  { %1814 = vst [vmem:[%s3028_s3 + $0x68] sm:$0xff] %v1710_v50   ;;  %v1705_v35 = vpack.c.bf16 %v1081_v19, %v1080_v41  ;;  %v2228_v3 = vpop.eup %2227  ;;  %v988_v12 = vadd.f32 1.0, %v2226_v2 }
 0x17b   :  { %1830 = vst [vmem:[%s3028_s3 + $0xe8] sm:$0xff] %v1790_v25   ;;  %v1785_v37 = vpack.c.bf16 %v1113_v62, %v1112_v20  ;;  %v2230_v15 = vpop.eup %2229  ;;  %v1086_v18 = vmul.f32 %v2228_v3, %v2918_v57 }
 0x17c   :  { %1813 = vst [vmem:[%s3028_s3 + $0x60] sm:$0xff] %v1705_v35   ;;  %v991_v17 = vadd.f32 1.0, %v2230_v15 }
 0x17d   :  { %1829 = vst [vmem:[%s3028_s3 + $0xe0] sm:$0xff] %v1785_v37  }
 0x17e   :  { %v2232_v33 = vpop.eup %2231  ;;  %2241 = vrcp.f32 %v991_v17 }
 0x17f   :  { %v2234_v43 = vpop.eup %2233  ;;  %v1087_v63 = vmul.f32 %v2232_v33, %v2939_v54  ;;  %2243 = vrcp.f32 %v988_v12 }
 0x180   :  { %v2236_v23 = vpop.eup %2235  ;;  %v957_v32 = vadd.f32 1.0, %v2234_v43 }
 0x181   :  { %v1720_v40 = vpack.c.bf16 %v1087_v63, %v1086_v18  ;;  %v989_v58 = vadd.f32 1.0, %v2236_v23  ;;  %v2238_v22 = vpop.eup %2237 }
 0x182   :  { %2245 = vrcp.f32 %v957_v32  ;;  %v1118_v57 = vmul.f32 %v2238_v22, %v2924_v14 }
 0x183   :  { %1816 = vst [vmem:[%s3028_s3 + $0x78] sm:$0xff] %v1720_v40   ;;  %2247 = vrcp.f32 %v989_v58  ;;  %v2240_v44 = vpop.eup %2239 }
 0x184   :  { %v1084_v24 = vmul.f32 %v2240_v44, %v2928_v26 }
 0x188   :  { %v2242_v28 = vpop.eup %2241 }
 0x189   :  { %v2244_v38 = vpop.eup %2243  ;;  %v1119_v54 = vmul.f32 %v2242_v28, %v2959_v1 }
 0x18a   :  { %v1116_v56 = vmul.f32 %v2244_v38, %v2935_v30 }
 0x18b   :  { %v1800_v4 = vpack.c.bf16 %v1119_v54, %v1118_v57 }
 0x18c   :  { %v2246_v21 = vpop.eup %2245 }
 0x18d   :  { %v2248_v36 = vpop.eup %2247  ;;  %v1085_v47 = vmul.f32 %v2246_v21, %v2967_v7  ;;  %1832 = vst [vmem:[%s3028_s3 + $0xf8] sm:$0xff] %v1800_v4  }
 0x18e   :  { %v1117_v31 = vmul.f32 %v2248_v36, %v2974_v13 }
 0x18f   :  { %v1715_v16 = vpack.c.bf16 %v1085_v47, %v1084_v24 }
 0x190   :  { %v1795_v59 = vpack.c.bf16 %v1117_v31, %v1116_v56 }
 0x191   :  { %1815 = vst [vmem:[%s3028_s3 + $0x70] sm:$0xff] %v1715_v16  }
 0x192   :  { %1831 = vst [vmem:[%s3028_s3 + $0xf0] sm:$0xff] %v1795_v59  }

// kernel: _lambda_.66
= control target key start
LH: loop header
LB: loop body
LE: loop exit
PB: predicated region body
PF: predicated region fallthrough
CT: control target
= control target key end

     0   :  { %s3984_s3 = inlined_call_operand.vmem [shape: bf16[128,128], index: 3, kind: input, shape index: {}]   ;;  %s3985_s1 = inlined_call_operand.vmem [shape: bf16[128,128], index: 1, kind: input, shape index: {}]   ;;  %s3986_s2 = inlined_call_operand.vmem [shape: bf16[512,128], index: 2, kind: input, shape index: {}]   ;;  %s3987_s0 = inlined_call_operand.vmem [shape: bf16[512,128], index: 0, kind: input, shape index: {}]   ;;  %s3988_s4 = inlined_call_operand.vmem [shape: f32[1,128], index: 4, kind: input, shape index: {}]   ;;  %s3989_s5 = inlined_call_operand.vmem [shape: bf16[512,128], index: 5, kind: output, shape index: {}]  }
   0x1   :  { %v2786_v0 = vld [vmem:[%s3984_s3] sm:$0xff]   ;;  %v2788_v2 = vld [vmem:[%s3984_s3 + $0x8] sm:$0xff]   ;;  %v2790_v4 = vld [vmem:[%s3984_s3 + $0x10] sm:$0xff]  }
   0x2   :  { %v2787_v1 = vld [vmem:[%s3985_s1] sm:$0xff]   ;;  %2562 = vmatprep.subr.bf16.mxu1 %v2786_v0  ;;  %v2789_v3 = vld [vmem:[%s3985_s1 + $0x8] sm:$0xff]   ;;  %v2791_v5 = vld [vmem:[%s3985_s1 + $0x10] sm:$0xff]  }
   0x3   :  { %2642 = vmatprep.subr.bf16.mxu0 %v2787_v1  ;;  %2563 = vmatpush3.bf16.msra.mxu1 %v2786_v0  ;;  %v2792_v6 = vld [vmem:[%s3984_s3 + $0x18] sm:$0xff]   ;;  %v2794_v8 = vld [vmem:[%s3984_s3 + $0x20] sm:$0xff]   ;;  %v2796_v10 = vld [vmem:[%s3984_s3 + $0x28] sm:$0xff]  }
   0x4   :  { %2643 = vmatpush3.bf16.msra.mxu0 %v2787_v1  ;;  %2564 = vmatprep.subr.bf16.mxu1 %v2788_v2  ;;  %v2793_v7 = vld [vmem:[%s3985_s1 + $0x18] sm:$0xff]   ;;  %v2795_v9 = vld [vmem:[%s3985_s1 + $0x20] sm:$0xff]   ;;  %v2797_v11 = vld [vmem:[%s3985_s1 + $0x28] sm:$0xff]  }
   0x5   :  { %2644 = vmatprep.subr.bf16.mxu0 %v2789_v3  ;;  %v2802_v12 = vld [vmem:[%s3986_s2] sm:$0xff]   ;;  %v2798_v14 = vld [vmem:[%s3984_s3 + $0x30] sm:$0xff]   ;;  %v2800_v16 = vld [vmem:[%s3984_s3 + $0x38] sm:$0xff]  }
   0x6   :  { %v2803_v13 = vld [vmem:[%s3987_s0] sm:$0xff]   ;;  %2578 = vmatprep.mubr.bf16.mxu1 %v2802_v12  ;;  %v2799_v15 = vld [vmem:[%s3985_s1 + $0x30] sm:$0xff]   ;;  %v2801_v17 = vld [vmem:[%s3985_s1 + $0x38] sm:$0xff]  }
   0x7   :  { %2565 = vmatpush3.bf16.msra.mxu1 %v2788_v2  ;;  %2658 = vmatprep.mubr.bf16.mxu0 %v2803_v13  ;;  %v2804_v18 = vld [vmem:[%s3986_s2 + $0x8] sm:$0xff]   ;;  %v2806_v20 = vld [vmem:[%s3986_s2 + $0x10] sm:$0xff]   ;;  %v2808_v22 = vld [vmem:[%s3986_s2 + $0x18] sm:$0xff]  }
   0x8   :  { %2645 = vmatpush3.bf16.msra.mxu0 %v2789_v3  ;;  %2566 = vmatprep.subr.bf16.mxu1 %v2790_v4  ;;  %v2805_v19 = vld [vmem:[%s3987_s0 + $0x8] sm:$0xff]   ;;  %v2807_v21 = vld [vmem:[%s3987_s0 + $0x10] sm:$0xff]   ;;  %v2809_v23 = vld [vmem:[%s3987_s0 + $0x18] sm:$0xff]  }
   0x9   :  { %2646 = vmatprep.subr.bf16.mxu0 %v2791_v5  ;;  %v2810_v24 = vld [vmem:[%s3986_s2 + $0x20] sm:$0xff]   ;;  %v2812_v26 = vld [vmem:[%s3986_s2 + $0x28] sm:$0xff]   ;;  %v2814_v28 = vld [vmem:[%s3986_s2 + $0x30] sm:$0xff]  }
   0xa   :  { %v2811_v25 = vld [vmem:[%s3987_s0 + $0x20] sm:$0xff]   ;;  %v2813_v27 = vld [vmem:[%s3987_s0 + $0x28] sm:$0xff]   ;;  %v2815_v29 = vld [vmem:[%s3987_s0 + $0x30] sm:$0xff]  }
   0xb   :  { %2567 = vmatpush3.bf16.msra.mxu1 %v2790_v4  ;;  %v2816_v30 = vld [vmem:[%s3986_s2 + $0x38] sm:$0xff]   ;;  %v2818_v32 = vld [vmem:[%s3986_s2 + $0x40] sm:$0xff]   ;;  %v2820_v34 = vld [vmem:[%s3986_s2 + $0x48] sm:$0xff]  }
   0xc   :  { %2647 = vmatpush3.bf16.msra.mxu0 %v2791_v5  ;;  %2568 = vmatprep.subr.bf16.mxu1 %v2792_v6  ;;  %v2817_v31 = vld [vmem:[%s3987_s0 + $0x38] sm:$0xff]   ;;  %v2819_v33 = vld [vmem:[%s3987_s0 + $0x40] sm:$0xff]   ;;  %v2821_v35 = vld [vmem:[%s3987_s0 + $0x48] sm:$0xff]  }
   0xd   :  { %2648 = vmatprep.subr.bf16.mxu0 %v2793_v7  ;;  %v2822_v36 = vld [vmem:[%s3986_s2 + $0x50] sm:$0xff]   ;;  %v2824_v38 = vld [vmem:[%s3986_s2 + $0x58] sm:$0xff]   ;;  %v2826_v40 = vld [vmem:[%s3986_s2 + $0x60] sm:$0xff]  }
   0xe   :  { %v2823_v37 = vld [vmem:[%s3987_s0 + $0x50] sm:$0xff]   ;;  %v2825_v39 = vld [vmem:[%s3987_s0 + $0x58] sm:$0xff]   ;;  %v2827_v41 = vld [vmem:[%s3987_s0 + $0x60] sm:$0xff]  }
   0xf   :  { %2569 = vmatpush3.bf16.msra.mxu1 %v2792_v6  ;;  %v2828_v42 = vld [vmem:[%s3986_s2 + $0x68] sm:$0xff]   ;;  %v2830_v44 = vld [vmem:[%s3986_s2 + $0x70] sm:$0xff]   ;;  %v2832_v46 = vld [vmem:[%s3986_s2 + $0x78] sm:$0xff]  }
  0x10   :  { %2649 = vmatpush3.bf16.msra.mxu0 %v2793_v7  ;;  %2570 = vmatprep.subr.bf16.mxu1 %v2794_v8  ;;  %v2829_v43 = vld [vmem:[%s3987_s0 + $0x68] sm:$0xff]   ;;  %v2831_v45 = vld [vmem:[%s3987_s0 + $0x70] sm:$0xff]   ;;  %v2833_v47 = vld [vmem:[%s3987_s0 + $0x78] sm:$0xff]  }
  0x11   :  { %2650 = vmatprep.subr.bf16.mxu0 %v2795_v9  ;;  %v2834_v48 = vld [vmem:[%s3986_s2 + $0x80] sm:$0xff]   ;;  %v2836_v50 = vld [vmem:[%s3986_s2 + $0x88] sm:$0xff]   ;;  %v2838_v52 = vld [vmem:[%s3986_s2 + $0x90] sm:$0xff]  }
  0x12   :  { %v2835_v49 = vld [vmem:[%s3987_s0 + $0x80] sm:$0xff]   ;;  %v2837_v51 = vld [vmem:[%s3987_s0 + $0x88] sm:$0xff]   ;;  %v2839_v53 = vld [vmem:[%s3987_s0 + $0x90] sm:$0xff]  }
  0x13   :  { %2571 = vmatpush3.bf16.msra.mxu1 %v2794_v8  ;;  %v2840_v54 = vld [vmem:[%s3986_s2 + $0x98] sm:$0xff]   ;;  %v2842_v56 = vld [vmem:[%s3986_s2 + $0xa0] sm:$0xff]   ;;  %v2844_v58 = vld [vmem:[%s3986_s2 + $0xa8] sm:$0xff]  }
  0x14   :  { %2651 = vmatpush3.bf16.msra.mxu0 %v2795_v9  ;;  %2572 = vmatprep.subr.bf16.mxu1 %v2796_v10  ;;  %v2841_v55 = vld [vmem:[%s3987_s0 + $0x98] sm:$0xff]   ;;  %v2843_v57 = vld [vmem:[%s3987_s0 + $0xa0] sm:$0xff]   ;;  %v2845_v59 = vld [vmem:[%s3987_s0 + $0xa8] sm:$0xff]  }
  0x15   :  { %2652 = vmatprep.subr.bf16.mxu0 %v2797_v11  ;;  %v2846_v60 = vld [vmem:[%s3986_s2 + $0xb0] sm:$0xff]   ;;  %v2848_v62 = vld [vmem:[%s3986_s2 + $0xb8] sm:$0xff]   ;;  %v2850_v0 = vld [vmem:[%s3986_s2 + $0xc0] sm:$0xff]  }
  0x16   :  { %v2847_v61 = vld [vmem:[%s3987_s0 + $0xb0] sm:$0xff]   ;;  %v2849_v63 = vld [vmem:[%s3987_s0 + $0xb8] sm:$0xff]   ;;  %v2851_v1 = vld [vmem:[%s3987_s0 + $0xc0] sm:$0xff]  }
  0x17   :  { %2573 = vmatpush3.bf16.msra.mxu1 %v2796_v10  ;;  %v2852_v2 = vld [vmem:[%s3986_s2 + $0xc8] sm:$0xff]   ;;  %v2854_v4 = vld [vmem:[%s3986_s2 + $0xd0] sm:$0xff]   ;;  %v2856_v6 = vld [vmem:[%s3986_s2 + $0xd8] sm:$0xff]  }
  0x18   :  { %2653 = vmatpush3.bf16.msra.mxu0 %v2797_v11  ;;  %2574 = vmatprep.subr.bf16.mxu1 %v2798_v14  ;;  %v2853_v3 = vld [vmem:[%s3987_s0 + $0xc8] sm:$0xff]   ;;  %v2855_v5 = vld [vmem:[%s3987_s0 + $0xd0] sm:$0xff]   ;;  %v2857_v7 = vld [vmem:[%s3987_s0 + $0xd8] sm:$0xff]  }
  0x19   :  { %2654 = vmatprep.subr.bf16.mxu0 %v2799_v15  ;;  %v2858_v8 = vld [vmem:[%s3986_s2 + $0xe0] sm:$0xff]   ;;  %v2860_v10 = vld [vmem:[%s3986_s2 + $0xe8] sm:$0xff]   ;;  %v2862_v12 = vld [vmem:[%s3986_s2 + $0xf0] sm:$0xff]  }
  0x1a   :  { %v2859_v9 = vld [vmem:[%s3987_s0 + $0xe0] sm:$0xff]   ;;  %v2861_v11 = vld [vmem:[%s3987_s0 + $0xe8] sm:$0xff]   ;;  %v2863_v13 = vld [vmem:[%s3987_s0 + $0xf0] sm:$0xff]  }
  0x1b   :  { %2575 = vmatpush3.bf16.msra.mxu1 %v2798_v14  ;;  %v2864_v14 = vld [vmem:[%s3986_s2 + $0xf8] sm:$0xff]  }
  0x1c   :  { %2655 = vmatpush3.bf16.msra.mxu0 %v2799_v15  ;;  %2576 = vmatprep.subr.bf16.mxu1 %v2800_v16  ;;  %v2865_v15 = vld [vmem:[%s3987_s0 + $0xf8] sm:$0xff]  }
  0x1d   :  { %2656 = vmatprep.subr.bf16.mxu0 %v2801_v17 }
  0x1f   :  { %2577 = vmatpush3.bf16.msra.mxu1 %v2800_v16 }
  0x20   :  { %2657 = vmatpush3.bf16.msra.mxu0 %v2801_v17 }
  0x22   :  { %2579 = vmatmul.mubr.bf16.vlgmr.msra.gmra.mrb[0].mxu1 %v2804_v18  ;;  %v3396_v18 = vld [vmem:[%s3988_s4] ss:$0 sm:$0xff] }
  0x23   :  { %2659 = vmatmul.mubr.bf16.vlgmr.msra.gmra.mrb[0].mxu0 %v2805_v19  ;;  %2582 = vmatprep.mubr.bf16.mxu1 %v2806_v20 }
  0x24   :  { %2662 = vmatprep.mubr.bf16.mxu0 %v2807_v21 }
  0x2a   :  { %2583 = vmatmul.mubr.bf16.gmra.mrb[4].mxu1 %v2808_v22 }
  0x2b   :  { %2663 = vmatmul.mubr.bf16.gmra.mrb[4].mxu0 %v2809_v23  ;;  %2586 = vmatprep.mubr.bf16.mxu1 %v2810_v24 }
  0x2c   :  { %2666 = vmatprep.mubr.bf16.mxu0 %v2811_v25 }
  0x32   :  { %2587 = vmatmul.mubr.bf16.gmra.mrb[8].mxu1 %v2812_v26 }
  0x33   :  { %2667 = vmatmul.mubr.bf16.gmra.mrb[8].mxu0 %v2813_v27  ;;  %2590 = vmatprep.mubr.bf16.mxu1 %v2814_v28 }
  0x34   :  { %2670 = vmatprep.mubr.bf16.mxu0 %v2815_v29 }
  0x3a   :  { %2591 = vmatmul.mubr.bf16.gmra.mrb[12].mxu1 %v2816_v30 }
  0x3b   :  { %2671 = vmatmul.mubr.bf16.gmra.mrb[12].mxu0 %v2817_v31  ;;  %2594 = vmatprep.mubr.bf16.mxu1 %v2818_v32 }
  0x3c   :  { %2674 = vmatprep.mubr.bf16.mxu0 %v2819_v33 }
  0x42   :  { %2595 = vmatmul.mubr.bf16.gmra.mrb[16].mxu1 %v2820_v34 }
  0x43   :  { %2675 = vmatmul.mubr.bf16.gmra.mrb[16].mxu0 %v2821_v35  ;;  %2598 = vmatprep.mubr.bf16.mxu1 %v2822_v36 }
  0x44   :  { %2678 = vmatprep.mubr.bf16.mxu0 %v2823_v37 }
  0x4a   :  { %2599 = vmatmul.mubr.bf16.gmra.mrb[20].mxu1 %v2824_v38 }
  0x4b   :  { %2679 = vmatmul.mubr.bf16.gmra.mrb[20].mxu0 %v2825_v39  ;;  %2602 = vmatprep.mubr.bf16.mxu1 %v2826_v40 }
  0x4c   :  { %2682 = vmatprep.mubr.bf16.mxu0 %v2827_v41 }
  0x52   :  { %2603 = vmatmul.mubr.bf16.gmra.mrb[24].mxu1 %v2828_v42 }
  0x53   :  { %2683 = vmatmul.mubr.bf16.gmra.mrb[24].mxu0 %v2829_v43  ;;  %2606 = vmatprep.mubr.bf16.mxu1 %v2830_v44 }
  0x54   :  { %2686 = vmatprep.mubr.bf16.mxu0 %v2831_v45 }
  0x5a   :  { %2607 = vmatmul.mubr.bf16.gmra.mrb[28].mxu1 %v2832_v46 }
  0x5b   :  { %2687 = vmatmul.mubr.bf16.gmra.mrb[28].mxu0 %v2833_v47  ;;  %2610 = vmatprep.mubr.bf16.mxu1 %v2834_v48 }
  0x5c   :  { %2690 = vmatprep.mubr.bf16.mxu0 %v2835_v49 }
  0x62   :  { %2611 = vmatmul.mubr.bf16.gmra.mrb[32].mxu1 %v2836_v50 }
  0x63   :  { %2691 = vmatmul.mubr.bf16.gmra.mrb[32].mxu0 %v2837_v51  ;;  %2614 = vmatprep.mubr.bf16.mxu1 %v2838_v52 }
  0x64   :  { %2694 = vmatprep.mubr.bf16.mxu0 %v2839_v53 }
  0x6a   :  { %2615 = vmatmul.mubr.bf16.gmra.mrb[36].mxu1 %v2840_v54 }
  0x6b   :  { %2695 = vmatmul.mubr.bf16.gmra.mrb[36].mxu0 %v2841_v55  ;;  %2618 = vmatprep.mubr.bf16.mxu1 %v2842_v56 }
  0x6c   :  { %2698 = vmatprep.mubr.bf16.mxu0 %v2843_v57 }
  0x72   :  { %2619 = vmatmul.mubr.bf16.gmra.mrb[40].mxu1 %v2844_v58 }
  0x73   :  { %2699 = vmatmul.mubr.bf16.gmra.mrb[40].mxu0 %v2845_v59  ;;  %2622 = vmatprep.mubr.bf16.mxu1 %v2846_v60 }
  0x74   :  { %2702 = vmatprep.mubr.bf16.mxu0 %v2847_v61 }
  0x7a   :  { %2623 = vmatmul.mubr.bf16.gmra.mrb[44].mxu1 %v2848_v62 }
  0x7b   :  { %2703 = vmatmul.mubr.bf16.gmra.mrb[44].mxu0 %v2849_v63  ;;  %2626 = vmatprep.mubr.bf16.mxu1 %v2850_v0 }
  0x7c   :  { %2706 = vmatprep.mubr.bf16.mxu0 %v2851_v1 }
  0x82   :  { %2627 = vmatmul.mubr.bf16.gmra.mrb[48].mxu1 %v2852_v2 }
  0x83   :  { %2707 = vmatmul.mubr.bf16.gmra.mrb[48].mxu0 %v2853_v3  ;;  %2630 = vmatprep.mubr.bf16.mxu1 %v2854_v4 }
  0x84   :  { %2710 = vmatprep.mubr.bf16.mxu0 %v2855_v5 }
  0x8a   :  { %2631 = vmatmul.mubr.bf16.gmra.mrb[52].mxu1 %v2856_v6 }
  0x8b   :  { %2711 = vmatmul.mubr.bf16.gmra.mrb[52].mxu0 %v2857_v7  ;;  %2634 = vmatprep.mubr.bf16.mxu1 %v2858_v8 }
  0x8c   :  { %2714 = vmatprep.mubr.bf16.mxu0 %v2859_v9 }
  0x92   :  { %2635 = vmatmul.mubr.bf16.gmra.mrb[56].mxu1 %v2860_v10 }
  0x93   :  { %2715 = vmatmul.mubr.bf16.gmra.mrb[56].mxu0 %v2861_v11  ;;  %2638 = vmatprep.mubr.bf16.mxu1 %v2862_v12 }
  0x94   :  { %2718 = vmatprep.mubr.bf16.mxu0 %v2863_v13 }
  0x9a   :  { %2639 = vmatmul.mubr.bf16.gmra.mrb[60].mxu1 %v2864_v14 }
  0x9b   :  { %2719 = vmatmul.mubr.bf16.gmra.mrb[60].mxu0 %v2865_v15 }
  0xf5   :  { %v2580_v16 = vpop.f32.mrb[0].mxu1 }
  0xf6   :  { %v2660_v17 = vpop.f32.mrb[0].mxu0  ;;  %v455_v19 = vpop.f32.mrb[1].mxu1 }
  0xf7   :  { %v993_v20 = vadd.f32 %v2660_v17, %v2580_v16  ;;  %v984_v21 = vpop.f32.mrb[1].mxu0  ;;  %v2581_v22 = vpop.f32.mrb[2].mxu1 }
  0xf8   :  { %v985_v23 = vadd.f32 %v984_v21, %v455_v19  ;;  %v2661_v24 = vpop.f32.mrb[2].mxu0  ;;  %v458_v25 = vpop.f32.mrb[3].mxu1 }
  0xf9   :  { %v3399_v26 = vadd.f32 %v3396_v18, %v993_v20  ;;  %v996_v27 = vadd.f32 %v2661_v24, %v2581_v22  ;;  %v987_v28 = vpop.f32.mrb[3].mxu0 }
  0xfa   :  { %v3402_v29 = vadd.f32 %v3396_v18, %v985_v23  ;;  %v988_v30 = vadd.f32 %v987_v28, %v458_v25 }
  0xfb   :  { %v1312_v31 = vmax.f32 %v3399_v26, -30.0  ;;  %v3406_v32 = vadd.f32 %v3396_v18, %v996_v27 }
  0xfc   :  { %v1310_v33 = vmax.f32 %v3402_v29, -30.0  ;;  %v3410_v34 = vadd.f32 %v3396_v18, %v988_v30 }
  0xfd   :  { %v1376_v35 = vsub.f32 0.0, %v1312_v31  ;;  %v1313_v36 = vmax.f32 %v3406_v32, -30.0  ;;  %v2584_v37 = vpop.f32.mrb[4].mxu1 }
  0xfe   :  { %v1374_v38 = vsub.f32 0.0, %v1310_v33  ;;  %v1311_v39 = vmax.f32 %v3410_v34, -30.0  ;;  %v2664_v40 = vpop.f32.mrb[4].mxu0  ;;  %v471_v41 = vpop.f32.mrb[5].mxu1 }
  0xff   :  { %v1442_v42 = vmul.f32 1.442695, %v1376_v35  ;;  %v1377_v43 = vsub.f32 0.0, %v1313_v36  ;;  %v1009_v44 = vadd.f32 %v2664_v40, %v2584_v37  ;;  %v1000_v45 = vpop.f32.mrb[5].mxu0  ;;  %v2585_v46 = vpop.f32.mrb[6].mxu1 }
 0x100   :  { %v1438_v47 = vmul.f32 1.442695, %v1374_v38  ;;  %v1375_v48 = vsub.f32 0.0, %v1311_v39  ;;  %v1001_v49 = vadd.f32 %v1000_v45, %v471_v41  ;;  %v2665_v50 = vpop.f32.mrb[6].mxu0  ;;  %v474_v51 = vpop.f32.mrb[7].mxu1 }
 0x101   :  { %2866 = vpow2.f32 %v1442_v42  ;;  %v1444_v52 = vmul.f32 1.442695, %v1377_v43  ;;  %v3415_v53 = vadd.f32 %v3396_v18, %v1009_v44  ;;  %v1012_v54 = vadd.f32 %v2665_v50, %v2585_v46  ;;  %v1003_v55 = vpop.f32.mrb[7].mxu0 }
 0x102   :  { %2868 = vpow2.f32 %v1438_v47  ;;  %v1440_v56 = vmul.f32 1.442695, %v1375_v48  ;;  %v3418_v57 = vadd.f32 %v3396_v18, %v1001_v49  ;;  %v1004_v58 = vadd.f32 %v1003_v55, %v474_v51 }
 0x103   :  { %2870 = vpow2.f32 %v1444_v52  ;;  %v1316_v59 = vmax.f32 %v3415_v53, -30.0  ;;  %v3422_v60 = vadd.f32 %v3396_v18, %v1012_v54 }
 0x104   :  { %2872 = vpow2.f32 %v1440_v56  ;;  %v1314_v61 = vmax.f32 %v3418_v57, -30.0  ;;  %v3426_v62 = vadd.f32 %v3396_v18, %v1004_v58 }
 0x105   :  { %v1380_v63 = vsub.f32 0.0, %v1316_v59  ;;  %v1317_v0 = vmax.f32 %v3422_v60, -30.0  ;;  %v2588_v1 = vpop.f32.mrb[8].mxu1 }
 0x106   :  { %v1378_v2 = vsub.f32 0.0, %v1314_v61  ;;  %v1315_v3 = vmax.f32 %v3426_v62, -30.0  ;;  %v2668_v4 = vpop.f32.mrb[8].mxu0  ;;  %v487_v5 = vpop.f32.mrb[9].mxu1 }
 0x107   :  { %v1450_v6 = vmul.f32 1.442695, %v1380_v63  ;;  %v1381_v7 = vsub.f32 0.0, %v1317_v0  ;;  %v1025_v8 = vadd.f32 %v2668_v4, %v2588_v1  ;;  %v1016_v9 = vpop.f32.mrb[9].mxu0  ;;  %v2589_v10 = vpop.f32.mrb[10].mxu1 }
 0x108   :  { %v1446_v11 = vmul.f32 1.442695, %v1378_v2  ;;  %v1379_v12 = vsub.f32 0.0, %v1315_v3  ;;  %v1017_v13 = vadd.f32 %v1016_v9, %v487_v5  ;;  %v2669_v14 = vpop.f32.mrb[10].mxu0  ;;  %v490_v15 = vpop.f32.mrb[11].mxu1 }
 0x109   :  { %2874 = vpow2.f32 %v1450_v6  ;;  %v1452_v16 = vmul.f32 1.442695, %v1381_v7  ;;  %v3431_v17 = vadd.f32 %v3396_v18, %v1025_v8  ;;  %v1028_v19 = vadd.f32 %v2669_v14, %v2589_v10  ;;  %v1019_v20 = vpop.f32.mrb[11].mxu0 }
 0x10a   :  { %2876 = vpow2.f32 %v1446_v11  ;;  %v1448_v21 = vmul.f32 1.442695, %v1379_v12  ;;  %v3434_v22 = vadd.f32 %v3396_v18, %v1017_v13  ;;  %v1020_v23 = vadd.f32 %v1019_v20, %v490_v15 }
 0x10b   :  { %v2867_v24 = vpop.eup %2866  ;;  %2878 = vpow2.f32 %v1452_v16  ;;  %v1320_v25 = vmax.f32 %v3431_v17, -30.0  ;;  %v3438_v27 = vadd.f32 %v3396_v18, %v1028_v19 }
 0x10c   :  { %v2869_v28 = vpop.eup %2868  ;;  %v1568_v30 = vadd.f32 1.0, %v2867_v24  ;;  %2880 = vpow2.f32 %v1448_v21  ;;  %v1318_v31 = vmax.f32 %v3434_v22, -30.0  ;;  %v3442_v33 = vadd.f32 %v3396_v18, %v1020_v23 }
 0x10d   :  { %v2871_v35 = vpop.eup %2870  ;;  %v1566_v36 = vadd.f32 1.0, %v2869_v28  ;;  %v1384_v37 = vsub.f32 0.0, %v1320_v25  ;;  %v1321_v38 = vmax.f32 %v3438_v27, -30.0  ;;  %v2592_v39 = vpop.f32.mrb[12].mxu1 }
 0x10e   :  { %v2873_v40 = vpop.eup %2872  ;;  %2882 = vrcp.f32 %v1568_v30  ;;  %v1569_v41 = vadd.f32 1.0, %v2871_v35  ;;  %v1382_v42 = vsub.f32 0.0, %v1318_v31  ;;  %v1319_v43 = vmax.f32 %v3442_v33, -30.0  ;;  %v2672_v44 = vpop.f32.mrb[12].mxu0 }
 0x10f   :  { %v503_v45 = vpop.f32.mrb[13].mxu1  ;;  %2884 = vrcp.f32 %v1566_v36  ;;  %v1567_v46 = vadd.f32 1.0, %v2873_v40  ;;  %v1458_v47 = vmul.f32 1.442695, %v1384_v37  ;;  %v1385_v48 = vsub.f32 0.0, %v1321_v38  ;;  %v1032_v49 = vpop.f32.mrb[13].mxu0 }
 0x110   :  { %v2593_v50 = vpop.f32.mrb[14].mxu1  ;;  %2886 = vrcp.f32 %v1569_v41  ;;  %v1454_v51 = vmul.f32 1.442695, %v1382_v42  ;;  %v1383_v52 = vsub.f32 0.0, %v1319_v43  ;;  %v1041_v54 = vadd.f32 %v2672_v44, %v2592_v39  ;;  %v2673_v55 = vpop.f32.mrb[14].mxu0 }
 0x111   :  { %v506_v56 = vpop.f32.mrb[15].mxu1  ;;  %2888 = vrcp.f32 %v1567_v46  ;;  %v1460_v58 = vmul.f32 1.442695, %v1385_v48  ;;  %v1033_v59 = vadd.f32 %v1032_v49, %v503_v45  ;;  %v1044_v61 = vadd.f32 %v2673_v55, %v2593_v50  ;;  %v1035_v63 = vpop.f32.mrb[15].mxu0 }
 0x112   :  { %2890 = vpow2.f32 %v1458_v47  ;;  %v1456_v0 = vmul.f32 1.442695, %v1383_v52  ;;  %v3447_v1 = vadd.f32 %v3396_v18, %v1041_v54  ;;  %v1036_v2 = vadd.f32 %v1035_v63, %v506_v56 }
 0x113   :  { %v2875_v3 = vpop.eup %2874  ;;  %2892 = vpow2.f32 %v1454_v51  ;;  %v3450_v4 = vadd.f32 %v3396_v18, %v1033_v59  ;;  %v3453_v5 = vadd.f32 %v3396_v18, %v1044_v61 }
 0x114   :  { %v2877_v6 = vpop.eup %2876  ;;  %v1572_v7 = vadd.f32 1.0, %v2875_v3  ;;  %2894 = vpow2.f32 %v1460_v58  ;;  %v1324_v8 = vmax.f32 %v3447_v1, -30.0  ;;  %v3457_v9 = vadd.f32 %v3396_v18, %v1036_v2 }
 0x115   :  { %v2879_v10 = vpop.eup %2878  ;;  %v1570_v11 = vadd.f32 1.0, %v2877_v6  ;;  %2896 = vpow2.f32 %v1456_v0  ;;  %v1322_v12 = vmax.f32 %v3450_v4, -30.0  ;;  %v1325_v13 = vmax.f32 %v3453_v5, -30.0  ;;  %v2596_v14 = vpop.f32.mrb[16].mxu1 }
 0x116   :  { %v2881_v15 = vpop.eup %2880  ;;  %2898 = vrcp.f32 %v1572_v7  ;;  %v1573_v16 = vadd.f32 1.0, %v2879_v10  ;;  %v1388_v19 = vsub.f32 0.0, %v1324_v8  ;;  %v1323_v20 = vmax.f32 %v3457_v9, -30.0  ;;  %v2676_v21 = vpop.f32.mrb[16].mxu0 }
 0x117   :  { %v519_v23 = vpop.f32.mrb[17].mxu1  ;;  %2900 = vrcp.f32 %v1570_v11  ;;  %v1571_v24 = vadd.f32 1.0, %v2881_v15  ;;  %v1386_v25 = vsub.f32 0.0, %v1322_v12  ;;  %v1389_v28 = vsub.f32 0.0, %v1325_v13  ;;  %v1048_v30 = vpop.f32.mrb[17].mxu0 }
 0x118   :  { %v2597_v31 = vpop.f32.mrb[18].mxu1  ;;  %v2883_v35 = vpop.eup %2882  ;;  %2902 = vrcp.f32 %v1573_v16  ;;  %v1466_v36 = vmul.f32 1.442695, %v1388_v19  ;;  %v1387_v37 = vsub.f32 0.0, %v1323_v20  ;;  %v1057_v38 = vadd.f32 %v2676_v21, %v2596_v14 }
 0x119   :  { %v2677_v39 = vpop.f32.mrb[18].mxu0  ;;  %v522_v40 = vpop.f32.mrb[19].mxu1  ;;  %v1696_v42 = vmul.f32 %v2883_v35, %v3399_v26  ;;  %2904 = vrcp.f32 %v1571_v24  ;;  %v1462_v43 = vmul.f32 1.442695, %v1386_v25  ;;  %v1468_v44 = vmul.f32 1.442695, %v1389_v28 }
 0x11a   :  { %v2885_v41 = vpop.eup %2884  ;;  %v1051_v45 = vpop.f32.mrb[19].mxu0  ;;  %2906 = vpow2.f32 %v1466_v36  ;;  %v1464_v48 = vmul.f32 1.442695, %v1387_v37  ;;  %v3465_v49 = vadd.f32 %v3396_v18, %v1057_v38  ;;  %v1049_v52 = vadd.f32 %v1048_v30, %v519_v23 }
 0x11b   :  { %v2887_v46 = vpop.eup %2886  ;;  %v1694_v47 = vmul.f32 %v2885_v41, %v3402_v29  ;;  %2908 = vpow2.f32 %v1462_v43  ;;  %v1060_v54 = vadd.f32 %v2677_v39, %v2597_v31  ;;  %v1052_v58 = vadd.f32 %v1051_v45, %v522_v40 }
 0x11c   :  { %v2889_v50 = vpop.eup %2888  ;;  %v1697_v51 = vmul.f32 %v2887_v46, %v3406_v32  ;;  %2910 = vpow2.f32 %v1468_v44  ;;  %v1328_v56 = vmax.f32 %v3465_v49, -30.0  ;;  %v3471_v63 = vadd.f32 %v3396_v18, %v1049_v52 }
 0x11d   :  { %v2891_v55 = vpop.eup %2890  ;;  %v1695_v26 = vmul.f32 %v2889_v50, %v3410_v34  ;;  %2912 = vpow2.f32 %v1464_v48  ;;  %v2600_v0 = vpop.f32.mrb[20].mxu1  ;;  %v3474_v7 = vadd.f32 %v3396_v18, %v1060_v54  ;;  %v3481_v13 = vadd.f32 %v3396_v18, %v1052_v58 }
 0x11e   :  { %v2893_v59 = vpop.eup %2892  ;;  %v2299_v29 = vpack.c.bf16 %v1697_v51, %v1696_v42  ;;  %v1576_v61 = vadd.f32 1.0, %v2891_v55  ;;  %v1392_v6 = vsub.f32 0.0, %v1328_v56  ;;  %v2680_v34 = vpop.f32.mrb[20].mxu0  ;;  %v1326_v12 = vmax.f32 %v3471_v63, -30.0 }
 0x11f   :  { %v2895_v2 = vpop.eup %2894  ;;  %v2294_v32 = vpack.c.bf16 %v1695_v26, %v1694_v47  ;;  %v1574_v3 = vadd.f32 1.0, %v2893_v59  ;;  %v535_v8 = vpop.f32.mrb[21].mxu1  ;;  %v1329_v21 = vmax.f32 %v3474_v7, -30.0  ;;  %v1327_v31 = vmax.f32 %v3481_v13, -30.0 }
 0x120   :  { %v2897_v10 = vpop.eup %2896  ;;  %2451 = vst [vmem:[%s3989_s5 + $0x8] sm:$0xff] %v2299_v29   ;;  %2914 = vrcp.f32 %v1576_v61  ;;  %v1577_v11 = vadd.f32 1.0, %v2895_v2  ;;  %v1064_v14 = vpop.f32.mrb[21].mxu0  ;;  %v1474_v20 = vmul.f32 1.442695, %v1392_v6  ;;  %v1390_v30 = vsub.f32 0.0, %v1326_v12 }
 0x121   :  { %v2601_v15 = vpop.f32.mrb[22].mxu1  ;;  %v2899_v16 = vpop.eup %2898  ;;  %2295 = vst [vmem:[%s3989_s5] sm:$0xff] %v2294_v32   ;;  %2916 = vrcp.f32 %v1574_v3  ;;  %v1575_v19 = vadd.f32 1.0, %v2897_v10  ;;  %v1393_v38 = vsub.f32 0.0, %v1329_v21  ;;  %v1073_v39 = vadd.f32 %v2680_v34, %v2600_v0 }
 0x122   :  { %v2681_v23 = vpop.f32.mrb[22].mxu0  ;;  %v538_v24 = vpop.f32.mrb[23].mxu1  ;;  %v1700_v28 = vmul.f32 %v2899_v16, %v3415_v53  ;;  %2918 = vrcp.f32 %v1577_v11  ;;  %v1470_v42 = vmul.f32 1.442695, %v1390_v30  ;;  %v1391_v43 = vsub.f32 0.0, %v1327_v31 }
 0x123   :  { %v2901_v25 = vpop.eup %2900  ;;  %v1067_v35 = vpop.f32.mrb[23].mxu0  ;;  %2920 = vrcp.f32 %v1575_v19  ;;  %v1476_v45 = vmul.f32 1.442695, %v1393_v38  ;;  %v3493_v46 = vadd.f32 %v3396_v18, %v1073_v39  ;;  %v1065_v47 = vadd.f32 %v1064_v14, %v535_v8 }
 0x124   :  { %v2903_v36 = vpop.eup %2902  ;;  %v1698_v37 = vmul.f32 %v2901_v25, %v3418_v57  ;;  %2922 = vpow2.f32 %v1474_v20  ;;  %v1472_v51 = vmul.f32 1.442695, %v1391_v43  ;;  %v1076_v61 = vadd.f32 %v2681_v23, %v2601_v15 }
 0x125   :  { %v2905_v40 = vpop.eup %2904  ;;  %v1701_v41 = vmul.f32 %v2903_v36, %v3422_v60  ;;  %2924 = vpow2.f32 %v1470_v42  ;;  %v2604_v52 = vpop.f32.mrb[24].mxu1  ;;  %v1332_v26 = vmax.f32 %v3493_v46, -30.0  ;;  %v3500_v29 = vadd.f32 %v3396_v18, %v1065_v47 }
 0x126   :  { %v2907_v44 = vpop.eup %2906  ;;  %v1699_v53 = vmul.f32 %v2905_v40, %v3426_v62  ;;  %2926 = vpow2.f32 %v1476_v45  ;;  %v2684_v56 = vpop.f32.mrb[24].mxu0  ;;  %v1068_v6 = vadd.f32 %v1067_v35, %v538_v24  ;;  %v3507_v12 = vadd.f32 %v3396_v18, %v1076_v61 }
 0x127   :  { %v2909_v48 = vpop.eup %2908  ;;  %v2309_v50 = vpack.c.bf16 %v1701_v41, %v1700_v28  ;;  %v1580_v57 = vadd.f32 1.0, %v2907_v44  ;;  %v551_v58 = vpop.f32.mrb[25].mxu1  ;;  %v1396_v3 = vsub.f32 0.0, %v1332_v26  ;;  %v1330_v11 = vmax.f32 %v3500_v29, -30.0 }
 0x128   :  { %v2911_v54 = vpop.eup %2910  ;;  %v2304_v55 = vpack.c.bf16 %v1699_v53, %v1698_v37  ;;  %v1578_v60 = vadd.f32 1.0, %v2909_v48  ;;  %v1080_v0 = vpop.f32.mrb[25].mxu0  ;;  %v1089_v14 = vadd.f32 %v2684_v56, %v2604_v52  ;;  %v3511_v21 = vadd.f32 %v3396_v18, %v1068_v6 }
 0x129   :  { %v2913_v62 = vpop.eup %2912  ;;  %2453 = vst [vmem:[%s3989_s5 + $0x18] sm:$0xff] %v2309_v50   ;;  %2928 = vrcp.f32 %v1580_v57  ;;  %v1581_v59 = vadd.f32 1.0, %v2911_v54  ;;  %v2605_v2 = vpop.f32.mrb[26].mxu1  ;;  %v1482_v20 = vmul.f32 1.442695, %v1396_v3  ;;  %v1394_v25 = vsub.f32 0.0, %v1330_v11 }
 0x12a   :  { %2452 = vst [vmem:[%s3989_s5 + $0x10] sm:$0xff] %v2304_v55   ;;  %2930 = vrcp.f32 %v1578_v60  ;;  %v1579_v32 = vadd.f32 1.0, %v2913_v62  ;;  %v2685_v34 = vpop.f32.mrb[26].mxu0  ;;  %v554_v8 = vpop.f32.mrb[27].mxu1  ;;  %v1333_v28 = vmax.f32 %v3507_v12, -30.0  ;;  %v1331_v35 = vmax.f32 %v3511_v21, -30.0 }
 0x12b   :  { %v2915_v10 = vpop.eup %2914  ;;  %2932 = vrcp.f32 %v1581_v59  ;;  %v1083_v15 = vpop.f32.mrb[27].mxu0  ;;  %v1478_v38 = vmul.f32 1.442695, %v1394_v25  ;;  %v1081_v40 = vadd.f32 %v1080_v0, %v551_v58  ;;  %v1092_v59 = vadd.f32 %v2685_v34, %v2605_v2 }
 0x12c   :  { %v2917_v16 = vpop.eup %2916  ;;  %v1704_v19 = vmul.f32 %v2915_v10, %v3431_v17  ;;  %2934 = vrcp.f32 %v1579_v32  ;;  %v3518_v17 = vadd.f32 %v3396_v18, %v1089_v14  ;;  %v1397_v39 = vsub.f32 0.0, %v1333_v28 }
 0x12d   :  { %v2919_v23 = vpop.eup %2918  ;;  %v1702_v24 = vmul.f32 %v2917_v16, %v3434_v22  ;;  %2936 = vpow2.f32 %v1472_v51  ;;  %v2608_v22 = vpop.f32.mrb[28].mxu1  ;;  %v1395_v43 = vsub.f32 0.0, %v1331_v35  ;;  %v3523_v50 = vadd.f32 %v3396_v18, %v1081_v40 }
 0x12e   :  { %v2921_v30 = vpop.eup %2920  ;;  %v1705_v31 = vmul.f32 %v2919_v23, %v3438_v27  ;;  %2938 = vpow2.f32 %v1482_v20  ;;  %v1336_v44 = vmax.f32 %v3518_v17, -30.0  ;;  %v2688_v53 = vpop.f32.mrb[28].mxu0  ;;  %v1484_v48 = vmul.f32 1.442695, %v1397_v39 }
 0x12f   :  { %v2923_v36 = vpop.eup %2922  ;;  %v1703_v37 = vmul.f32 %v2921_v30, %v3442_v33  ;;  %v567_v27 = vpop.f32.mrb[29].mxu1  ;;  %2940 = vpow2.f32 %v1478_v38  ;;  %v1480_v54 = vmul.f32 1.442695, %v1395_v43  ;;  %v1334_v62 = vmax.f32 %v3523_v50, -30.0 }
 0x130   :  { %v2319_v41 = vpack.c.bf16 %v1705_v31, %v1704_v19  ;;  %v1584_v42 = vadd.f32 1.0, %v2923_v36  ;;  %v2925_v45 = vpop.eup %2924  ;;  %v1096_v57 = vpop.f32.mrb[29].mxu0  ;;  %v1400_v55 = vsub.f32 0.0, %v1336_v44  ;;  %v1084_v6 = vadd.f32 %v1083_v15, %v554_v8 }
 0x131   :  { %v2314_v47 = vpack.c.bf16 %v1703_v37, %v1702_v24  ;;  %v2609_v33 = vpop.f32.mrb[30].mxu1  ;;  %v2927_v51 = vpop.eup %2926  ;;  %v1582_v52 = vadd.f32 1.0, %v2925_v45  ;;  %v1398_v14 = vsub.f32 0.0, %v1334_v62  ;;  %v3535_v16 = vadd.f32 %v3396_v18, %v1092_v59 }
 0x132   :  { %2455 = vst [vmem:[%s3989_s5 + $0x28] sm:$0xff] %v2319_v41   ;;  %2942 = vrcp.f32 %v1584_v42  ;;  %v2689_v60 = vpop.f32.mrb[30].mxu0  ;;  %v570_v26 = vpop.f32.mrb[31].mxu1  ;;  %v1585_v58 = vadd.f32 1.0, %v2927_v51  ;;  %v1490_v3 = vmul.f32 1.442695, %v1400_v55  ;;  %v3539_v2 = vadd.f32 %v3396_v18, %v1084_v6 }
 0x133   :  { %v2929_v56 = vpop.eup %2928  ;;  %2454 = vst [vmem:[%s3989_s5 + $0x20] sm:$0xff] %v2314_v47   ;;  %2944 = vpow2.f32 %v1484_v48  ;;  %v1099_v61 = vpop.f32.mrb[31].mxu0  ;;  %v1105_v34 = vadd.f32 %v2688_v53, %v2608_v22  ;;  %v1486_v8 = vmul.f32 1.442695, %v1398_v14  ;;  %v1097_v41 = vadd.f32 %v1096_v57, %v567_v27 }
 0x134   :  { %v2931_v0 = vpop.eup %2930  ;;  %v1708_v32 = vmul.f32 %v2929_v56, %v3447_v1  ;;  %2946 = vrcp.f32 %v1582_v52  ;;  %v1335_v30 = vmax.f32 %v3539_v2, -30.0  ;;  %v1108_v45 = vadd.f32 %v2689_v60, %v2609_v33 }
 0x135   :  { %v2933_v10 = vpop.eup %2932  ;;  %v1706_v11 = vmul.f32 %v2931_v0, %v3450_v4  ;;  %2948 = vrcp.f32 %v1585_v58  ;;  %v1337_v4 = vmax.f32 %v3535_v16, -30.0  ;;  %v2612_v15 = vpop.f32.mrb[32].mxu1  ;;  %v1100_v47 = vadd.f32 %v1099_v61, %v570_v26 }
 0x136   :  { %v2935_v19 = vpop.eup %2934  ;;  %v1709_v20 = vmul.f32 %v2933_v10, %v3453_v5  ;;  %2950 = vpow2.f32 %v1480_v54  ;;  %v3545_v5 = vadd.f32 %v3396_v18, %v1105_v34  ;;  %v2692_v31 = vpop.f32.mrb[32].mxu0  ;;  %v1399_v40 = vsub.f32 0.0, %v1335_v30 }
 0x137   :  { %v2937_v1 = vpop.eup %2936  ;;  %v1707_v23 = vmul.f32 %v2935_v19, %v3457_v9  ;;  %2952 = vpow2.f32 %v1490_v3  ;;  %v3547_v35 = vpop.f32.mrb[33].mxu1  ;;  %v1401_v9 = vsub.f32 0.0, %v1337_v4  ;;  %v3561_v56 = vadd.f32 %v3396_v18, %v1097_v41 }
 0x138   :  { %v2939_v24 = vpop.eup %2938  ;;  %v2329_v25 = vpack.c.bf16 %v1709_v20, %v1708_v32  ;;  %v1583_v28 = vadd.f32 1.0, %v2937_v1  ;;  %2954 = vpow2.f32 %v1486_v8  ;;  %v1112_v38 = vpop.f32.mrb[33].mxu0  ;;  %v1340_v22 = vmax.f32 %v3545_v5, -30.0 }
 0x139   :  { %v2324_v36 = vpack.c.bf16 %v1707_v23, %v1706_v11  ;;  %v1588_v37 = vadd.f32 1.0, %v2939_v24  ;;  %v3549_v39 = vpop.f32.mrb[34].mxu1  ;;  %v2693_v42 = vpop.f32.mrb[34].mxu0  ;;  %v1492_v53 = vmul.f32 1.442695, %v1401_v9  ;;  %v3565_v58 = vadd.f32 %v3396_v18, %v1108_v45 }
 0x13a   :  { %2457 = vst [vmem:[%s3989_s5 + $0x38] sm:$0xff] %v2329_v25   ;;  %2956 = vrcp.f32 %v1583_v28  ;;  %v3555_v43 = vpop.f32.mrb[35].mxu1  ;;  %v2941_v44 = vpop.eup %2940  ;;  %v1488_v54 = vmul.f32 1.442695, %v1399_v40  ;;  %v1404_v55 = vsub.f32 0.0, %v1340_v22  ;;  %v3568_v62 = vadd.f32 %v3396_v18, %v1100_v47 }
 0x13b   :  { %2456 = vst [vmem:[%s3989_s5 + $0x30] sm:$0xff] %v2324_v36   ;;  %2958 = vrcp.f32 %v1588_v37  ;;  %v1115_v48 = vpop.f32.mrb[35].mxu0  ;;  %v1586_v52 = vadd.f32 1.0, %v2941_v44  ;;  %v1338_v59 = vmax.f32 %v3561_v56, -30.0  ;;  %v1341_v32 = vmax.f32 %v3565_v58, -30.0 }
 0x13c   :  { %v2943_v51 = vpop.eup %2942  ;;  %2960 = vpow2.f32 %v1492_v53  ;;  %v1498_v26 = vmul.f32 1.442695, %v1404_v55  ;;  %v1121_v14 = vadd.f32 %v2692_v31, %v2612_v15  ;;  %v1113_v9 = vadd.f32 %v1112_v38, %v3547_v35 }
 0x13d   :  { %v2945_v27 = vpop.eup %2944  ;;  %v1712_v57 = vmul.f32 %v2943_v51, %v3465_v49  ;;  %2962 = vrcp.f32 %v1586_v52  ;;  %v1339_v49 = vmax.f32 %v3568_v62, -30.0  ;;  %v2616_v3 = vpop.f32.mrb[36].mxu1  ;;  %v1402_v11 = vsub.f32 0.0, %v1338_v59 }
 0x13e   :  { %v2947_v33 = vpop.eup %2946  ;;  %v1589_v60 = vadd.f32 1.0, %v2945_v27  ;;  %2964 = vpow2.f32 %v1488_v54  ;;  %v2696_v19 = vpop.f32.mrb[36].mxu0  ;;  %v1405_v23 = vsub.f32 0.0, %v1341_v32  ;;  %v3578_v30 = vadd.f32 %v3396_v18, %v1121_v14 }
 0x13f   :  { %v2949_v61 = vpop.eup %2948  ;;  %v1710_v0 = vmul.f32 %v2947_v33, %v3471_v63  ;;  %v599_v20 = vpop.f32.mrb[37].mxu1  ;;  %v1403_v8 = vsub.f32 0.0, %v1339_v49  ;;  %v1494_v28 = vmul.f32 1.442695, %v1402_v11  ;;  %v1124_v53 = vadd.f32 %v2693_v42, %v3549_v39 }
 0x140   :  { %v2951_v6 = vpop.eup %2950  ;;  %v1713_v10 = vmul.f32 %v2949_v61, %v3474_v7  ;;  %2966 = vrcp.f32 %v1589_v60  ;;  %v1128_v63 = vpop.f32.mrb[37].mxu0  ;;  %v1500_v31 = vmul.f32 1.442695, %v1405_v23  ;;  %v1344_v44 = vmax.f32 %v3578_v30, -30.0 }
 0x141   :  { %v2953_v34 = vpop.eup %2952  ;;  %v1587_v1 = vadd.f32 1.0, %v2951_v6  ;;  %2968 = vpow2.f32 %v1498_v26  ;;  %v3575_v4 = vpop.f32.mrb[38].mxu1  ;;  %v1496_v37 = vmul.f32 1.442695, %v1403_v8  ;;  %v3594_v51 = vadd.f32 %v3396_v18, %v1113_v9 }
 0x142   :  { %v2339_v24 = vpack.c.bf16 %v1713_v10, %v1712_v57  ;;  %v1592_v25 = vadd.f32 1.0, %v2953_v34  ;;  %v3580_v7 = vpop.f32.mrb[38].mxu0  ;;  %v3582_v36 = vpop.f32.mrb[39].mxu1  ;;  %v1116_v35 = vadd.f32 %v1115_v48, %v3555_v43  ;;  %v1408_v52 = vsub.f32 0.0, %v1344_v44 }
 0x143   :  { %v2955_v15 = vpop.eup %2954  ;;  %2970 = vrcp.f32 %v1587_v1  ;;  %v3585_v40 = vpop.f32.mrb[39].mxu0  ;;  %v3599_v54 = vadd.f32 %v3396_v18, %v1124_v53  ;;  %v1342_v39 = vmax.f32 %v3594_v51, -30.0  ;;  %v1137_v32 = vadd.f32 %v2696_v19, %v2616_v3 }
 0x144   :  { %v2957_v22 = vpop.eup %2956  ;;  %2459 = vst [vmem:[%s3989_s5 + $0x48] sm:$0xff] %v2339_v24   ;;  %2972 = vrcp.f32 %v1592_v25  ;;  %v1590_v41 = vadd.f32 1.0, %v2955_v15  ;;  %v1506_v43 = vmul.f32 1.442695, %v1408_v52  ;;  %v1129_v34 = vadd.f32 %v1128_v63, %v599_v20 }
 0x145   :  { %v2959_v45 = vpop.eup %2958  ;;  %v1711_v47 = vmul.f32 %v2957_v22, %v3481_v13  ;;  %2974 = vpow2.f32 %v1494_v28  ;;  %v3603_v13 = vadd.f32 %v3396_v18, %v1116_v35  ;;  %v3605_v42 = vpop.f32.mrb[40].mxu1  ;;  %v1406_v61 = vsub.f32 0.0, %v1342_v39 }
 0x146   :  { %v1716_v38 = vmul.f32 %v2959_v45, %v3493_v46  ;;  %2976 = vrcp.f32 %v1590_v41  ;;  %v2961_v55 = vpop.eup %2960  ;;  %v1345_v46 = vmax.f32 %v3599_v54, -30.0  ;;  %v3608_v48 = vpop.f32.mrb[40].mxu0  ;;  %v3627_v15 = vadd.f32 %v3396_v18, %v1137_v32 }
 0x147   :  { %v2334_v27 = vpack.c.bf16 %v1711_v47, %v1710_v0  ;;  %2978 = vpow2.f32 %v1500_v31  ;;  %v2963_v57 = vpop.eup %2962  ;;  %v1593_v33 = vadd.f32 1.0, %v2961_v55  ;;  %v3610_v60 = vpop.f32.mrb[41].mxu1  ;;  %v1343_v0 = vmax.f32 %v3603_v13, -30.0 }
 0x148   :  { %2980 = vpow2.f32 %v1496_v37  ;;  %v2965_v26 = vpop.eup %2964  ;;  %v1714_v59 = vmul.f32 %v2963_v57, %v3500_v29  ;;  %v3617_v49 = vpop.f32.mrb[41].mxu0  ;;  %v1409_v14 = vsub.f32 0.0, %v1345_v46  ;;  %v1502_v29 = vmul.f32 1.442695, %v1406_v61 }
 0x149   :  { %2458 = vst [vmem:[%s3989_s5 + $0x40] sm:$0xff] %v2334_v27   ;;  %v3619_v6 = vpop.f32.mrb[42].mxu1  ;;  %2982 = vrcp.f32 %v1593_v33  ;;  %v1591_v11 = vadd.f32 1.0, %v2965_v26  ;;  %v2701_v1 = vpop.f32.mrb[42].mxu0  ;;  %v1407_v25 = vsub.f32 0.0, %v1343_v0  ;;  %v3630_v63 = vadd.f32 %v3396_v18, %v1129_v34 }
 0x14a   :  { %v2967_v10 = vpop.eup %2966  ;;  %v3621_v23 = vpop.f32.mrb[43].mxu1  ;;  %2984 = vpow2.f32 %v1506_v43  ;;  %v1508_v19 = vmul.f32 1.442695, %v1409_v14  ;;  %v1348_v22 = vmax.f32 %v3627_v15, -30.0  ;;  %v1140_v41 = vadd.f32 %v3580_v7, %v3575_v4 }
 0x14b   :  { %v2969_v8 = vpop.eup %2968  ;;  %v1717_v24 = vmul.f32 %v2967_v10, %v3507_v12  ;;  %v3624_v28 = vpop.f32.mrb[43].mxu0  ;;  %2986 = vrcp.f32 %v1591_v11  ;;  %v1504_v20 = vmul.f32 1.442695, %v1407_v25  ;;  %v1346_v45 = vmax.f32 %v3630_v63, -30.0 }
 0x14c   :  { %v1596_v3 = vadd.f32 1.0, %v2969_v8  ;;  %2988 = vpow2.f32 %v1502_v29  ;;  %v1132_v47 = vadd.f32 %v3585_v40, %v3582_v36  ;;  %v1412_v4 = vsub.f32 0.0, %v1348_v22 }
 0x14d   :  { %v2971_v31 = vpop.eup %2970  ;;  %v2349_v37 = vpack.c.bf16 %v1717_v24, %v1716_v38  ;;  %v1410_v39 = vsub.f32 0.0, %v1346_v45  ;;  %v3653_v57 = vadd.f32 %v3396_v18, %v1140_v41  ;;  %v1153_v26 = vadd.f32 %v3608_v48, %v3605_v42 }
 0x14e   :  { %v2973_v9 = vpop.eup %2972  ;;  %v1715_v12 = vmul.f32 %v2971_v31, %v3511_v21  ;;  %2990 = vrcp.f32 %v1596_v3  ;;  %v3643_v21 = vpop.f32.mrb[44].mxu1  ;;  %v3656_v36 = vadd.f32 %v3396_v18, %v1132_v47  ;;  %v1145_v42 = vadd.f32 %v3617_v49, %v3610_v60 }
 0x14f   :  { %v2975_v44 = vpop.eup %2974  ;;  %2461 = vst [vmem:[%s3989_s5 + $0x58] sm:$0xff] %v2349_v37   ;;  %v1720_v53 = vmul.f32 %v2973_v9, %v3518_v17  ;;  %2992 = vpow2.f32 %v1508_v19  ;;  %v3645_v7 = vpop.f32.mrb[44].mxu0  ;;  %v1510_v32 = vmul.f32 1.442695, %v1410_v39  ;;  %v1349_v10 = vmax.f32 %v3653_v57, -30.0 }
 0x150   :  { %v2977_v35 = vpop.eup %2976  ;;  %v2344_v38 = vpack.c.bf16 %v1715_v12, %v1714_v59  ;;  %v1594_v52 = vadd.f32 1.0, %v2975_v44  ;;  %2994 = vpow2.f32 %v1504_v20  ;;  %v3647_v55 = vpop.f32.mrb[45].mxu1  ;;  %v1347_v11 = vmax.f32 %v3656_v36, -30.0 }
 0x151   :  { %v2979_v27 = vpop.eup %2978  ;;  %v3650_v17 = vmul.f32 %v2977_v35, %v3523_v50  ;;  %v3658_v40 = vpop.f32.mrb[45].mxu0  ;;  %v1514_v50 = vmul.f32 1.442695, %v1412_v4  ;;  %v3676_v8 = vadd.f32 %v3396_v18, %v1153_v26  ;;  %v1156_v48 = vadd.f32 %v2701_v1, %v3619_v6  ;;  %v3686_v18 = vld [vmem:[%s3988_s4] ss:$0 sm:$0xff] }
 0x152   :  { %v3660_v33 = vpop.f32.mrb[46].mxu1  ;;  %v2981_v43 = vpop.eup %2980  ;;  %2460 = vst [vmem:[%s3989_s5 + $0x50] sm:$0xff] %v2344_v38   ;;  %2996 = vrcp.f32 %v1594_v52  ;;  %v1597_v46 = vadd.f32 1.0, %v2979_v27  ;;  %v1413_v25 = vsub.f32 0.0, %v1349_v10  ;;  %v1411_v3 = vsub.f32 0.0, %v1347_v11 }
 0x153   :  { %v3667_v59 = vpop.f32.mrb[46].mxu0  ;;  %v3669_v61 = vpop.f32.mrb[47].mxu1  ;;  %v1595_v0 = vadd.f32 1.0, %v2981_v43  ;;  %v1352_v37 = vmax.f32 %v3676_v8, -30.0  ;;  %v3689_v60 = vadd.f32 %v3686_v18, %v1145_v42  ;;  %v3709_v43 = vadd.f32 %v3686_v18, %v1156_v48 }
 0x154   :  { %v3673_v14 = vpop.f32.mrb[47].mxu0  ;;  %v2983_v34 = vpop.eup %2982  ;;  %2998 = vrcp.f32 %v1597_v46  ;;  %v1516_v1 = vmul.f32 1.442695, %v1413_v25  ;;  %v1512_v22 = vmul.f32 1.442695, %v1411_v3  ;;  %v1148_v26 = vadd.f32 %v3624_v28, %v3621_v23 }
 0x155   :  { %v2985_v24 = vpop.eup %2984  ;;  %v1721_v29 = vmul.f32 %v2983_v34, %v3535_v16  ;;  %3000 = vrcp.f32 %v1595_v0  ;;  %v3692_v20 = vpop.f32.mrb[48].mxu1  ;;  %v1416_v41 = vsub.f32 0.0, %v1352_v37  ;;  %v1350_v35 = vmax.f32 %v3689_v60, -30.0 }
 0x156   :  { %v2987_v19 = vpop.eup %2986  ;;  %v1600_v31 = vadd.f32 1.0, %v2985_v24  ;;  %3002 = vpow2.f32 %v1514_v50  ;;  %v3694_v44 = vpop.f32.mrb[48].mxu0  ;;  %v1353_v10 = vmax.f32 %v3709_v43, -30.0  ;;  %v1169_v11 = vadd.f32 %v3645_v7, %v3643_v21 }
 0x157   :  { %v2989_v49 = vpop.eup %2988  ;;  %v2359_v6 = vpack.c.bf16 %v1721_v29, %v1720_v53  ;;  %v1719_v16 = vmul.f32 %v2987_v19, %v3539_v2  ;;  %3004 = vpow2.f32 %v1510_v32  ;;  %v3696_v45 = vpop.f32.mrb[49].mxu1  ;;  %v1522_v39 = vmul.f32 1.442695, %v1416_v41 }
 0x158   :  { %v2991_v9 = vpop.eup %2990  ;;  %3006 = vrcp.f32 %v1600_v31  ;;  %v1598_v12 = vadd.f32 1.0, %v2989_v49  ;;  %v3704_v38 = vpop.f32.mrb[49].mxu0  ;;  %v1161_v34 = vadd.f32 %v3658_v40, %v3647_v55  ;;  %v3729_v24 = vadd.f32 %v3686_v18, %v1148_v26 }
 0x159   :  { %v2993_v47 = vpop.eup %2992  ;;  %2463 = vst [vmem:[%s3989_s5 + $0x68] sm:$0xff] %v2359_v6   ;;  %v2354_v2 = vpack.c.bf16 %v1719_v16, %v3650_v17  ;;  %v1724_v53 = vmul.f32 %v2991_v9, %v3545_v5  ;;  %3008 = vpow2.f32 %v1516_v1  ;;  %v3706_v52 = vpop.f32.mrb[50].mxu1  ;;  %v1414_v17 = vsub.f32 0.0, %v1350_v35 }
 0x15a   :  { %v2995_v4 = vpop.eup %2994  ;;  %3010 = vrcp.f32 %v1598_v12  ;;  %v1601_v27 = vadd.f32 1.0, %v2993_v47  ;;  %v3711_v46 = vpop.f32.mrb[50].mxu0  ;;  %v1417_v28 = vsub.f32 0.0, %v1353_v10  ;;  %v3732_v29 = vadd.f32 %v3686_v18, %v1169_v11 }
 0x15b   :  { %v3713_v50 = vpop.f32.mrb[51].mxu1  ;;  %2462 = vst [vmem:[%s3989_s5 + $0x60] sm:$0xff] %v2354_v2   ;;  %v1599_v5 = vadd.f32 1.0, %v2995_v4  ;;  %3012 = vpow2.f32 %v1512_v22  ;;  %v3720_v0 = vpop.f32.mrb[51].mxu0  ;;  %v1518_v48 = vmul.f32 1.442695, %v1414_v17  ;;  %v3735_v25 = vadd.f32 %v3686_v18, %v1161_v34 }
 0x15c   :  { %v2997_v32 = vpop.eup %2996  ;;  %3014 = vrcp.f32 %v1601_v27  ;;  %v1172_v55 = vadd.f32 %v3667_v59, %v3660_v33  ;;  %v1524_v31 = vmul.f32 1.442695, %v1417_v28  ;;  %v1356_v37 = vmax.f32 %v3732_v29, -30.0 }
 0x15d   :  { %v1722_v42 = vmul.f32 %v2997_v32, %v3561_v56  ;;  %3016 = vrcp.f32 %v1599_v5  ;;  %v1351_v56 = vmax.f32 %v3729_v24, -30.0  ;;  %v3741_v40 = vpop.f32.mrb[52].mxu1  ;;  %v1354_v49 = vmax.f32 %v3735_v25, -30.0 }
 0x15e   :  { %v2999_v23 = vpop.eup %2998  ;;  %3018 = vpow2.f32 %v1522_v39  ;;  %v3746_v6 = vpop.f32.mrb[52].mxu0  ;;  %v3751_v33 = vadd.f32 %v3686_v18, %v1172_v55  ;;  %v1420_v2 = vsub.f32 0.0, %v1356_v37 }
 0x15f   :  { %v3001_v21 = vpop.eup %3000  ;;  %v1725_v7 = vmul.f32 %v2999_v23, %v3565_v58  ;;  %3020 = vpow2.f32 %v1518_v48  ;;  %v3748_v16 = vpop.f32.mrb[53].mxu1  ;;  %v1415_v12 = vsub.f32 0.0, %v1351_v56  ;;  %v1418_v5 = vsub.f32 0.0, %v1354_v49 }
 0x160   :  { %v3003_v3 = vpop.eup %3002  ;;  %v1723_v19 = vmul.f32 %v3001_v21, %v3568_v62  ;;  %v3753_v59 = vpop.f32.mrb[53].mxu0  ;;  %3022 = vpow2.f32 %v1524_v31  ;;  %v1530_v10 = vmul.f32 1.442695, %v1420_v2  ;;  %v1357_v11 = vmax.f32 %v3751_v33, -30.0 }
 0x161   :  { %v3005_v58 = vpop.eup %3004  ;;  %v2369_v1 = vpack.c.bf16 %v1725_v7, %v1724_v53  ;;  %v1604_v9 = vadd.f32 1.0, %v3003_v3  ;;  %v3755_v22 = vpop.f32.mrb[54].mxu1  ;;  %v1520_v39 = vmul.f32 1.442695, %v1415_v12  ;;  %v1164_v48 = vadd.f32 %v3673_v14, %v3669_v61 }
 0x162   :  { %v3007_v62 = vpop.eup %3006  ;;  %v2364_v41 = vpack.c.bf16 %v1723_v19, %v1722_v42  ;;  %v1602_v47 = vadd.f32 1.0, %v3005_v58  ;;  %v3757_v35 = vpop.f32.mrb[54].mxu0  ;;  %v1421_v21 = vsub.f32 0.0, %v1357_v11  ;;  %v1185_v7 = vadd.f32 %v3694_v44, %v3692_v20 }
 0x163   :  { %v3759_v4 = vpop.f32.mrb[55].mxu1  ;;  %v3009_v27 = vpop.eup %3008  ;;  %2465 = vst [vmem:[%s3989_s5 + $0x78] sm:$0xff] %v2369_v1   ;;  %v1728_v53 = vmul.f32 %v3007_v62, %v3578_v30  ;;  %3024 = vrcp.f32 %v1604_v9  ;;  %v1526_v30 = vmul.f32 1.442695, %v1418_v5  ;;  %v3778_v3 = vadd.f32 %v3686_v18, %v1164_v48 }
 0x164   :  { %v3765_v17 = vpop.f32.mrb[55].mxu0  ;;  %v3011_v26 = vpop.eup %3010  ;;  %2464 = vst [vmem:[%s3989_s5 + $0x70] sm:$0xff] %v2364_v41   ;;  %3026 = vrcp.f32 %v1602_v47  ;;  %v1605_v32 = vadd.f32 1.0, %v3009_v27  ;;  %v1532_v31 = vmul.f32 1.442695, %v1421_v21  ;;  %v3786_v37 = vadd.f32 %v3686_v18, %v1185_v7 }
 0x165   :  { %v3013_v34 = vpop.eup %3012  ;;  %v1726_v42 = vmul.f32 %v3011_v26, %v3594_v51  ;;  %3028 = vpow2.f32 %v1520_v39  ;;  %v1177_v51 = vadd.f32 %v3704_v38, %v3696_v45  ;;  %v3782_v19 = vpop.f32.mrb[56].mxu1  ;;  %v1355_v45 = vmax.f32 %v3778_v3, -30.0 }
 0x166   :  { %v3015_v23 = vpop.eup %3014  ;;  %3030 = vrcp.f32 %v1605_v32  ;;  %v1603_v28 = vadd.f32 1.0, %v3013_v34  ;;  %v3788_v20 = vpop.f32.mrb[56].mxu0  ;;  %v1360_v12 = vmax.f32 %v3786_v37, -30.0  ;;  %v1188_v27 = vadd.f32 %v3711_v46, %v3706_v52 }
 0x167   :  { %v3017_v56 = vpop.eup %3016  ;;  %v1729_v55 = vmul.f32 %v3015_v23, %v3599_v54  ;;  %3032 = vpow2.f32 %v1530_v10  ;;  %v3790_v54 = vpop.f32.mrb[57].mxu1  ;;  %v1419_v47 = vsub.f32 0.0, %v1355_v45  ;;  %v3806_v2 = vadd.f32 %v3686_v18, %v1177_v51 }
 0x168   :  { %v3019_v61 = vpop.eup %3018  ;;  %v1727_v14 = vmul.f32 %v3017_v56, %v3603_v13  ;;  %3034 = vrcp.f32 %v1603_v28  ;;  %v3793_v38 = vpop.f32.mrb[57].mxu0  ;;  %v1424_v5 = vsub.f32 0.0, %v1360_v12  ;;  %v1180_v26 = vadd.f32 %v3720_v0, %v3713_v50 }
 0x169   :  { %v3021_v44 = vpop.eup %3020  ;;  %v2379_v49 = vpack.c.bf16 %v1729_v55, %v1728_v53  ;;  %v1608_v58 = vadd.f32 1.0, %v3019_v61  ;;  %3036 = vpow2.f32 %v1526_v30  ;;  %v3795_v1 = vpop.f32.mrb[58].mxu1  ;;  %v1201_v32 = vadd.f32 %v3746_v6, %v3741_v40 }
 0x16a   :  { %v2374_v13 = vpack.c.bf16 %v1727_v14, %v1726_v42  ;;  %v1606_v9 = vadd.f32 1.0, %v3021_v44  ;;  %3038 = vpow2.f32 %v1532_v31  ;;  %v3798_v62 = vpop.f32.mrb[58].mxu0  ;;  %v3800_v41 = vpop.f32.mrb[59].mxu1  ;;  %v1528_v34 = vmul.f32 1.442695, %v1419_v47 }
 0x16b   :  { %2467 = vst [vmem:[%s3989_s5 + $0x88] sm:$0xff] %v2379_v49   ;;  %3040 = vrcp.f32 %v1608_v58  ;;  %v3810_v53 = vpop.f32.mrb[59].mxu0  ;;  %v3023_v39 = vpop.eup %3022  ;;  %v1358_v52 = vmax.f32 %v3806_v2, -30.0  ;;  %v3821_v46 = vadd.f32 %v3686_v18, %v1188_v27  ;;  %v1538_v48 = vmul.f32 1.442695, %v1424_v5 }
 0x16c   :  { %2466 = vst [vmem:[%s3989_s5 + $0x80] sm:$0xff] %v2374_v13   ;;  %3042 = vrcp.f32 %v1606_v9  ;;  %v1609_v11 = vadd.f32 1.0, %v3023_v39  ;;  %v3825_v23 = vadd.f32 %v3686_v18, %v1180_v26  ;;  %v3828_v50 = vadd.f32 %v3686_v18, %v1201_v32 }
 0x16d   :  { %v3025_v10 = vpop.eup %3024  ;;  %v1422_v6 = vsub.f32 0.0, %v1358_v52  ;;  %v1361_v28 = vmax.f32 %v3821_v46, -30.0  ;;  %v3832_v21 = vpop.f32.mrb[60].mxu1 }
 0x16e   :  { %v3027_v42 = vpop.eup %3026  ;;  %v1732_v30 = vmul.f32 %v3025_v10, %v3627_v15  ;;  %3044 = vrcp.f32 %v1609_v11  ;;  %v1359_v15 = vmax.f32 %v3825_v23, -30.0  ;;  %v1364_v55 = vmax.f32 %v3828_v50, -30.0  ;;  %v3836_v51 = vpop.f32.mrb[60].mxu0 }
 0x16f   :  { %v3029_v0 = vpop.eup %3028  ;;  %v1730_v40 = vmul.f32 %v3027_v42, %v3630_v63  ;;  %3046 = vpow2.f32 %v1528_v34  ;;  %v3838_v61 = vpop.f32.mrb[61].mxu1  ;;  %v1534_v31 = vmul.f32 1.442695, %v1422_v6  ;;  %v1425_v44 = vsub.f32 0.0, %v1361_v28 }
 0x170   :  { %v3031_v7 = vpop.eup %3030  ;;  %v1607_v56 = vadd.f32 1.0, %v3029_v0  ;;  %3048 = vpow2.f32 %v1538_v48  ;;  %v3841_v49 = vpop.f32.mrb[61].mxu0  ;;  %v1423_v9 = vsub.f32 0.0, %v1359_v15  ;;  %v1428_v12 = vsub.f32 0.0, %v1364_v55 }
 0x171   :  { %v3033_v14 = vpop.eup %3032  ;;  %v1733_v63 = vmul.f32 %v3031_v7, %v3653_v57  ;;  %v3843_v58 = vpop.f32.mrb[62].mxu1  ;;  %v1540_v26 = vmul.f32 1.442695, %v1425_v44  ;;  %v1204_v28 = vadd.f32 %v3757_v35, %v3755_v22  ;;  %v1196_v7 = vadd.f32 %v3765_v17, %v3759_v4 }
 0x172   :  { %v3035_v45 = vpop.eup %3034  ;;  %3050 = vrcp.f32 %v1607_v56  ;;  %v1612_v13 = vadd.f32 1.0, %v3033_v14  ;;  %v3845_v47 = vpop.f32.mrb[62].mxu0  ;;  %v1536_v34 = vmul.f32 1.442695, %v1423_v9  ;;  %v1546_v52 = vmul.f32 1.442695, %v1428_v12 }
 0x173   :  { %v3847_v27 = vpop.f32.mrb[63].mxu1  ;;  %v3037_v39 = vpop.eup %3036  ;;  %v2389_v5 = vpack.c.bf16 %v1733_v63, %v1732_v30  ;;  %v1731_v57 = vmul.f32 %v3035_v45, %v3656_v36  ;;  %3052 = vpow2.f32 %v1534_v31  ;;  %v1193_v36 = vadd.f32 %v3753_v59, %v3748_v16 }
 0x174   :  { %v3850_v32 = vpop.f32.mrb[63].mxu0  ;;  %v3039_v10 = vpop.eup %3038  ;;  %3054 = vrcp.f32 %v1612_v13  ;;  %v1610_v11 = vadd.f32 1.0, %v3037_v39  ;;  %v3872_v16 = vadd.f32 %v3686_v18, %v1204_v28  ;;  %v3875_v59 = vadd.f32 %v3686_v18, %v1196_v7 }
 0x175   :  { %v3041_v42 = vpop.eup %3040  ;;  %2469 = vst [vmem:[%s3989_s5 + $0x98] sm:$0xff] %v2389_v5   ;;  %v2384_v48 = vpack.c.bf16 %v1731_v57, %v1730_v40  ;;  %v1613_v0 = vadd.f32 1.0, %v3039_v10  ;;  %3056 = vpow2.f32 %v1540_v26  ;;  %v3867_v56 = vadd.f32 %v3686_v18, %v1193_v36 }
 0x176   :  { %v3043_v30 = vpop.eup %3042  ;;  %v1736_v6 = vmul.f32 %v3041_v42, %v3676_v8  ;;  %3058 = vrcp.f32 %v1610_v11  ;;  %v1217_v8 = vadd.f32 %v3788_v20, %v3782_v19  ;;  %v1209_v22 = vadd.f32 %v3793_v38, %v3790_v54 }
 0x177   :  { %2468 = vst [vmem:[%s3989_s5 + $0x90] sm:$0xff] %v2384_v48   ;;  %v1734_v40 = vmul.f32 %v3043_v30, %v3689_v60  ;;  %3060 = vrcp.f32 %v1613_v0  ;;  %v1362_v60 = vmax.f32 %v3867_v56, -30.0  ;;  %v1220_v17 = vadd.f32 %v3798_v62, %v3795_v1 }
 0x178   :  { %3062 = vpow2.f32 %v1536_v34  ;;  %v3045_v35 = vpop.eup %3044  ;;  %v3881_v4 = vadd.f32 %v3686_v18, %v1217_v8  ;;  %v1365_v15 = vmax.f32 %v3872_v16, -30.0  ;;  %v1363_v55 = vmax.f32 %v3875_v59, -30.0 }
 0x179   :  { %3064 = vpow2.f32 %v1546_v52  ;;  %v3047_v19 = vpop.eup %3046  ;;  %v1737_v20 = vmul.f32 %v3045_v35, %v3709_v43  ;;  %v3889_v14 = vadd.f32 %v3686_v18, %v1209_v22  ;;  %v1426_v63 = vsub.f32 0.0, %v1362_v60 }
 0x17a   :  { %v3049_v54 = vpop.eup %3048  ;;  %v1611_v38 = vadd.f32 1.0, %v3047_v19  ;;  %v1368_v31 = vmax.f32 %v3881_v4, -30.0  ;;  %v3893_v44 = vadd.f32 %v3686_v18, %v1220_v17  ;;  %v1429_v13 = vsub.f32 0.0, %v1365_v15 }
 0x17b   :  { %v2399_v1 = vpack.c.bf16 %v1737_v20, %v1736_v6  ;;  %v1616_v62 = vadd.f32 1.0, %v3049_v54  ;;  %v1427_v43 = vsub.f32 0.0, %v1363_v55  ;;  %v1542_v39 = vmul.f32 1.442695, %v1426_v63 }
 0x17c   :  { %v3051_v45 = vpop.eup %3050  ;;  %3066 = vrcp.f32 %v1611_v38  ;;  %v1432_v5 = vsub.f32 0.0, %v1368_v31  ;;  %v1548_v10 = vmul.f32 1.442695, %v1429_v13  ;;  %v1369_v36 = vmax.f32 %v3893_v44, -30.0 }
 0x17d   :  { %v3053_v9 = vpop.eup %3052  ;;  %v1735_v12 = vmul.f32 %v3051_v45, %v3729_v24  ;;  %2471 = vst [vmem:[%s3989_s5 + $0xa8] sm:$0xff] %v2399_v1   ;;  %3068 = vrcp.f32 %v1616_v62  ;;  %v1544_v52 = vmul.f32 1.442695, %v1427_v43  ;;  %v1366_v24 = vmax.f32 %v3889_v14, -30.0 }
 0x17e   :  { %v3055_v57 = vpop.eup %3054  ;;  %v1614_v26 = vadd.f32 1.0, %v3053_v9  ;;  %3070 = vpow2.f32 %v1542_v39  ;;  %v1554_v42 = vmul.f32 1.442695, %v1432_v5  ;;  %v1212_v28 = vadd.f32 %v3810_v53, %v3800_v41 }
 0x17f   :  { %v3057_v11 = vpop.eup %3056  ;;  %v2394_v34 = vpack.c.bf16 %v1735_v12, %v1734_v40  ;;  %v1740_v6 = vmul.f32 %v3055_v57, %v3732_v29  ;;  %v1233_v7 = vadd.f32 %v3836_v51, %v3832_v21  ;;  %v1430_v22 = vsub.f32 0.0, %v1366_v24 }
 0x180   :  { %v3059_v48 = vpop.eup %3058  ;;  %3072 = vrcp.f32 %v1614_v26  ;;  %v1617_v0 = vadd.f32 1.0, %v3057_v11  ;;  %v1433_v35 = vsub.f32 0.0, %v1369_v36  ;;  %v3911_v19 = vadd.f32 %v3686_v18, %v1212_v28 }
 0x181   :  { %v3061_v30 = vpop.eup %3060  ;;  %2470 = vst [vmem:[%s3989_s5 + $0xa0] sm:$0xff] %v2394_v34   ;;  %3074 = vpow2.f32 %v1548_v10  ;;  %v3914_v29 = vadd.f32 %v3686_v18, %v1233_v7  ;;  %v1550_v53 = vmul.f32 1.442695, %v1430_v22  ;;  %v1225_v15 = vadd.f32 %v3841_v49, %v3838_v61 }
 0x182   :  { %v3063_v40 = vpop.eup %3062  ;;  %v1741_v8 = vmul.f32 %v3061_v30, %v3751_v33  ;;  %3076 = vrcp.f32 %v1617_v0  ;;  %v1556_v21 = vmul.f32 1.442695, %v1433_v35  ;;  %v1367_v33 = vmax.f32 %v3911_v19, -30.0 }
 0x183   :  { %v3065_v60 = vpop.eup %3064  ;;  %v1615_v17 = vadd.f32 1.0, %v3063_v40  ;;  %3078 = vpow2.f32 %v1544_v52  ;;  %v1372_v51 = vmax.f32 %v3914_v29, -30.0  ;;  %v1236_v55 = vadd.f32 %v3845_v47, %v3843_v58 }
 0x184   :  { %v2409_v20 = vpack.c.bf16 %v1741_v8, %v1740_v6  ;;  %v1620_v41 = vadd.f32 1.0, %v3065_v60  ;;  %3080 = vpow2.f32 %v1554_v42  ;;  %v1228_v54 = vadd.f32 %v3850_v32, %v3847_v27 }
 0x185   :  { %3082 = vrcp.f32 %v1615_v17  ;;  %v1738_v63 = vmul.f32 %v3059_v48, %v3735_v25  ;;  %v1431_v31 = vsub.f32 0.0, %v1367_v33  ;;  %v1436_v45 = vsub.f32 0.0, %v1372_v51 }
 0x186   :  { %2473 = vst [vmem:[%s3989_s5 + $0xb8] sm:$0xff] %v2409_v20   ;;  %v3067_v38 = vpop.eup %3066  ;;  %3084 = vpow2.f32 %v1550_v53  ;;  %v3930_v13 = vadd.f32 %v3686_v18, %v1225_v15  ;;  %v3933_v61 = vadd.f32 %v3686_v18, %v1236_v55  ;;  %v3936_v27 = vadd.f32 %v3686_v18, %v1228_v54 }
 0x187   :  { %v3069_v1 = vpop.eup %3068  ;;  %v1739_v62 = vmul.f32 %v3067_v38, %v3778_v3  ;;  %3086 = vpow2.f32 %v1556_v21  ;;  %v1552_v58 = vmul.f32 1.442695, %v1431_v31  ;;  %v1562_v47 = vmul.f32 1.442695, %v1436_v45 }
 0x188   :  { %v3071_v49 = vpop.eup %3070  ;;  %3088 = vrcp.f32 %v1620_v41  ;;  %v1370_v9 = vmax.f32 %v3930_v13, -30.0  ;;  %v1373_v3 = vmax.f32 %v3933_v61, -30.0  ;;  %v1371_v39 = vmax.f32 %v3936_v27, -30.0 }
 0x189   :  { %v2404_v32 = vpack.c.bf16 %v1739_v62, %v1738_v63  ;;  %v1618_v43 = vadd.f32 1.0, %v3071_v49  ;;  %3090 = vpow2.f32 %v1552_v58  ;;  %v1744_v11 = vmul.f32 %v3069_v1, %v3786_v37 }
 0x18a   :  { %v3073_v25 = vpop.eup %3072  ;;  %v1434_v18 = vsub.f32 0.0, %v1370_v9  ;;  %v1437_v26 = vsub.f32 0.0, %v1373_v3  ;;  %v1435_v0 = vsub.f32 0.0, %v1371_v39 }
 0x18b   :  { %v3075_v12 = vpop.eup %3074  ;;  %2472 = vst [vmem:[%s3989_s5 + $0xb0] sm:$0xff] %v2404_v32   ;;  %3092 = vrcp.f32 %v1618_v43  ;;  %v1742_v28 = vmul.f32 %v3073_v25, %v3806_v2 }
 0x18c   :  { %v3077_v5 = vpop.eup %3076  ;;  %v1621_v57 = vadd.f32 1.0, %v3075_v12  ;;  %3094 = vpow2.f32 %v1562_v47  ;;  %v1558_v48 = vmul.f32 1.442695, %v1434_v18  ;;  %v1564_v6 = vmul.f32 1.442695, %v1437_v26 }
 0x18d   :  { %v3079_v10 = vpop.eup %3078  ;;  %v1745_v34 = vmul.f32 %v3077_v5, %v3821_v46  ;;  %v1560_v22 = vmul.f32 1.442695, %v1435_v0 }
 0x18e   :  { %v3081_v52 = vpop.eup %3080  ;;  %3096 = vrcp.f32 %v1621_v57  ;;  %v1619_v42 = vadd.f32 1.0, %v3079_v10 }
 0x18f   :  { %v3083_v24 = vpop.eup %3082  ;;  %v2419_v36 = vpack.c.bf16 %v1745_v34, %v1744_v11  ;;  %v1624_v30 = vadd.f32 1.0, %v3081_v52 }
 0x190   :  { %v1743_v7 = vmul.f32 %v3083_v24, %v3825_v23  ;;  %3098 = vrcp.f32 %v1619_v42  ;;  %v3085_v40 = vpop.eup %3084 }
 0x191   :  { %2475 = vst [vmem:[%s3989_s5 + $0xc8] sm:$0xff] %v2419_v36   ;;  %3100 = vrcp.f32 %v1624_v30  ;;  %v3087_v37 = vpop.eup %3086  ;;  %v1622_v8 = vadd.f32 1.0, %v3085_v40 }
 0x192   :  { %v2414_v46 = vpack.c.bf16 %v1743_v7, %v1742_v28  ;;  %3102 = vpow2.f32 %v1558_v48  ;;  %v3089_v35 = vpop.eup %3088  ;;  %v1625_v60 = vadd.f32 1.0, %v3087_v37 }
 0x193   :  { %3104 = vpow2.f32 %v1564_v6  ;;  %v3091_v2 = vpop.eup %3090  ;;  %v1748_v53 = vmul.f32 %v3089_v35, %v3828_v50 }
 0x194   :  { %2474 = vst [vmem:[%s3989_s5 + $0xc0] sm:$0xff] %v2414_v46   ;;  %3106 = vrcp.f32 %v1622_v8  ;;  %v1623_v17 = vadd.f32 1.0, %v3091_v2 }
 0x195   :  { %3108 = vrcp.f32 %v1625_v60  ;;  %v3093_v23 = vpop.eup %3092 }
 0x196   :  { %3110 = vpow2.f32 %v1560_v22  ;;  %v3095_v20 = vpop.eup %3094  ;;  %v1746_v55 = vmul.f32 %v3093_v23, %v3867_v56 }
 0x197   :  { %3112 = vrcp.f32 %v1623_v17  ;;  %v1628_v51 = vadd.f32 1.0, %v3095_v20 }
 0x198   :  { %v3097_v41 = vpop.eup %3096 }
 0x199   :  { %v1749_v21 = vmul.f32 %v3097_v41, %v3872_v16  ;;  %3114 = vrcp.f32 %v1628_v51 }
 0x19a   :  { %v3099_v33 = vpop.eup %3098 }
 0x19b   :  { %v3101_v15 = vpop.eup %3100  ;;  %v2429_v54 = vpack.c.bf16 %v1749_v21, %v1748_v53  ;;  %v1747_v38 = vmul.f32 %v3099_v33, %v3875_v59 }
 0x19c   :  { %v3103_v63 = vpop.eup %3102  ;;  %v1752_v49 = vmul.f32 %v3101_v15, %v3881_v4 }
 0x19d   :  { %v3105_v31 = vpop.eup %3104  ;;  %2477 = vst [vmem:[%s3989_s5 + $0xd8] sm:$0xff] %v2429_v54   ;;  %v2424_v45 = vpack.c.bf16 %v1747_v38, %v1746_v55  ;;  %v1626_v1 = vadd.f32 1.0, %v3103_v63 }
 0x19e   :  { %v3107_v62 = vpop.eup %3106  ;;  %v1629_v50 = vadd.f32 1.0, %v3105_v31 }
 0x19f   :  { %v3109_v16 = vpop.eup %3108  ;;  %2476 = vst [vmem:[%s3989_s5 + $0xd0] sm:$0xff] %v2424_v45   ;;  %v1750_v32 = vmul.f32 %v3107_v62, %v3889_v14 }
 0x1a0   :  { %v3111_v56 = vpop.eup %3110  ;;  %v1753_v59 = vmul.f32 %v3109_v16, %v3893_v44  ;;  %3116 = vrcp.f32 %v1629_v50 }
 0x1a1   :  { %3118 = vrcp.f32 %v1626_v1  ;;  %v1627_v58 = vadd.f32 1.0, %v3111_v56  ;;  %v3113_v47 = vpop.eup %3112 }
 0x1a2   :  { %v2439_v25 = vpack.c.bf16 %v1753_v59, %v1752_v49  ;;  %v1751_v43 = vmul.f32 %v3113_v47, %v3911_v19 }
 0x1a3   :  { %3120 = vrcp.f32 %v1627_v58  ;;  %v3115_v4 = vpop.eup %3114 }
 0x1a4   :  { %2479 = vst [vmem:[%s3989_s5 + $0xe8] sm:$0xff] %v2439_v25   ;;  %v2434_v9 = vpack.c.bf16 %v1751_v43, %v1750_v32  ;;  %v1756_v12 = vmul.f32 %v3115_v4, %v3914_v29 }
 0x1a6   :  { %2478 = vst [vmem:[%s3989_s5 + $0xe0] sm:$0xff] %v2434_v9  }
 0x1aa   :  { %v3117_v44 = vpop.eup %3116 }
 0x1ab   :  { %v3119_v3 = vpop.eup %3118  ;;  %v1757_v39 = vmul.f32 %v3117_v44, %v3933_v61 }
 0x1ac   :  { %v1754_v19 = vmul.f32 %v3119_v3, %v3930_v13 }
 0x1ad   :  { %v3121_v14 = vpop.eup %3120  ;;  %v2449_v5 = vpack.c.bf16 %v1757_v39, %v1756_v12 }
 0x1ae   :  { %v1755_v57 = vmul.f32 %v3121_v14, %v3936_v27 }
 0x1af   :  { %2481 = vst [vmem:[%s3989_s5 + $0xf8] sm:$0xff] %v2449_v5  }
 0x1b0   :  { %v2444_v18 = vpack.c.bf16 %v1755_v57, %v1754_v19 }
 0x1b2   :  { %2480 = vst [vmem:[%s3989_s5 + $0xf0] sm:$0xff] %v2444_v18  }

// kernel: _lambda_.67
= control target key start
LH: loop header
LB: loop body
LE: loop exit
PB: predicated region body
PF: predicated region fallthrough
CT: control target
= control target key end

     0   :  { %v729_v0 = vmov 0   ;;  %vm182_vm0 = vcmask 130048   ;;  %s942_s1 = inlined_call_operand.vmem [shape: bf16[144,128], index: 1, kind: input, shape index: {}]   ;;  %s943_s0 = inlined_call_operand.vmem [shape: bf16[128,144], index: 0, kind: input, shape index: {}]   ;;  %s944_s2 = inlined_call_operand.vmem [shape: f32[1,128], index: 2, kind: input, shape index: {}]   ;;  %s945_s3 = inlined_call_operand.vmem [shape: bf16[128,128], index: 3, kind: output, shape index: {}]  }
   0x1   :  { %207 = vmatprep.subr.bf16.mxu0 %v729_v0  ;;  %613 = vmatprep.subr.bf16.mxu1 %v729_v0  ;;  %v632_v1 = vld [vmem:[%s942_s1] sm:$0xff]   ;;  %v633_v2 = vld [vmem:[%s942_s1 + $0x8] sm:$0xff]   ;;  %v634_v3 = vld [vmem:[%s942_s1 + $0x10] sm:$0xff]  }
   0x2   :  { %208 = vmatpush1.bf16.msra.mxu0 %v632_v1  ;;  %622 = vmatpush1.bf16.msra.mxu1 %v632_v1  ;;  %v635_v4 = vld [vmem:[%s942_s1 + $0x18] sm:$0xff]   ;;  %v643_v5 = vld [vmem:[%s943_s0 + $0x4] ss:$8 sps:$4 sm:$0xff]   ;;  %v638_v9 = vld [vmem:[%s942_s1 + $0x30] sm:$0xff]  }
   0x3   :  { %209 = vmatprep.subr.bf16.mxu0 %v729_v0  ;;  %614 = vmatprep.subr.bf16.mxu1 %v729_v0  ;;  %v646_v6 = vld [vmem:[%s943_s0 + $0x44] ss:$8 sps:$4 sm:$0xff]   ;;  %v639_v10 = vld [vmem:[%s942_s1 + $0x38] sm:$0xff]   ;;  %v641_v12 = vld [vmem:[%s943_s0] ss:$8 sps:$4 sm:$0xff]  }
   0x4   :  { %526 = vmatprep.mubr.msk.bf16.mxu0 %vm182_vm0, %v643_v5  ;;  %530 = vmatprep.mubr.msk.bf16.mxu1 %vm182_vm0, %v646_v6  ;;  %v636_v7 = vld [vmem:[%s942_s1 + $0x20] sm:$0xff]   ;;  %v637_v8 = vld [vmem:[%s942_s1 + $0x28] sm:$0xff]   ;;  %v647_v14 = vld [vmem:[%s943_s0 + $0x14] ss:$8 sps:$4 sm:$0xff]  }
   0x5   :  { %v640_v11 = vld [vmem:[%s942_s1 + $0x40] sm:$0xff]   ;;  %v649_v15 = vld [vmem:[%s943_s0 + $0x54] ss:$8 sps:$4 sm:$0xff]   ;;  %v651_v16 = vld [vmem:[%s943_s0 + $0x10] ss:$8 sps:$4 sm:$0xff]  }
   0x6   :  { %210 = vmatpush1.bf16.msra.mxu0 %v633_v2  ;;  %623 = vmatpush1.bf16.msra.mxu1 %v633_v2  ;;  %v644_v13 = vld [vmem:[%s943_s0 + $0x40] ss:$8 sps:$4 sm:$0xff]   ;;  %v652_v17 = vld [vmem:[%s943_s0 + $0x50] ss:$8 sps:$4 sm:$0xff]   ;;  %v653_v18 = vld [vmem:[%s943_s0 + $0x24] ss:$8 sps:$4 sm:$0xff]  }
   0x7   :  { %211 = vmatprep.subr.bf16.mxu0 %v729_v0  ;;  %615 = vmatprep.subr.bf16.mxu1 %v729_v0  ;;  %v655_v19 = vld [vmem:[%s943_s0 + $0x64] ss:$8 sps:$4 sm:$0xff]   ;;  %v657_v20 = vld [vmem:[%s943_s0 + $0x20] ss:$8 sps:$4 sm:$0xff]   ;;  %v659_v22 = vld [vmem:[%s943_s0 + $0x34] ss:$8 sps:$4 sm:$0xff]  }
   0x8   :  { %v658_v21 = vld [vmem:[%s943_s0 + $0x60] ss:$8 sps:$4 sm:$0xff]   ;;  %v661_v23 = vld [vmem:[%s943_s0 + $0x74] ss:$8 sps:$4 sm:$0xff]   ;;  %v663_v24 = vld [vmem:[%s943_s0 + $0x30] ss:$8 sps:$4 sm:$0xff]  }
   0x9   :  { %v664_v25 = vld [vmem:[%s943_s0 + $0x70] ss:$8 sps:$4 sm:$0xff]   ;;  %v836_v26 = vld [vmem:[%s944_s2] ss:$0 sm:$0xff] }
   0xa   :  { %212 = vmatpush1.bf16.msra.mxu0 %v634_v3  ;;  %624 = vmatpush1.bf16.msra.mxu1 %v634_v3 }
   0xb   :  { %213 = vmatprep.subr.bf16.mxu0 %v729_v0  ;;  %616 = vmatprep.subr.bf16.mxu1 %v729_v0 }
   0xe   :  { %214 = vmatpush1.bf16.msra.mxu0 %v635_v4  ;;  %625 = vmatpush1.bf16.msra.mxu1 %v635_v4 }
   0xf   :  { %215 = vmatprep.subr.bf16.mxu0 %v729_v0  ;;  %617 = vmatprep.subr.bf16.mxu1 %v729_v0 }
  0x12   :  { %216 = vmatpush1.bf16.msra.mxu0 %v636_v7  ;;  %626 = vmatpush1.bf16.msra.mxu1 %v636_v7 }
  0x13   :  { %217 = vmatprep.subr.bf16.mxu0 %v729_v0  ;;  %618 = vmatprep.subr.bf16.mxu1 %v729_v0 }
  0x16   :  { %218 = vmatpush1.bf16.msra.mxu0 %v637_v8  ;;  %627 = vmatpush1.bf16.msra.mxu1 %v637_v8 }
  0x17   :  { %219 = vmatprep.subr.bf16.mxu0 %v729_v0  ;;  %619 = vmatprep.subr.bf16.mxu1 %v729_v0 }
  0x1a   :  { %220 = vmatpush1.bf16.msra.mxu0 %v638_v9  ;;  %628 = vmatpush1.bf16.msra.mxu1 %v638_v9 }
  0x1b   :  { %221 = vmatprep.subr.bf16.mxu0 %v729_v0  ;;  %620 = vmatprep.subr.bf16.mxu1 %v729_v0 }
  0x1e   :  { %222 = vmatpush1.bf16.msra.mxu0 %v639_v10  ;;  %629 = vmatpush1.bf16.msra.mxu1 %v639_v10 }
  0x1f   :  { %223 = vmatprep.subr.bf16.mxu0 %v729_v0  ;;  %621 = vmatprep.subr.bf16.mxu1 %v729_v0 }
  0x22   :  { %224 = vmatpush1.bf16.msra.mxu0 %v640_v11  ;;  %630 = vmatpush1.bf16.msra.mxu1 %v640_v11 }
  0x25   :  { %240 = vmatmul.mubr.bf16.vlgmr.msra.gmra.mrb[0].mxu0 %v641_v12  ;;  %272 = vmatmul.mubr.bf16.vlgmr.msra.gmra.mrb[0].mxu1 %v644_v13 }
  0x26   :  { %527 = vmatprep.mubr.msk.bf16.mxu0 %vm182_vm0, %v647_v14  ;;  %531 = vmatprep.mubr.msk.bf16.mxu1 %vm182_vm0, %v649_v15 }
  0x2d   :  { %248 = vmatmul.mubr.bf16.gmra.mrb[4].mxu0 %v651_v16  ;;  %280 = vmatmul.mubr.bf16.gmra.mrb[4].mxu1 %v652_v17 }
  0x2e   :  { %528 = vmatprep.mubr.msk.bf16.mxu0 %vm182_vm0, %v653_v18  ;;  %532 = vmatprep.mubr.msk.bf16.mxu1 %vm182_vm0, %v655_v19 }
  0x35   :  { %256 = vmatmul.mubr.bf16.gmra.mrb[8].mxu0 %v657_v20  ;;  %288 = vmatmul.mubr.bf16.gmra.mrb[8].mxu1 %v658_v21 }
  0x36   :  { %529 = vmatprep.mubr.msk.bf16.mxu0 %vm182_vm0, %v659_v22  ;;  %533 = vmatprep.mubr.msk.bf16.mxu1 %vm182_vm0, %v661_v23 }
  0x3d   :  { %264 = vmatmul.mubr.bf16.gmra.mrb[12].mxu0 %v663_v24  ;;  %296 = vmatmul.mubr.bf16.gmra.mrb[12].mxu1 %v664_v25 }
  0xf8   :  { %v241_v27 = vpop.f32.mrb[0].mxu0  ;;  %v273_v28 = vpop.f32.mrb[0].mxu1 }
  0xf9   :  { %v839_v29 = vadd.f32 %v836_v26, %v241_v27  ;;  %v842_v30 = vadd.f32 %v836_v26, %v273_v28  ;;  %v243_v31 = vpop.f32.mrb[1].mxu0  ;;  %v275_v32 = vpop.f32.mrb[1].mxu1 }
  0xfa   :  { %v244_v33 = vpop.f32.mrb[2].mxu0  ;;  %v276_v34 = vpop.f32.mrb[2].mxu1 }
  0xfb   :  { %v304_v35 = vmax.f32 %v839_v29, -30.0  ;;  %v312_v36 = vmax.f32 %v842_v30, -30.0  ;;  %v847_v37 = vadd.f32 %v836_v26, %v244_v33  ;;  %v850_v38 = vadd.f32 %v836_v26, %v276_v34  ;;  %v246_v39 = vpop.f32.mrb[3].mxu0  ;;  %v278_v40 = vpop.f32.mrb[3].mxu1 }
  0xfd   :  { %v320_v41 = vsub.f32 0.0, %v304_v35  ;;  %v328_v42 = vsub.f32 0.0, %v312_v36  ;;  %v305_v43 = vmax.f32 %v847_v37, -30.0  ;;  %v313_v44 = vmax.f32 %v850_v38, -30.0 }
  0xff   :  { %v336_v45 = vmul.f32 1.442695, %v320_v41  ;;  %v352_v46 = vmul.f32 1.442695, %v328_v42  ;;  %v321_v47 = vsub.f32 0.0, %v305_v43  ;;  %v329_v48 = vsub.f32 0.0, %v313_v44 }
 0x100   :  { %v249_v49 = vpop.f32.mrb[4].mxu0  ;;  %v281_v50 = vpop.f32.mrb[4].mxu1 }
 0x101   :  { %665 = vpow2.f32 %v336_v45  ;;  %v338_v51 = vmul.f32 1.442695, %v321_v47  ;;  %v354_v52 = vmul.f32 1.442695, %v329_v48  ;;  %v855_v53 = vadd.f32 %v836_v26, %v249_v49  ;;  %v251_v54 = vpop.f32.mrb[5].mxu0  ;;  %v283_v55 = vpop.f32.mrb[5].mxu1 }
 0x102   :  { %667 = vpow2.f32 %v352_v46  ;;  %v858_v56 = vadd.f32 %v836_v26, %v281_v50  ;;  %v252_v57 = vpop.f32.mrb[6].mxu0  ;;  %v284_v58 = vpop.f32.mrb[6].mxu1 }
 0x103   :  { %669 = vpow2.f32 %v338_v51  ;;  %v306_v59 = vmax.f32 %v855_v53, -30.0  ;;  %v862_v60 = vadd.f32 %v836_v26, %v252_v57  ;;  %v865_v61 = vadd.f32 %v836_v26, %v284_v58  ;;  %v254_v62 = vpop.f32.mrb[7].mxu0  ;;  %v286_v63 = vpop.f32.mrb[7].mxu1 }
 0x104   :  { %671 = vpow2.f32 %v354_v52  ;;  %v314_v0 = vmax.f32 %v858_v56, -30.0 }
 0x105   :  { %v322_v1 = vsub.f32 0.0, %v306_v59  ;;  %v307_v2 = vmax.f32 %v862_v60, -30.0  ;;  %v315_v3 = vmax.f32 %v865_v61, -30.0 }
 0x106   :  { %v330_v4 = vsub.f32 0.0, %v314_v0 }
 0x107   :  { %v340_v5 = vmul.f32 1.442695, %v322_v1  ;;  %v323_v6 = vsub.f32 0.0, %v307_v2  ;;  %v331_v7 = vsub.f32 0.0, %v315_v3 }
 0x108   :  { %v356_v8 = vmul.f32 1.442695, %v330_v4  ;;  %v257_v9 = vpop.f32.mrb[8].mxu0  ;;  %v289_v10 = vpop.f32.mrb[8].mxu1 }
 0x109   :  { %673 = vpow2.f32 %v340_v5  ;;  %v342_v11 = vmul.f32 1.442695, %v323_v6  ;;  %v358_v12 = vmul.f32 1.442695, %v331_v7  ;;  %v871_v13 = vadd.f32 %v836_v26, %v257_v9  ;;  %v259_v14 = vpop.f32.mrb[9].mxu0  ;;  %v291_v15 = vpop.f32.mrb[9].mxu1 }
 0x10a   :  { %675 = vpow2.f32 %v356_v8  ;;  %v874_v16 = vadd.f32 %v836_v26, %v289_v10  ;;  %v260_v17 = vpop.f32.mrb[10].mxu0  ;;  %v292_v18 = vpop.f32.mrb[10].mxu1 }
 0x10b   :  { %v666_v19 = vpop.eup %665  ;;  %677 = vpow2.f32 %v342_v11  ;;  %v308_v20 = vmax.f32 %v871_v13, -30.0  ;;  %v878_v21 = vadd.f32 %v836_v26, %v260_v17  ;;  %v881_v22 = vadd.f32 %v836_v26, %v292_v18  ;;  %v262_v23 = vpop.f32.mrb[11].mxu0 }
 0x10c   :  { %v294_v24 = vpop.f32.mrb[11].mxu1  ;;  %v668_v25 = vpop.eup %667  ;;  %v368_v27 = vadd.f32 1.0, %v666_v19  ;;  %679 = vpow2.f32 %v358_v12  ;;  %v316_v28 = vmax.f32 %v874_v16, -30.0 }
 0x10d   :  { %v670_v31 = vpop.eup %669  ;;  %v376_v32 = vadd.f32 1.0, %v668_v25  ;;  %v324_v33 = vsub.f32 0.0, %v308_v20  ;;  %v309_v34 = vmax.f32 %v878_v21, -30.0  ;;  %v317_v35 = vmax.f32 %v881_v22, -30.0 }
 0x10e   :  { %v672_v36 = vpop.eup %671  ;;  %681 = vrcp.f32 %v368_v27  ;;  %v369_v39 = vadd.f32 1.0, %v670_v31  ;;  %v332_v40 = vsub.f32 0.0, %v316_v28 }
 0x10f   :  { %683 = vrcp.f32 %v376_v32  ;;  %v377_v41 = vadd.f32 1.0, %v672_v36  ;;  %v344_v42 = vmul.f32 1.442695, %v324_v33  ;;  %v325_v43 = vsub.f32 0.0, %v309_v34 }
 0x110   :  { %685 = vrcp.f32 %v369_v39  ;;  %v360_v44 = vmul.f32 1.442695, %v332_v40  ;;  %v333_v45 = vsub.f32 0.0, %v317_v35  ;;  %v265_v46 = vpop.f32.mrb[12].mxu0  ;;  %v297_v47 = vpop.f32.mrb[12].mxu1 }
 0x111   :  { %687 = vrcp.f32 %v377_v41  ;;  %v346_v48 = vmul.f32 1.442695, %v325_v43  ;;  %v887_v49 = vadd.f32 %v836_v26, %v265_v46  ;;  %v890_v50 = vadd.f32 %v836_v26, %v297_v47  ;;  %v267_v51 = vpop.f32.mrb[13].mxu0  ;;  %v299_v52 = vpop.f32.mrb[13].mxu1 }
 0x112   :  { %689 = vpow2.f32 %v344_v42  ;;  %v362_v54 = vmul.f32 1.442695, %v333_v45  ;;  %v268_v55 = vpop.f32.mrb[14].mxu0  ;;  %v300_v57 = vpop.f32.mrb[14].mxu1 }
 0x113   :  { %v674_v58 = vpop.eup %673  ;;  %691 = vpow2.f32 %v360_v44  ;;  %v310_v59 = vmax.f32 %v887_v49, -30.0  ;;  %v318_v62 = vmax.f32 %v890_v50, -30.0  ;;  %v895_v63 = vadd.f32 %v836_v26, %v268_v55  ;;  %v270_v0 = vpop.f32.mrb[15].mxu0 }
 0x114   :  { %v302_v1 = vpop.f32.mrb[15].mxu1  ;;  %v676_v2 = vpop.eup %675  ;;  %v370_v3 = vadd.f32 1.0, %v674_v58  ;;  %693 = vpow2.f32 %v346_v48  ;;  %v898_v4 = vadd.f32 %v836_v26, %v300_v57 }
 0x115   :  { %v678_v5 = vpop.eup %677  ;;  %v378_v6 = vadd.f32 1.0, %v676_v2  ;;  %695 = vpow2.f32 %v362_v54  ;;  %v326_v7 = vsub.f32 0.0, %v310_v59  ;;  %v334_v8 = vsub.f32 0.0, %v318_v62 }
 0x116   :  { %v680_v9 = vpop.eup %679  ;;  %697 = vrcp.f32 %v370_v3  ;;  %v371_v10 = vadd.f32 1.0, %v678_v5  ;;  %v311_v11 = vmax.f32 %v895_v63, -30.0  ;;  %v319_v12 = vmax.f32 %v898_v4, -30.0 }
 0x117   :  { %699 = vrcp.f32 %v378_v6  ;;  %v379_v14 = vadd.f32 1.0, %v680_v9  ;;  %v348_v15 = vmul.f32 1.442695, %v326_v7  ;;  %v364_v17 = vmul.f32 1.442695, %v334_v8 }
 0x118   :  { %v682_v18 = vpop.eup %681  ;;  %701 = vrcp.f32 %v371_v10  ;;  %v327_v26 = vsub.f32 0.0, %v311_v11  ;;  %v335_v19 = vsub.f32 0.0, %v319_v12 }
 0x119   :  { %v684_v20 = vpop.eup %683  ;;  %703 = vrcp.f32 %v379_v14  ;;  %v400_v28 = vmul.f32 %v682_v18, %v839_v29 }
 0x11a   :  { %v686_v23 = vpop.eup %685  ;;  %705 = vpow2.f32 %v348_v15  ;;  %v350_v24 = vmul.f32 1.442695, %v327_v26  ;;  %v366_v25 = vmul.f32 1.442695, %v335_v19  ;;  %v408_v33 = vmul.f32 %v684_v20, %v842_v30 }
 0x11b   :  { %v688_v27 = vpop.eup %687  ;;  %v401_v31 = vmul.f32 %v686_v23, %v847_v37  ;;  %707 = vpow2.f32 %v364_v17 }
 0x11c   :  { %v690_v32 = vpop.eup %689  ;;  %v409_v34 = vmul.f32 %v688_v27, %v850_v38  ;;  %709 = vpow2.f32 %v350_v24 }
 0x11d   :  { %v692_v35 = vpop.eup %691  ;;  %v569_v36 = vpack.c.bf16 %v401_v31, %v400_v28  ;;  %v372_v39 = vadd.f32 1.0, %v690_v32  ;;  %711 = vpow2.f32 %v366_v25 }
 0x11e   :  { %v694_v40 = vpop.eup %693  ;;  %v589_v41 = vpack.c.bf16 %v409_v34, %v408_v33  ;;  %v380_v42 = vadd.f32 1.0, %v692_v35 }
 0x11f   :  { %v696_v43 = vpop.eup %695  ;;  %570 = vst [vmem:[%s945_s3] sm:$0xff] %v569_v36   ;;  %713 = vrcp.f32 %v372_v39  ;;  %v373_v29 = vadd.f32 1.0, %v694_v40 }
 0x120   :  { %v698_v37 = vpop.eup %697  ;;  %609 = vst [vmem:[%s945_s3 + $0x20] sm:$0xff] %v589_v41   ;;  %715 = vrcp.f32 %v380_v42  ;;  %v381_v30 = vadd.f32 1.0, %v696_v43 }
 0x121   :  { %v700_v38 = vpop.eup %699  ;;  %717 = vrcp.f32 %v373_v29  ;;  %v402_v46 = vmul.f32 %v698_v37, %v855_v53 }
 0x122   :  { %v702_v44 = vpop.eup %701  ;;  %719 = vrcp.f32 %v381_v30  ;;  %v410_v51 = vmul.f32 %v700_v38, %v858_v56 }
 0x123   :  { %v704_v45 = vpop.eup %703  ;;  %v403_v47 = vmul.f32 %v702_v44, %v862_v60 }
 0x124   :  { %v706_v48 = vpop.eup %705  ;;  %v411_v52 = vmul.f32 %v704_v45, %v865_v61 }
 0x125   :  { %v708_v54 = vpop.eup %707  ;;  %v574_v55 = vpack.c.bf16 %v403_v47, %v402_v46  ;;  %v374_v57 = vadd.f32 1.0, %v706_v48 }
 0x126   :  { %v710_v58 = vpop.eup %709  ;;  %v594_v59 = vpack.c.bf16 %v411_v52, %v410_v51  ;;  %v382_v62 = vadd.f32 1.0, %v708_v54 }
 0x127   :  { %v712_v0 = vpop.eup %711  ;;  %606 = vst [vmem:[%s945_s3 + $0x8] sm:$0xff] %v574_v55   ;;  %721 = vrcp.f32 %v374_v57  ;;  %v375_v53 = vadd.f32 1.0, %v710_v58 }
 0x128   :  { %610 = vst [vmem:[%s945_s3 + $0x28] sm:$0xff] %v594_v59   ;;  %723 = vrcp.f32 %v382_v62  ;;  %v383_v56 = vadd.f32 1.0, %v712_v0 }
 0x129   :  { %v714_v60 = vpop.eup %713  ;;  %725 = vrcp.f32 %v375_v53 }
 0x12a   :  { %v716_v61 = vpop.eup %715  ;;  %727 = vrcp.f32 %v383_v56  ;;  %v404_v3 = vmul.f32 %v714_v60, %v871_v13 }
 0x12b   :  { %v718_v1 = vpop.eup %717  ;;  %v412_v6 = vmul.f32 %v716_v61, %v874_v16 }
 0x12c   :  { %v720_v2 = vpop.eup %719  ;;  %v405_v5 = vmul.f32 %v718_v1, %v878_v21 }
 0x12d   :  { %v413_v7 = vmul.f32 %v720_v2, %v881_v22 }
 0x12e   :  { %v579_v8 = vpack.c.bf16 %v405_v5, %v404_v3 }
 0x12f   :  { %v599_v9 = vpack.c.bf16 %v413_v7, %v412_v6 }
 0x130   :  { %607 = vst [vmem:[%s945_s3 + $0x10] sm:$0xff] %v579_v8  }
 0x131   :  { %v722_v10 = vpop.eup %721  ;;  %611 = vst [vmem:[%s945_s3 + $0x30] sm:$0xff] %v599_v9  }
 0x132   :  { %v724_v11 = vpop.eup %723  ;;  %v406_v21 = vmul.f32 %v722_v10, %v887_v49 }
 0x133   :  { %v726_v12 = vpop.eup %725  ;;  %v414_v22 = vmul.f32 %v724_v11, %v890_v50 }
 0x134   :  { %v728_v13 = vpop.eup %727  ;;  %v407_v16 = vmul.f32 %v726_v12, %v895_v63 }
 0x135   :  { %v415_v14 = vmul.f32 %v728_v13, %v898_v4 }
 0x136   :  { %v584_v15 = vpack.c.bf16 %v407_v16, %v406_v21 }
 0x137   :  { %v604_v17 = vpack.c.bf16 %v415_v14, %v414_v22 }
 0x138   :  { %608 = vst [vmem:[%s945_s3 + $0x18] sm:$0xff] %v584_v15  }
 0x139   :  { %612 = vst [vmem:[%s945_s3 + $0x38] sm:$0xff] %v604_v17  }

// kernel: _lambda_.68
= control target key start
LH: loop header
LB: loop body
LE: loop exit
PB: predicated region body
PF: predicated region fallthrough
CT: control target
= control target key end

     0   :  { %s860_s1 = inlined_call_operand.vmem [shape: bf16[128,128], index: 1, kind: input, shape index: {}]   ;;  %s861_s0 = inlined_call_operand.vmem [shape: bf16[128,128], index: 0, kind: input, shape index: {}]   ;;  %s862_s2 = inlined_call_operand.vmem [shape: f32[1,128], index: 2, kind: input, shape index: {}]   ;;  %s863_s3 = inlined_call_operand.vmem [shape: bf16[128,128], index: 3, kind: output, shape index: {}]  }
   0x1   :  { %v603_v0 = vld [vmem:[%s860_s1] sm:$0xff]   ;;  %v604_v1 = vld [vmem:[%s860_s1 + $0x8] sm:$0xff]   ;;  %v605_v2 = vld [vmem:[%s860_s1 + $0x10] sm:$0xff]  }
   0x2   :  { %555 = vmatprep.subr.bf16.mxu0 %v603_v0  ;;  %587 = vmatprep.subr.bf16.mxu1 %v603_v0  ;;  %v606_v3 = vld [vmem:[%s860_s1 + $0x18] sm:$0xff]   ;;  %v611_v4 = vld [vmem:[%s861_s0] sm:$0xff]   ;;  %v608_v7 = vld [vmem:[%s860_s1 + $0x28] sm:$0xff]  }
   0x3   :  { %556 = vmatpush3.bf16.msra.mxu0 %v603_v0  ;;  %595 = vmatpush3.bf16.msra.mxu1 %v603_v0  ;;  %v612_v5 = vld [vmem:[%s861_s0 + $0x20] sm:$0xff]   ;;  %v609_v8 = vld [vmem:[%s860_s1 + $0x30] sm:$0xff]   ;;  %v610_v9 = vld [vmem:[%s860_s1 + $0x38] sm:$0xff]  }
   0x4   :  { %557 = vmatprep.subr.bf16.mxu0 %v604_v1  ;;  %588 = vmatprep.subr.bf16.mxu1 %v604_v1  ;;  %v607_v6 = vld [vmem:[%s860_s1 + $0x20] sm:$0xff]   ;;  %v613_v10 = vld [vmem:[%s861_s0 + $0x8] sm:$0xff]   ;;  %v615_v12 = vld [vmem:[%s861_s0 + $0x10] sm:$0xff]  }
   0x5   :  { %571 = vmatprep.mubr.bf16.mxu0 %v611_v4  ;;  %579 = vmatprep.mubr.bf16.mxu1 %v612_v5  ;;  %v614_v11 = vld [vmem:[%s861_s0 + $0x28] sm:$0xff]   ;;  %v616_v13 = vld [vmem:[%s861_s0 + $0x30] sm:$0xff]   ;;  %v617_v14 = vld [vmem:[%s861_s0 + $0x18] sm:$0xff]  }
   0x6   :  { %v618_v15 = vld [vmem:[%s861_s0 + $0x38] sm:$0xff]   ;;  %v754_v16 = vld [vmem:[%s862_s2] ss:$0 sm:$0xff] }
   0x7   :  { %558 = vmatpush3.bf16.msra.mxu0 %v604_v1  ;;  %596 = vmatpush3.bf16.msra.mxu1 %v604_v1 }
   0x8   :  { %559 = vmatprep.subr.bf16.mxu0 %v605_v2  ;;  %589 = vmatprep.subr.bf16.mxu1 %v605_v2 }
   0xb   :  { %560 = vmatpush3.bf16.msra.mxu0 %v605_v2  ;;  %597 = vmatpush3.bf16.msra.mxu1 %v605_v2 }
   0xc   :  { %561 = vmatprep.subr.bf16.mxu0 %v606_v3  ;;  %590 = vmatprep.subr.bf16.mxu1 %v606_v3 }
   0xf   :  { %562 = vmatpush3.bf16.msra.mxu0 %v606_v3  ;;  %598 = vmatpush3.bf16.msra.mxu1 %v606_v3 }
  0x10   :  { %563 = vmatprep.subr.bf16.mxu0 %v607_v6  ;;  %591 = vmatprep.subr.bf16.mxu1 %v607_v6 }
  0x13   :  { %564 = vmatpush3.bf16.msra.mxu0 %v607_v6  ;;  %599 = vmatpush3.bf16.msra.mxu1 %v607_v6 }
  0x14   :  { %565 = vmatprep.subr.bf16.mxu0 %v608_v7  ;;  %592 = vmatprep.subr.bf16.mxu1 %v608_v7 }
  0x17   :  { %566 = vmatpush3.bf16.msra.mxu0 %v608_v7  ;;  %600 = vmatpush3.bf16.msra.mxu1 %v608_v7 }
  0x18   :  { %567 = vmatprep.subr.bf16.mxu0 %v609_v8  ;;  %593 = vmatprep.subr.bf16.mxu1 %v609_v8 }
  0x1b   :  { %568 = vmatpush3.bf16.msra.mxu0 %v609_v8  ;;  %601 = vmatpush3.bf16.msra.mxu1 %v609_v8 }
  0x1c   :  { %569 = vmatprep.subr.bf16.mxu0 %v610_v9  ;;  %594 = vmatprep.subr.bf16.mxu1 %v610_v9 }
  0x1f   :  { %570 = vmatpush3.bf16.msra.mxu0 %v610_v9  ;;  %602 = vmatpush3.bf16.msra.mxu1 %v610_v9 }
  0x22   :  { %572 = vmatmul.mubr.bf16.vlgmr.msra.gmra.mrb[0].mxu0 %v613_v10  ;;  %580 = vmatmul.mubr.bf16.vlgmr.msra.gmra.mrb[0].mxu1 %v614_v11 }
  0x23   :  { %575 = vmatprep.mubr.bf16.mxu0 %v615_v12  ;;  %583 = vmatprep.mubr.bf16.mxu1 %v616_v13 }
  0x2a   :  { %576 = vmatmul.mubr.bf16.gmra.mrb[4].mxu0 %v617_v14  ;;  %584 = vmatmul.mubr.bf16.gmra.mrb[4].mxu1 %v618_v15 }
  0xf5   :  { %v573_v17 = vpop.f32.mrb[0].mxu0  ;;  %v581_v18 = vpop.f32.mrb[0].mxu1 }
  0xf6   :  { %v757_v19 = vadd.f32 %v573_v17, %v754_v16  ;;  %v760_v20 = vadd.f32 %v581_v18, %v754_v16  ;;  %v184_v21 = vpop.f32.mrb[1].mxu0  ;;  %v216_v22 = vpop.f32.mrb[1].mxu1 }
  0xf7   :  { %v763_v23 = vadd.f32 %v754_v16, %v184_v21  ;;  %v766_v24 = vadd.f32 %v754_v16, %v216_v22  ;;  %v574_v25 = vpop.f32.mrb[2].mxu0  ;;  %v582_v26 = vpop.f32.mrb[2].mxu1 }
  0xf8   :  { %v249_v27 = vmax.f32 %v757_v19, -30.0  ;;  %v257_v28 = vmax.f32 %v760_v20, -30.0  ;;  %v771_v29 = vadd.f32 %v574_v25, %v754_v16  ;;  %v774_v30 = vadd.f32 %v582_v26, %v754_v16  ;;  %v187_v31 = vpop.f32.mrb[3].mxu0  ;;  %v219_v32 = vpop.f32.mrb[3].mxu1 }
  0xf9   :  { %v247_v33 = vmax.f32 %v763_v23, -30.0  ;;  %v255_v34 = vmax.f32 %v766_v24, -30.0  ;;  %v779_v35 = vadd.f32 %v754_v16, %v187_v31  ;;  %v782_v36 = vadd.f32 %v754_v16, %v219_v32 }
  0xfa   :  { %v265_v37 = vsub.f32 0.0, %v249_v27  ;;  %v273_v38 = vsub.f32 0.0, %v257_v28  ;;  %v250_v39 = vmax.f32 %v771_v29, -30.0  ;;  %v258_v40 = vmax.f32 %v774_v30, -30.0 }
  0xfb   :  { %v263_v41 = vsub.f32 0.0, %v247_v33  ;;  %v271_v42 = vsub.f32 0.0, %v255_v34  ;;  %v248_v43 = vmax.f32 %v779_v35, -30.0  ;;  %v256_v44 = vmax.f32 %v782_v36, -30.0 }
  0xfc   :  { %v283_v45 = vmul.f32 1.442695, %v265_v37  ;;  %v299_v46 = vmul.f32 1.442695, %v273_v38  ;;  %v266_v47 = vsub.f32 0.0, %v250_v39  ;;  %v274_v48 = vsub.f32 0.0, %v258_v40 }
  0xfd   :  { %v279_v49 = vmul.f32 1.442695, %v263_v41  ;;  %v295_v50 = vmul.f32 1.442695, %v271_v42  ;;  %v264_v51 = vsub.f32 0.0, %v248_v43  ;;  %v272_v52 = vsub.f32 0.0, %v256_v44 }
  0xfe   :  { %619 = vpow2.f32 %v283_v45  ;;  %v285_v53 = vmul.f32 1.442695, %v266_v47  ;;  %v577_v54 = vpop.f32.mrb[4].mxu0  ;;  %v585_v55 = vpop.f32.mrb[4].mxu1  ;;  %v301_v56 = vmul.f32 1.442695, %v274_v48 }
  0xff   :  { %621 = vpow2.f32 %v299_v46  ;;  %v281_v57 = vmul.f32 1.442695, %v264_v51  ;;  %v789_v58 = vadd.f32 %v577_v54, %v754_v16  ;;  %v200_v59 = vpop.f32.mrb[5].mxu0  ;;  %v232_v60 = vpop.f32.mrb[5].mxu1  ;;  %v792_v61 = vadd.f32 %v585_v55, %v754_v16 }
 0x100   :  { %623 = vpow2.f32 %v279_v49  ;;  %v795_v62 = vadd.f32 %v754_v16, %v200_v59  ;;  %v798_v63 = vadd.f32 %v754_v16, %v232_v60  ;;  %v578_v0 = vpop.f32.mrb[6].mxu0  ;;  %v586_v1 = vpop.f32.mrb[6].mxu1  ;;  %v297_v2 = vmul.f32 1.442695, %v272_v52 }
 0x101   :  { %625 = vpow2.f32 %v295_v50  ;;  %v253_v3 = vmax.f32 %v789_v58, -30.0  ;;  %v203_v4 = vpop.f32.mrb[7].mxu0  ;;  %v235_v5 = vpop.f32.mrb[7].mxu1  ;;  %v261_v6 = vmax.f32 %v792_v61, -30.0  ;;  %v805_v10 = vadd.f32 %v578_v0, %v754_v16 }
 0x102   :  { %627 = vpow2.f32 %v285_v53  ;;  %v251_v7 = vmax.f32 %v795_v62, -30.0  ;;  %v259_v8 = vmax.f32 %v798_v63, -30.0  ;;  %v809_v25 = vadd.f32 %v586_v1, %v754_v16 }
 0x103   :  { %629 = vpow2.f32 %v301_v56  ;;  %v269_v9 = vsub.f32 0.0, %v253_v3  ;;  %v277_v11 = vsub.f32 0.0, %v261_v6  ;;  %v254_v21 = vmax.f32 %v805_v10, -30.0 }
 0x104   :  { %631 = vpow2.f32 %v281_v57  ;;  %v267_v12 = vsub.f32 0.0, %v251_v7  ;;  %v275_v13 = vsub.f32 0.0, %v259_v8  ;;  %v812_v28 = vadd.f32 %v754_v16, %v203_v4 }
 0x105   :  { %633 = vpow2.f32 %v297_v2  ;;  %v291_v14 = vmul.f32 1.442695, %v269_v9  ;;  %v307_v15 = vmul.f32 1.442695, %v277_v11  ;;  %v815_v33 = vadd.f32 %v754_v16, %v235_v5 }
 0x106   :  { %v287_v17 = vmul.f32 1.442695, %v267_v12  ;;  %v303_v18 = vmul.f32 1.442695, %v275_v13  ;;  %v270_v38 = vsub.f32 0.0, %v254_v21  ;;  %v262_v41 = vmax.f32 %v809_v25, -30.0 }
 0x107   :  { %635 = vpow2.f32 %v291_v14  ;;  %v252_v44 = vmax.f32 %v812_v28, -30.0  ;;  %v260_v16 = vmax.f32 %v815_v33, -30.0 }
 0x108   :  { %v620_v22 = vpop.eup %619  ;;  %637 = vpow2.f32 %v307_v15  ;;  %v293_v49 = vmul.f32 1.442695, %v270_v38  ;;  %v278_v51 = vsub.f32 0.0, %v262_v41 }
 0x109   :  { %v622_v26 = vpop.eup %621  ;;  %v313_v27 = vadd.f32 1.0, %v620_v22  ;;  %639 = vpow2.f32 %v287_v17  ;;  %v268_v53 = vsub.f32 0.0, %v252_v44  ;;  %v276_v55 = vsub.f32 0.0, %v260_v16 }
 0x10a   :  { %v624_v31 = vpop.eup %623  ;;  %v321_v32 = vadd.f32 1.0, %v622_v26  ;;  %641 = vpow2.f32 %v303_v18  ;;  %v309_v59 = vmul.f32 1.442695, %v278_v51 }
 0x10b   :  { %v626_v34 = vpop.eup %625  ;;  %643 = vrcp.f32 %v313_v27  ;;  %v311_v37 = vadd.f32 1.0, %v624_v31  ;;  %v289_v0 = vmul.f32 1.442695, %v268_v53  ;;  %v305_v2 = vmul.f32 1.442695, %v276_v55 }
 0x10c   :  { %v628_v39 = vpop.eup %627  ;;  %645 = vrcp.f32 %v321_v32  ;;  %v319_v40 = vadd.f32 1.0, %v626_v34 }
 0x10d   :  { %v630_v42 = vpop.eup %629  ;;  %647 = vrcp.f32 %v311_v37  ;;  %v314_v43 = vadd.f32 1.0, %v628_v39 }
 0x10e   :  { %v632_v45 = vpop.eup %631  ;;  %649 = vrcp.f32 %v319_v40  ;;  %v322_v46 = vadd.f32 1.0, %v630_v42 }
 0x10f   :  { %v634_v47 = vpop.eup %633  ;;  %651 = vrcp.f32 %v314_v43  ;;  %v312_v48 = vadd.f32 1.0, %v632_v45 }
 0x110   :  { %653 = vrcp.f32 %v322_v46  ;;  %v320_v50 = vadd.f32 1.0, %v634_v47 }
 0x111   :  { %v636_v52 = vpop.eup %635  ;;  %655 = vrcp.f32 %v312_v48 }
 0x112   :  { %v638_v54 = vpop.eup %637  ;;  %657 = vrcp.f32 %v320_v50  ;;  %v317_v9 = vadd.f32 1.0, %v636_v52 }
 0x113   :  { %v640_v56 = vpop.eup %639  ;;  %659 = vpow2.f32 %v293_v49 }
 0x114   :  { %v642_v57 = vpop.eup %641  ;;  %661 = vpow2.f32 %v309_v59 }
 0x115   :  { %v644_v60 = vpop.eup %643  ;;  %663 = vpow2.f32 %v289_v0 }
 0x116   :  { %v646_v1 = vpop.eup %645  ;;  %v345_v7 = vmul.f32 %v644_v60, %v757_v19  ;;  %665 = vpow2.f32 %v305_v2 }
 0x117   :  { %v648_v3 = vpop.eup %647  ;;  %v353_v12 = vmul.f32 %v646_v1, %v760_v20  ;;  %667 = vrcp.f32 %v317_v9  ;;  %v325_v20 = vadd.f32 1.0, %v638_v54 }
 0x118   :  { %v650_v4 = vpop.eup %649  ;;  %v343_v15 = vmul.f32 %v648_v3, %v763_v23 }
 0x119   :  { %v652_v5 = vpop.eup %651  ;;  %v351_v22 = vmul.f32 %v650_v4, %v766_v24  ;;  %v323_v24 = vadd.f32 1.0, %v642_v57 }
 0x11a   :  { %v654_v6 = vpop.eup %653  ;;  %v346_v8 = vmul.f32 %v652_v5, %v771_v29 }
 0x11b   :  { %v656_v11 = vpop.eup %655  ;;  %v354_v13 = vmul.f32 %v654_v6, %v774_v30 }
 0x11c   :  { %v658_v14 = vpop.eup %657  ;;  %v500_v17 = vpack.c.bf16 %v346_v8, %v345_v7  ;;  %v344_v18 = vmul.f32 %v656_v11, %v779_v35  ;;  %v315_v35 = vadd.f32 1.0, %v640_v56 }
 0x11d   :  { %v660_v21 = vpop.eup %659  ;;  %v520_v26 = vpack.c.bf16 %v354_v13, %v353_v12  ;;  %v352_v19 = vmul.f32 %v658_v14, %v782_v36 }
 0x11e   :  { %532 = vst [vmem:[%s863_s3 + $0x8] sm:$0xff] %v500_v17   ;;  %v495_v29 = vpack.c.bf16 %v344_v18, %v343_v15  ;;  %v318_v30 = vadd.f32 1.0, %v660_v21  ;;  %v662_v36 = vpop.eup %661 }
 0x11f   :  { %536 = vst [vmem:[%s863_s3 + $0x28] sm:$0xff] %v520_v26   ;;  %v515_v23 = vpack.c.bf16 %v352_v19, %v351_v22  ;;  %v664_v27 = vpop.eup %663  ;;  %v326_v31 = vadd.f32 1.0, %v662_v36 }
 0x120   :  { %496 = vst [vmem:[%s863_s3] sm:$0xff] %v495_v29   ;;  %669 = vrcp.f32 %v318_v30  ;;  %v666_v32 = vpop.eup %665  ;;  %v316_v34 = vadd.f32 1.0, %v664_v27 }
 0x121   :  { %535 = vst [vmem:[%s863_s3 + $0x20] sm:$0xff] %v515_v23   ;;  %671 = vrcp.f32 %v325_v20  ;;  %v324_v37 = vadd.f32 1.0, %v666_v32  ;;  %v668_v38 = vpop.eup %667 }
 0x122   :  { %673 = vrcp.f32 %v315_v35  ;;  %v349_v40 = vmul.f32 %v668_v38, %v789_v58 }
 0x123   :  { %675 = vrcp.f32 %v323_v24 }
 0x124   :  { %677 = vrcp.f32 %v326_v31 }
 0x125   :  { %679 = vrcp.f32 %v316_v34 }
 0x126   :  { %681 = vrcp.f32 %v324_v37 }
 0x12a   :  { %v670_v39 = vpop.eup %669 }
 0x12b   :  { %v350_v41 = vmul.f32 %v670_v39, %v805_v10  ;;  %v672_v42 = vpop.eup %671 }
 0x12c   :  { %v674_v43 = vpop.eup %673  ;;  %v357_v47 = vmul.f32 %v672_v42, %v792_v61 }
 0x12d   :  { %v510_v44 = vpack.c.bf16 %v350_v41, %v349_v40  ;;  %v676_v45 = vpop.eup %675  ;;  %v347_v50 = vmul.f32 %v674_v43, %v795_v62 }
 0x12e   :  { %v678_v46 = vpop.eup %677  ;;  %v355_v10 = vmul.f32 %v676_v45, %v798_v63 }
 0x12f   :  { %534 = vst [vmem:[%s863_s3 + $0x18] sm:$0xff] %v510_v44   ;;  %v680_v16 = vpop.eup %679  ;;  %v358_v48 = vmul.f32 %v678_v46, %v809_v25 }
 0x130   :  { %v682_v49 = vpop.eup %681  ;;  %v348_v58 = vmul.f32 %v680_v16, %v812_v28 }
 0x131   :  { %v530_v51 = vpack.c.bf16 %v358_v48, %v357_v47  ;;  %v356_v52 = vmul.f32 %v682_v49, %v815_v33 }
 0x132   :  { %v505_v53 = vpack.c.bf16 %v348_v58, %v347_v50 }
 0x133   :  { %538 = vst [vmem:[%s863_s3 + $0x38] sm:$0xff] %v530_v51   ;;  %v525_v54 = vpack.c.bf16 %v356_v52, %v355_v10 }
 0x134   :  { %533 = vst [vmem:[%s863_s3 + $0x10] sm:$0xff] %v505_v53  }
 0x135   :  { %537 = vst [vmem:[%s863_s3 + $0x30] sm:$0xff] %v525_v54  }

// kernel: _lambda_.76
= control target key start
LH: loop header
LB: loop body
LE: loop exit
PB: predicated region body
PF: predicated region fallthrough
CT: control target
= control target key end

     0   :  { %s1245_s3 = inlined_call_operand.vmem [shape: bf16[128,128], index: 3, kind: input, shape index: {}]   ;;  %s1246_s1 = inlined_call_operand.vmem [shape: bf16[128,128], index: 1, kind: input, shape index: {}]   ;;  %s1247_s2 = inlined_call_operand.vmem [shape: bf16[128,128], index: 2, kind: input, shape index: {}]   ;;  %s1248_s0 = inlined_call_operand.vmem [shape: bf16[128,128], index: 0, kind: input, shape index: {}]   ;;  %s1249_s4 = inlined_call_operand.vmem [shape: f32[1,128], index: 4, kind: input, shape index: {}]   ;;  %s1250_s5 = inlined_call_operand.vmem [shape: bf16[128,128], index: 5, kind: output, shape index: {}]  }
   0x1   :  { %v914_v0 = vld [vmem:[%s1245_s3] sm:$0xff]   ;;  %v916_v2 = vld [vmem:[%s1245_s3 + $0x8] sm:$0xff]   ;;  %v918_v4 = vld [vmem:[%s1245_s3 + $0x10] sm:$0xff]  }
   0x2   :  { %v915_v1 = vld [vmem:[%s1246_s1] sm:$0xff]   ;;  %834 = vmatprep.subr.bf16.mxu1 %v914_v0  ;;  %v917_v3 = vld [vmem:[%s1246_s1 + $0x8] sm:$0xff]   ;;  %v919_v5 = vld [vmem:[%s1246_s1 + $0x10] sm:$0xff]  }
   0x3   :  { %866 = vmatprep.subr.bf16.mxu0 %v915_v1  ;;  %835 = vmatpush3.bf16.msra.mxu1 %v914_v0  ;;  %v920_v6 = vld [vmem:[%s1245_s3 + $0x18] sm:$0xff]   ;;  %v922_v8 = vld [vmem:[%s1245_s3 + $0x20] sm:$0xff]   ;;  %v924_v10 = vld [vmem:[%s1245_s3 + $0x28] sm:$0xff]  }
   0x4   :  { %867 = vmatpush3.bf16.msra.mxu0 %v915_v1  ;;  %836 = vmatprep.subr.bf16.mxu1 %v916_v2  ;;  %v921_v7 = vld [vmem:[%s1246_s1 + $0x18] sm:$0xff]   ;;  %v923_v9 = vld [vmem:[%s1246_s1 + $0x20] sm:$0xff]   ;;  %v925_v11 = vld [vmem:[%s1246_s1 + $0x28] sm:$0xff]  }
   0x5   :  { %868 = vmatprep.subr.bf16.mxu0 %v917_v3  ;;  %v930_v12 = vld [vmem:[%s1247_s2] sm:$0xff]   ;;  %v926_v14 = vld [vmem:[%s1245_s3 + $0x30] sm:$0xff]   ;;  %v928_v16 = vld [vmem:[%s1245_s3 + $0x38] sm:$0xff]  }
   0x6   :  { %v931_v13 = vld [vmem:[%s1248_s0] sm:$0xff]   ;;  %850 = vmatprep.mubr.bf16.mxu1 %v930_v12  ;;  %v927_v15 = vld [vmem:[%s1246_s1 + $0x30] sm:$0xff]   ;;  %v929_v17 = vld [vmem:[%s1246_s1 + $0x38] sm:$0xff]  }
   0x7   :  { %837 = vmatpush3.bf16.msra.mxu1 %v916_v2  ;;  %882 = vmatprep.mubr.bf16.mxu0 %v931_v13  ;;  %v932_v18 = vld [vmem:[%s1247_s2 + $0x8] sm:$0xff]   ;;  %v934_v20 = vld [vmem:[%s1247_s2 + $0x10] sm:$0xff]   ;;  %v936_v22 = vld [vmem:[%s1247_s2 + $0x18] sm:$0xff]  }
   0x8   :  { %869 = vmatpush3.bf16.msra.mxu0 %v917_v3  ;;  %838 = vmatprep.subr.bf16.mxu1 %v918_v4  ;;  %v933_v19 = vld [vmem:[%s1248_s0 + $0x8] sm:$0xff]   ;;  %v935_v21 = vld [vmem:[%s1248_s0 + $0x10] sm:$0xff]   ;;  %v937_v23 = vld [vmem:[%s1248_s0 + $0x18] sm:$0xff]  }
   0x9   :  { %870 = vmatprep.subr.bf16.mxu0 %v919_v5  ;;  %v938_v24 = vld [vmem:[%s1247_s2 + $0x20] sm:$0xff]   ;;  %v940_v26 = vld [vmem:[%s1247_s2 + $0x28] sm:$0xff]   ;;  %v942_v28 = vld [vmem:[%s1247_s2 + $0x30] sm:$0xff]  }
   0xa   :  { %v939_v25 = vld [vmem:[%s1248_s0 + $0x20] sm:$0xff]   ;;  %v941_v27 = vld [vmem:[%s1248_s0 + $0x28] sm:$0xff]   ;;  %v943_v29 = vld [vmem:[%s1248_s0 + $0x30] sm:$0xff]  }
   0xb   :  { %839 = vmatpush3.bf16.msra.mxu1 %v918_v4  ;;  %v944_v30 = vld [vmem:[%s1247_s2 + $0x38] sm:$0xff]   ;;  %v1139_v34 = vld [vmem:[%s1249_s4] ss:$0 sm:$0xff] }
   0xc   :  { %871 = vmatpush3.bf16.msra.mxu0 %v919_v5  ;;  %840 = vmatprep.subr.bf16.mxu1 %v920_v6  ;;  %v945_v31 = vld [vmem:[%s1248_s0 + $0x38] sm:$0xff]  }
   0xd   :  { %872 = vmatprep.subr.bf16.mxu0 %v921_v7 }
   0xf   :  { %841 = vmatpush3.bf16.msra.mxu1 %v920_v6 }
  0x10   :  { %873 = vmatpush3.bf16.msra.mxu0 %v921_v7  ;;  %842 = vmatprep.subr.bf16.mxu1 %v922_v8 }
  0x11   :  { %874 = vmatprep.subr.bf16.mxu0 %v923_v9 }
  0x13   :  { %843 = vmatpush3.bf16.msra.mxu1 %v922_v8 }
  0x14   :  { %875 = vmatpush3.bf16.msra.mxu0 %v923_v9  ;;  %844 = vmatprep.subr.bf16.mxu1 %v924_v10 }
  0x15   :  { %876 = vmatprep.subr.bf16.mxu0 %v925_v11 }
  0x17   :  { %845 = vmatpush3.bf16.msra.mxu1 %v924_v10 }
  0x18   :  { %877 = vmatpush3.bf16.msra.mxu0 %v925_v11  ;;  %846 = vmatprep.subr.bf16.mxu1 %v926_v14 }
  0x19   :  { %878 = vmatprep.subr.bf16.mxu0 %v927_v15 }
  0x1b   :  { %847 = vmatpush3.bf16.msra.mxu1 %v926_v14 }
  0x1c   :  { %879 = vmatpush3.bf16.msra.mxu0 %v927_v15  ;;  %848 = vmatprep.subr.bf16.mxu1 %v928_v16 }
  0x1d   :  { %880 = vmatprep.subr.bf16.mxu0 %v929_v17 }
  0x1f   :  { %849 = vmatpush3.bf16.msra.mxu1 %v928_v16 }
  0x20   :  { %881 = vmatpush3.bf16.msra.mxu0 %v929_v17 }
  0x22   :  { %851 = vmatmul.mubr.bf16.vlgmr.msra.gmra.mrb[0].mxu1 %v932_v18 }
  0x23   :  { %883 = vmatmul.mubr.bf16.vlgmr.msra.gmra.mrb[0].mxu0 %v933_v19  ;;  %854 = vmatprep.mubr.bf16.mxu1 %v934_v20 }
  0x24   :  { %886 = vmatprep.mubr.bf16.mxu0 %v935_v21 }
  0x2a   :  { %855 = vmatmul.mubr.bf16.gmra.mrb[4].mxu1 %v936_v22 }
  0x2b   :  { %887 = vmatmul.mubr.bf16.gmra.mrb[4].mxu0 %v937_v23  ;;  %858 = vmatprep.mubr.bf16.mxu1 %v938_v24 }
  0x2c   :  { %890 = vmatprep.mubr.bf16.mxu0 %v939_v25 }
  0x32   :  { %859 = vmatmul.mubr.bf16.gmra.mrb[8].mxu1 %v940_v26 }
  0x33   :  { %891 = vmatmul.mubr.bf16.gmra.mrb[8].mxu0 %v941_v27  ;;  %862 = vmatprep.mubr.bf16.mxu1 %v942_v28 }
  0x34   :  { %894 = vmatprep.mubr.bf16.mxu0 %v943_v29 }
  0x3a   :  { %863 = vmatmul.mubr.bf16.gmra.mrb[12].mxu1 %v944_v30 }
  0x3b   :  { %895 = vmatmul.mubr.bf16.gmra.mrb[12].mxu0 %v945_v31 }
  0xf5   :  { %v852_v32 = vpop.f32.mrb[0].mxu1 }
  0xf6   :  { %v884_v33 = vpop.f32.mrb[0].mxu0  ;;  %v215_v35 = vpop.f32.mrb[1].mxu1 }
  0xf7   :  { %v417_v36 = vadd.f32 %v884_v33, %v852_v32  ;;  %v408_v37 = vpop.f32.mrb[1].mxu0  ;;  %v853_v38 = vpop.f32.mrb[2].mxu1 }
  0xf8   :  { %v409_v39 = vadd.f32 %v408_v37, %v215_v35  ;;  %v885_v40 = vpop.f32.mrb[2].mxu0  ;;  %v218_v41 = vpop.f32.mrb[3].mxu1 }
  0xf9   :  { %v1142_v42 = vadd.f32 %v1139_v34, %v417_v36  ;;  %v420_v43 = vadd.f32 %v885_v40, %v853_v38  ;;  %v411_v44 = vpop.f32.mrb[3].mxu0 }
  0xfa   :  { %v1145_v45 = vadd.f32 %v1139_v34, %v409_v39  ;;  %v412_v46 = vadd.f32 %v411_v44, %v218_v41 }
  0xfb   :  { %v496_v47 = vmax.f32 %v1142_v42, -30.0  ;;  %v1149_v48 = vadd.f32 %v1139_v34, %v420_v43 }
  0xfc   :  { %v494_v49 = vmax.f32 %v1145_v45, -30.0  ;;  %v1153_v50 = vadd.f32 %v1139_v34, %v412_v46 }
  0xfd   :  { %v512_v51 = vsub.f32 0.0, %v496_v47  ;;  %v497_v52 = vmax.f32 %v1149_v48, -30.0  ;;  %v856_v53 = vpop.f32.mrb[4].mxu1 }
  0xfe   :  { %v510_v54 = vsub.f32 0.0, %v494_v49  ;;  %v495_v55 = vmax.f32 %v1153_v50, -30.0  ;;  %v888_v56 = vpop.f32.mrb[4].mxu0  ;;  %v231_v57 = vpop.f32.mrb[5].mxu1 }
  0xff   :  { %v530_v58 = vmul.f32 1.442695, %v512_v51  ;;  %v513_v59 = vsub.f32 0.0, %v497_v52  ;;  %v433_v60 = vadd.f32 %v888_v56, %v856_v53  ;;  %v424_v61 = vpop.f32.mrb[5].mxu0  ;;  %v857_v62 = vpop.f32.mrb[6].mxu1 }
 0x100   :  { %v526_v63 = vmul.f32 1.442695, %v510_v54  ;;  %v511_v0 = vsub.f32 0.0, %v495_v55  ;;  %v425_v1 = vadd.f32 %v424_v61, %v231_v57  ;;  %v889_v2 = vpop.f32.mrb[6].mxu0  ;;  %v234_v3 = vpop.f32.mrb[7].mxu1 }
 0x101   :  { %946 = vpow2.f32 %v530_v58  ;;  %v532_v4 = vmul.f32 1.442695, %v513_v59  ;;  %v1158_v5 = vadd.f32 %v1139_v34, %v433_v60  ;;  %v436_v6 = vadd.f32 %v889_v2, %v857_v62  ;;  %v427_v7 = vpop.f32.mrb[7].mxu0 }
 0x102   :  { %948 = vpow2.f32 %v526_v63  ;;  %v528_v8 = vmul.f32 1.442695, %v511_v0  ;;  %v1161_v9 = vadd.f32 %v1139_v34, %v425_v1  ;;  %v428_v10 = vadd.f32 %v427_v7, %v234_v3 }
 0x103   :  { %950 = vpow2.f32 %v532_v4  ;;  %v500_v11 = vmax.f32 %v1158_v5, -30.0  ;;  %v1165_v12 = vadd.f32 %v1139_v34, %v436_v6 }
 0x104   :  { %952 = vpow2.f32 %v528_v8  ;;  %v498_v13 = vmax.f32 %v1161_v9, -30.0  ;;  %v1169_v14 = vadd.f32 %v1139_v34, %v428_v10 }
 0x105   :  { %v516_v15 = vsub.f32 0.0, %v500_v11  ;;  %v501_v16 = vmax.f32 %v1165_v12, -30.0  ;;  %v860_v17 = vpop.f32.mrb[8].mxu1 }
 0x106   :  { %v514_v18 = vsub.f32 0.0, %v498_v13  ;;  %v499_v19 = vmax.f32 %v1169_v14, -30.0  ;;  %v892_v20 = vpop.f32.mrb[8].mxu0  ;;  %v247_v21 = vpop.f32.mrb[9].mxu1 }
 0x107   :  { %v538_v22 = vmul.f32 1.442695, %v516_v15  ;;  %v517_v23 = vsub.f32 0.0, %v501_v16  ;;  %v449_v24 = vadd.f32 %v892_v20, %v860_v17  ;;  %v440_v25 = vpop.f32.mrb[9].mxu0  ;;  %v861_v26 = vpop.f32.mrb[10].mxu1 }
 0x108   :  { %v534_v27 = vmul.f32 1.442695, %v514_v18  ;;  %v515_v28 = vsub.f32 0.0, %v499_v19  ;;  %v441_v29 = vadd.f32 %v440_v25, %v247_v21  ;;  %v893_v30 = vpop.f32.mrb[10].mxu0  ;;  %v250_v31 = vpop.f32.mrb[11].mxu1 }
 0x109   :  { %954 = vpow2.f32 %v538_v22  ;;  %v540_v32 = vmul.f32 1.442695, %v517_v23  ;;  %v1174_v33 = vadd.f32 %v1139_v34, %v449_v24  ;;  %v452_v35 = vadd.f32 %v893_v30, %v861_v26  ;;  %v443_v36 = vpop.f32.mrb[11].mxu0 }
 0x10a   :  { %956 = vpow2.f32 %v534_v27  ;;  %v536_v37 = vmul.f32 1.442695, %v515_v28  ;;  %v1177_v38 = vadd.f32 %v1139_v34, %v441_v29  ;;  %v444_v39 = vadd.f32 %v443_v36, %v250_v31 }
 0x10b   :  { %v947_v40 = vpop.eup %946  ;;  %958 = vpow2.f32 %v540_v32  ;;  %v504_v41 = vmax.f32 %v1174_v33, -30.0  ;;  %v1181_v43 = vadd.f32 %v1139_v34, %v452_v35 }
 0x10c   :  { %v949_v44 = vpop.eup %948  ;;  %v560_v46 = vadd.f32 1.0, %v947_v40  ;;  %960 = vpow2.f32 %v536_v37  ;;  %v502_v47 = vmax.f32 %v1177_v38, -30.0  ;;  %v1185_v49 = vadd.f32 %v1139_v34, %v444_v39 }
 0x10d   :  { %v951_v51 = vpop.eup %950  ;;  %v558_v52 = vadd.f32 1.0, %v949_v44  ;;  %v520_v53 = vsub.f32 0.0, %v504_v41  ;;  %v505_v54 = vmax.f32 %v1181_v43, -30.0  ;;  %v864_v55 = vpop.f32.mrb[12].mxu1 }
 0x10e   :  { %v953_v56 = vpop.eup %952  ;;  %962 = vrcp.f32 %v560_v46  ;;  %v561_v57 = vadd.f32 1.0, %v951_v51  ;;  %v518_v58 = vsub.f32 0.0, %v502_v47  ;;  %v503_v59 = vmax.f32 %v1185_v49, -30.0  ;;  %v896_v60 = vpop.f32.mrb[12].mxu0 }
 0x10f   :  { %v263_v61 = vpop.f32.mrb[13].mxu1  ;;  %964 = vrcp.f32 %v558_v52  ;;  %v559_v62 = vadd.f32 1.0, %v953_v56  ;;  %v546_v63 = vmul.f32 1.442695, %v520_v53  ;;  %v521_v0 = vsub.f32 0.0, %v505_v54  ;;  %v456_v1 = vpop.f32.mrb[13].mxu0 }
 0x110   :  { %v865_v2 = vpop.f32.mrb[14].mxu1  ;;  %966 = vrcp.f32 %v561_v57  ;;  %v542_v3 = vmul.f32 1.442695, %v518_v58  ;;  %v519_v4 = vsub.f32 0.0, %v503_v59  ;;  %v465_v6 = vadd.f32 %v896_v60, %v864_v55  ;;  %v897_v7 = vpop.f32.mrb[14].mxu0 }
 0x111   :  { %v266_v8 = vpop.f32.mrb[15].mxu1  ;;  %968 = vrcp.f32 %v559_v62  ;;  %v548_v10 = vmul.f32 1.442695, %v521_v0  ;;  %v457_v11 = vadd.f32 %v456_v1, %v263_v61  ;;  %v468_v13 = vadd.f32 %v897_v7, %v865_v2  ;;  %v459_v15 = vpop.f32.mrb[15].mxu0 }
 0x112   :  { %970 = vpow2.f32 %v546_v63  ;;  %v544_v16 = vmul.f32 1.442695, %v519_v4  ;;  %v1190_v17 = vadd.f32 %v1139_v34, %v465_v6  ;;  %v460_v18 = vadd.f32 %v459_v15, %v266_v8 }
 0x113   :  { %v955_v19 = vpop.eup %954  ;;  %972 = vpow2.f32 %v542_v3  ;;  %v1193_v20 = vadd.f32 %v1139_v34, %v457_v11  ;;  %v1196_v21 = vadd.f32 %v1139_v34, %v468_v13 }
 0x114   :  { %v957_v22 = vpop.eup %956  ;;  %v564_v23 = vadd.f32 1.0, %v955_v19  ;;  %974 = vpow2.f32 %v548_v10  ;;  %v508_v24 = vmax.f32 %v1190_v17, -30.0  ;;  %v1200_v25 = vadd.f32 %v1139_v34, %v460_v18 }
 0x115   :  { %v959_v26 = vpop.eup %958  ;;  %v562_v27 = vadd.f32 1.0, %v957_v22  ;;  %976 = vpow2.f32 %v544_v16  ;;  %v506_v28 = vmax.f32 %v1193_v20, -30.0  ;;  %v509_v29 = vmax.f32 %v1196_v21, -30.0 }
 0x116   :  { %v961_v30 = vpop.eup %960  ;;  %978 = vrcp.f32 %v564_v23  ;;  %v565_v31 = vadd.f32 1.0, %v959_v26  ;;  %v524_v32 = vsub.f32 0.0, %v508_v24  ;;  %v507_v35 = vmax.f32 %v1200_v25, -30.0 }
 0x117   :  { %980 = vrcp.f32 %v562_v27  ;;  %v563_v36 = vadd.f32 1.0, %v961_v30  ;;  %v522_v37 = vsub.f32 0.0, %v506_v28  ;;  %v525_v39 = vsub.f32 0.0, %v509_v29 }
 0x118   :  { %v963_v40 = vpop.eup %962  ;;  %982 = vrcp.f32 %v565_v31  ;;  %v554_v34 = vmul.f32 1.442695, %v524_v32  ;;  %v523_v41 = vsub.f32 0.0, %v507_v35 }
 0x119   :  { %v965_v44 = vpop.eup %964  ;;  %984 = vrcp.f32 %v563_v36  ;;  %v550_v46 = vmul.f32 1.442695, %v522_v37  ;;  %v556_v47 = vmul.f32 1.442695, %v525_v39  ;;  %v592_v54 = vmul.f32 %v963_v40, %v1142_v42 }
 0x11a   :  { %v967_v51 = vpop.eup %966  ;;  %986 = vpow2.f32 %v554_v34  ;;  %v552_v52 = vmul.f32 1.442695, %v523_v41  ;;  %v590_v57 = vmul.f32 %v965_v44, %v1145_v45 }
 0x11b   :  { %v969_v53 = vpop.eup %968  ;;  %v593_v55 = vmul.f32 %v967_v51, %v1149_v48  ;;  %988 = vpow2.f32 %v550_v46 }
 0x11c   :  { %v971_v56 = vpop.eup %970  ;;  %v591_v58 = vmul.f32 %v969_v53, %v1153_v50  ;;  %990 = vpow2.f32 %v556_v47 }
 0x11d   :  { %v973_v59 = vpop.eup %972  ;;  %v763_v60 = vpack.c.bf16 %v593_v55, %v592_v54  ;;  %v568_v61 = vadd.f32 1.0, %v971_v56  ;;  %992 = vpow2.f32 %v552_v52 }
 0x11e   :  { %v975_v62 = vpop.eup %974  ;;  %v758_v63 = vpack.c.bf16 %v591_v58, %v590_v57  ;;  %v566_v0 = vadd.f32 1.0, %v973_v59 }
 0x11f   :  { %v977_v1 = vpop.eup %976  ;;  %795 = vst [vmem:[%s1250_s5 + $0x8] sm:$0xff] %v763_v60   ;;  %994 = vrcp.f32 %v568_v61  ;;  %v569_v42 = vadd.f32 1.0, %v975_v62 }
 0x120   :  { %v979_v48 = vpop.eup %978  ;;  %759 = vst [vmem:[%s1250_s5] sm:$0xff] %v758_v63   ;;  %996 = vrcp.f32 %v566_v0  ;;  %v567_v45 = vadd.f32 1.0, %v977_v1 }
 0x121   :  { %v981_v50 = vpop.eup %980  ;;  %998 = vrcp.f32 %v569_v42  ;;  %v596_v4 = vmul.f32 %v979_v48, %v1158_v5 }
 0x122   :  { %v983_v2 = vpop.eup %982  ;;  %1000 = vrcp.f32 %v567_v45  ;;  %v594_v8 = vmul.f32 %v981_v50, %v1161_v9 }
 0x123   :  { %v985_v3 = vpop.eup %984  ;;  %v597_v6 = vmul.f32 %v983_v2, %v1165_v12 }
 0x124   :  { %v987_v7 = vpop.eup %986  ;;  %v595_v10 = vmul.f32 %v985_v3, %v1169_v14 }
 0x125   :  { %v989_v11 = vpop.eup %988  ;;  %v773_v13 = vpack.c.bf16 %v597_v6, %v596_v4  ;;  %v572_v15 = vadd.f32 1.0, %v987_v7 }
 0x126   :  { %v991_v16 = vpop.eup %990  ;;  %v768_v18 = vpack.c.bf16 %v595_v10, %v594_v8  ;;  %v570_v19 = vadd.f32 1.0, %v989_v11 }
 0x127   :  { %v993_v22 = vpop.eup %992  ;;  %797 = vst [vmem:[%s1250_s5 + $0x18] sm:$0xff] %v773_v13   ;;  %1002 = vrcp.f32 %v572_v15  ;;  %v573_v5 = vadd.f32 1.0, %v991_v16 }
 0x128   :  { %796 = vst [vmem:[%s1250_s5 + $0x10] sm:$0xff] %v768_v18   ;;  %1004 = vrcp.f32 %v570_v19  ;;  %v571_v9 = vadd.f32 1.0, %v993_v22 }
 0x129   :  { %v995_v12 = vpop.eup %994  ;;  %1006 = vrcp.f32 %v573_v5 }
 0x12a   :  { %v997_v14 = vpop.eup %996  ;;  %1008 = vrcp.f32 %v571_v9  ;;  %v600_v26 = vmul.f32 %v995_v12, %v1174_v33 }
 0x12b   :  { %v999_v23 = vpop.eup %998  ;;  %v598_v28 = vmul.f32 %v997_v14, %v1177_v38 }
 0x12c   :  { %v1001_v24 = vpop.eup %1000  ;;  %v601_v27 = vmul.f32 %v999_v23, %v1181_v43 }
 0x12d   :  { %v599_v29 = vmul.f32 %v1001_v24, %v1185_v49 }
 0x12e   :  { %v783_v30 = vpack.c.bf16 %v601_v27, %v600_v26 }
 0x12f   :  { %v778_v31 = vpack.c.bf16 %v599_v29, %v598_v28 }
 0x130   :  { %799 = vst [vmem:[%s1250_s5 + $0x28] sm:$0xff] %v783_v30  }
 0x131   :  { %v1003_v32 = vpop.eup %1002  ;;  %798 = vst [vmem:[%s1250_s5 + $0x20] sm:$0xff] %v778_v31  }
 0x132   :  { %v1005_v35 = vpop.eup %1004  ;;  %v604_v43 = vmul.f32 %v1003_v32, %v1190_v17 }
 0x133   :  { %v1007_v36 = vpop.eup %1006  ;;  %v602_v49 = vmul.f32 %v1005_v35, %v1193_v20 }
 0x134   :  { %v1009_v33 = vpop.eup %1008  ;;  %v605_v38 = vmul.f32 %v1007_v36, %v1196_v21 }
 0x135   :  { %v603_v37 = vmul.f32 %v1009_v33, %v1200_v25 }
 0x136   :  { %v793_v39 = vpack.c.bf16 %v605_v38, %v604_v43 }
 0x137   :  { %v788_v40 = vpack.c.bf16 %v603_v37, %v602_v49 }
 0x138   :  { %801 = vst [vmem:[%s1250_s5 + $0x38] sm:$0xff] %v793_v39  }
 0x139   :  { %800 = vst [vmem:[%s1250_s5 + $0x30] sm:$0xff] %v788_v40  }

// kernel: _lambda_.78
= control target key start
LH: loop header
LB: loop body
LE: loop exit
PB: predicated region body
PF: predicated region fallthrough
CT: control target
= control target key end

     0   :  { %s348_s1 = inlined_call_operand.vmem [shape: bf16[128,128], index: 1, kind: input, shape index: {}]   ;;  %s349_s0 = inlined_call_operand.vmem [shape: bf16[32,128], index: 0, kind: input, shape index: {}]   ;;  %s350_s2 = inlined_call_operand.vmem [shape: f32[1,128], index: 2, kind: input, shape index: {}]   ;;  %s351_s3 = inlined_call_operand.vmem [shape: bf16[32,128], index: 3, kind: output, shape index: {}]  }
   0x1   :  { %v263_v0 = vld [vmem:[%s348_s1] sm:$0xff]   ;;  %v264_v1 = vld [vmem:[%s348_s1 + $0x8] sm:$0xff]   ;;  %v265_v2 = vld [vmem:[%s348_s1 + $0x10] sm:$0xff]  }
   0x2   :  { %243 = vmatprep.subr.bf16.mxu0 %v263_v0  ;;  %v266_v3 = vld [vmem:[%s348_s1 + $0x18] sm:$0xff]   ;;  %v271_v4 = vld [vmem:[%s349_s0] sm:$0xff]   ;;  %v268_v6 = vld [vmem:[%s348_s1 + $0x28] sm:$0xff]  }
   0x3   :  { %244 = vmatpush3.bf16.msra.mxu0 %v263_v0  ;;  %259 = vmatprep.mubr.bf16.mxu0 %v271_v4  ;;  %v267_v5 = vld [vmem:[%s348_s1 + $0x20] sm:$0xff]   ;;  %v269_v7 = vld [vmem:[%s348_s1 + $0x30] sm:$0xff]   ;;  %v270_v8 = vld [vmem:[%s348_s1 + $0x38] sm:$0xff]  }
   0x4   :  { %245 = vmatprep.subr.bf16.mxu0 %v264_v1  ;;  %v272_v9 = vld [vmem:[%s349_s0 + $0x8] sm:$0xff]   ;;  %v203_v10 = vld [vmem:[%s350_s2] ss:$0 sm:$0xff] }
   0x7   :  { %246 = vmatpush3.bf16.msra.mxu0 %v264_v1 }
   0x8   :  { %247 = vmatprep.subr.bf16.mxu0 %v265_v2 }
   0xb   :  { %248 = vmatpush3.bf16.msra.mxu0 %v265_v2 }
   0xc   :  { %249 = vmatprep.subr.bf16.mxu0 %v266_v3 }
   0xf   :  { %250 = vmatpush3.bf16.msra.mxu0 %v266_v3 }
  0x10   :  { %251 = vmatprep.subr.bf16.mxu0 %v267_v5 }
  0x13   :  { %252 = vmatpush3.bf16.msra.mxu0 %v267_v5 }
  0x14   :  { %253 = vmatprep.subr.bf16.mxu0 %v268_v6 }
  0x17   :  { %254 = vmatpush3.bf16.msra.mxu0 %v268_v6 }
  0x18   :  { %255 = vmatprep.subr.bf16.mxu0 %v269_v7 }
  0x1b   :  { %256 = vmatpush3.bf16.msra.mxu0 %v269_v7 }
  0x1c   :  { %257 = vmatprep.subr.bf16.mxu0 %v270_v8 }
  0x1f   :  { %258 = vmatpush3.bf16.msra.mxu0 %v270_v8 }
  0x22   :  { %260 = vmatmul.mubr.bf16.vlgmr.msra.gmra.mrb[0].mxu0 %v272_v9 }
  0xf5   :  { %v261_v11 = vpop.f32.mrb[0].mxu0 }
  0xf6   :  { %v145_v12 = vadd.f32 %v261_v11, %v203_v10  ;;  %v136_v13 = vpop.f32.mrb[1].mxu0 }
  0xf7   :  { %v137_v14 = vadd.f32 %v203_v10, %v136_v13  ;;  %v262_v15 = vpop.f32.mrb[2].mxu0 }
  0xf8   :  { %v153_v16 = vmax.f32 %v145_v12, -30.0  ;;  %v148_v17 = vadd.f32 %v262_v15, %v203_v10  ;;  %v139_v18 = vpop.f32.mrb[3].mxu0 }
  0xf9   :  { %v151_v19 = vmax.f32 %v137_v14, -30.0  ;;  %v140_v20 = vadd.f32 %v203_v10, %v139_v18 }
  0xfa   :  { %v157_v21 = vsub.f32 0.0, %v153_v16  ;;  %v154_v22 = vmax.f32 %v148_v17, -30.0 }
  0xfb   :  { %v155_v23 = vsub.f32 0.0, %v151_v19  ;;  %v152_v24 = vmax.f32 %v140_v20, -30.0 }
  0xfc   :  { %v163_v25 = vmul.f32 1.442695, %v157_v21  ;;  %v158_v26 = vsub.f32 0.0, %v154_v22 }
  0xfd   :  { %v159_v27 = vmul.f32 1.442695, %v155_v23  ;;  %v156_v28 = vsub.f32 0.0, %v152_v24 }
  0xfe   :  { %273 = vpow2.f32 %v163_v25  ;;  %v165_v29 = vmul.f32 1.442695, %v158_v26 }
  0xff   :  { %275 = vpow2.f32 %v159_v27  ;;  %v161_v30 = vmul.f32 1.442695, %v156_v28 }
 0x100   :  { %277 = vpow2.f32 %v165_v29 }
 0x101   :  { %279 = vpow2.f32 %v161_v30 }
 0x108   :  { %v274_v31 = vpop.eup %273 }
 0x109   :  { %v276_v32 = vpop.eup %275  ;;  %v169_v33 = vadd.f32 1.0, %v274_v31 }
 0x10a   :  { %v278_v34 = vpop.eup %277  ;;  %v167_v35 = vadd.f32 1.0, %v276_v32 }
 0x10b   :  { %v280_v36 = vpop.eup %279  ;;  %281 = vrcp.f32 %v169_v33  ;;  %v170_v37 = vadd.f32 1.0, %v278_v34 }
 0x10c   :  { %283 = vrcp.f32 %v167_v35  ;;  %v168_v38 = vadd.f32 1.0, %v280_v36 }
 0x10d   :  { %285 = vrcp.f32 %v170_v37 }
 0x10e   :  { %287 = vrcp.f32 %v168_v38 }
 0x115   :  { %v282_v39 = vpop.eup %281 }
 0x116   :  { %v284_v40 = vpop.eup %283  ;;  %v177_v43 = vmul.f32 %v282_v39, %v145_v12 }
 0x117   :  { %v286_v41 = vpop.eup %285  ;;  %v175_v45 = vmul.f32 %v284_v40, %v137_v14 }
 0x118   :  { %v288_v42 = vpop.eup %287  ;;  %v178_v44 = vmul.f32 %v286_v41, %v148_v17 }
 0x119   :  { %v176_v46 = vmul.f32 %v288_v42, %v140_v20 }
 0x11a   :  { %v230_v47 = vpack.c.bf16 %v178_v44, %v177_v43 }
 0x11b   :  { %v225_v48 = vpack.c.bf16 %v176_v46, %v175_v45 }
 0x11c   :  { %232 = vst [vmem:[%s351_s3 + $0x8] sm:$0xff] %v230_v47  }
 0x11d   :  { %226 = vst [vmem:[%s351_s3] sm:$0xff] %v225_v48  }

// kernel: _lambda_.77
= control target key start
LH: loop header
LB: loop body
LE: loop exit
PB: predicated region body
PF: predicated region fallthrough
CT: control target
= control target key end

     0   :  { %vm204_vm0 = vcmask 261120   ;;  %s590_s1 = inlined_call_operand.vmem [shape: bf16[288,128], index: 1, kind: input, shape index: {}]   ;;  %s591_s0 = inlined_call_operand.vmem [shape: bf16[32,288], index: 0, kind: input, shape index: {}]   ;;  %s592_s2 = inlined_call_operand.vmem [shape: f32[1,128], index: 2, kind: input, shape index: {}]   ;;  %s593_s3 = inlined_call_operand.vmem [shape: bf16[32,128], index: 3, kind: output, shape index: {}]  }
   0x1   :  { %v447_v0 = vld [vmem:[%s590_s1 + $0x40] sm:$0xff]   ;;  %v449_v2 = vld [vmem:[%s590_s1 + $0x48] sm:$0xff]   ;;  %v451_v4 = vld [vmem:[%s590_s1 + $0x50] sm:$0xff]  }
   0x2   :  { %v448_v1 = vld [vmem:[%s590_s1] sm:$0xff]   ;;  %407 = vmatprep.subr.bf16.mxu0 %v447_v0  ;;  %v450_v3 = vld [vmem:[%s590_s1 + $0x8] sm:$0xff]   ;;  %v452_v5 = vld [vmem:[%s590_s1 + $0x10] sm:$0xff]  }
   0x3   :  { %408 = vmatpush3.bf16.msra.mxu0 %v448_v1  ;;  %v453_v6 = vld [vmem:[%s590_s1 + $0x58] sm:$0xff]   ;;  %v455_v8 = vld [vmem:[%s590_s1 + $0x60] sm:$0xff]   ;;  %v457_v11 = vld [vmem:[%s590_s1 + $0x68] sm:$0xff]  }
   0x4   :  { %409 = vmatprep.subr.bf16.mxu0 %v449_v2  ;;  %v454_v7 = vld [vmem:[%s590_s1 + $0x18] sm:$0xff]   ;;  %v456_v9 = vld [vmem:[%s590_s1 + $0x20] sm:$0xff]   ;;  %v458_v12 = vld [vmem:[%s590_s1 + $0x28] sm:$0xff]  }
   0x5   :  { %v462_v10 = vld [vmem:[%s590_s1 + $0x80] sm:$0xff]   ;;  %v459_v13 = vld [vmem:[%s590_s1 + $0x70] sm:$0xff]   ;;  %v467_v15 = vld [vmem:[%s590_s1 + $0x88] sm:$0xff]  }
   0x6   :  { %439 = vmatprep.subr.bf16.mxu1 %v462_v10  ;;  %v466_v14 = vld [vmem:[%s591_s0 + $0x4] ss:$12 sps:$4 sm:$0xff]   ;;  %v468_v16 = vld [vmem:[%s591_s0 + $0x8] ss:$12 sps:$4 sm:$0xff]   ;;  %v469_v17 = vld [vmem:[%s591_s0 + $0x20] ss:$12 sps:$4 sm:$0xff]  }
   0x7   :  { %410 = vmatpush3.bf16.msra.mxu0 %v450_v3  ;;  %440 = vmatpush3.bf16.msra.mxu1 %v462_v10  ;;  %v460_v18 = vld [vmem:[%s590_s1 + $0x30] sm:$0xff]   ;;  %v461_v19 = vld [vmem:[%s590_s1 + $0x78] sm:$0xff]   ;;  %v464_v21 = vld [vmem:[%s591_s0] ss:$12 sps:$4 sm:$0xff]  }
   0x8   :  { %411 = vmatprep.subr.bf16.mxu0 %v451_v4  ;;  %243 = vmatprep.mubr.bf16.mxu0 %v466_v14  ;;  %v463_v20 = vld [vmem:[%s590_s1 + $0x38] sm:$0xff]   ;;  %v361_v30 = vld [vmem:[%s592_s2] ss:$0 sm:$0xff] }
   0x9   :  { %441 = vmatprep.subr.bf16.mxu1 %v467_v15  ;;  %443 = vmatprep.mubr.msk.bf16.mxu1 %vm204_vm0, %v468_v16  ;;  %v470_v22 = vld [vmem:[%s591_s0 + $0x1c] ss:$12 sps:$4 sm:$0xff]   ;;  %v472_v23 = vld [vmem:[%s591_s0 + $0x18] ss:$12 sps:$4 sm:$0xff]  }
   0xb   :  { %412 = vmatpush3.bf16.msra.mxu0 %v452_v5  ;;  %442 = vmatpush3.bf16.msra.mxu1 %v467_v15 }
   0xc   :  { %413 = vmatprep.subr.bf16.mxu0 %v453_v6 }
   0xe   :  { %444 = vmatmul.mubr.msk.bf16.vlgmr.msra.gmra.mrb[0].mxu1 %vm204_vm0, %v469_v17 }
   0xf   :  { %414 = vmatpush3.bf16.msra.mxu0 %v454_v7 }
  0x10   :  { %415 = vmatprep.subr.bf16.mxu0 %v455_v8 }
  0x13   :  { %416 = vmatpush3.bf16.msra.mxu0 %v456_v9 }
  0x14   :  { %417 = vmatprep.subr.bf16.mxu0 %v457_v11 }
  0x17   :  { %418 = vmatpush3.bf16.msra.mxu0 %v458_v12 }
  0x18   :  { %419 = vmatprep.subr.bf16.mxu0 %v459_v13 }
  0x1b   :  { %420 = vmatpush3.bf16.msra.mxu0 %v460_v18 }
  0x1c   :  { %421 = vmatprep.subr.bf16.mxu0 %v461_v19 }
  0x1f   :  { %422 = vmatpush3.bf16.msra.mxu0 %v463_v20 }
  0x22   :  { %244 = vmatmul.mubr.bf16.vlgmr.msra.gmra.mrb[0].mxu0 %v464_v21 }
  0x23   :  { %251 = vmatprep.mubr.bf16.mxu0 %v470_v22 }
  0x2a   :  { %252 = vmatmul.mubr.bf16.gmra.mrb[4].mxu0 %v472_v23 }
  0xe1   :  { %v445_v24 = vpop.f32.mrb[0].mxu1 }
  0xe2   :  { %v294_v25 = vpop.f32.mrb[1].mxu1 }
  0xe3   :  { %v446_v26 = vpop.f32.mrb[2].mxu1 }
  0xe4   :  { %v297_v27 = vpop.f32.mrb[3].mxu1 }
  0xf5   :  { %v423_v28 = vpop.f32.mrb[0].mxu0 }
  0xf6   :  { %v424_v29 = vpop.f32.mrb[1].mxu0 }
  0xf7   :  { %v425_v31 = vadd.f32 %v424_v29, %v423_v28  ;;  %v426_v32 = vpop.f32.mrb[2].mxu0 }
  0xf8   :  { %v427_v33 = vpop.f32.mrb[3].mxu0 }
  0xf9   :  { %v428_v34 = vadd.f32 %v427_v33, %v426_v32  ;;  %v246_v35 = vadd.f32 %v425_v31, %v361_v30 }
  0xfb   :  { %v295_v36 = vadd.f32 %v294_v25, %v246_v35  ;;  %v249_v37 = vadd.f32 %v428_v34, %v361_v30 }
  0xfd   :  { %v309_v38 = vmax.f32 %v295_v36, -30.0  ;;  %v298_v39 = vadd.f32 %v297_v27, %v249_v37  ;;  %v429_v40 = vpop.f32.mrb[4].mxu0 }
  0xfe   :  { %v430_v41 = vpop.f32.mrb[5].mxu0 }
  0xff   :  { %v313_v42 = vsub.f32 0.0, %v309_v38  ;;  %v310_v43 = vmax.f32 %v298_v39, -30.0  ;;  %v431_v44 = vadd.f32 %v430_v41, %v429_v40  ;;  %v432_v45 = vpop.f32.mrb[6].mxu0 }
 0x100   :  { %v433_v46 = vpop.f32.mrb[7].mxu0 }
 0x101   :  { %v317_v47 = vmul.f32 1.442695, %v313_v42  ;;  %v314_v48 = vsub.f32 0.0, %v310_v43  ;;  %v254_v49 = vadd.f32 %v431_v44, %v361_v30  ;;  %v434_v50 = vadd.f32 %v433_v46, %v432_v45 }
 0x103   :  { %473 = vpow2.f32 %v317_v47  ;;  %v319_v51 = vmul.f32 1.442695, %v314_v48  ;;  %v303_v52 = vadd.f32 %v445_v24, %v254_v49  ;;  %v257_v53 = vadd.f32 %v434_v50, %v361_v30 }
 0x105   :  { %475 = vpow2.f32 %v319_v51  ;;  %v311_v54 = vmax.f32 %v303_v52, -30.0  ;;  %v306_v55 = vadd.f32 %v446_v26, %v257_v53 }
 0x107   :  { %v315_v56 = vsub.f32 0.0, %v311_v54  ;;  %v312_v57 = vmax.f32 %v306_v55, -30.0 }
 0x109   :  { %v321_v58 = vmul.f32 1.442695, %v315_v56  ;;  %v316_v59 = vsub.f32 0.0, %v312_v57 }
 0x10b   :  { %477 = vpow2.f32 %v321_v58  ;;  %v323_v60 = vmul.f32 1.442695, %v316_v59 }
 0x10d   :  { %v474_v61 = vpop.eup %473  ;;  %479 = vpow2.f32 %v323_v60 }
 0x10e   :  { %v325_v62 = vadd.f32 1.0, %v474_v61 }
 0x10f   :  { %v476_v63 = vpop.eup %475 }
 0x110   :  { %481 = vrcp.f32 %v325_v62  ;;  %v326_v0 = vadd.f32 1.0, %v476_v63 }
 0x112   :  { %483 = vrcp.f32 %v326_v0 }
 0x115   :  { %v478_v1 = vpop.eup %477 }
 0x116   :  { %v327_v2 = vadd.f32 1.0, %v478_v1 }
 0x117   :  { %v480_v3 = vpop.eup %479 }
 0x118   :  { %485 = vrcp.f32 %v327_v2  ;;  %v328_v4 = vadd.f32 1.0, %v480_v3 }
 0x11a   :  { %v482_v5 = vpop.eup %481  ;;  %487 = vrcp.f32 %v328_v4 }
 0x11b   :  { %v333_v7 = vmul.f32 %v482_v5, %v295_v36 }
 0x11c   :  { %v484_v6 = vpop.eup %483 }
 0x11d   :  { %v334_v8 = vmul.f32 %v484_v6, %v298_v39 }
 0x11f   :  { %v399_v9 = vpack.c.bf16 %v334_v8, %v333_v7 }
 0x121   :  { %400 = vst [vmem:[%s593_s3] sm:$0xff] %v399_v9  }
 0x122   :  { %v486_v10 = vpop.eup %485 }
 0x123   :  { %v335_v12 = vmul.f32 %v486_v10, %v303_v52 }
 0x124   :  { %v488_v11 = vpop.eup %487 }
 0x125   :  { %v336_v13 = vmul.f32 %v488_v11, %v306_v55 }
 0x127   :  { %v404_v14 = vpack.c.bf16 %v336_v13, %v335_v12 }
 0x129   :  { %406 = vst [vmem:[%s593_s3 + $0x8] sm:$0xff] %v404_v14  }

// kernel: _lambda_.86
= control target key start
LH: loop header
LB: loop body
LE: loop exit
PB: predicated region body
PF: predicated region fallthrough
CT: control target
= control target key end

     0   :  { %s581_s3 = inlined_call_operand.vmem [shape: bf16[128,128], index: 3, kind: input, shape index: {}]   ;;  %s582_s1 = inlined_call_operand.vmem [shape: bf16[128,128], index: 1, kind: input, shape index: {}]   ;;  %s583_s2 = inlined_call_operand.vmem [shape: bf16[32,128], index: 2, kind: input, shape index: {}]   ;;  %s584_s0 = inlined_call_operand.vmem [shape: bf16[32,128], index: 0, kind: input, shape index: {}]   ;;  %s585_s4 = inlined_call_operand.vmem [shape: f32[1,128], index: 4, kind: input, shape index: {}]   ;;  %s586_s5 = inlined_call_operand.vmem [shape: bf16[32,128], index: 5, kind: output, shape index: {}]  }
   0x1   :  { %v446_v0 = vld [vmem:[%s581_s3] sm:$0xff]   ;;  %v448_v2 = vld [vmem:[%s581_s3 + $0x8] sm:$0xff]   ;;  %v450_v4 = vld [vmem:[%s581_s3 + $0x10] sm:$0xff]  }
   0x2   :  { %v447_v1 = vld [vmem:[%s582_s1] sm:$0xff]   ;;  %402 = vmatprep.subr.bf16.mxu1 %v446_v0  ;;  %v449_v3 = vld [vmem:[%s582_s1 + $0x8] sm:$0xff]   ;;  %v451_v5 = vld [vmem:[%s582_s1 + $0x10] sm:$0xff]  }
   0x3   :  { %422 = vmatprep.subr.bf16.mxu0 %v447_v1  ;;  %403 = vmatpush3.bf16.msra.mxu1 %v446_v0  ;;  %v452_v6 = vld [vmem:[%s581_s3 + $0x18] sm:$0xff]   ;;  %v454_v8 = vld [vmem:[%s581_s3 + $0x20] sm:$0xff]   ;;  %v456_v10 = vld [vmem:[%s581_s3 + $0x28] sm:$0xff]  }
   0x4   :  { %423 = vmatpush3.bf16.msra.mxu0 %v447_v1  ;;  %404 = vmatprep.subr.bf16.mxu1 %v448_v2  ;;  %v453_v7 = vld [vmem:[%s582_s1 + $0x18] sm:$0xff]   ;;  %v455_v9 = vld [vmem:[%s582_s1 + $0x20] sm:$0xff]   ;;  %v457_v11 = vld [vmem:[%s582_s1 + $0x28] sm:$0xff]  }
   0x5   :  { %424 = vmatprep.subr.bf16.mxu0 %v449_v3  ;;  %v462_v12 = vld [vmem:[%s583_s2] sm:$0xff]   ;;  %v458_v14 = vld [vmem:[%s581_s3 + $0x30] sm:$0xff]   ;;  %v460_v16 = vld [vmem:[%s581_s3 + $0x38] sm:$0xff]  }
   0x6   :  { %v463_v13 = vld [vmem:[%s584_s0] sm:$0xff]   ;;  %418 = vmatprep.mubr.bf16.mxu1 %v462_v12  ;;  %v459_v15 = vld [vmem:[%s582_s1 + $0x30] sm:$0xff]   ;;  %v461_v17 = vld [vmem:[%s582_s1 + $0x38] sm:$0xff]  }
   0x7   :  { %405 = vmatpush3.bf16.msra.mxu1 %v448_v2  ;;  %438 = vmatprep.mubr.bf16.mxu0 %v463_v13  ;;  %v464_v18 = vld [vmem:[%s583_s2 + $0x8] sm:$0xff]   ;;  %v362_v22 = vld [vmem:[%s585_s4] ss:$0 sm:$0xff] }
   0x8   :  { %425 = vmatpush3.bf16.msra.mxu0 %v449_v3  ;;  %406 = vmatprep.subr.bf16.mxu1 %v450_v4  ;;  %v465_v19 = vld [vmem:[%s584_s0 + $0x8] sm:$0xff]  }
   0x9   :  { %426 = vmatprep.subr.bf16.mxu0 %v451_v5 }
   0xb   :  { %407 = vmatpush3.bf16.msra.mxu1 %v450_v4 }
   0xc   :  { %427 = vmatpush3.bf16.msra.mxu0 %v451_v5  ;;  %408 = vmatprep.subr.bf16.mxu1 %v452_v6 }
   0xd   :  { %428 = vmatprep.subr.bf16.mxu0 %v453_v7 }
   0xf   :  { %409 = vmatpush3.bf16.msra.mxu1 %v452_v6 }
  0x10   :  { %429 = vmatpush3.bf16.msra.mxu0 %v453_v7  ;;  %410 = vmatprep.subr.bf16.mxu1 %v454_v8 }
  0x11   :  { %430 = vmatprep.subr.bf16.mxu0 %v455_v9 }
  0x13   :  { %411 = vmatpush3.bf16.msra.mxu1 %v454_v8 }
  0x14   :  { %431 = vmatpush3.bf16.msra.mxu0 %v455_v9  ;;  %412 = vmatprep.subr.bf16.mxu1 %v456_v10 }
  0x15   :  { %432 = vmatprep.subr.bf16.mxu0 %v457_v11 }
  0x17   :  { %413 = vmatpush3.bf16.msra.mxu1 %v456_v10 }
  0x18   :  { %433 = vmatpush3.bf16.msra.mxu0 %v457_v11  ;;  %414 = vmatprep.subr.bf16.mxu1 %v458_v14 }
  0x19   :  { %434 = vmatprep.subr.bf16.mxu0 %v459_v15 }
  0x1b   :  { %415 = vmatpush3.bf16.msra.mxu1 %v458_v14 }
  0x1c   :  { %435 = vmatpush3.bf16.msra.mxu0 %v459_v15  ;;  %416 = vmatprep.subr.bf16.mxu1 %v460_v16 }
  0x1d   :  { %436 = vmatprep.subr.bf16.mxu0 %v461_v17 }
  0x1f   :  { %417 = vmatpush3.bf16.msra.mxu1 %v460_v16 }
  0x20   :  { %437 = vmatpush3.bf16.msra.mxu0 %v461_v17 }
  0x22   :  { %419 = vmatmul.mubr.bf16.vlgmr.msra.gmra.mrb[0].mxu1 %v464_v18 }
  0x23   :  { %439 = vmatmul.mubr.bf16.vlgmr.msra.gmra.mrb[0].mxu0 %v465_v19 }
  0xf5   :  { %v420_v20 = vpop.f32.mrb[0].mxu1 }
  0xf6   :  { %v440_v21 = vpop.f32.mrb[0].mxu0  ;;  %v155_v23 = vpop.f32.mrb[1].mxu1 }
  0xf7   :  { %v273_v24 = vadd.f32 %v440_v21, %v420_v20  ;;  %v264_v25 = vpop.f32.mrb[1].mxu0  ;;  %v421_v26 = vpop.f32.mrb[2].mxu1 }
  0xf8   :  { %v265_v27 = vadd.f32 %v264_v25, %v155_v23  ;;  %v441_v28 = vpop.f32.mrb[2].mxu0  ;;  %v158_v29 = vpop.f32.mrb[3].mxu1 }
  0xf9   :  { %v288_v30 = vadd.f32 %v362_v22, %v273_v24  ;;  %v276_v31 = vadd.f32 %v441_v28, %v421_v26  ;;  %v267_v32 = vpop.f32.mrb[3].mxu0 }
  0xfa   :  { %v286_v33 = vadd.f32 %v362_v22, %v265_v27  ;;  %v268_v34 = vadd.f32 %v267_v32, %v158_v29 }
  0xfb   :  { %v292_v35 = vmax.f32 %v288_v30, -30.0  ;;  %v289_v36 = vadd.f32 %v362_v22, %v276_v31 }
  0xfc   :  { %v290_v37 = vmax.f32 %v286_v33, -30.0  ;;  %v287_v38 = vadd.f32 %v362_v22, %v268_v34 }
  0xfd   :  { %v296_v39 = vsub.f32 0.0, %v292_v35  ;;  %v293_v40 = vmax.f32 %v289_v36, -30.0 }
  0xfe   :  { %v294_v41 = vsub.f32 0.0, %v290_v37  ;;  %v291_v42 = vmax.f32 %v287_v38, -30.0 }
  0xff   :  { %v302_v43 = vmul.f32 1.442695, %v296_v39  ;;  %v297_v44 = vsub.f32 0.0, %v293_v40 }
 0x100   :  { %v298_v45 = vmul.f32 1.442695, %v294_v41  ;;  %v295_v46 = vsub.f32 0.0, %v291_v42 }
 0x101   :  { %466 = vpow2.f32 %v302_v43  ;;  %v304_v47 = vmul.f32 1.442695, %v297_v44 }
 0x102   :  { %468 = vpow2.f32 %v298_v45  ;;  %v300_v48 = vmul.f32 1.442695, %v295_v46 }
 0x103   :  { %470 = vpow2.f32 %v304_v47 }
 0x104   :  { %472 = vpow2.f32 %v300_v48 }
 0x10b   :  { %v467_v49 = vpop.eup %466 }
 0x10c   :  { %v469_v50 = vpop.eup %468  ;;  %v308_v51 = vadd.f32 1.0, %v467_v49 }
 0x10d   :  { %v471_v52 = vpop.eup %470  ;;  %v306_v53 = vadd.f32 1.0, %v469_v50 }
 0x10e   :  { %v473_v54 = vpop.eup %472  ;;  %474 = vrcp.f32 %v308_v51  ;;  %v309_v55 = vadd.f32 1.0, %v471_v52 }
 0x10f   :  { %476 = vrcp.f32 %v306_v53  ;;  %v307_v56 = vadd.f32 1.0, %v473_v54 }
 0x110   :  { %478 = vrcp.f32 %v309_v55 }
 0x111   :  { %480 = vrcp.f32 %v307_v56 }
 0x118   :  { %v475_v57 = vpop.eup %474 }
 0x119   :  { %v477_v58 = vpop.eup %476  ;;  %v316_v61 = vmul.f32 %v475_v57, %v288_v30 }
 0x11a   :  { %v479_v59 = vpop.eup %478  ;;  %v314_v63 = vmul.f32 %v477_v58, %v286_v33 }
 0x11b   :  { %v481_v60 = vpop.eup %480  ;;  %v317_v62 = vmul.f32 %v479_v59, %v289_v36 }
 0x11c   :  { %v315_v0 = vmul.f32 %v481_v60, %v287_v38 }
 0x11d   :  { %v379_v1 = vpack.c.bf16 %v317_v62, %v316_v61 }
 0x11e   :  { %v374_v2 = vpack.c.bf16 %v315_v0, %v314_v63 }
 0x11f   :  { %381 = vst [vmem:[%s586_s5 + $0x8] sm:$0xff] %v379_v1  }
 0x120   :  { %375 = vst [vmem:[%s586_s5] sm:$0xff] %v374_v2  }

// kernel: _lambda_.88
= control target key start
LH: loop header
LB: loop body
LE: loop exit
PB: predicated region body
PF: predicated region fallthrough
CT: control target
= control target key end

     0   :  { %v192_v0 = vmov 0.0   ;;  %vm193_vm0 = vmmov 0   ;;  %s247_s1 = inlined_call_operand.vmem [shape: bf16[128,128], index: 1, kind: input, shape index: {}]   ;;  %s248_s0 = inlined_call_operand.vmem [shape: bf16[8,128], index: 0, kind: input, shape index: {}]   ;;  %s249_s2 = inlined_call_operand.vmem [shape: f32[1,128], index: 2, kind: input, shape index: {}]   ;;  %s250_s3 = inlined_call_operand.vmem [shape: bf16[8,128], index: 3, kind: output, shape index: {}]  }
   0x1   :  { %158 = vmatprep.subr.bf16.mxu0 %v192_v0  ;;  %v180_v1 = vld [vmem:[%s247_s1] sm:$0xff]   ;;  %174 = vmatprep.mubr.msk.bf16.mxu0 %vm193_vm0, %v192_v0  ;;  %v181_v2 = vld [vmem:[%s247_s1 + $0x8] sm:$0xff]   ;;  %v182_v3 = vld [vmem:[%s247_s1 + $0x10] sm:$0xff]  }
   0x2   :  { %159 = vmatpush3.bf16.msra.mxu0 %v180_v1  ;;  %v183_v4 = vld [vmem:[%s247_s1 + $0x18] sm:$0xff]   ;;  %v184_v5 = vld [vmem:[%s247_s1 + $0x20] sm:$0xff]   ;;  %v185_v6 = vld [vmem:[%s247_s1 + $0x28] sm:$0xff]  }
   0x3   :  { %160 = vmatprep.subr.bf16.mxu0 %v192_v0  ;;  %v186_v7 = vld [vmem:[%s247_s1 + $0x30] sm:$0xff]   ;;  %v187_v8 = vld [vmem:[%s247_s1 + $0x38] sm:$0xff]   ;;  %v15_v9 = vld [vmem:[%s248_s0] sm:$0xf] }
   0x4   :  { %v140_v10 = vld [vmem:[%s249_s2] ss:$0 sm:$0xff] }
   0x6   :  { %161 = vmatpush3.bf16.msra.mxu0 %v181_v2 }
   0x7   :  { %162 = vmatprep.subr.bf16.mxu0 %v192_v0 }
   0xa   :  { %163 = vmatpush3.bf16.msra.mxu0 %v182_v3 }
   0xb   :  { %164 = vmatprep.subr.bf16.mxu0 %v192_v0 }
   0xe   :  { %165 = vmatpush3.bf16.msra.mxu0 %v183_v4 }
   0xf   :  { %166 = vmatprep.subr.bf16.mxu0 %v192_v0 }
  0x12   :  { %167 = vmatpush3.bf16.msra.mxu0 %v184_v5 }
  0x13   :  { %168 = vmatprep.subr.bf16.mxu0 %v192_v0 }
  0x16   :  { %169 = vmatpush3.bf16.msra.mxu0 %v185_v6 }
  0x17   :  { %170 = vmatprep.subr.bf16.mxu0 %v192_v0 }
  0x1a   :  { %171 = vmatpush3.bf16.msra.mxu0 %v186_v7 }
  0x1b   :  { %172 = vmatprep.subr.bf16.mxu0 %v192_v0 }
  0x1e   :  { %173 = vmatpush3.bf16.msra.mxu0 %v187_v8 }
  0x21   :  { %175 = vmatmul.mubr.bf16.vlgmr.msra.gmra.mrb[0].mxu0 %v15_v9 }
  0xf4   :  { %v121_v11 = vpop.f32.mrb[0].mxu0 }
  0xf5   :  { %v122_v12 = vadd.f32 %v140_v10, %v121_v11  ;;  %v176_v13 = vpop.f32.mrb[1].mxu0 }
  0xf6   :  { %v124_v14 = vpop.f32.mrb[2].mxu0 }
  0xf7   :  { %v127_v15 = vmax.f32 %v122_v12, -30.0  ;;  %v177_v16 = vpop.f32.mrb[3].mxu0 }
  0xf9   :  { %v128_v17 = vsub.f32 0.0, %v127_v15 }
  0xfb   :  { %v129_v18 = vmul.f32 1.442695, %v128_v17 }
  0xfd   :  { %188 = vpow2.f32 %v129_v18 }
 0x107   :  { %v189_v19 = vpop.eup %188 }
 0x108   :  { %v131_v20 = vadd.f32 1.0, %v189_v19 }
 0x10a   :  { %190 = vrcp.f32 %v131_v20 }
 0x114   :  { %v191_v21 = vpop.eup %190 }
 0x115   :  { %v133_v22 = vmul.f32 %v191_v21, %v122_v12 }
 0x117   :  { %v134_v23 = vpack.c.bf16 %v133_v22, %v133_v22 }
 0x119   :  { %135 = vst [vmem:[%s250_s3] sm:$0xf] %v134_v23 }

// kernel: _lambda_.87
= control target key start
LH: loop header
LB: loop body
LE: loop exit
PB: predicated region body
PF: predicated region fallthrough
CT: control target
= control target key end

     0   :  { %v618_v35 = vmov 0.0   ;;  %vm619_vm0 = vmmov 0   ;;  %vm330_vm1 = vcmask 523264   ;;  %s763_s1 = inlined_call_operand.vmem [shape: bf16[576,128], index: 1, kind: input, shape index: {}]   ;;  %s764_s0 = inlined_call_operand.vmem [shape: bf16[8,576], index: 0, kind: input, shape index: {}]   ;;  %s765_s2 = inlined_call_operand.vmem [shape: f32[1,128], index: 2, kind: input, shape index: {}]   ;;  %s766_s3 = inlined_call_operand.vmem [shape: bf16[8,128], index: 3, kind: output, shape index: {}]  }
   0x1   :  { %v573_v0 = vld [vmem:[%s763_s1 + $0x40] sm:$0xff]   ;;  %v577_v4 = vld [vmem:[%s763_s1 + $0x48] sm:$0xff]   ;;  %v581_v8 = vld [vmem:[%s763_s1 + $0x50] sm:$0xff]  }
   0x2   :  { %v574_v1 = vld [vmem:[%s763_s1] sm:$0xff]   ;;  %510 = vmatprep.subr.bf16.mxu0 %v573_v0  ;;  %v578_v5 = vld [vmem:[%s763_s1 + $0x8] sm:$0xff]   ;;  %v582_v9 = vld [vmem:[%s763_s1 + $0x10] sm:$0xff]  }
   0x3   :  { %v575_v2 = vld [vmem:[%s763_s1 + $0xc0] sm:$0xff]   ;;  %511 = vmatpush3.bf16.msra.mxu0 %v574_v1  ;;  %v579_v6 = vld [vmem:[%s763_s1 + $0xc8] sm:$0xff]   ;;  %v583_v10 = vld [vmem:[%s763_s1 + $0xd0] sm:$0xff]  }
   0x4   :  { %v576_v3 = vld [vmem:[%s763_s1 + $0x80] sm:$0xff]   ;;  %532 = vmatprep.subr.bf16.mxu1 %v575_v2  ;;  %512 = vmatprep.subr.bf16.mxu0 %v577_v4  ;;  %v580_v7 = vld [vmem:[%s763_s1 + $0x88] sm:$0xff]   ;;  %v584_v11 = vld [vmem:[%s763_s1 + $0x90] sm:$0xff]  }
   0x5   :  { %533 = vmatpush3.bf16.msra.mxu1 %v576_v3  ;;  %v585_v12 = vld [vmem:[%s763_s1 + $0x58] sm:$0xff]   ;;  %v589_v16 = vld [vmem:[%s763_s1 + $0x60] sm:$0xff]   ;;  %v593_v20 = vld [vmem:[%s763_s1 + $0x68] sm:$0xff]  }
   0x6   :  { %534 = vmatprep.subr.bf16.mxu1 %v579_v6  ;;  %v586_v13 = vld [vmem:[%s763_s1 + $0x18] sm:$0xff]   ;;  %v590_v17 = vld [vmem:[%s763_s1 + $0x20] sm:$0xff]   ;;  %v594_v21 = vld [vmem:[%s763_s1 + $0x28] sm:$0xff]  }
   0x7   :  { %513 = vmatpush3.bf16.msra.mxu0 %v578_v5  ;;  %v587_v14 = vld [vmem:[%s763_s1 + $0xd8] sm:$0xff]   ;;  %v591_v18 = vld [vmem:[%s763_s1 + $0xe0] sm:$0xff]   ;;  %v595_v22 = vld [vmem:[%s763_s1 + $0xe8] sm:$0xff]  }
   0x8   :  { %514 = vmatprep.subr.bf16.mxu0 %v581_v8  ;;  %v588_v15 = vld [vmem:[%s763_s1 + $0x98] sm:$0xff]   ;;  %v592_v19 = vld [vmem:[%s763_s1 + $0xa0] sm:$0xff]   ;;  %v596_v23 = vld [vmem:[%s763_s1 + $0xa8] sm:$0xff]  }
   0x9   :  { %535 = vmatpush3.bf16.msra.mxu1 %v580_v7  ;;  %v597_v24 = vld [vmem:[%s763_s1 + $0x70] sm:$0xff]   ;;  %v601_v28 = vld [vmem:[%s763_s1 + $0x78] sm:$0xff]   ;;  %v15_v31 = vld [vmem:[%s764_s0] sm:$0xff] }
   0xa   :  { %536 = vmatprep.subr.bf16.mxu1 %v583_v10  ;;  %v598_v25 = vld [vmem:[%s763_s1 + $0x30] sm:$0xff]   ;;  %v602_v29 = vld [vmem:[%s763_s1 + $0x38] sm:$0xff]   ;;  %v468_v32 = vcombine.low %v15_v31, %v15_v31  ;;  %v469_v33 = vcombine.high %v15_v31, %v15_v31  ;;  %v16_v36 = vld [vmem:[%s764_s0 + $0x8] sm:$0xff] }
   0xb   :  { %515 = vmatpush3.bf16.msra.mxu0 %v582_v9  ;;  %v599_v26 = vld [vmem:[%s763_s1 + $0xf0] sm:$0xff]   ;;  %v603_v30 = vld [vmem:[%s763_s1 + $0xf8] sm:$0xff]   ;;  %v470_v37 = vcombine.low %v16_v36, %v16_v36  ;;  %v471_v38 = vcombine.high %v16_v36, %v16_v36  ;;  %v610_v39 = vld [vmem:[%s763_s1 + $0x100] sm:$0xff]  }
   0xc   :  { %516 = vmatprep.subr.bf16.mxu0 %v585_v12  ;;  %v600_v27 = vld [vmem:[%s763_s1 + $0xb0] sm:$0xff]   ;;  %v607_v34 = vld [vmem:[%s763_s1 + $0xb8] sm:$0xff]   ;;  %366 = vmatprep.mubr.bf16.mxu0 %v469_v33  ;;  %v611_v40 = vld [vmem:[%s763_s1 + $0x108] sm:$0xff]  }
   0xd   :  { %537 = vmatpush3.bf16.msra.mxu1 %v584_v11  ;;  %406 = vmatprep.mubr.bf16.mxu1 %v471_v38  ;;  %v612_v41 = vld [vmem:[%s763_s1 + $0x110] sm:$0xff]   ;;  %v613_v42 = vld [vmem:[%s763_s1 + $0x118] sm:$0xff]   ;;  %v467_v45 = vld [vmem:[%s765_s2] ss:$0 sm:$0xff] }
   0xe   :  { %538 = vmatprep.subr.bf16.mxu1 %v587_v14  ;;  %v606_v43 = vld [vmem:[%s764_s0 + $0x10] ss:$0 sps:$4 sm:$0xff]  }
   0xf   :  { %517 = vmatpush3.bf16.msra.mxu0 %v586_v13 }
  0x10   :  { %518 = vmatprep.subr.bf16.mxu0 %v589_v16 }
  0x11   :  { %539 = vmatpush3.bf16.msra.mxu1 %v588_v15 }
  0x12   :  { %540 = vmatprep.subr.bf16.mxu1 %v591_v18 }
  0x13   :  { %519 = vmatpush3.bf16.msra.mxu0 %v590_v17 }
  0x14   :  { %520 = vmatprep.subr.bf16.mxu0 %v593_v20 }
  0x15   :  { %541 = vmatpush3.bf16.msra.mxu1 %v592_v19 }
  0x16   :  { %542 = vmatprep.subr.bf16.mxu1 %v595_v22 }
  0x17   :  { %521 = vmatpush3.bf16.msra.mxu0 %v594_v21 }
  0x18   :  { %522 = vmatprep.subr.bf16.mxu0 %v597_v24 }
  0x19   :  { %543 = vmatpush3.bf16.msra.mxu1 %v596_v23 }
  0x1a   :  { %544 = vmatprep.subr.bf16.mxu1 %v599_v26 }
  0x1b   :  { %523 = vmatpush3.bf16.msra.mxu0 %v598_v25 }
  0x1c   :  { %524 = vmatprep.subr.bf16.mxu0 %v601_v28 }
  0x1d   :  { %545 = vmatpush3.bf16.msra.mxu1 %v600_v27 }
  0x1e   :  { %546 = vmatprep.subr.bf16.mxu1 %v603_v30 }
  0x1f   :  { %525 = vmatpush3.bf16.msra.mxu0 %v602_v29 }
  0x20   :  { %559 = vmatprep.subr.bf16.mxu0 %v618_v35 }
  0x21   :  { %547 = vmatpush3.bf16.msra.mxu1 %v607_v34 }
  0x22   :  { %367 = vmatmul.mubr.bf16.vlgmr.msra.gmra.mrb[0].mxu0 %v468_v32 }
  0x23   :  { %560 = vmatpush3.bf16.msra.mxu0 %v610_v39  ;;  %567 = vmatprep.mubr.msk.bf16.mxu0 %vm619_vm0, %v618_v35 }
  0x24   :  { %407 = vmatmul.mubr.bf16.vlgmr.msra.gmra.mrb[0].mxu1 %v470_v37  ;;  %561 = vmatprep.subr.bf16.mxu0 %v618_v35 }
  0x27   :  { %562 = vmatpush3.bf16.msra.mxu0 %v611_v40 }
  0x28   :  { %563 = vmatprep.subr.bf16.mxu0 %v618_v35 }
  0x2b   :  { %564 = vmatpush3.bf16.msra.mxu0 %v612_v41 }
  0x2c   :  { %565 = vmatprep.subr.bf16.mxu0 %v618_v35 }
  0x2f   :  { %566 = vmatpush3.bf16.msra.mxu0 %v613_v42 }
  0x32   :  { %568 = vmatmul.mubr.msk.bf16.vlgmr.msra.gmra.mrb[4].mxu0 %vm330_vm1, %v606_v43 }
  0xf5   :  { %v526_v44 = vpop.f32.mrb[0].mxu0 }
  0xf6   :  { %v527_v46 = vpop.f32.mrb[1].mxu0 }
  0xf7   :  { %v528_v47 = vadd.f32 %v527_v46, %v526_v44  ;;  %v529_v48 = vpop.f32.mrb[2].mxu0  ;;  %v548_v49 = vpop.f32.mrb[0].mxu1 }
  0xf8   :  { %v530_v50 = vpop.f32.mrb[3].mxu0  ;;  %v549_v51 = vpop.f32.mrb[1].mxu1 }
  0xf9   :  { %v369_v52 = vadd.f32 %v528_v47, %v467_v45  ;;  %v550_v53 = vadd.f32 %v549_v51, %v548_v49  ;;  %v551_v54 = vpop.f32.mrb[2].mxu1 }
  0xfa   :  { %v552_v55 = vpop.f32.mrb[3].mxu1 }
  0xfb   :  { %v409_v56 = vadd.f32 %v550_v53, %v369_v52 }
 0x105   :  { %v448_v57 = vpop.f32.mrb[4].mxu0 }
 0x106   :  { %v449_v58 = vadd.f32 %v448_v57, %v409_v56  ;;  %v569_v59 = vpop.f32.mrb[5].mxu0 }
 0x107   :  { %v451_v60 = vpop.f32.mrb[6].mxu0 }
 0x108   :  { %v454_v61 = vmax.f32 %v449_v58, -30.0  ;;  %v570_v62 = vpop.f32.mrb[7].mxu0 }
 0x10a   :  { %v455_v63 = vsub.f32 0.0, %v454_v61 }
 0x10c   :  { %v456_v0 = vmul.f32 1.442695, %v455_v63 }
 0x10e   :  { %614 = vpow2.f32 %v456_v0 }
 0x118   :  { %v615_v1 = vpop.eup %614 }
 0x119   :  { %v458_v2 = vadd.f32 1.0, %v615_v1 }
 0x11b   :  { %616 = vrcp.f32 %v458_v2 }
 0x125   :  { %v617_v3 = vpop.eup %616 }
 0x126   :  { %v460_v4 = vmul.f32 %v617_v3, %v449_v58 }
 0x128   :  { %v461_v5 = vpack.c.bf16 %v460_v4, %v460_v4 }
 0x12a   :  { %462 = vst [vmem:[%s766_s3] sm:$0xf] %v461_v5 }

// kernel: _lambda_.90
= control target key start
LH: loop header
LB: loop body
LE: loop exit
PB: predicated region body
PF: predicated region fallthrough
CT: control target
= control target key end

     0   :  { %v663_v0 = vmov 0.0   ;;  %vm664_vm0 = vmmov 0   ;;  %s869_s3 = inlined_call_operand.vmem [shape: bf16[128,128], index: 3, kind: input, shape index: {}]   ;;  %s870_s1 = inlined_call_operand.vmem [shape: bf16[128,128], index: 1, kind: input, shape index: {}]   ;;  %s871_s5 = inlined_call_operand.vmem [shape: bf16[128,128], index: 5, kind: input, shape index: {}]   ;;  %s872_s7 = inlined_call_operand.vmem [shape: bf16[128,128], index: 7, kind: input, shape index: {}]   ;;  %s873_s2 = inlined_call_operand.vmem [shape: bf16[8,128], index: 2, kind: input, shape index: {}]   ;;  %s874_s0 = inlined_call_operand.vmem [shape: bf16[8,128], index: 0, kind: input, shape index: {}]   ;;  %s875_s4 = inlined_call_operand.vmem [shape: bf16[8,128], index: 4, kind: input, shape index: {}]   ;;  %s876_s6 = inlined_call_operand.vmem [shape: bf16[8,128], index: 6, kind: input, shape index: {}]   ;;  %s877_s8 = inlined_call_operand.vmem [shape: f32[1,128], index: 8, kind: input, shape index: {}]   ;;  %s878_s9 = inlined_call_operand.vmem [shape: bf16[8,128], index: 9, kind: output, shape index: {}]  }
   0x1   :  { %545 = vmatprep.subr.bf16.mxu0 %v663_v0  ;;  %565 = vmatprep.subr.bf16.mxu1 %v663_v0  ;;  %v627_v1 = vld [vmem:[%s869_s3] sm:$0xff]   ;;  %v629_v3 = vld [vmem:[%s869_s3 + $0x8] sm:$0xff]   ;;  %v631_v5 = vld [vmem:[%s869_s3 + $0x10] sm:$0xff]  }
   0x2   :  { %v628_v2 = vld [vmem:[%s870_s1] sm:$0xff]   ;;  %561 = vmatprep.mubr.msk.bf16.mxu0 %vm664_vm0, %v663_v0  ;;  %581 = vmatprep.mubr.msk.bf16.mxu1 %vm664_vm0, %v663_v0  ;;  %v630_v4 = vld [vmem:[%s870_s1 + $0x8] sm:$0xff]   ;;  %v632_v6 = vld [vmem:[%s870_s1 + $0x10] sm:$0xff]  }
   0x3   :  { %546 = vmatpush3.bf16.msra.mxu0 %v627_v1  ;;  %566 = vmatpush3.bf16.msra.mxu1 %v628_v2  ;;  %v633_v7 = vld [vmem:[%s869_s3 + $0x18] sm:$0xff]   ;;  %v635_v9 = vld [vmem:[%s869_s3 + $0x20] sm:$0xff]   ;;  %v637_v11 = vld [vmem:[%s869_s3 + $0x28] sm:$0xff]  }
   0x4   :  { %547 = vmatprep.subr.bf16.mxu0 %v663_v0  ;;  %567 = vmatprep.subr.bf16.mxu1 %v663_v0  ;;  %v634_v8 = vld [vmem:[%s870_s1 + $0x18] sm:$0xff]   ;;  %v636_v10 = vld [vmem:[%s870_s1 + $0x20] sm:$0xff]   ;;  %v638_v12 = vld [vmem:[%s870_s1 + $0x28] sm:$0xff]  }
   0x5   :  { %v639_v13 = vld [vmem:[%s869_s3 + $0x30] sm:$0xff]   ;;  %v641_v15 = vld [vmem:[%s869_s3 + $0x38] sm:$0xff]   ;;  %v50_v17 = vld [vmem:[%s873_s2] sm:$0xf] }
   0x6   :  { %v640_v14 = vld [vmem:[%s870_s1 + $0x30] sm:$0xff]   ;;  %v642_v16 = vld [vmem:[%s870_s1 + $0x38] sm:$0xff]   ;;  %v33_v18 = vld [vmem:[%s874_s0] sm:$0xf] }
   0x7   :  { %548 = vmatpush3.bf16.msra.mxu0 %v629_v3  ;;  %568 = vmatpush3.bf16.msra.mxu1 %v630_v4  ;;  %v643_v19 = vld [vmem:[%s871_s5] sm:$0xff]   ;;  %v645_v21 = vld [vmem:[%s871_s5 + $0x8] sm:$0xff]   ;;  %v647_v23 = vld [vmem:[%s871_s5 + $0x10] sm:$0xff]  }
   0x8   :  { %549 = vmatprep.subr.bf16.mxu0 %v663_v0  ;;  %569 = vmatprep.subr.bf16.mxu1 %v663_v0  ;;  %v644_v20 = vld [vmem:[%s872_s7] sm:$0xff]   ;;  %v646_v22 = vld [vmem:[%s872_s7 + $0x8] sm:$0xff]   ;;  %v648_v24 = vld [vmem:[%s872_s7 + $0x10] sm:$0xff]  }
   0x9   :  { %v649_v25 = vld [vmem:[%s871_s5 + $0x18] sm:$0xff]   ;;  %v651_v27 = vld [vmem:[%s871_s5 + $0x20] sm:$0xff]   ;;  %v653_v29 = vld [vmem:[%s871_s5 + $0x28] sm:$0xff]  }
   0xa   :  { %v650_v26 = vld [vmem:[%s872_s7 + $0x18] sm:$0xff]   ;;  %v652_v28 = vld [vmem:[%s872_s7 + $0x20] sm:$0xff]   ;;  %v654_v30 = vld [vmem:[%s872_s7 + $0x28] sm:$0xff]  }
   0xb   :  { %550 = vmatpush3.bf16.msra.mxu0 %v631_v5  ;;  %570 = vmatpush3.bf16.msra.mxu1 %v632_v6  ;;  %v655_v31 = vld [vmem:[%s871_s5 + $0x30] sm:$0xff]   ;;  %v657_v33 = vld [vmem:[%s871_s5 + $0x38] sm:$0xff]   ;;  %v243_v35 = vld [vmem:[%s875_s4] sm:$0xf] }
   0xc   :  { %551 = vmatprep.subr.bf16.mxu0 %v663_v0  ;;  %571 = vmatprep.subr.bf16.mxu1 %v663_v0  ;;  %v656_v32 = vld [vmem:[%s872_s7 + $0x30] sm:$0xff]   ;;  %v658_v34 = vld [vmem:[%s872_s7 + $0x38] sm:$0xff]   ;;  %v349_v36 = vld [vmem:[%s876_s6] sm:$0xf] }
   0xd   :  { %v508_v50 = vld [vmem:[%s877_s8] ss:$0 sm:$0xff] }
   0xf   :  { %552 = vmatpush3.bf16.msra.mxu0 %v633_v7  ;;  %572 = vmatpush3.bf16.msra.mxu1 %v634_v8 }
  0x10   :  { %553 = vmatprep.subr.bf16.mxu0 %v663_v0  ;;  %573 = vmatprep.subr.bf16.mxu1 %v663_v0 }
  0x13   :  { %554 = vmatpush3.bf16.msra.mxu0 %v635_v9  ;;  %574 = vmatpush3.bf16.msra.mxu1 %v636_v10 }
  0x14   :  { %555 = vmatprep.subr.bf16.mxu0 %v663_v0  ;;  %575 = vmatprep.subr.bf16.mxu1 %v663_v0 }
  0x17   :  { %556 = vmatpush3.bf16.msra.mxu0 %v637_v11  ;;  %576 = vmatpush3.bf16.msra.mxu1 %v638_v12 }
  0x18   :  { %557 = vmatprep.subr.bf16.mxu0 %v663_v0  ;;  %577 = vmatprep.subr.bf16.mxu1 %v663_v0 }
  0x1b   :  { %558 = vmatpush3.bf16.msra.mxu0 %v639_v13  ;;  %578 = vmatpush3.bf16.msra.mxu1 %v640_v14 }
  0x1c   :  { %559 = vmatprep.subr.bf16.mxu0 %v663_v0  ;;  %579 = vmatprep.subr.bf16.mxu1 %v663_v0 }
  0x1f   :  { %560 = vmatpush3.bf16.msra.mxu0 %v641_v15  ;;  %580 = vmatpush3.bf16.msra.mxu1 %v642_v16 }
  0x20   :  { %585 = vmatprep.subr.bf16.mxu0 %v663_v0  ;;  %605 = vmatprep.subr.bf16.mxu1 %v663_v0 }
  0x22   :  { %562 = vmatmul.mubr.bf16.vlgmr.msra.gmra.mrb[0].mxu0 %v50_v17  ;;  %582 = vmatmul.mubr.bf16.vlgmr.msra.gmra.mrb[0].mxu1 %v33_v18 }
  0x23   :  { %586 = vmatpush3.bf16.msra.mxu0 %v643_v19  ;;  %606 = vmatpush3.bf16.msra.mxu1 %v644_v20 }
  0x24   :  { %587 = vmatprep.subr.bf16.mxu0 %v663_v0  ;;  %607 = vmatprep.subr.bf16.mxu1 %v663_v0 }
  0x25   :  { %601 = vmatprep.mubr.msk.bf16.mxu0 %vm664_vm0, %v663_v0  ;;  %621 = vmatprep.mubr.msk.bf16.mxu1 %vm664_vm0, %v663_v0 }
  0x27   :  { %588 = vmatpush3.bf16.msra.mxu0 %v645_v21  ;;  %608 = vmatpush3.bf16.msra.mxu1 %v646_v22 }
  0x28   :  { %589 = vmatprep.subr.bf16.mxu0 %v663_v0  ;;  %609 = vmatprep.subr.bf16.mxu1 %v663_v0 }
  0x2b   :  { %590 = vmatpush3.bf16.msra.mxu0 %v647_v23  ;;  %610 = vmatpush3.bf16.msra.mxu1 %v648_v24 }
  0x2c   :  { %591 = vmatprep.subr.bf16.mxu0 %v663_v0  ;;  %611 = vmatprep.subr.bf16.mxu1 %v663_v0 }
  0x2f   :  { %592 = vmatpush3.bf16.msra.mxu0 %v649_v25  ;;  %612 = vmatpush3.bf16.msra.mxu1 %v650_v26 }
  0x30   :  { %593 = vmatprep.subr.bf16.mxu0 %v663_v0  ;;  %613 = vmatprep.subr.bf16.mxu1 %v663_v0 }
  0x33   :  { %594 = vmatpush3.bf16.msra.mxu0 %v651_v27  ;;  %614 = vmatpush3.bf16.msra.mxu1 %v652_v28 }
  0x34   :  { %595 = vmatprep.subr.bf16.mxu0 %v663_v0  ;;  %615 = vmatprep.subr.bf16.mxu1 %v663_v0 }
  0x37   :  { %596 = vmatpush3.bf16.msra.mxu0 %v653_v29  ;;  %616 = vmatpush3.bf16.msra.mxu1 %v654_v30 }
  0x38   :  { %597 = vmatprep.subr.bf16.mxu0 %v663_v0  ;;  %617 = vmatprep.subr.bf16.mxu1 %v663_v0 }
  0x3b   :  { %598 = vmatpush3.bf16.msra.mxu0 %v655_v31  ;;  %618 = vmatpush3.bf16.msra.mxu1 %v656_v32 }
  0x3c   :  { %599 = vmatprep.subr.bf16.mxu0 %v663_v0  ;;  %619 = vmatprep.subr.bf16.mxu1 %v663_v0 }
  0x3f   :  { %600 = vmatpush3.bf16.msra.mxu0 %v657_v33  ;;  %620 = vmatpush3.bf16.msra.mxu1 %v658_v34 }
  0x42   :  { %602 = vmatmul.mubr.bf16.vlgmr.msra.gmra.mrb[4].mxu0 %v243_v35  ;;  %622 = vmatmul.mubr.bf16.vlgmr.msra.gmra.mrb[4].mxu1 %v349_v36 }
  0xf5   :  { %v149_v37 = vpop.f32.mrb[0].mxu0  ;;  %v237_v38 = vpop.f32.mrb[0].mxu1 }
  0xf6   :  { %v563_v39 = vpop.f32.mrb[1].mxu0  ;;  %v238_v40 = vadd.f32 %v237_v38, %v149_v37  ;;  %v583_v41 = vpop.f32.mrb[1].mxu1 }
  0xf7   :  { %v152_v42 = vpop.f32.mrb[2].mxu0  ;;  %v240_v43 = vpop.f32.mrb[2].mxu1 }
  0xf8   :  { %v564_v44 = vpop.f32.mrb[3].mxu0  ;;  %v584_v45 = vpop.f32.mrb[3].mxu1 }
 0x115   :  { %v342_v46 = vpop.f32.mrb[4].mxu0  ;;  %v448_v48 = vpop.f32.mrb[4].mxu1 }
 0x116   :  { %v348_v47 = vadd.f32 %v342_v46, %v238_v40  ;;  %v603_v49 = vpop.f32.mrb[5].mxu0  ;;  %v623_v51 = vpop.f32.mrb[5].mxu1 }
 0x117   :  { %v345_v52 = vpop.f32.mrb[6].mxu0  ;;  %v451_v54 = vpop.f32.mrb[6].mxu1 }
 0x118   :  { %v454_v53 = vadd.f32 %v448_v48, %v348_v47  ;;  %v604_v55 = vpop.f32.mrb[7].mxu0  ;;  %v624_v56 = vpop.f32.mrb[7].mxu1 }
 0x11a   :  { %v462_v57 = vadd.f32 %v508_v50, %v454_v53 }
 0x11c   :  { %v463_v58 = vmax.f32 %v462_v57, -30.0 }
 0x11e   :  { %v464_v59 = vsub.f32 0.0, %v463_v58 }
 0x120   :  { %v465_v60 = vmul.f32 1.442695, %v464_v59 }
 0x122   :  { %659 = vpow2.f32 %v465_v60 }
 0x12c   :  { %v660_v61 = vpop.eup %659 }
 0x12d   :  { %v467_v62 = vadd.f32 1.0, %v660_v61 }
 0x12f   :  { %661 = vrcp.f32 %v467_v62 }
 0x139   :  { %v662_v63 = vpop.eup %661 }
 0x13a   :  { %v469_v0 = vmul.f32 %v662_v63, %v462_v57 }
 0x13c   :  { %v470_v1 = vpack.c.bf16 %v469_v0, %v469_v0 }
 0x13e   :  { %471 = vst [vmem:[%s878_s9] sm:$0xf] %v470_v1 }

// kernel: _lambda_.89
= control target key start
LH: loop header
LB: loop body
LE: loop exit
PB: predicated region body
PF: predicated region fallthrough
CT: control target
= control target key end

     0   :  { %s1067_s12 = smov 0   ;;  %s1646_s0 = inlined_call_operand.vmem [shape: bf16[2,14,14,128], index: 0, kind: input, shape index: {}]   ;;  %s1647_s1 = inlined_call_operand.vmem [shape: bf16[2,2,2,128], index: 1, kind: output, shape index: {0}]   ;;  %s1648_s2 = inlined_call_operand.vmem [shape: bf16[2,2,2,128], index: 2, kind: output, shape index: {1}]   ;;  %s1649_s3 = inlined_call_operand.vmem [shape: bf16[2,2,2,128], index: 3, kind: output, shape index: {2}]  }
   0x1 LB: > { %s1015_s13 = sadd.s32 4294967295, %s1044_s12   ;;  %p1019_p0 = scmp.ge.s32.totalorder %s1044_s12, 1  ;;  %s1044_s12 = sphi %s1067_s12, %s14_s12  }
   0x2   : > { %p142_p1 = scmp.lt.s32.totalorder %s1044_s12, 3 }
   0x4   : > { %p143_p2 = pnand %p1019_p0, %p142_p1 }
   0x6   : > { %146 = sbr.rel (%p143_p2) target bundleno = 149 (0x95), region = 24 }
   0xd   : > { %p173_p3 = scmp.lt.s32.totalorder %s1015_s13, 1  ;;  %v827_v0 = vlaneseq  ;;  %v1046_v1 = vmov 1966171168   ;;  %vm346_vm0 = vcmask 1046528   ;;  %vm417_vm1 = vcmask 1045504  }
   0xe   : > { %v825_v2 = vunpack.c.l.s4 %v1046_v1  ;;  %vm488_vm2 = vcmask 1044480   ;;  %vm559_vm3 = vcmask 1043456  }
   0xf   : > { %s1695_s13 = smov (!%p173_p3, %s1015_s13), 1  ;;  %v828_v3 = vshrl.u32 %v827_v0, 7 }
  0x10   : > { %s1028_s14 = smul.u32 112, %s1695_s13  ;;  %v826_v4 = vunpack.c.0.s8 %v825_v2  ;;  %s1623_s18 = sshll.u32 %s1695_s13, 1 }
  0x11   : > { %s181_s21 = scalar_lea.vmem %s1647_s1, %s1623_s18  ;;  %s185_s24 = scalar_lea.vmem %s1648_s2, %s1623_s18 }
  0x12   : > { %s1081_s17 = scalar_lea.vmem %s1646_s0, %s1028_s14  ;;  %v1086_v8 = vsub.s32 %v826_v4, %v828_v3  ;;  %s189_s27 = scalar_lea.vmem %s1649_s3, %s1623_s18 }
  0x13   : > { %v190_v5 = vld [vmem:[%s1081_s17] ss:$8 sps:$4 sm:$0xff]   ;;  %v191_v6 = vld [vmem:[%s1081_s17 + $0x4] sm:$0x7]  ;;  %v193_v7 = vld [vmem:[%s1081_s17 + $0xc] sm:$0x7] }
  0x14   : > { %1669 = vst [vmem:[#allocation2_spill] sm:$0xff] %v1086_v8  ;;  %v194_v9 = vld [vmem:[%s1081_s17 + $0x10] ss:$8 sps:$4 sm:$0xff]   ;;  %v195_v10 = vld [vmem:[%s1081_s17 + $0x14] sm:$0x7]  ;;  %v218_v12 = vunpack.c.l.bf16 %v190_v5  ;;  %v219_v13 = vunpack.c.l.bf16 %v191_v6  ;;  %v220_v14 = vunpack.c.h.bf16 %v190_v5  ;;  %v221_v15 = vunpack.c.l.bf16 %v193_v7 }
  0x15   : > { %v197_v11 = vld [vmem:[%s1081_s17 + $0x1c] sm:$0x7]  ;;  %v198_v16 = vld [vmem:[%s1081_s17 + $0x20] ss:$8 sps:$4 sm:$0xff]   ;;  %v199_v17 = vld [vmem:[%s1081_s17 + $0x24] sm:$0x7]  ;;  %v1094_v19 = vunpack.c.l.bf16 %v194_v9  ;;  %v1096_v20 = vunpack.c.l.bf16 %v195_v10  ;;  %v1098_v21 = vunpack.c.h.bf16 %v194_v9 }
  0x16   : > { %v201_v18 = vld [vmem:[%s1081_s17 + $0x2c] sm:$0x7]  ;;  %v1100_v22 = vunpack.c.l.bf16 %v197_v11  ;;  %v202_v23 = vld [vmem:[%s1081_s17 + $0x30] ss:$8 sps:$4 sm:$0xff]   ;;  %v203_v24 = vld [vmem:[%s1081_s17 + $0x34] sm:$0x7]  ;;  %v1105_v26 = vunpack.c.l.bf16 %v198_v16  ;;  %v1107_v27 = vunpack.c.l.bf16 %v199_v17  ;;  %v1109_v28 = vunpack.c.h.bf16 %v198_v16 }
  0x17   : > { %v205_v25 = vld [vmem:[%s1081_s17 + $0x3c] sm:$0x7]  ;;  %v1111_v29 = vunpack.c.l.bf16 %v201_v18  ;;  %v206_v30 = vld [vmem:[%s1081_s17 + $0x40] ss:$8 sps:$4 sm:$0xff]   ;;  %v207_v31 = vld [vmem:[%s1081_s17 + $0x44] sm:$0x7]  ;;  %v1116_v33 = vunpack.c.l.bf16 %v202_v23  ;;  %v1118_v34 = vunpack.c.l.bf16 %v203_v24  ;;  %v1120_v35 = vunpack.c.h.bf16 %v202_v23 }
  0x18   : > { %v209_v32 = vld [vmem:[%s1081_s17 + $0x4c] sm:$0x7]  ;;  %v1122_v36 = vunpack.c.l.bf16 %v205_v25  ;;  %v210_v37 = vld [vmem:[%s1081_s17 + $0x50] ss:$8 sps:$4 sm:$0xff]   ;;  %v211_v38 = vld [vmem:[%s1081_s17 + $0x54] sm:$0x7]  ;;  %v1127_v40 = vunpack.c.l.bf16 %v206_v30  ;;  %v1129_v41 = vunpack.c.l.bf16 %v207_v31  ;;  %v1131_v42 = vunpack.c.h.bf16 %v206_v30 }
  0x19   : > { %v213_v39 = vld [vmem:[%s1081_s17 + $0x5c] sm:$0x7]  ;;  %v1133_v43 = vunpack.c.l.bf16 %v209_v32  ;;  %v1136_v44 = vld [vmem:[%s1081_s17 + $0x60] ss:$8 sps:$4 sm:$0xff]   ;;  %v1139_v45 = vld [vmem:[%s1081_s17 + $0x64] sm:$0x7]  ;;  %v1144_v47 = vunpack.c.l.bf16 %v210_v37  ;;  %v1146_v48 = vunpack.c.l.bf16 %v211_v38  ;;  %v1148_v49 = vunpack.c.h.bf16 %v210_v37 }
  0x1a   : > { %v1142_v46 = vld [vmem:[%s1081_s17 + $0x6c] sm:$0x7]  ;;  %v1150_v50 = vunpack.c.l.bf16 %v213_v39  ;;  %v242_v51 = vunpack.c.l.bf16 %v1136_v44  ;;  %v243_v52 = vunpack.c.l.bf16 %v1139_v45  ;;  %v244_v53 = vunpack.c.h.bf16 %v1136_v44 }
  0x1b   : > { %v245_v54 = vunpack.c.l.bf16 %v1142_v46  ;;  %v246_v55 = vmax.f32 %v218_v12, %v220_v14  ;;  %v247_v56 = vmax.f32 %v219_v13, %v221_v15  ;;  %v248_v57 = vmax.f32 %v220_v14, %v1094_v19 }
  0x1c   : > { %v249_v58 = vmax.f32 %v221_v15, %v1096_v20  ;;  %v250_v59 = vmax.f32 %v1094_v19, %v1098_v21  ;;  %v251_v60 = vmax.f32 %v1096_v20, %v1100_v22  ;;  %v252_v61 = vmax.f32 %v1098_v21, %v1105_v26 }
  0x1d   : > { %v253_v62 = vmax.f32 %v1100_v22, %v1107_v27  ;;  %v254_v63 = vmax.f32 %v1105_v26, %v1109_v28  ;;  %v255_v0 = vmax.f32 %v1107_v27, %v1111_v29  ;;  %v256_v1 = vmax.f32 %v1109_v28, %v1116_v33 }
  0x1e   : > { %v257_v2 = vmax.f32 %v1111_v29, %v1118_v34  ;;  %v258_v3 = vmax.f32 %v1116_v33, %v1120_v35  ;;  %v259_v4 = vmax.f32 %v1118_v34, %v1122_v36  ;;  %v260_v5 = vmax.f32 %v1120_v35, %v1127_v40 }
  0x1f   : > { %v261_v6 = vmax.f32 %v1122_v36, %v1129_v41  ;;  %v262_v7 = vmax.f32 %v1127_v40, %v1131_v42  ;;  %v263_v9 = vmax.f32 %v1129_v41, %v1133_v43  ;;  %v264_v10 = vmax.f32 %v1131_v42, %v1144_v47 }
  0x20   : > { %v265_v11 = vmax.f32 %v1133_v43, %v1146_v48  ;;  %v266_v12 = vmax.f32 %v246_v55, %v1094_v19  ;;  %v267_v13 = vmax.f32 %v247_v56, %v1096_v20  ;;  %v268_v14 = vmax.f32 %v248_v57, %v1098_v21 }
  0x21   : > { %v269_v15 = vmax.f32 %v249_v58, %v1100_v22  ;;  %v270_v16 = vmax.f32 %v250_v59, %v1105_v26  ;;  %v271_v17 = vmax.f32 %v251_v60, %v1107_v27  ;;  %v272_v18 = vmax.f32 %v252_v61, %v1109_v28 }
  0x22   : > { %v273_v23 = vmax.f32 %v253_v62, %v1111_v29  ;;  %v274_v24 = vmax.f32 %v254_v63, %v1116_v33  ;;  %v275_v25 = vmax.f32 %v255_v0, %v1118_v34  ;;  %v276_v19 = vmax.f32 %v256_v1, %v1120_v35 }
  0x23   : > { %v277_v20 = vmax.f32 %v257_v2, %v1122_v36  ;;  %v278_v30 = vmax.f32 %v258_v3, %v1127_v40  ;;  %v279_v31 = vmax.f32 %v259_v4, %v1129_v41  ;;  %v280_v32 = vmax.f32 %v260_v5, %v1131_v42 }
  0x24   : > { %v281_v37 = vmax.f32 %v261_v6, %v1133_v43  ;;  %v282_v38 = vmax.f32 %v262_v7, %v1144_v47  ;;  %v283_v39 = vmax.f32 %v263_v9, %v1146_v48  ;;  %v284_v55 = vmax.f32 %v264_v10, %v1148_v49 }
  0x25   : > { %v285_v56 = vmax.f32 %v265_v11, %v1150_v50  ;;  %v286_v57 = vmax.f32 %v266_v12, %v1098_v21  ;;  %v287_v58 = vmax.f32 %v267_v13, %v1100_v22  ;;  %v288_v59 = vmax.f32 %v268_v14, %v1105_v26 }
  0x26   : > { %v289_v60 = vmax.f32 %v269_v15, %v1107_v27  ;;  %v290_v61 = vmax.f32 %v270_v16, %v1109_v28  ;;  %v291_v62 = vmax.f32 %v271_v17, %v1111_v29  ;;  %v292_v63 = vmax.f32 %v272_v18, %v1116_v33 }
  0x27   : > { %v293_v0 = vmax.f32 %v273_v23, %v1118_v34  ;;  %v294_v1 = vmax.f32 %v274_v24, %v1120_v35  ;;  %v295_v2 = vmax.f32 %v275_v25, %v1122_v36  ;;  %v296_v21 = vmax.f32 %v276_v19, %v1127_v40 }
  0x28   : > { %v297_v22 = vmax.f32 %v277_v20, %v1129_v41  ;;  %v298_v3 = vmax.f32 %v278_v30, %v1131_v42  ;;  %v299_v4 = vmax.f32 %v279_v31, %v1133_v43  ;;  %v300_v5 = vmax.f32 %v280_v32, %v1144_v47 }
  0x29   : > { %v301_v6 = vmax.f32 %v281_v37, %v1146_v48  ;;  %v302_v7 = vmax.f32 %v282_v38, %v1148_v49  ;;  %v303_v9 = vmax.f32 %v283_v39, %v1150_v50  ;;  %v304_v10 = vmax.f32 %v284_v55, %v242_v51 }
  0x2a   : > { %v305_v11 = vmax.f32 %v285_v56, %v243_v52  ;;  %v1233_v12 = vmax.f32 %v286_v57, %v1105_v26  ;;  %v1236_v13 = vmax.f32 %v287_v58, %v1107_v27  ;;  %v1239_v14 = vmax.f32 %v288_v59, %v1109_v28 }
  0x2b   : > { %v1242_v15 = vmax.f32 %v289_v60, %v1111_v29  ;;  %v1245_v16 = vmax.f32 %v290_v61, %v1116_v33  ;;  %v1248_v17 = vmax.f32 %v291_v62, %v1118_v34  ;;  %v1251_v18 = vmax.f32 %v292_v63, %v1120_v35 }
  0x2c   : > { %v1254_v26 = vmax.f32 %v293_v0, %v1122_v36  ;;  %v1257_v27 = vmax.f32 %v294_v1, %v1127_v40  ;;  %v1260_v28 = vmax.f32 %v295_v2, %v1129_v41  ;;  %v1263_v29 = vmax.f32 %v296_v21, %v1131_v42 }
  0x2d   : > { %v1266_v33 = vmax.f32 %v297_v22, %v1133_v43  ;;  %v1269_v34 = vmax.f32 %v298_v3, %v1144_v47  ;;  %v1272_v35 = vmax.f32 %v299_v4, %v1146_v48  ;;  %v1275_v36 = vmax.f32 %v300_v5, %v1148_v49 }
  0x2e   : > { %v1278_v40 = vmax.f32 %v301_v6, %v1150_v50  ;;  %v1282_v41 = vmax.f32 %v302_v7, %v242_v51  ;;  %v1286_v42 = vmax.f32 %v303_v9, %v243_v52  ;;  %v1290_v43 = vmax.f32 %v304_v10, %v244_v53 }
  0x2f   : > { %1670 = vst [vmem:[#allocation3_spill] sm:$0xff] %v1266_v33  ;;  %1671 = vst [vmem:[#allocation4_spill] sm:$0xff] %v1269_v34  ;;  %v1294_v47 = vmax.f32 %v305_v11, %v245_v54  ;;  %v347_v48 = vrot.slane %v1233_v12, 1  ;;  %v348_v49 = vrot.slane %v1236_v13, 1  ;;  %v350_v50 = vrot.slane %v1239_v14, 1 }
  0x30   : > { %1672 = vst [vmem:[#allocation5_spill] sm:$0xff] %v1272_v35  ;;  %1673 = vst [vmem:[#allocation6_spill] sm:$0xff] %v1275_v36  ;;  %v351_v51 = vrot.slane %v1242_v15, 1  ;;  %v353_v45 = vrot.slane %v1245_v16, 1  ;;  %v354_v52 = vrot.slane %v1248_v17, 1  ;;  %v356_v44 = vrot.slane %v1251_v18, 1 }
  0x31   : > { %1674 = vst [vmem:[#allocation7_spill] sm:$0xff] %v1278_v40  ;;  %1675 = vst [vmem:[#allocation8_spill] sm:$0xff] %v1282_v41  ;;  %v357_v53 = vrot.slane %v1254_v26, 1  ;;  %v1305_v46 = vsel %vm346_vm0, %v347_v48, %v348_v49  ;;  %v359_v23 = vrot.slane %v1257_v27, 1  ;;  %v360_v24 = vrot.slane %v1260_v28, 1 }
  0x32   : > { %1676 = vst [vmem:[#allocation9_spill] sm:$0xff] %v1286_v42  ;;  %1677 = vst [vmem:[#allocation10_spill] sm:$0xff] %v1290_v43  ;;  %v1308_v54 = vsel %vm346_vm0, %v350_v50, %v351_v51  ;;  %v1313_v25 = vsel %vm346_vm0, %v353_v45, %v354_v52  ;;  %v362_v20 = vrot.slane %v1263_v29, 1  ;;  %v363_v30 = vrot.slane %v1266_v33, 1 }
  0x33   : > { %1678 = vst [vmem:[#allocation11_spill] sm:$0xff] %v1294_v47  ;;  %v1316_v19 = vsel %vm346_vm0, %v356_v44, %v357_v53  ;;  %v1321_v31 = vsel %vm346_vm0, %v359_v23, %v360_v24  ;;  %v365_v32 = vrot.slane %v1269_v34, 1  ;;  %v366_v37 = vrot.slane %v1272_v35, 1 }
  0x34   : > { %v368_v38 = vrot.slane %v1275_v36, 1  ;;  %v1327_v39 = vsel %vm346_vm0, %v362_v20, %v363_v30  ;;  %v369_v55 = vrot.slane %v1278_v40, 1  ;;  %v371_v56 = vrot.slane %v1282_v41, 1 }
  0x35   : > { %v372_v57 = vrot.slane %v1286_v42, 1  ;;  %v1333_v58 = vsel %vm346_vm0, %v365_v32, %v366_v37  ;;  %v374_v59 = vrot.slane %v1290_v43, 1  ;;  %v375_v60 = vrot.slane %v1294_v47, 1 }
  0x36   : > { %v397_v61 = vmax.f32 %v1233_v12, %v1305_v46  ;;  %v1340_v62 = vsel %vm346_vm0, %v368_v38, %v369_v55  ;;  %v398_v0 = vmax.f32 %v1236_v13, %v348_v49  ;;  %v399_v1 = vmax.f32 %v1239_v14, %v1308_v54 }
  0x37   : > { %v1343_v63 = vsel %vm346_vm0, %v371_v56, %v372_v57  ;;  %v1349_v2 = vsel %vm346_vm0, %v374_v59, %v375_v60  ;;  %v400_v21 = vmax.f32 %v1242_v15, %v351_v51  ;;  %v401_v22 = vmax.f32 %v1245_v16, %v1313_v25 }
  0x38   : > { %v402_v3 = vmax.f32 %v1248_v17, %v354_v52  ;;  %v403_v4 = vmax.f32 %v1251_v18, %v1316_v19  ;;  %v404_v5 = vmax.f32 %v1254_v26, %v357_v53  ;;  %v405_v6 = vmax.f32 %v1257_v27, %v1321_v31 }
  0x39   : > { %v406_v7 = vmax.f32 %v1260_v28, %v360_v24  ;;  %v407_v9 = vmax.f32 %v1263_v29, %v1327_v39  ;;  %v408_v10 = vmax.f32 %v1266_v33, %v363_v30  ;;  %v409_v11 = vmax.f32 %v1269_v34, %v1333_v58 }
  0x3a   : > { %v410_v48 = vmax.f32 %v1272_v35, %v366_v37  ;;  %v411_v49 = vmax.f32 %v1275_v36, %v1340_v62  ;;  %v412_v50 = vmax.f32 %v1278_v40, %v369_v55  ;;  %v413_v51 = vmax.f32 %v1282_v41, %v1343_v63 }
  0x3b   : > { %v414_v45 = vmax.f32 %v1286_v42, %v372_v57  ;;  %v415_v52 = vmax.f32 %v1290_v43, %v1349_v2  ;;  %v416_v44 = vmax.f32 %v1294_v47, %v375_v60  ;;  %v418_v53 = vrot.slane %v1233_v12, 2 }
  0x3c   : > { %v419_v46 = vrot.slane %v1236_v13, 2  ;;  %v421_v54 = vrot.slane %v1239_v14, 2  ;;  %v422_v23 = vrot.slane %v1242_v15, 2  ;;  %v424_v24 = vrot.slane %v1245_v16, 2 }
  0x3d   : > { %v425_v25 = vrot.slane %v1248_v17, 2  ;;  %v427_v20 = vrot.slane %v1251_v18, 2  ;;  %v428_v30 = vrot.slane %v1254_v26, 2  ;;  %v430_v31 = vrot.slane %v1257_v27, 2 }
  0x3e   : > { %v420_v19 = vsel %vm417_vm1, %v418_v53, %v419_v46  ;;  %v423_v32 = vsel %vm417_vm1, %v421_v54, %v422_v23  ;;  %v431_v38 = vrot.slane %v1260_v28, 2  ;;  %v433_v39 = vrot.slane %v1263_v29, 2 }
  0x3f   : > { %v426_v37 = vsel %vm417_vm1, %v424_v24, %v425_v25  ;;  %v429_v55 = vsel %vm417_vm1, %v427_v20, %v428_v30  ;;  %v434_v56 = vrot.slane %v1266_v33, 2  ;;  %v436_v57 = vrot.slane %v1269_v34, 2 }
  0x40   : > { %v437_v58 = vrot.slane %v1272_v35, 2  ;;  %v432_v59 = vsel %vm417_vm1, %v430_v31, %v431_v38  ;;  %v439_v60 = vrot.slane %v1275_v36, 2  ;;  %v440_v62 = vrot.slane %v1278_v40, 2 }
  0x41   : > { %v442_v63 = vrot.slane %v1282_v41, 2  ;;  %v435_v2 = vsel %vm417_vm1, %v433_v39, %v434_v56  ;;  %v443_v54 = vrot.slane %v1286_v42, 2  ;;  %v445_v24 = vrot.slane %v1290_v43, 2 }
  0x42   : > { %v438_v53 = vsel %vm417_vm1, %v436_v57, %v437_v58  ;;  %v441_v20 = vsel %vm417_vm1, %v439_v60, %v440_v62  ;;  %v446_v8 = vrot.slane %v1294_v47, 2  ;;  %v1404_v35 = vmax.f32 %v397_v61, %v420_v19 }
  0x43   : > { %v469_v31 = vmax.f32 %v398_v0, %v419_v46  ;;  %v444_v36 = vsel %vm417_vm1, %v442_v63, %v443_v54  ;;  %v1407_v40 = vmax.f32 %v399_v1, %v423_v32  ;;  %v471_v41 = vmax.f32 %v400_v21, %v422_v23  ;;  %v1680_v32 = vld [vmem:[#allocation4_spill] sm:$0xff] }
  0x44   : > { %v1409_v34 = vmax.f32 %v401_v22, %v426_v37  ;;  %v447_v39 = vsel %vm417_vm1, %v445_v24, %v446_v8  ;;  %v473_v57 = vmax.f32 %v402_v3, %v425_v25  ;;  %v1412_v42 = vmax.f32 %v403_v4, %v429_v55 }
  0x45   : > { %v475_v43 = vmax.f32 %v404_v5, %v428_v30  ;;  %v1414_v33 = vmax.f32 %v405_v6, %v432_v59  ;;  %v477_v60 = vmax.f32 %v406_v7, %v431_v38  ;;  %v1416_v47 = vmax.f32 %v407_v9, %v435_v2  ;;  %v1681_v38 = vld [vmem:[#allocation5_spill] sm:$0xff]  ;;  %v1684_v2 = vld [vmem:[#allocation8_spill] sm:$0xff] }
  0x46   : > { %v479_v61 = vmax.f32 %v408_v10, %v434_v56  ;;  %v1418_v0 = vmax.f32 %v409_v11, %v438_v53  ;;  %v481_v46 = vmax.f32 %v410_v48, %v437_v58  ;;  %v1420_v1 = vmax.f32 %v411_v49, %v441_v20  ;;  %v1682_v56 = vld [vmem:[#allocation6_spill] sm:$0xff] }
  0x47   : > { %v483_v21 = vmax.f32 %v412_v50, %v440_v62  ;;  %v1422_v22 = vmax.f32 %v413_v51, %v444_v36  ;;  %v485_v23 = vmax.f32 %v414_v45, %v443_v54  ;;  %v1424_v19 = vmax.f32 %v415_v52, %v447_v39  ;;  %v1683_v62 = vld [vmem:[#allocation7_spill] sm:$0xff]  ;;  %v1685_v54 = vld [vmem:[#allocation9_spill] sm:$0xff]  ;;  %v1686_v39 = vld [vmem:[#allocation10_spill] sm:$0xff] }
  0x48   : > { %v487_v3 = vmax.f32 %v416_v44, %v446_v8  ;;  %v489_v4 = vrot.slane %v1233_v12, 3  ;;  %v490_v5 = vrot.slane %v1236_v13, 3  ;;  %v492_v6 = vrot.slane %v1239_v14, 3  ;;  %v1679_v44 = vld [vmem:[#allocation3_spill] sm:$0xff] }
  0x49   : > { %v493_v7 = vrot.slane %v1242_v15, 3  ;;  %v495_v9 = vrot.slane %v1245_v16, 3  ;;  %v496_v10 = vrot.slane %v1248_v17, 3  ;;  %v498_v11 = vrot.slane %v1251_v18, 3 }
  0x4a   : > { %v499_v36 = vrot.slane %v1254_v26, 3  ;;  %v1435_v48 = vsel %vm488_vm2, %v489_v4, %v490_v5  ;;  %v501_v49 = vrot.slane %v1257_v27, 3  ;;  %v502_v50 = vrot.slane %v1260_v28, 3 }
  0x4b   : > { %v1438_v8 = vsel %vm488_vm2, %v492_v6, %v493_v7  ;;  %v1443_v51 = vsel %vm488_vm2, %v495_v9, %v496_v10  ;;  %v504_v52 = vrot.slane %v1263_v29, 3  ;;  %v505_v25 = vrot.slane %v1679_v44, 3  ;;  %v1687_v6 = vld [vmem:[#allocation11_spill] sm:$0xff] }
  0x4c   : > { %v1446_v45 = vsel %vm488_vm2, %v498_v11, %v499_v36  ;;  %v1451_v30 = vsel %vm488_vm2, %v501_v49, %v502_v50  ;;  %v507_v37 = vrot.slane %v1680_v32, 3  ;;  %v508_v55 = vrot.slane %v1681_v38, 3 }
  0x4d   : > { %v510_v58 = vrot.slane %v1682_v56, 3  ;;  %v1457_v59 = vsel %vm488_vm2, %v504_v52, %v505_v25  ;;  %v511_v63 = vrot.slane %v1683_v62, 3  ;;  %v513_v53 = vrot.slane %v1684_v2, 3 }
  0x4e   : > { %v514_v24 = vrot.slane %v1685_v54, 3  ;;  %v1463_v20 = vsel %vm488_vm2, %v507_v37, %v508_v55  ;;  %v516_v4 = vrot.slane %v1686_v39, 3  ;;  %v517_v9 = vrot.slane %v1687_v6, 3 }
  0x4f   : > { %v539_v11 = vmax.f32 %v1404_v35, %v1435_v48  ;;  %v1470_v49 = vsel %vm488_vm2, %v510_v58, %v511_v63  ;;  %v540_v62 = vmax.f32 %v469_v31, %v490_v5  ;;  %v541_v54 = vmax.f32 %v1407_v40, %v1438_v8  ;;  %v1689_v8 = vld [vmem:[#allocation8_spill] sm:$0xff] }
  0x50   : > { %v1473_v52 = vsel %vm488_vm2, %v513_v53, %v514_v24  ;;  %v1478_v37 = vsel %vm488_vm2, %v516_v4, %v517_v9  ;;  %v542_v2 = vmax.f32 %v471_v41, %v493_v7  ;;  %v543_v6 = vmax.f32 %v1409_v34, %v1443_v51  ;;  %v1690_v51 = vld [vmem:[#allocation9_spill] sm:$0xff] }
  0x51   : > { %v544_v39 = vmax.f32 %v473_v57, %v496_v10  ;;  %v545_v35 = vmax.f32 %v1412_v42, %v1446_v45  ;;  %v546_v48 = vmax.f32 %v475_v43, %v499_v36  ;;  %v547_v58 = vmax.f32 %v1414_v33, %v1451_v30  ;;  %v1688_v10 = vld [vmem:[#allocation7_spill] sm:$0xff] }
  0x52   : > { %v548_v53 = vmax.f32 %v477_v60, %v502_v50  ;;  %v549_v31 = vmax.f32 %v1416_v47, %v1457_v59  ;;  %v550_v40 = vmax.f32 %v479_v61, %v505_v25  ;;  %v551_v5 = vmax.f32 %v1418_v0, %v1463_v20  ;;  %v1691_v25 = vld [vmem:[#allocation10_spill] sm:$0xff] }
  0x53   : > { %v552_v41 = vmax.f32 %v481_v46, %v508_v55  ;;  %v553_v34 = vmax.f32 %v1420_v1, %v1470_v49  ;;  %v554_v57 = vmax.f32 %v483_v21, %v511_v63  ;;  %v555_v42 = vmax.f32 %v1422_v22, %v1473_v52 }
  0x54   : > { %v556_v43 = vmax.f32 %v485_v23, %v514_v24  ;;  %v557_v33 = vmax.f32 %v1424_v19, %v1478_v37  ;;  %v558_v60 = vmax.f32 %v487_v3, %v517_v9  ;;  %v560_v7 = vrot.slane %v1233_v12, 4 }
  0x55   : > { %v561_v47 = vrot.slane %v1236_v13, 4  ;;  %v563_v61 = vrot.slane %v1239_v14, 4  ;;  %v564_v0 = vrot.slane %v1242_v15, 4  ;;  %v566_v46 = vrot.slane %v1245_v16, 4 }
  0x56   : > { %v567_v1 = vrot.slane %v1248_v17, 4  ;;  %v569_v22 = vrot.slane %v1251_v18, 4  ;;  %v570_v23 = vrot.slane %v1254_v26, 4  ;;  %v572_v19 = vrot.slane %v1257_v27, 4 }
  0x57   : > { %v562_v21 = vsel %vm559_vm3, %v560_v7, %v561_v47  ;;  %v565_v12 = vsel %vm559_vm3, %v563_v61, %v564_v0  ;;  %v573_v14 = vrot.slane %v1260_v28, 4  ;;  %v575_v15 = vrot.slane %v1263_v29, 4 }
  0x58   : > { %v568_v13 = vsel %vm559_vm3, %v566_v46, %v567_v1  ;;  %v571_v16 = vsel %vm559_vm3, %v569_v22, %v570_v23  ;;  %v576_v17 = vrot.slane %v1679_v44, 4  ;;  %v578_v3 = vrot.slane %v1680_v32, 4  ;;  %v1692_v32 = vld [vmem:[#allocation11_spill] sm:$0xff] }
  0x59   : > { %v579_v18 = vrot.slane %v1681_v38, 4  ;;  %v574_v26 = vsel %vm559_vm3, %v572_v19, %v573_v14  ;;  %v581_v27 = vrot.slane %v1682_v56, 4  ;;  %v582_v36 = vrot.slane %v1688_v10, 4 }
  0x5a   : > { %v584_v50 = vrot.slane %v1689_v8, 4  ;;  %v577_v28 = vsel %vm559_vm3, %v575_v15, %v576_v17  ;;  %v585_v45 = vrot.slane %v1690_v51, 4  ;;  %v587_v44 = vrot.slane %v1691_v25, 4 }
  0x5b   : > { %v580_v29 = vsel %vm559_vm3, %v578_v3, %v579_v18  ;;  %v583_v30 = vsel %vm559_vm3, %v581_v27, %v582_v36  ;;  %v588_v38 = vrot.slane %v1692_v32, 4  ;;  %v610_v55 = vmax.f32 %v539_v11, %v562_v21 }
  0x5c   : > { %v611_v59 = vmax.f32 %v540_v62, %v561_v47  ;;  %v586_v56 = vsel %vm559_vm3, %v584_v50, %v585_v45  ;;  %v612_v63 = vmax.f32 %v541_v54, %v565_v12  ;;  %v613_v24 = vmax.f32 %v542_v2, %v564_v0 }
  0x5d   : > { %v614_v20 = vmax.f32 %v543_v6, %v568_v13  ;;  %v589_v4 = vsel %vm559_vm3, %v587_v44, %v588_v38  ;;  %v615_v9 = vmax.f32 %v544_v39, %v567_v1  ;;  %v616_v49 = vmax.f32 %v545_v35, %v571_v16 }
  0x5e   : > { %v617_v52 = vmax.f32 %v546_v48, %v570_v23  ;;  %v1526_v37 = vmax.f32 %v547_v58, %v574_v26  ;;  %v619_v7 = vmax.f32 %v548_v53, %v573_v14  ;;  %v1528_v61 = vmax.f32 %v549_v31, %v577_v28 }
  0x5f   : > { %v621_v46 = vmax.f32 %v550_v40, %v576_v17  ;;  %v622_v22 = vmax.f32 %v551_v5, %v580_v29  ;;  %v623_v19 = vmax.f32 %v552_v41, %v579_v18  ;;  %v624_v11 = vmax.f32 %v553_v34, %v583_v30 }
  0x60   : > { %v625_v62 = vmax.f32 %v554_v57, %v582_v36  ;;  %v626_v47 = vmax.f32 %v555_v42, %v586_v56  ;;  %v627_v21 = vmax.f32 %v556_v43, %v585_v45  ;;  %v628_v54 = vmax.f32 %v557_v33, %v589_v4 }
  0x61   : > { %v629_v2 = vmax.f32 %v558_v60, %v588_v38  ;;  %v630_v6 = vmax.f32 %v610_v55, %v612_v63  ;;  %v631_v0 = vmax.f32 %v611_v59, %v613_v24  ;;  %v632_v12 = vmax.f32 %v612_v63, %v614_v20 }
  0x62   : > { %v633_v39 = vmax.f32 %v613_v24, %v615_v9  ;;  %v634_v35 = vmax.f32 %v614_v20, %v616_v49  ;;  %v635_v48 = vmax.f32 %v615_v9, %v617_v52  ;;  %v636_v58 = vmax.f32 %v616_v49, %v1526_v37 }
  0x63   : > { %v637_v53 = vmax.f32 %v617_v52, %v619_v7  ;;  %v638_v31 = vmax.f32 %v1526_v37, %v1528_v61  ;;  %v639_v40 = vmax.f32 %v619_v7, %v621_v46  ;;  %v640_v5 = vmax.f32 %v1528_v61, %v622_v22 }
  0x64   : > { %v641_v41 = vmax.f32 %v621_v46, %v623_v19  ;;  %v642_v34 = vmax.f32 %v630_v6, %v614_v20  ;;  %v643_v57 = vmax.f32 %v631_v0, %v615_v9  ;;  %v644_v42 = vmax.f32 %v632_v12, %v616_v49 }
  0x65   : > { %v645_v43 = vmax.f32 %v633_v39, %v617_v52  ;;  %v646_v33 = vmax.f32 %v634_v35, %v1526_v37  ;;  %v647_v60 = vmax.f32 %v635_v48, %v619_v7  ;;  %v648_v1 = vmax.f32 %v636_v58, %v1528_v61 }
  0x66   : > { %v649_v23 = vmax.f32 %v637_v53, %v621_v46  ;;  %v650_v13 = vmax.f32 %v638_v31, %v622_v22  ;;  %v651_v14 = vmax.f32 %v639_v40, %v623_v19  ;;  %v652_v15 = vmax.f32 %v640_v5, %v624_v11 }
  0x67   : > { %v653_v16 = vmax.f32 %v641_v41, %v625_v62  ;;  %v654_v17 = vmax.f32 %v642_v34, %v616_v49  ;;  %v655_v3 = vmax.f32 %v643_v57, %v617_v52  ;;  %v656_v18 = vmax.f32 %v644_v42, %v1526_v37 }
  0x68   : > { %v657_v26 = vmax.f32 %v645_v43, %v619_v7  ;;  %v658_v27 = vmax.f32 %v646_v33, %v1528_v61  ;;  %v659_v10 = vmax.f32 %v647_v60, %v621_v46  ;;  %v660_v36 = vmax.f32 %v648_v1, %v622_v22 }
  0x69   : > { %v661_v8 = vmax.f32 %v649_v23, %v623_v19  ;;  %v662_v50 = vmax.f32 %v650_v13, %v624_v11  ;;  %v663_v28 = vmax.f32 %v651_v14, %v625_v62  ;;  %v664_v29 = vmax.f32 %v652_v15, %v626_v47 }
  0x6a   : > { %v665_v51 = vmax.f32 %v653_v16, %v627_v21  ;;  %v1539_v45 = vmax.f32 %v654_v17, %v1526_v37  ;;  %v1541_v25 = vmax.f32 %v655_v3, %v619_v7  ;;  %v1544_v44 = vmax.f32 %v656_v18, %v1528_v61 }
  0x6b   : > { %v1546_v30 = vmax.f32 %v657_v26, %v621_v46  ;;  %v1548_v32 = vmax.f32 %v658_v27, %v622_v22  ;;  %v1550_v38 = vmax.f32 %v659_v10, %v623_v19  ;;  %v1552_v55 = vmax.f32 %v660_v36, %v624_v11 }
  0x6c   : > { %v1554_v59 = vmax.f32 %v661_v8, %v625_v62  ;;  %v1556_v56 = vmax.f32 %v662_v50, %v626_v47  ;;  %v1558_v63 = vmax.f32 %v663_v28, %v627_v21  ;;  %v1560_v24 = vmax.f32 %v664_v29, %v628_v54 }
  0x6d   : > { %v1562_v20 = vmax.f32 %v665_v51, %v629_v2  ;;  %v684_v4 = vrot.slane %v1539_v45, 1  ;;  %v685_v9 = vrot.slane %v1544_v44, 1  ;;  %v686_v49 = vrot.slane %v1548_v32, 1 }
  0x6e   : > { %v687_v52 = vrot.slane %v1552_v55, 1  ;;  %v688_v7 = vrot.slane %v1556_v56, 1  ;;  %v689_v46 = vrot.slane %v1560_v24, 1  ;;  %v702_v22 = vrot.slane %v1539_v45, 2 }
  0x6f   : > { %v703_v19 = vrot.slane %v1544_v44, 2  ;;  %v696_v11 = vmax.f32 %v1539_v45, %v684_v4  ;;  %v697_v62 = vmax.f32 %v1544_v44, %v685_v9  ;;  %v698_v47 = vmax.f32 %v1548_v32, %v686_v49 }
  0x70   : > { %v699_v21 = vmax.f32 %v1552_v55, %v687_v52  ;;  %v700_v54 = vmax.f32 %v1556_v56, %v688_v7  ;;  %v701_v2 = vmax.f32 %v1560_v24, %v689_v46  ;;  %v704_v6 = vrot.slane %v1548_v32, 2 }
  0x71   : > { %v705_v0 = vrot.slane %v1552_v55, 2  ;;  %v706_v12 = vrot.slane %v1556_v56, 2  ;;  %v707_v39 = vrot.slane %v1560_v24, 2  ;;  %v714_v35 = vmax.f32 %v696_v11, %v702_v22 }
  0x72   : > { %v715_v48 = vmax.f32 %v697_v62, %v703_v19  ;;  %v716_v58 = vmax.f32 %v698_v47, %v704_v6  ;;  %v726_v31 = vrot.slane %v1539_v45, 3  ;;  %v727_v40 = vrot.slane %v1541_v25, 3 }
  0x73   : > { %v717_v53 = vmax.f32 %v699_v21, %v705_v0  ;;  %v718_v5 = vmax.f32 %v700_v54, %v706_v12  ;;  %v719_v41 = vmax.f32 %v701_v2, %v707_v39  ;;  %v729_v34 = vrot.slane %v1544_v44, 3 }
  0x74   : > { %v730_v57 = vrot.slane %v1546_v30, 3  ;;  %v728_v42 = vsel %vm488_vm2, %v726_v31, %v727_v40  ;;  %v732_v43 = vrot.slane %v1548_v32, 3  ;;  %v733_v33 = vrot.slane %v1550_v38, 3 }
  0x75   : > { %v735_v60 = vrot.slane %v1552_v55, 3  ;;  %v736_v23 = vrot.slane %v1554_v59, 3  ;;  %v738_v13 = vrot.slane %v1556_v56, 3  ;;  %v739_v14 = vrot.slane %v1558_v63, 3 }
  0x76   : > { %v731_v1 = vsel %vm488_vm2, %v729_v34, %v730_v57  ;;  %v734_v15 = vsel %vm488_vm2, %v732_v43, %v733_v33  ;;  %v741_v16 = vrot.slane %v1560_v24, 3  ;;  %v742_v17 = vrot.slane %v1562_v20, 3 }
  0x77   : > { %v750_v3 = vmax.f32 %v714_v35, %v728_v42  ;;  %v737_v18 = vsel %vm488_vm2, %v735_v60, %v736_v23  ;;  %v740_v26 = vsel %vm488_vm2, %v738_v13, %v739_v14  ;;  %v751_v27 = vmax.f32 %v715_v48, %v731_v1 }
  0x78   : > { %v752_v10 = vmax.f32 %v716_v58, %v734_v15  ;;  %v743_v36 = vsel %vm488_vm2, %v741_v16, %v742_v17  ;;  %v753_v8 = vmax.f32 %v717_v53, %v737_v18  ;;  %v754_v50 = vmax.f32 %v718_v5, %v740_v26 }
  0x79   : > { %v756_v28 = vrot.slane %v1539_v45, 4  ;;  %v755_v29 = vmax.f32 %v719_v41, %v743_v36  ;;  %v757_v51 = vrot.slane %v1541_v25, 4  ;;  %v759_v4 = vrot.slane %v1544_v44, 4 }
  0x7a   : > { %v760_v9 = vrot.slane %v1546_v30, 4  ;;  %v762_v49 = vrot.slane %v1548_v32, 4  ;;  %v763_v52 = vrot.slane %v1550_v38, 4  ;;  %v765_v7 = vrot.slane %v1552_v55, 4 }
  0x7b   : > { %v766_v46 = vrot.slane %v1554_v59, 4  ;;  %v758_v22 = vsel %vm559_vm3, %v756_v28, %v757_v51  ;;  %v768_v45 = vrot.slane %v1556_v56, 4  ;;  %v769_v25 = vrot.slane %v1558_v63, 4 }
  0x7c   : > { %v761_v19 = vsel %vm559_vm3, %v759_v4, %v760_v9  ;;  %v764_v44 = vsel %vm559_vm3, %v762_v49, %v763_v52  ;;  %v771_v32 = vrot.slane %v1560_v24, 4  ;;  %v772_v38 = vrot.slane %v1562_v20, 4  ;;  %v1693_v24 = vld [vmem:[#allocation2_spill] sm:$0xff] }
  0x7d   : > { %v767_v30 = vsel %vm559_vm3, %v765_v7, %v766_v46  ;;  %v770_v55 = vsel %vm559_vm3, %v768_v45, %v769_v25  ;;  %v780_v59 = vmax.f32 %v750_v3, %v758_v22  ;;  %v781_v11 = vmax.f32 %v751_v27, %v761_v19 }
  0x7e   : > { %v782_v62 = vmax.f32 %v752_v10, %v764_v44  ;;  %v773_v47 = vsel %vm559_vm3, %v771_v32, %v772_v38  ;;  %v783_v21 = vmax.f32 %v753_v8, %v767_v30  ;;  %v820_v56 = vpack.c.bf16 %v1526_v37, %v1526_v37 }
  0x7f   : > { %v784_v63 = vmax.f32 %v754_v50, %v770_v55  ;;  %v786_v54 = vmax.f32 %v780_v59, %v781_v11  ;;  %v821_v6 = vpack.c.bf16 %v1528_v61, %v1528_v61  ;;  %v785_v39 = vmax.f32 %v755_v29, %v773_v47 }
  0x80   : > { %v787_v2 = vmax.f32 %v781_v11, %v782_v62  ;;  %v830_v20 = vrot.slane %v820_v56, %v1693_v24  ;;  %v858_v0 = vpack.c.bf16 %v782_v62, %v782_v62  ;;  %v859_v12 = vpack.c.bf16 %v783_v21, %v783_v21 }
  0x81   : > { %v788_v35 = vmax.f32 %v786_v54, %v782_v62  ;;  %v845_v58 = vrot.slane %v821_v6, %v1693_v24 }
  0x82   : > { %v789_v48 = vmax.f32 %v787_v2, %v783_v21  ;;  %v837_v37 = vrot.slane %v830_v20, %v1693_v24  ;;  %v868_v53 = vrot.slane %v858_v0, %v1693_v24  ;;  %v883_v31 = vrot.slane %v859_v12, %v1693_v24 }
  0x83   : > { %v790_v61 = vmax.f32 %v788_v35, %v783_v21  ;;  %v852_v5 = vrot.slane %v845_v58, %v1693_v24 }
  0x84   : > { %v791_v40 = vmax.f32 %v789_v48, %v784_v63  ;;  %v838_v41 = vcombine.high %v837_v37, %v837_v37  ;;  %v869_v34 = vcombine.high %v868_v53, %v868_v53  ;;  %v884_v57 = vcombine.high %v883_v31, %v883_v31 }
  0x85   : > { %v792_v42 = vmax.f32 %v790_v61, %v784_v63  ;;  %v853_v33 = vcombine.high %v852_v5, %v852_v5 }
  0x86   : > { %v793_v43 = vmax.f32 %v791_v40, %v785_v39  ;;  %856 = vst [vmem:[%s181_s21] sm:$0x1] %v838_v41  ;;  %1024 = vst.sshfl [vmem:[%s185_s24] sm:$0x1 pattern:$0x73625140] %v869_v34 }
  0x87   : > { %1025 = vst.sshfl [vmem:[%s185_s24 + $0x1] sm:$0x1 pattern:$0x73625140] %v884_v57  ;;  %v796_v60 = vrot.slane %v792_v42, 1  ;;  %v802_v23 = vrot.slane %v792_v42, 2 }
  0x88   : > { %v797_v1 = vrot.slane %v793_v43, 1  ;;  %v803_v13 = vrot.slane %v793_v43, 2  ;;  %857 = vst [vmem:[%s181_s21 + $0x1] sm:$0x1] %v853_v33  ;;  %v808_v16 = vrot.slane %v792_v42, 3  ;;  %v809_v17 = vrot.slane %v793_v43, 3 }
  0x89   : > { %v800_v14 = vmax.f32 %v792_v42, %v796_v60  ;;  %v814_v26 = vrot.slane %v792_v42, 4  ;;  %v815_v27 = vrot.slane %v793_v43, 4 }
  0x8a   : > { %v801_v15 = vmax.f32 %v793_v43, %v797_v1 }
  0x8b   : > { %v806_v3 = vmax.f32 %v800_v14, %v802_v23 }
  0x8c   : > { %v807_v18 = vmax.f32 %v801_v15, %v803_v13 }
  0x8d   : > { %v812_v10 = vmax.f32 %v806_v3, %v808_v16 }
  0x8e   : > { %v813_v36 = vmax.f32 %v807_v18, %v809_v17 }
  0x8f   : > { %v818_v8 = vmax.f32 %v812_v10, %v814_v26 }
  0x90   : > { %v819_v50 = vmax.f32 %v813_v36, %v815_v27 }
  0x91   : > { %v896_v28 = vpack.c.bf16 %v818_v8, %v818_v8 }
  0x92   : > { %v897_v29 = vpack.c.bf16 %v819_v50, %v819_v50 }
  0x93   : > { %898 = vst [vmem:[%s189_s27] sm:$0x1] %v896_v28 }
  0x94   : > { %899 = vst [vmem:[%s189_s27 + $0x1] sm:$0x1] %v897_v29 }
  0x95 PF: > { %s14_s12 = sadd.s32 1, %s1044_s12  }
  0x96   : > { %p11_p4 = scmp.ge.s32.totalorder %s14_s12, 4  }
  0x98   :  { %13 = sbr.rel (!%p11_p4) target bundleno = 1 (0x1), region = 78 }

// kernel: _lambda_.95
= control target key start
LH: loop header
LB: loop body
LE: loop exit
PB: predicated region body
PF: predicated region fallthrough
CT: control target
= control target key end

     0   :  { %v349_v0 = vmov 0.0   ;;  %vm350_vm0 = vmmov 0   ;;  %s441_s3 = inlined_call_operand.vmem [shape: bf16[128,128], index: 3, kind: input, shape index: {}]   ;;  %s442_s1 = inlined_call_operand.vmem [shape: bf16[128,128], index: 1, kind: input, shape index: {}]   ;;  %s443_s2 = inlined_call_operand.vmem [shape: bf16[8,128], index: 2, kind: input, shape index: {}]   ;;  %s444_s0 = inlined_call_operand.vmem [shape: bf16[8,128], index: 0, kind: input, shape index: {}]   ;;  %s445_s4 = inlined_call_operand.vmem [shape: f32[1,128], index: 4, kind: input, shape index: {}]   ;;  %s446_s5 = inlined_call_operand.vmem [shape: bf16[8,128], index: 5, kind: output, shape index: {}]  }
   0x1   :  { %287 = vmatprep.subr.bf16.mxu0 %v349_v0  ;;  %307 = vmatprep.subr.bf16.mxu1 %v349_v0  ;;  %v329_v1 = vld [vmem:[%s441_s3] sm:$0xff]   ;;  %v331_v3 = vld [vmem:[%s441_s3 + $0x8] sm:$0xff]   ;;  %v333_v5 = vld [vmem:[%s441_s3 + $0x10] sm:$0xff]  }
   0x2   :  { %v330_v2 = vld [vmem:[%s442_s1] sm:$0xff]   ;;  %303 = vmatprep.mubr.msk.bf16.mxu0 %vm350_vm0, %v349_v0  ;;  %323 = vmatprep.mubr.msk.bf16.mxu1 %vm350_vm0, %v349_v0  ;;  %v332_v4 = vld [vmem:[%s442_s1 + $0x8] sm:$0xff]   ;;  %v334_v6 = vld [vmem:[%s442_s1 + $0x10] sm:$0xff]  }
   0x3   :  { %288 = vmatpush3.bf16.msra.mxu0 %v329_v1  ;;  %308 = vmatpush3.bf16.msra.mxu1 %v330_v2  ;;  %v335_v7 = vld [vmem:[%s441_s3 + $0x18] sm:$0xff]   ;;  %v337_v9 = vld [vmem:[%s441_s3 + $0x20] sm:$0xff]   ;;  %v339_v11 = vld [vmem:[%s441_s3 + $0x28] sm:$0xff]  }
   0x4   :  { %289 = vmatprep.subr.bf16.mxu0 %v349_v0  ;;  %309 = vmatprep.subr.bf16.mxu1 %v349_v0  ;;  %v336_v8 = vld [vmem:[%s442_s1 + $0x18] sm:$0xff]   ;;  %v338_v10 = vld [vmem:[%s442_s1 + $0x20] sm:$0xff]   ;;  %v340_v12 = vld [vmem:[%s442_s1 + $0x28] sm:$0xff]  }
   0x5   :  { %v341_v13 = vld [vmem:[%s441_s3 + $0x30] sm:$0xff]   ;;  %v343_v15 = vld [vmem:[%s441_s3 + $0x38] sm:$0xff]   ;;  %v38_v17 = vld [vmem:[%s443_s2] sm:$0xf] }
   0x6   :  { %v342_v14 = vld [vmem:[%s442_s1 + $0x30] sm:$0xff]   ;;  %v344_v16 = vld [vmem:[%s442_s1 + $0x38] sm:$0xff]   ;;  %v21_v18 = vld [vmem:[%s444_s0] sm:$0xf] }
   0x7   :  { %290 = vmatpush3.bf16.msra.mxu0 %v331_v3  ;;  %310 = vmatpush3.bf16.msra.mxu1 %v332_v4  ;;  %v268_v21 = vld [vmem:[%s445_s4] ss:$0 sm:$0xff] }
   0x8   :  { %291 = vmatprep.subr.bf16.mxu0 %v349_v0  ;;  %311 = vmatprep.subr.bf16.mxu1 %v349_v0 }
   0xb   :  { %292 = vmatpush3.bf16.msra.mxu0 %v333_v5  ;;  %312 = vmatpush3.bf16.msra.mxu1 %v334_v6 }
   0xc   :  { %293 = vmatprep.subr.bf16.mxu0 %v349_v0  ;;  %313 = vmatprep.subr.bf16.mxu1 %v349_v0 }
   0xf   :  { %294 = vmatpush3.bf16.msra.mxu0 %v335_v7  ;;  %314 = vmatpush3.bf16.msra.mxu1 %v336_v8 }
  0x10   :  { %295 = vmatprep.subr.bf16.mxu0 %v349_v0  ;;  %315 = vmatprep.subr.bf16.mxu1 %v349_v0 }
  0x13   :  { %296 = vmatpush3.bf16.msra.mxu0 %v337_v9  ;;  %316 = vmatpush3.bf16.msra.mxu1 %v338_v10 }
  0x14   :  { %297 = vmatprep.subr.bf16.mxu0 %v349_v0  ;;  %317 = vmatprep.subr.bf16.mxu1 %v349_v0 }
  0x17   :  { %298 = vmatpush3.bf16.msra.mxu0 %v339_v11  ;;  %318 = vmatpush3.bf16.msra.mxu1 %v340_v12 }
  0x18   :  { %299 = vmatprep.subr.bf16.mxu0 %v349_v0  ;;  %319 = vmatprep.subr.bf16.mxu1 %v349_v0 }
  0x1b   :  { %300 = vmatpush3.bf16.msra.mxu0 %v341_v13  ;;  %320 = vmatpush3.bf16.msra.mxu1 %v342_v14 }
  0x1c   :  { %301 = vmatprep.subr.bf16.mxu0 %v349_v0  ;;  %321 = vmatprep.subr.bf16.mxu1 %v349_v0 }
  0x1f   :  { %302 = vmatpush3.bf16.msra.mxu0 %v343_v15  ;;  %322 = vmatpush3.bf16.msra.mxu1 %v344_v16 }
  0x22   :  { %304 = vmatmul.mubr.bf16.vlgmr.msra.gmra.mrb[0].mxu0 %v38_v17  ;;  %324 = vmatmul.mubr.bf16.vlgmr.msra.gmra.mrb[0].mxu1 %v21_v18 }
  0xf5   :  { %v137_v19 = vpop.f32.mrb[0].mxu0  ;;  %v225_v20 = vpop.f32.mrb[0].mxu1 }
  0xf6   :  { %v305_v22 = vpop.f32.mrb[1].mxu0  ;;  %v226_v23 = vadd.f32 %v225_v20, %v137_v19  ;;  %v325_v24 = vpop.f32.mrb[1].mxu1 }
  0xf7   :  { %v140_v25 = vpop.f32.mrb[2].mxu0  ;;  %v228_v26 = vpop.f32.mrb[2].mxu1 }
  0xf8   :  { %v306_v27 = vpop.f32.mrb[3].mxu0  ;;  %v238_v28 = vadd.f32 %v268_v21, %v226_v23  ;;  %v326_v29 = vpop.f32.mrb[3].mxu1 }
  0xfa   :  { %v239_v30 = vmax.f32 %v238_v28, -30.0 }
  0xfc   :  { %v240_v31 = vsub.f32 0.0, %v239_v30 }
  0xfe   :  { %v241_v32 = vmul.f32 1.442695, %v240_v31 }
 0x100   :  { %345 = vpow2.f32 %v241_v32 }
 0x10a   :  { %v346_v33 = vpop.eup %345 }
 0x10b   :  { %v243_v34 = vadd.f32 1.0, %v346_v33 }
 0x10d   :  { %347 = vrcp.f32 %v243_v34 }
 0x117   :  { %v348_v35 = vpop.eup %347 }
 0x118   :  { %v245_v36 = vmul.f32 %v348_v35, %v238_v28 }
 0x11a   :  { %v246_v37 = vpack.c.bf16 %v245_v36, %v245_v36 }
 0x11c   :  { %247 = vst [vmem:[%s446_s5] sm:$0xf] %v246_v37 }

</bundles_post_ra>
